<compile_context>
chip_gen: v7x
topology: tpu7x:2x2x1
jax: 0.10.0
libtpu: 0.0.40
codegen_flags: <defaults>
</compile_context>

<pallas_src>
import functools
import math

import jax
import jax.numpy as jnp
from jax.experimental import pallas as pl
from jax.experimental.pallas import tpu as pltpu

LN_EPS = 1e-5  # torch.nn.LayerNorm default


# --------------------------------------------------------------------------
# LayerNorm kernel
# --------------------------------------------------------------------------
def _layernorm_kernel(x_ref, g_ref, b_ref, o_ref, *, eps):
    x = x_ref[...].astype(jnp.float32)                      # (tm, D)
    mean = jnp.mean(x, axis=-1, keepdims=True)
    xc = x - mean
    var = jnp.mean(xc * xc, axis=-1, keepdims=True)         # biased variance (torch)
    inv = jax.lax.rsqrt(var + eps)
    y = xc * inv * g_ref[...].astype(jnp.float32) + b_ref[...].astype(jnp.float32)
    o_ref[...] = y.astype(o_ref.dtype)


def layer_norm(x2d, gamma, beta, *, eps=LN_EPS, tm=256):
    M, D = x2d.shape
    tm = min(tm, M)
    assert M % tm == 0
    g2 = gamma.reshape(1, D)
    b2 = beta.reshape(1, D)
    return pl.pallas_call(
        functools.partial(_layernorm_kernel, eps=eps),
        out_shape=jax.ShapeDtypeStruct((M, D), x2d.dtype),
        grid_spec=pltpu.PrefetchScalarGridSpec(
            num_scalar_prefetch=0,
            grid=(M // tm,),
            in_specs=[
                pl.BlockSpec((tm, D), lambda i: (i, 0)),
                pl.BlockSpec((1, D), lambda i: (0, 0)),
                pl.BlockSpec((1, D), lambda i: (0, 0)),
            ],
            out_specs=pl.BlockSpec((tm, D), lambda i: (i, 0)),
        ),
        compiler_params=pltpu.CompilerParams(dimension_semantics=("parallel",)),
    )(x2d, g2, b2)


# --------------------------------------------------------------------------
# Linear kernel (optionally fused with a residual add)
# --------------------------------------------------------------------------
def _linear_kernel(x_ref, w_ref, b_ref, o_ref):
    y = jnp.dot(x_ref[...], w_ref[...], preferred_element_type=jnp.float32)
    y = y + b_ref[...].astype(jnp.float32)
    o_ref[...] = y.astype(o_ref.dtype)


def _linear_residual_kernel(x_ref, w_ref, b_ref, r_ref, o_ref):
    y = jnp.dot(x_ref[...], w_ref[...], preferred_element_type=jnp.float32)
    y = y + b_ref[...].astype(jnp.float32) + r_ref[...].astype(jnp.float32)
    o_ref[...] = y.astype(o_ref.dtype)


def linear(x2d, w, b, residual=None, *, tm=256):
    """y = x @ W + b (+ residual).  W stored (in_features, out_features)."""
    M, K = x2d.shape
    N = w.shape[1]
    tm = min(tm, M)
    assert M % tm == 0
    b2 = b.reshape(1, N)

    in_specs = [
        pl.BlockSpec((tm, K), lambda i: (i, 0)),   # x rows
        pl.BlockSpec((K, N), lambda i: (0, 0)),    # full weight (small K here)
        pl.BlockSpec((1, N), lambda i: (0, 0)),    # bias
    ]
    args = [x2d, w, b2]
    kernel = _linear_kernel
    if residual is not None:
        in_specs.append(pl.BlockSpec((tm, N), lambda i: (i, 0)))
        args.append(residual)
        kernel = _linear_residual_kernel

    return pl.pallas_call(
        kernel,
        out_shape=jax.ShapeDtypeStruct((M, N), x2d.dtype),
        grid_spec=pltpu.PrefetchScalarGridSpec(
            num_scalar_prefetch=0,
            grid=(M // tm,),
            in_specs=in_specs,
            out_specs=pl.BlockSpec((tm, N), lambda i: (i, 0)),
        ),
        compiler_params=pltpu.CompilerParams(dimension_semantics=("parallel",)),
    )(*args)


# --------------------------------------------------------------------------
# Multi-head scaled dot-product attention kernel (one batch element per step)
# --------------------------------------------------------------------------
def _attention_kernel(q_ref, k_ref, v_ref, o_ref, *, scale):
    q = q_ref[0].astype(jnp.float32)                         # (H, S, Dh)
    k = k_ref[0].astype(jnp.float32)
    v = v_ref[0]
    s = jnp.einsum('hqd,hkd->hqk', q, k,
                   preferred_element_type=jnp.float32) * scale
    # TODO(synk): optional attention mask (masked_fill with dtype-min) not implemented.
    m = jnp.max(s, axis=-1, keepdims=True)
    e = jnp.exp(s - m)
    denom = jnp.sum(e, axis=-1, keepdims=True)
    p = e / denom
    out = jnp.einsum('hqk,hkd->hqd', p.astype(v.dtype), v,
                     preferred_element_type=jnp.float32)
    o_ref[0] = out.astype(o_ref.dtype)


def attention(q, k, v, *, scale):
    """q, k, v: (B, H, S, Dh) -> (B, H, S, Dh)."""
    B, H, S, Dh = q.shape
    spec = pl.BlockSpec((1, H, S, Dh), lambda b: (b, 0, 0, 0))
    return pl.pallas_call(
        functools.partial(_attention_kernel, scale=scale),
        out_shape=jax.ShapeDtypeStruct((B, H, S, Dh), q.dtype),
        grid_spec=pltpu.PrefetchScalarGridSpec(
            num_scalar_prefetch=0,
            grid=(B,),
            in_specs=[spec, spec, spec],
            out_specs=spec,
        ),
        compiler_params=pltpu.CompilerParams(dimension_semantics=("parallel",)),
    )(q, k, v)


# --------------------------------------------------------------------------
# Fused FeedForward (+ residual) kernel: grid = (rows, d_ff reduction)
# --------------------------------------------------------------------------
def _ffn_kernel(x_ref, w1_ref, b1_ref, w2_ref, b2_ref, r_ref, o_ref, acc_ref):
    k = pl.program_id(1)

    @pl.when(k == 0)
    def _():
        acc_ref[...] = jnp.zeros_like(acc_ref)

    # hidden slice: relu(x @ W1[:, k-slice] + b1[k-slice])   (dropout = identity)
    h = jnp.dot(x_ref[...], w1_ref[...], preferred_element_type=jnp.float32)
    h = jnp.maximum(h + b1_ref[...].astype(jnp.float32), 0.0)
    acc_ref[...] += jnp.dot(h.astype(w2_ref.dtype), w2_ref[...],
                            preferred_element_type=jnp.float32)

    @pl.when(k == pl.num_programs(1) - 1)
    def _():
        # b2 and the residual are added exactly once, in the epilogue.
        y = acc_ref[...] + b2_ref[...].astype(jnp.float32) + r_ref[...].astype(jnp.float32)
        o_ref[...] = y.astype(o_ref.dtype)


def ffn_residual(x2d, w1, b1, w2, b2, residual, *, tm=256, tk=256):
    """residual + linear2(relu(linear1(x)))   (dropouts are identity)."""
    M, D = x2d.shape
    F = w1.shape[1]
    tm = min(tm, M)
    tk = min(tk, F)
    assert M % tm == 0 and F % tk == 0
    b1_2 = b1.reshape(1, F)
    b2_2 = b2.reshape(1, D)
    return pl.pallas_call(
        _ffn_kernel,
        out_shape=jax.ShapeDtypeStruct((M, D), x2d.dtype),
        grid_spec=pltpu.PrefetchScalarGridSpec(
            num_scalar_prefetch=0,
            grid=(M // tm, F // tk),
            in_specs=[
                pl.BlockSpec((tm, D), lambda i, k: (i, 0)),   # x rows (LN2 output)
                pl.BlockSpec((D, tk), lambda i, k: (0, k)),   # W1 column slice
                pl.BlockSpec((1, tk), lambda i, k: (0, k)),   # b1 slice
                pl.BlockSpec((tk, D), lambda i, k: (k, 0)),   # W2 row slice
                pl.BlockSpec((1, D), lambda i, k: (0, 0)),    # b2
                pl.BlockSpec((tm, D), lambda i, k: (i, 0)),   # residual rows
            ],
            out_specs=pl.BlockSpec((tm, D), lambda i, k: (i, 0)),
            scratch_shapes=[pltpu.VMEM((tm, D), jnp.float32)],
        ),
        compiler_params=pltpu.CompilerParams(
            dimension_semantics=("parallel", "arbitrary")),
    )(x2d, w1, b1_2, w2, b2_2, residual)


# --------------------------------------------------------------------------
# Encoder assembled from the kernels above
# --------------------------------------------------------------------------
def encoder_layer_forward(x, p, num_heads, *, tm=256, tk=256):
    B, S, D = x.shape
    H = num_heads
    Dh = D // H
    M = B * S
    x2d = x.reshape(M, D)

    # ---- self-attention sub-layer:  x = x + MHA(LN1(x)) ----
    h = layer_norm(x2d, p['g1'], p['be1'], tm=tm)
    wqkv = jnp.concatenate([p['wq'], p['wk'], p['wv']], axis=1)     # (D, 3D)
    bqkv = jnp.concatenate([p['bq'], p['bk'], p['bv']], axis=0)
    qkv = linear(h, wqkv, bqkv, tm=tm)                              # (M, 3D), fused q/k/v proj
    q, k, v = jnp.split(qkv, 3, axis=1)

    def split_heads(t):
        return t.reshape(B, S, H, Dh).transpose(0, 2, 1, 3)         # (B, H, S, Dh)

    attn = attention(split_heads(q), split_heads(k), split_heads(v),
                     scale=1.0 / math.sqrt(D))                      # module divides by sqrt(d_model)
    attn2d = attn.transpose(0, 2, 1, 3).reshape(M, D)
    # out-projection fused with the residual add (MHA dropout = identity)
    x2d = linear(attn2d, p['wo'], p['bo'], residual=x2d, tm=tm)

    # ---- feed-forward sub-layer:  x = dropout(x + FFN(LN2(x))) ----
    h2 = layer_norm(x2d, p['g2'], p['be2'], tm=tm)
    x2d = ffn_residual(h2, p['w1'], p['b1'], p['w2'], p['b2'], x2d, tm=tm, tk=tk)
    return x2d.reshape(B, S, D)


def encoder_forward(x, layer_params, num_heads, *, tm=256, tk=256):
    for p in layer_params:
        x = encoder_layer_forward(x, p, num_heads, tm=tm, tk=tk)
    return x


# --------------------------------------------------------------------------
# Parameter init (mimics torch.nn.Linear uniform init; LN affine randomized
# slightly so the correctness check actually exercises it)
# --------------------------------------------------------------------------
def init_layer_params(key, d_model, d_ff, dtype=jnp.float32):
    keys = jax.random.split(key, 16)

    def lin(kw, kb, fan_in, fan_out):
        bound = 1.0 / math.sqrt(fan_in)
        w = jax.random.uniform(kw, (fan_in, fan_out), dtype, -bound, bound)
        b = jax.random.uniform(kb, (fan_out,), dtype, -bound, bound)
        return w, b

    wq, bq = lin(keys[0], keys[1], d_model, d_model)
    wk, bk = lin(keys[2], keys[3], d_model, d_model)
    wv, bv = lin(keys[4], keys[5], d_model, d_model)
    wo, bo = lin(keys[6], keys[7], d_model, d_model)
    w1, b1 = lin(keys[8], keys[9], d_model, d_ff)
    w2, b2 = lin(keys[10], keys[11], d_ff, d_model)
    g1 = 1.0 + 0.1 * jax.random.normal(keys[12], (d_model,), dtype)
    be1 = 0.1 * jax.random.normal(keys[13], (d_model,), dtype)
    g2 = 1.0 + 0.1 * jax.random.normal(keys[14], (d_model,), dtype)
    be2 = 0.1 * jax.random.normal(keys[15], (d_model,), dtype)
    return dict(g1=g1, be1=be1, g2=g2, be2=be2,
                wq=wq, bq=bq, wk=wk, bk=bk, wv=wv, bv=bv, wo=wo, bo=bo,
                w1=w1, b1=b1, w2=w2, b2=b2)


# --------------------------------------------------------------------------
# Plain-JAX reference (mirrors the torch forward exactly, eval mode)
# --------------------------------------------------------------------------
def encoder_reference(x, layer_params, num_heads):
    B, S, D = x.shape
    H = num_heads
    Dh = D // H

    def ln(t, g, b):
        mu = jnp.mean(t, axis=-1, keepdims=True)
        var = jnp.mean((t - mu) ** 2, axis=-1, keepdims=True)
        return (t - mu) / jnp.sqrt(var + LN_EPS) * g + b

    for p in layer_params:
        xn = ln(x, p['g1'], p['be1'])
        q = xn @ p['wq'] + p['bq']
        k = xn @ p['wk'] + p['bk']
        v = xn @ p['wv'] + p['bv']

        def sh(t):
            return t.reshape(B, S, H, Dh).transpose(0, 2, 1, 3)

        qh, kh, vh = sh(q), sh(k), sh(v)
        scores = jnp.einsum('bhqd,bhkd->bhqk', qh, kh) / math.sqrt(D)
        w = jax.nn.softmax(scores, axis=-1)
        o = jnp.einsum('bhqk,bhkd->bhqd', w, vh)
        o = o.transpose(0, 2, 1, 3).reshape(B, S, D)
        x = x + (o @ p['wo'] + p['bo'])

        xn = ln(x, p['g2'], p['be2'])
        hdn = jnp.maximum(xn @ p['w1'] + p['b1'], 0.0)
        x = x + (hdn @ p['w2'] + p['b2'])
    return x


if __name__ == "__main__":
    # Lane-dense demo shapes (d_model and d_ff multiples of 128; d_ff % d_model == 0).
    d_model, d_ff, num_heads = 128, 512, 4
    num_layers = 2
    batch, seq = 2, 128

    key = jax.random.PRNGKey(0)
    k_x, k_p = jax.random.split(key)
    x = jax.random.normal(k_x, (batch, seq, d_model), jnp.float32)
    layer_keys = jax.random.split(k_p, num_layers)
    params = [init_layer_params(k, d_model, d_ff) for k in layer_keys]

    run = jax.jit(functools.partial(encoder_forward, num_heads=num_heads))
    out = run(x, params)
    out = jax.block_until_ready(out)
    assert out.shape == x.shape

    ref = encoder_reference(x, params, num_heads)
    max_err = float(jnp.max(jnp.abs(out - ref)))
    assert jnp.allclose(out, ref, atol=5e-4, rtol=5e-4), f"max abs err {max_err}"

    print("KERNEL_OK")
</pallas_src>

<mosaic_0001>
module attributes {stable_mosaic.version = 11 : i64} {
  func.func @_layernorm_kernel(%arg0: i32, %arg1: memref<256x128xf32, #tpu.memory_space<vmem>>, %arg2: memref<1x128xf32, #tpu.memory_space<vmem>>, %arg3: memref<1x128xf32, #tpu.memory_space<vmem>>, %arg4: memref<256x128xf32, #tpu.memory_space<vmem>>) attributes {dimension_semantics = [#tpu.dimension_semantics<parallel>], iteration_bounds = array<i64: 1>, scalar_prefetch = 0 : i64, scratch_operands = 0 : i64, tpu.core_type = #tpu.core_type<tc>, window_params = [{transform_indices = @transform_0, window_bounds = array<i64: 256, 128>}, {pipeline_mode = #tpu.pipeline_mode<synchronous>, transform_indices = @transform_1, window_bounds = array<i64: 1, 128>}, {pipeline_mode = #tpu.pipeline_mode<synchronous>, transform_indices = @transform_2, window_bounds = array<i64: 1, 128>}, {transform_indices = @transform_3, window_bounds = array<i64: 256, 128>}]} {
    %c0 = arith.constant 0 : index
    %c0_0 = arith.constant 0 : index
    %0 = vector.load %arg1[%c0, %c0_0] : memref<256x128xf32, #tpu.memory_space<vmem>>, vector<256x128xf32>
    %cst = arith.constant dense<0.000000e+00> : vector<256xf32>
    %1 = vector.multi_reduction <add>, %0, %cst [1] : vector<256x128xf32> to vector<256xf32>
    %2 = vector.shape_cast %1 : vector<256xf32> to vector<256x1xf32>
    %cst_1 = arith.constant 1.280000e+02 : f32
    %3 = vector.broadcast %cst_1 : f32 to vector<256x1xf32>
    %4 = arith.divf %2, %3 : vector<256x1xf32>
    %5 = vector.broadcast %4 : vector<256x1xf32> to vector<256x128xf32>
    %6 = arith.subf %0, %5 : vector<256x128xf32>
    %7 = arith.mulf %6, %6 : vector<256x128xf32>
    %cst_2 = arith.constant dense<0.000000e+00> : vector<256xf32>
    %8 = vector.multi_reduction <add>, %7, %cst_2 [1] : vector<256x128xf32> to vector<256xf32>
    %9 = vector.shape_cast %8 : vector<256xf32> to vector<256x1xf32>
    %cst_3 = arith.constant 1.280000e+02 : f32
    %10 = vector.broadcast %cst_3 : f32 to vector<256x1xf32>
    %11 = arith.divf %9, %10 : vector<256x1xf32>
    %cst_4 = arith.constant 9.99999974E-6 : f32
    %12 = vector.broadcast %cst_4 : f32 to vector<256x1xf32>
    %13 = arith.addf %11, %12 : vector<256x1xf32>
    %14 = math.rsqrt %13 : vector<256x1xf32>
    %15 = vector.broadcast %14 : vector<256x1xf32> to vector<256x128xf32>
    %16 = arith.mulf %6, %15 : vector<256x128xf32>
    %c0_5 = arith.constant 0 : index
    %c0_6 = arith.constant 0 : index
    %17 = vector.load %arg2[%c0_5, %c0_6] : memref<1x128xf32, #tpu.memory_space<vmem>>, vector<1x128xf32>
    %18 = vector.broadcast %17 : vector<1x128xf32> to vector<256x128xf32>
    %19 = arith.mulf %16, %18 : vector<256x128xf32>
    %c0_7 = arith.constant 0 : index
    %c0_8 = arith.constant 0 : index
    %20 = vector.load %arg3[%c0_7, %c0_8] : memref<1x128xf32, #tpu.memory_space<vmem>>, vector<1x128xf32>
    %21 = vector.broadcast %20 : vector<1x128xf32> to vector<256x128xf32>
    %22 = arith.addf %19, %21 : vector<256x128xf32>
    %c0_9 = arith.constant 0 : index
    %c0_10 = arith.constant 0 : index
    %23 = vector.load %arg4[%c0_9, %c0_10] : memref<256x128xf32, #tpu.memory_space<vmem>>, vector<256x128xf32>
    tpu.vector_store %arg4[%c0_9, %c0_10], %22 {strides = array<i32>} : memref<256x128xf32, #tpu.memory_space<vmem>>, vector<256x128xf32>,
    return
  }
  func.func @transform_0(%arg0: i32) -> (i32, i32) {
    %c0_i32 = arith.constant 0 : i32
    %c0_i32_0 = arith.constant 0 : i32
    return %arg0, %c0_i32 : i32, i32
  }
  func.func @transform_1(%arg0: i32) -> (i32, i32) {
    %c0_i32 = arith.constant 0 : i32
    %c0_i32_0 = arith.constant 0 : i32
    %c0_i32_1 = arith.constant 0 : i32
    return %c0_i32, %c0_i32_0 : i32, i32
  }
  func.func @transform_2(%arg0: i32) -> (i32, i32) {
    %c0_i32 = arith.constant 0 : i32
    %c0_i32_0 = arith.constant 0 : i32
    %c0_i32_1 = arith.constant 0 : i32
    return %c0_i32, %c0_i32_0 : i32, i32
  }
  func.func @transform_3(%arg0: i32) -> (i32, i32) {
    %c0_i32 = arith.constant 0 : i32
    %c0_i32_0 = arith.constant 0 : i32
    return %arg0, %c0_i32 : i32, i32
  }
}

module attributes {stable_mosaic.version = 11 : i64} {
  func.func @_linear_kernel(%arg0: i32, %arg1: memref<256x128xf32, #tpu.memory_space<vmem>>, %arg2: memref<128x384xf32, #tpu.memory_space<vmem>>, %arg3: memref<1x384xf32, #tpu.memory_space<vmem>>, %arg4: memref<256x384xf32, #tpu.memory_space<vmem>>) attributes {dimension_semantics = [#tpu.dimension_semantics<parallel>], iteration_bounds = array<i64: 1>, scalar_prefetch = 0 : i64, scratch_operands = 0 : i64, tpu.core_type = #tpu.core_type<tc>, window_params = [{transform_indices = @transform_0, window_bounds = array<i64: 256, 128>}, {pipeline_mode = #tpu.pipeline_mode<synchronous>, transform_indices = @transform_1, window_bounds = array<i64: 128, 384>}, {pipeline_mode = #tpu.pipeline_mode<synchronous>, transform_indices = @transform_2, window_bounds = array<i64: 1, 384>}, {transform_indices = @transform_3, window_bounds = array<i64: 256, 384>}]} {
    %c0 = arith.constant 0 : index
    %c0_0 = arith.constant 0 : index
    %0 = vector.load %arg1[%c0, %c0_0] : memref<256x128xf32, #tpu.memory_space<vmem>>, vector<256x128xf32>
    %c0_1 = arith.constant 0 : index
    %c0_2 = arith.constant 0 : index
    %1 = vector.load %arg2[%c0_1, %c0_2] : memref<128x384xf32, #tpu.memory_space<vmem>>, vector<128x384xf32>
    %cst = arith.constant dense<0.000000e+00> : vector<256x384xf32>
    %2 = tpu.matmul %0, %1, %cst {dimension_numbers = #tpu.dot_dimension_numbers<[1], [0], [0], [1], [0, 0, 1, 1], [], []>} : vector<256x128xf32>, vector<128x384xf32>, vector<256x384xf32> -> vector<256x384xf32>
    %c0_3 = arith.constant 0 : index
    %c0_4 = arith.constant 0 : index
    %3 = vector.load %arg3[%c0_3, %c0_4] : memref<1x384xf32, #tpu.memory_space<vmem>>, vector<1x384xf32>
    %4 = vector.broadcast %3 : vector<1x384xf32> to vector<256x384xf32>
    %5 = arith.addf %2, %4 : vector<256x384xf32>
    %c0_5 = arith.constant 0 : index
    %c0_6 = arith.constant 0 : index
    %6 = vector.load %arg4[%c0_5, %c0_6] : memref<256x384xf32, #tpu.memory_space<vmem>>, vector<256x384xf32>
    tpu.vector_store %arg4[%c0_5, %c0_6], %5 {strides = array<i32>} : memref<256x384xf32, #tpu.memory_space<vmem>>, vector<256x384xf32>,
    return
  }
  func.func @transform_0(%arg0: i32) -> (i32, i32) {
    %c0_i32 = arith.constant 0 : i32
    %c0_i32_0 = arith.constant 0 : i32
    return %arg0, %c0_i32 : i32, i32
  }
  func.func @transform_1(%arg0: i32) -> (i32, i32) {
    %c0_i32 = arith.constant 0 : i32
    %c0_i32_0 = arith.constant 0 : i32
    %c0_i32_1 = arith.constant 0 : i32
    return %c0_i32, %c0_i32_0 : i32, i32
  }
  func.func @transform_2(%arg0: i32) -> (i32, i32) {
    %c0_i32 = arith.constant 0 : i32
    %c0_i32_0 = arith.constant 0 : i32
    %c0_i32_1 = arith.constant 0 : i32
    return %c0_i32, %c0_i32_0 : i32, i32
  }
  func.func @transform_3(%arg0: i32) -> (i32, i32) {
    %c0_i32 = arith.constant 0 : i32
    %c0_i32_0 = arith.constant 0 : i32
    return %arg0, %c0_i32 : i32, i32
  }
}

module attributes {stable_mosaic.version = 11 : i64} {
  func.func @_attention_kernel(%arg0: i32, %arg1: memref<1x4x128x32xf32, #tpu.memory_space<vmem>>, %arg2: memref<1x4x128x32xf32, #tpu.memory_space<vmem>>, %arg3: memref<1x4x128x32xf32, #tpu.memory_space<vmem>>, %arg4: memref<1x4x128x32xf32, #tpu.memory_space<vmem>>) attributes {dimension_semantics = [#tpu.dimension_semantics<parallel>], iteration_bounds = array<i64: 2>, scalar_prefetch = 0 : i64, scratch_operands = 0 : i64, tpu.core_type = #tpu.core_type<tc>, window_params = [{transform_indices = @transform_0, window_bounds = array<i64: 1, 4, 128, 32>}, {transform_indices = @transform_1, window_bounds = array<i64: 1, 4, 128, 32>}, {transform_indices = @transform_2, window_bounds = array<i64: 1, 4, 128, 32>}, {transform_indices = @transform_3, window_bounds = array<i64: 1, 4, 128, 32>}]} {
    %c0 = arith.constant 0 : index
    %c0_0 = arith.constant 0 : index
    %c0_1 = arith.constant 0 : index
    %c0_2 = arith.constant 0 : index
    %0 = vector.load %arg1[%c0, %c0_0, %c0_1, %c0_2] : memref<1x4x128x32xf32, #tpu.memory_space<vmem>>, vector<1x4x128x32xf32>
    %1 = vector.shape_cast %0 : vector<1x4x128x32xf32> to vector<4x128x32xf32>
    %c0_3 = arith.constant 0 : index
    %c0_4 = arith.constant 0 : index
    %c0_5 = arith.constant 0 : index
    %c0_6 = arith.constant 0 : index
    %2 = vector.load %arg2[%c0_3, %c0_4, %c0_5, %c0_6] : memref<1x4x128x32xf32, #tpu.memory_space<vmem>>, vector<1x4x128x32xf32>
    %3 = vector.shape_cast %2 : vector<1x4x128x32xf32> to vector<4x128x32xf32>
    %c0_7 = arith.constant 0 : index
    %c0_8 = arith.constant 0 : index
    %c0_9 = arith.constant 0 : index
    %c0_10 = arith.constant 0 : index
    %4 = vector.load %arg3[%c0_7, %c0_8, %c0_9, %c0_10] : memref<1x4x128x32xf32, #tpu.memory_space<vmem>>, vector<1x4x128x32xf32>
    %5 = vector.shape_cast %4 : vector<1x4x128x32xf32> to vector<4x128x32xf32>
    "tpu.trace_start"() <{level = 10 : i32, message = "hqd,hkd->hqk"}> : () -> ()
    %cst = arith.constant dense<0.000000e+00> : vector<4x128x128xf32>
    %6 = tpu.matmul %1, %3, %cst {dimension_numbers = #tpu.dot_dimension_numbers<[2], [2], [1], [1], [0, 0, 0, 1, 1, 1], [0], [0]>} : vector<4x128x32xf32>, vector<4x128x32xf32>, vector<4x128x128xf32> -> vector<4x128x128xf32>
    "tpu.trace_stop"() : () -> ()
    %cst_11 = arith.constant 0.0883883461 : f32
    %7 = vector.broadcast %cst_11 : f32 to vector<4x128x128xf32>
    %8 = arith.mulf %6, %7 : vector<4x128x128xf32>
    %cst_12 = arith.constant dense<0xFF800000> : vector<4x128xf32>
    %9 = vector.multi_reduction <maximumf>, %8, %cst_12 [2] : vector<4x128x128xf32> to vector<4x128xf32>
    %10 = vector.shape_cast %9 : vector<4x128xf32> to vector<4x128x1xf32>
    %11 = vector.broadcast %10 : vector<4x128x1xf32> to vector<4x128x128xf32>
    %12 = arith.subf %8, %11 : vector<4x128x128xf32>
    %13 = math.exp %12 : vector<4x128x128xf32>
    %cst_13 = arith.constant dense<0.000000e+00> : vector<4x128xf32>
    %14 = vector.multi_reduction <add>, %13, %cst_13 [2] : vector<4x128x128xf32> to vector<4x128xf32>
    %15 = vector.shape_cast %14 : vector<4x128xf32> to vector<4x128x1xf32>
    %16 = vector.broadcast %15 : vector<4x128x1xf32> to vector<4x128x128xf32>
    %17 = arith.divf %13, %16 : vector<4x128x128xf32>
    "tpu.trace_start"() <{level = 10 : i32, message = "hqk,hkd->hqd"}> : () -> ()
    %cst_14 = arith.constant dense<0.000000e+00> : vector<4x128x32xf32>
    %18 = tpu.matmul %17, %5, %cst_14 {dimension_numbers = #tpu.dot_dimension_numbers<[2], [1], [1], [2], [0, 0, 0, 1, 1, 2], [0], [0]>} : vector<4x128x128xf32>, vector<4x128x32xf32>, vector<4x128x32xf32> -> vector<4x128x32xf32>
    "tpu.trace_stop"() : () -> ()
    %c0_15 = arith.constant 0 : index
    %c0_16 = arith.constant 0 : index
    %c0_17 = arith.constant 0 : index
    %c0_18 = arith.constant 0 : index
    %19 = vector.load %arg4[%c0_15, %c0_16, %c0_17, %c0_18] : memref<1x4x128x32xf32, #tpu.memory_space<vmem>>, vector<1x4x128x32xf32>
    %20 = vector.shape_cast %19 : vector<1x4x128x32xf32> to vector<4x128x32xf32>
    %21 = vector.shape_cast %18 : vector<4x128x32xf32> to vector<1x4x128x32xf32>
    tpu.vector_store %arg4[%c0_15, %c0_16, %c0_17, %c0_18], %21 {strides = array<i32>} : memref<1x4x128x32xf32, #tpu.memory_space<vmem>>, vector<1x4x128x32xf32>,
    return
  }
  func.func @transform_0(%arg0: i32) -> (i32, i32, i32, i32) {
    %c0_i32 = arith.constant 0 : i32
    %c0_i32_0 = arith.constant 0 : i32
    %c0_i32_1 = arith.constant 0 : i32
    %c0_i32_2 = arith.constant 0 : i32
    return %arg0, %c0_i32, %c0_i32_0, %c0_i32_1 : i32, i32, i32, i32
  }
  func.func @transform_1(%arg0: i32) -> (i32, i32, i32, i32) {
    %c0_i32 = arith.constant 0 : i32
    %c0_i32_0 = arith.constant 0 : i32
    %c0_i32_1 = arith.constant 0 : i32
    %c0_i32_2 = arith.constant 0 : i32
    return %arg0, %c0_i32, %c0_i32_0, %c0_i32_1 : i32, i32, i32, i32
  }
  func.func @transform_2(%arg0: i32) -> (i32, i32, i32, i32) {
    %c0_i32 = arith.constant 0 : i32
    %c0_i32_0 = arith.constant 0 : i32
    %c0_i32_1 = arith.constant 0 : i32
    %c0_i32_2 = arith.constant 0 : i32
    return %arg0, %c0_i32, %c0_i32_0, %c0_i32_1 : i32, i32, i32, i32
  }
  func.func @transform_3(%arg0: i32) -> (i32, i32, i32, i32) {
    %c0_i32 = arith.constant 0 : i32
    %c0_i32_0 = arith.constant 0 : i32
    %c0_i32_1 = arith.constant 0 : i32
    %c0_i32_2 = arith.constant 0 : i32
    return %arg0, %c0_i32, %c0_i32_0, %c0_i32_1 : i32, i32, i32, i32
  }
}

module attributes {stable_mosaic.version = 11 : i64} {
  func.func @_linear_residual_kernel(%arg0: i32, %arg1: memref<256x128xf32, #tpu.memory_space<vmem>>, %arg2: memref<128x128xf32, #tpu.memory_space<vmem>>, %arg3: memref<1x128xf32, #tpu.memory_space<vmem>>, %arg4: memref<256x128xf32, #tpu.memory_space<vmem>>, %arg5: memref<256x128xf32, #tpu.memory_space<vmem>>) attributes {dimension_semantics = [#tpu.dimension_semantics<parallel>], iteration_bounds = array<i64: 1>, scalar_prefetch = 0 : i64, scratch_operands = 0 : i64, tpu.core_type = #tpu.core_type<tc>, window_params = [{transform_indices = @transform_0, window_bounds = array<i64: 256, 128>}, {pipeline_mode = #tpu.pipeline_mode<synchronous>, transform_indices = @transform_1, window_bounds = array<i64: 128, 128>}, {pipeline_mode = #tpu.pipeline_mode<synchronous>, transform_indices = @transform_2, window_bounds = array<i64: 1, 128>}, {transform_indices = @transform_3, window_bounds = array<i64: 256, 128>}, {transform_indices = @transform_4, window_bounds = array<i64: 256, 128>}]} {
    %c0 = arith.constant 0 : index
    %c0_0 = arith.constant 0 : index
    %0 = vector.load %arg1[%c0, %c0_0] : memref<256x128xf32, #tpu.memory_space<vmem>>, vector<256x128xf32>
    %c0_1 = arith.constant 0 : index
    %c0_2 = arith.constant 0 : index
    %1 = vector.load %arg2[%c0_1, %c0_2] : memref<128x128xf32, #tpu.memory_space<vmem>>, vector<128x128xf32>
    %cst = arith.constant dense<0.000000e+00> : vector<256x128xf32>
    %2 = tpu.matmul %0, %1, %cst {dimension_numbers = #tpu.dot_dimension_numbers<[1], [0], [0], [1], [0, 0, 1, 1], [], []>} : vector<256x128xf32>, vector<128x128xf32>, vector<256x128xf32> -> vector<256x128xf32>
    %c0_3 = arith.constant 0 : index
    %c0_4 = arith.constant 0 : index
    %3 = vector.load %arg3[%c0_3, %c0_4] : memref<1x128xf32, #tpu.memory_space<vmem>>, vector<1x128xf32>
    %4 = vector.broadcast %3 : vector<1x128xf32> to vector<256x128xf32>
    %5 = arith.addf %2, %4 : vector<256x128xf32>
    %c0_5 = arith.constant 0 : index
    %c0_6 = arith.constant 0 : index
    %6 = vector.load %arg4[%c0_5, %c0_6] : memref<256x128xf32, #tpu.memory_space<vmem>>, vector<256x128xf32>
    %7 = arith.addf %5, %6 : vector<256x128xf32>
    %c0_7 = arith.constant 0 : index
    %c0_8 = arith.constant 0 : index
    %8 = vector.load %arg5[%c0_7, %c0_8] : memref<256x128xf32, #tpu.memory_space<vmem>>, vector<256x128xf32>
    tpu.vector_store %arg5[%c0_7, %c0_8], %7 {strides = array<i32>} : memref<256x128xf32, #tpu.memory_space<vmem>>, vector<256x128xf32>,
    return
  }
  func.func @transform_0(%arg0: i32) -> (i32, i32) {
    %c0_i32 = arith.constant 0 : i32
    %c0_i32_0 = arith.constant 0 : i32
    return %arg0, %c0_i32 : i32, i32
  }
  func.func @transform_1(%arg0: i32) -> (i32, i32) {
    %c0_i32 = arith.constant 0 : i32
    %c0_i32_0 = arith.constant 0 : i32
    %c0_i32_1 = arith.constant 0 : i32
    return %c0_i32, %c0_i32_0 : i32, i32
  }
  func.func @transform_2(%arg0: i32) -> (i32, i32) {
    %c0_i32 = arith.constant 0 : i32
    %c0_i32_0 = arith.constant 0 : i32
    %c0_i32_1 = arith.constant 0 : i32
    return %c0_i32, %c0_i32_0 : i32, i32
  }
  func.func @transform_3(%arg0: i32) -> (i32, i32) {
    %c0_i32 = arith.constant 0 : i32
    %c0_i32_0 = arith.constant 0 : i32
    return %arg0, %c0_i32 : i32, i32
  }
  func.func @transform_4(%arg0: i32) -> (i32, i32) {
    %c0_i32 = arith.constant 0 : i32
    %c0_i32_0 = arith.constant 0 : i32
    return %arg0, %c0_i32 : i32, i32
  }
}

module attributes {stable_mosaic.version = 11 : i64} {
  func.func @_ffn_kernel(%arg0: i32, %arg1: i32, %arg2: memref<256x128xf32, #tpu.memory_space<vmem>>, %arg3: memref<128x256xf32, #tpu.memory_space<vmem>>, %arg4: memref<1x256xf32, #tpu.memory_space<vmem>>, %arg5: memref<256x128xf32, #tpu.memory_space<vmem>>, %arg6: memref<1x128xf32, #tpu.memory_space<vmem>>, %arg7: memref<256x128xf32, #tpu.memory_space<vmem>>, %arg8: memref<256x128xf32, #tpu.memory_space<vmem>>, %arg9: memref<256x128xf32, #tpu.memory_space<vmem>>) attributes {dimension_semantics = [#tpu.dimension_semantics<parallel>, #tpu.dimension_semantics<arbitrary>], iteration_bounds = array<i64: 1, 2>, scalar_prefetch = 0 : i64, scratch_operands = 1 : i64, tpu.core_type = #tpu.core_type<tc>, window_params = [{transform_indices = @transform_0, window_bounds = array<i64: 256, 128>}, {transform_indices = @transform_1, window_bounds = array<i64: 128, 256>}, {transform_indices = @transform_2, window_bounds = array<i64: 1, 256>}, {transform_indices = @transform_3, window_bounds = array<i64: 256, 128>}, {pipeline_mode = #tpu.pipeline_mode<synchronous>, transform_indices = @transform_4, window_bounds = array<i64: 1, 128>}, {transform_indices = @transform_5, window_bounds = array<i64: 256, 128>}, {transform_indices = @transform_6, window_bounds = array<i64: 256, 128>}]} {
    %c0_i32 = arith.constant 0 : i32
    %0 = arith.cmpi eq, %arg1, %c0_i32 : i32
    %1 = arith.extui %0 : i1 to i32
    %c0_i32_0 = arith.constant 0 : i32
    %2 = arith.cmpi ne, %1, %c0_i32_0 : i32
    scf.if %2 {
      %cst_15 = arith.constant 0.000000e+00 : f32
      %19 = vector.broadcast %cst_15 : f32 to vector<256x128xf32>
      %c0_16 = arith.constant 0 : index
      %c0_17 = arith.constant 0 : index
      %20 = vector.load %arg9[%c0_16, %c0_17] : memref<256x128xf32, #tpu.memory_space<vmem>>, vector<256x128xf32>
      tpu.vector_store %arg9[%c0_16, %c0_17], %19 {strides = array<i32>} : memref<256x128xf32, #tpu.memory_space<vmem>>, vector<256x128xf32>,
    } else {
    }
    %c0 = arith.constant 0 : index
    %c0_1 = arith.constant 0 : index
    %3 = vector.load %arg2[%c0, %c0_1] : memref<256x128xf32, #tpu.memory_space<vmem>>, vector<256x128xf32>
    %c0_2 = arith.constant 0 : index
    %c0_3 = arith.constant 0 : index
    %4 = vector.load %arg3[%c0_2, %c0_3] : memref<128x256xf32, #tpu.memory_space<vmem>>, vector<128x256xf32>
    %cst = arith.constant dense<0.000000e+00> : vector<256x256xf32>
    %5 = tpu.matmul %3, %4, %cst {dimension_numbers = #tpu.dot_dimension_numbers<[1], [0], [0], [1], [0, 0, 1, 1], [], []>} : vector<256x128xf32>, vector<128x256xf32>, vector<256x256xf32> -> vector<256x256xf32>
    %c0_4 = arith.constant 0 : index
    %c0_5 = arith.constant 0 : index
    %6 = vector.load %arg4[%c0_4, %c0_5] : memref<1x256xf32, #tpu.memory_space<vmem>>, vector<1x256xf32>
    %7 = vector.broadcast %6 : vector<1x256xf32> to vector<256x256xf32>
    %8 = arith.addf %5, %7 : vector<256x256xf32>
    %cst_6 = arith.constant 0.000000e+00 : f32
    %9 = vector.broadcast %cst_6 : f32 to vector<256x256xf32>
    %10 = arith.maximumf %8, %9 : vector<256x256xf32>
    %c0_7 = arith.constant 0 : index
    %c0_8 = arith.constant 0 : index
    %11 = vector.load %arg9[%c0_7, %c0_8] : memref<256x128xf32, #tpu.memory_space<vmem>>, vector<256x128xf32>
    %c0_9 = arith.constant 0 : index
    %c0_10 = arith.constant 0 : index
    %12 = vector.load %arg5[%c0_9, %c0_10] : memref<256x128xf32, #tpu.memory_space<vmem>>, vector<256x128xf32>
    %cst_11 = arith.constant dense<0.000000e+00> : vector<256x128xf32>
    %13 = tpu.matmul %10, %12, %cst_11 {dimension_numbers = #tpu.dot_dimension_numbers<[1], [0], [0], [1], [0, 0, 1, 1], [], []>} : vector<256x256xf32>, vector<256x128xf32>, vector<256x128xf32> -> vector<256x128xf32>
    %14 = arith.addf %11, %13 : vector<256x128xf32>
    %c0_12 = arith.constant 0 : index
    %c0_13 = arith.constant 0 : index
    %15 = vector.load %arg9[%c0_12, %c0_13] : memref<256x128xf32, #tpu.memory_space<vmem>>, vector<256x128xf32>
    tpu.vector_store %arg9[%c0_12, %c0_13], %14 {strides = array<i32>} : memref<256x128xf32, #tpu.memory_space<vmem>>, vector<256x128xf32>,
    %c1_i32 = arith.constant 1 : i32
    %16 = arith.cmpi eq, %arg1, %c1_i32 : i32
    %17 = arith.extui %16 : i1 to i32
    %c0_i32_14 = arith.constant 0 : i32
    %18 = arith.cmpi ne, %17, %c0_i32_14 : i32
    scf.if %18 {
      %c0_15 = arith.constant 0 : index
      %c0_16 = arith.constant 0 : index
      %19 = vector.load %arg9[%c0_15, %c0_16] : memref<256x128xf32, #tpu.memory_space<vmem>>, vector<256x128xf32>
      %c0_17 = arith.constant 0 : index
      %c0_18 = arith.constant 0 : index
      %20 = vector.load %arg6[%c0_17, %c0_18] : memref<1x128xf32, #tpu.memory_space<vmem>>, vector<1x128xf32>
      %21 = vector.broadcast %20 : vector<1x128xf32> to vector<256x128xf32>
      %22 = arith.addf %19, %21 : vector<256x128xf32>
      %c0_19 = arith.constant 0 : index
      %c0_20 = arith.constant 0 : index
      %23 = vector.load %arg7[%c0_19, %c0_20] : memref<256x128xf32, #tpu.memory_space<vmem>>, vector<256x128xf32>
      %24 = arith.addf %22, %23 : vector<256x128xf32>
      %c0_21 = arith.constant 0 : index
      %c0_22 = arith.constant 0 : index
      %25 = vector.load %arg8[%c0_21, %c0_22] : memref<256x128xf32, #tpu.memory_space<vmem>>, vector<256x128xf32>
      tpu.vector_store %arg8[%c0_21, %c0_22], %24 {strides = array<i32>} : memref<256x128xf32, #tpu.memory_space<vmem>>, vector<256x128xf32>,
    } else {
    }
    return
  }
  func.func @transform_0(%arg0: i32, %arg1: i32) -> (i32, i32) {
    %c0_i32 = arith.constant 0 : i32
    %c0_i32_0 = arith.constant 0 : i32
    return %arg0, %c0_i32 : i32, i32
  }
  func.func @transform_1(%arg0: i32, %arg1: i32) -> (i32, i32) {
    %c0_i32 = arith.constant 0 : i32
    %c0_i32_0 = arith.constant 0 : i32
    return %c0_i32, %arg1 : i32, i32
  }
  func.func @transform_2(%arg0: i32, %arg1: i32) -> (i32, i32) {
    %c0_i32 = arith.constant 0 : i32
    %c0_i32_0 = arith.constant 0 : i32
    return %c0_i32, %arg1 : i32, i32
  }
  func.func @transform_3(%arg0: i32, %arg1: i32) -> (i32, i32) {
    %c0_i32 = arith.constant 0 : i32
    %c0_i32_0 = arith.constant 0 : i32
    return %arg1, %c0_i32 : i32, i32
  }
  func.func @transform_4(%arg0: i32, %arg1: i32) -> (i32, i32) {
    %c0_i32 = arith.constant 0 : i32
    %c0_i32_0 = arith.constant 0 : i32
    %c0_i32_1 = arith.constant 0 : i32
    return %c0_i32, %c0_i32_0 : i32, i32
  }
  func.func @transform_5(%arg0: i32, %arg1: i32) -> (i32, i32) {
    %c0_i32 = arith.constant 0 : i32
    %c0_i32_0 = arith.constant 0 : i32
    return %arg0, %c0_i32 : i32, i32
  }
  func.func @transform_6(%arg0: i32, %arg1: i32) -> (i32, i32) {
    %c0_i32 = arith.constant 0 : i32
    %c0_i32_0 = arith.constant 0 : i32
    return %arg0, %c0_i32 : i32, i32
  }
}

module attributes {stable_mosaic.version = 11 : i64} {
  func.func @_layernorm_kernel(%arg0: i32, %arg1: memref<256x128xf32, #tpu.memory_space<vmem>>, %arg2: memref<1x128xf32, #tpu.memory_space<vmem>>, %arg3: memref<1x128xf32, #tpu.memory_space<vmem>>, %arg4: memref<256x128xf32, #tpu.memory_space<vmem>>) attributes {dimension_semantics = [#tpu.dimension_semantics<parallel>], iteration_bounds = array<i64: 1>, scalar_prefetch = 0 : i64, scratch_operands = 0 : i64, tpu.core_type = #tpu.core_type<tc>, window_params = [{transform_indices = @transform_0, window_bounds = array<i64: 256, 128>}, {pipeline_mode = #tpu.pipeline_mode<synchronous>, transform_indices = @transform_1, window_bounds = array<i64: 1, 128>}, {pipeline_mode = #tpu.pipeline_mode<synchronous>, transform_indices = @transform_2, window_bounds = array<i64: 1, 128>}, {transform_indices = @transform_3, window_bounds = array<i64: 256, 128>}]} {
    %c0 = arith.constant 0 : index
    %c0_0 = arith.constant 0 : index
    %0 = vector.load %arg1[%c0, %c0_0] : memref<256x128xf32, #tpu.memory_space<vmem>>, vector<256x128xf32>
    %cst = arith.constant dense<0.000000e+00> : vector<256xf32>
    %1 = vector.multi_reduction <add>, %0, %cst [1] : vector<256x128xf32> to vector<256xf32>
    %2 = vector.shape_cast %1 : vector<256xf32> to vector<256x1xf32>
    %cst_1 = arith.constant 1.280000e+02 : f32
    %3 = vector.broadcast %cst_1 : f32 to vector<256x1xf32>
    %4 = arith.divf %2, %3 : vector<256x1xf32>
    %5 = vector.broadcast %4 : vector<256x1xf32> to vector<256x128xf32>
    %6 = arith.subf %0, %5 : vector<256x128xf32>
    %7 = arith.mulf %6, %6 : vector<256x128xf32>
    %cst_2 = arith.constant dense<0.000000e+00> : vector<256xf32>
    %8 = vector.multi_reduction <add>, %7, %cst_2 [1] : vector<256x128xf32> to vector<256xf32>
    %9 = vector.shape_cast %8 : vector<256xf32> to vector<256x1xf32>
    %cst_3 = arith.constant 1.280000e+02 : f32
    %10 = vector.broadcast %cst_3 : f32 to vector<256x1xf32>
    %11 = arith.divf %9, %10 : vector<256x1xf32>
    %cst_4 = arith.constant 9.99999974E-6 : f32
    %12 = vector.broadcast %cst_4 : f32 to vector<256x1xf32>
    %13 = arith.addf %11, %12 : vector<256x1xf32>
    %14 = math.rsqrt %13 : vector<256x1xf32>
    %15 = vector.broadcast %14 : vector<256x1xf32> to vector<256x128xf32>
    %16 = arith.mulf %6, %15 : vector<256x128xf32>
    %c0_5 = arith.constant 0 : index
    %c0_6 = arith.constant 0 : index
    %17 = vector.load %arg2[%c0_5, %c0_6] : memref<1x128xf32, #tpu.memory_space<vmem>>, vector<1x128xf32>
    %18 = vector.broadcast %17 : vector<1x128xf32> to vector<256x128xf32>
    %19 = arith.mulf %16, %18 : vector<256x128xf32>
    %c0_7 = arith.constant 0 : index
    %c0_8 = arith.constant 0 : index
    %20 = vector.load %arg3[%c0_7, %c0_8] : memref<1x128xf32, #tpu.memory_space<vmem>>, vector<1x128xf32>
    %21 = vector.broadcast %20 : vector<1x128xf32> to vector<256x128xf32>
    %22 = arith.addf %19, %21 : vector<256x128xf32>
    %c0_9 = arith.constant 0 : index
    %c0_10 = arith.constant 0 : index
    %23 = vector.load %arg4[%c0_9, %c0_10] : memref<256x128xf32, #tpu.memory_space<vmem>>, vector<256x128xf32>
    tpu.vector_store %arg4[%c0_9, %c0_10], %22 {strides = array<i32>} : memref<256x128xf32, #tpu.memory_space<vmem>>, vector<256x128xf32>,
    return
  }
  func.func @transform_0(%arg0: i32) -> (i32, i32) {
    %c0_i32 = arith.constant 0 : i32
    %c0_i32_0 = arith.constant 0 : i32
    return %arg0, %c0_i32 : i32, i32
  }
  func.func @transform_1(%arg0: i32) -> (i32, i32) {
    %c0_i32 = arith.constant 0 : i32
    %c0_i32_0 = arith.constant 0 : i32
    %c0_i32_1 = arith.constant 0 : i32
    return %c0_i32, %c0_i32_0 : i32, i32
  }
  func.func @transform_2(%arg0: i32) -> (i32, i32) {
    %c0_i32 = arith.constant 0 : i32
    %c0_i32_0 = arith.constant 0 : i32
    %c0_i32_1 = arith.constant 0 : i32
    return %c0_i32, %c0_i32_0 : i32, i32
  }
  func.func @transform_3(%arg0: i32) -> (i32, i32) {
    %c0_i32 = arith.constant 0 : i32
    %c0_i32_0 = arith.constant 0 : i32
    return %arg0, %c0_i32 : i32, i32
  }
}

module attributes {stable_mosaic.version = 11 : i64} {
  func.func @_ffn_kernel(%arg0: i32, %arg1: i32, %arg2: memref<256x128xf32, #tpu.memory_space<vmem>>, %arg3: memref<128x256xf32, #tpu.memory_space<vmem>>, %arg4: memref<1x256xf32, #tpu.memory_space<vmem>>, %arg5: memref<256x128xf32, #tpu.memory_space<vmem>>, %arg6: memref<1x128xf32, #tpu.memory_space<vmem>>, %arg7: memref<256x128xf32, #tpu.memory_space<vmem>>, %arg8: memref<256x128xf32, #tpu.memory_space<vmem>>, %arg9: memref<256x128xf32, #tpu.memory_space<vmem>>) attributes {dimension_semantics = [#tpu.dimension_semantics<parallel>, #tpu.dimension_semantics<arbitrary>], iteration_bounds = array<i64: 1, 2>, scalar_prefetch = 0 : i64, scratch_operands = 1 : i64, tpu.core_type = #tpu.core_type<tc>, window_params = [{transform_indices = @transform_0, window_bounds = array<i64: 256, 128>}, {transform_indices = @transform_1, window_bounds = array<i64: 128, 256>}, {transform_indices = @transform_2, window_bounds = array<i64: 1, 256>}, {transform_indices = @transform_3, window_bounds = array<i64: 256, 128>}, {pipeline_mode = #tpu.pipeline_mode<synchronous>, transform_indices = @transform_4, window_bounds = array<i64: 1, 128>}, {transform_indices = @transform_5, window_bounds = array<i64: 256, 128>}, {transform_indices = @transform_6, window_bounds = array<i64: 256, 128>}]} {
    %c0_i32 = arith.constant 0 : i32
    %0 = arith.cmpi eq, %arg1, %c0_i32 : i32
    %1 = arith.extui %0 : i1 to i32
    %c0_i32_0 = arith.constant 0 : i32
    %2 = arith.cmpi ne, %1, %c0_i32_0 : i32
    scf.if %2 {
      %cst_15 = arith.constant 0.000000e+00 : f32
      %19 = vector.broadcast %cst_15 : f32 to vector<256x128xf32>
      %c0_16 = arith.constant 0 : index
      %c0_17 = arith.constant 0 : index
      %20 = vector.load %arg9[%c0_16, %c0_17] : memref<256x128xf32, #tpu.memory_space<vmem>>, vector<256x128xf32>
      tpu.vector_store %arg9[%c0_16, %c0_17], %19 {strides = array<i32>} : memref<256x128xf32, #tpu.memory_space<vmem>>, vector<256x128xf32>,
    } else {
    }
    %c0 = arith.constant 0 : index
    %c0_1 = arith.constant 0 : index
    %3 = vector.load %arg2[%c0, %c0_1] : memref<256x128xf32, #tpu.memory_space<vmem>>, vector<256x128xf32>
    %c0_2 = arith.constant 0 : index
    %c0_3 = arith.constant 0 : index
    %4 = vector.load %arg3[%c0_2, %c0_3] : memref<128x256xf32, #tpu.memory_space<vmem>>, vector<128x256xf32>
    %cst = arith.constant dense<0.000000e+00> : vector<256x256xf32>
    %5 = tpu.matmul %3, %4, %cst {dimension_numbers = #tpu.dot_dimension_numbers<[1], [0], [0], [1], [0, 0, 1, 1], [], []>} : vector<256x128xf32>, vector<128x256xf32>, vector<256x256xf32> -> vector<256x256xf32>
    %c0_4 = arith.constant 0 : index
    %c0_5 = arith.constant 0 : index
    %6 = vector.load %arg4[%c0_4, %c0_5] : memref<1x256xf32, #tpu.memory_space<vmem>>, vector<1x256xf32>
    %7 = vector.broadcast %6 : vector<1x256xf32> to vector<256x256xf32>
    %8 = arith.addf %5, %7 : vector<256x256xf32>
    %cst_6 = arith.constant 0.000000e+00 : f32
    %9 = vector.broadcast %cst_6 : f32 to vector<256x256xf32>
    %10 = arith.maximumf %8, %9 : vector<256x256xf32>
    %c0_7 = arith.constant 0 : index
    %c0_8 = arith.constant 0 : index
    %11 = vector.load %arg9[%c0_7, %c0_8] : memref<256x128xf32, #tpu.memory_space<vmem>>, vector<256x128xf32>
    %c0_9 = arith.constant 0 : index
    %c0_10 = arith.constant 0 : index
    %12 = vector.load %arg5[%c0_9, %c0_10] : memref<256x128xf32, #tpu.memory_space<vmem>>, vector<256x128xf32>
    %cst_11 = arith.constant dense<0.000000e+00> : vector<256x128xf32>
    %13 = tpu.matmul %10, %12, %cst_11 {dimension_numbers = #tpu.dot_dimension_numbers<[1], [0], [0], [1], [0, 0, 1, 1], [], []>} : vector<256x256xf32>, vector<256x128xf32>, vector<256x128xf32> -> vector<256x128xf32>
    %14 = arith.addf %11, %13 : vector<256x128xf32>
    %c0_12 = arith.constant 0 : index
    %c0_13 = arith.constant 0 : index
    %15 = vector.load %arg9[%c0_12, %c0_13] : memref<256x128xf32, #tpu.memory_space<vmem>>, vector<256x128xf32>
    tpu.vector_store %arg9[%c0_12, %c0_13], %14 {strides = array<i32>} : memref<256x128xf32, #tpu.memory_space<vmem>>, vector<256x128xf32>,
    %c1_i32 = arith.constant 1 : i32
    %16 = arith.cmpi eq, %arg1, %c1_i32 : i32
    %17 = arith.extui %16 : i1 to i32
    %c0_i32_14 = arith.constant 0 : i32
    %18 = arith.cmpi ne, %17, %c0_i32_14 : i32
    scf.if %18 {
      %c0_15 = arith.constant 0 : index
      %c0_16 = arith.constant 0 : index
      %19 = vector.load %arg9[%c0_15, %c0_16] : memref<256x128xf32, #tpu.memory_space<vmem>>, vector<256x128xf32>
      %c0_17 = arith.constant 0 : index
      %c0_18 = arith.constant 0 : index
      %20 = vector.load %arg6[%c0_17, %c0_18] : memref<1x128xf32, #tpu.memory_space<vmem>>, vector<1x128xf32>
      %21 = vector.broadcast %20 : vector<1x128xf32> to vector<256x128xf32>
      %22 = arith.addf %19, %21 : vector<256x128xf32>
      %c0_19 = arith.constant 0 : index
      %c0_20 = arith.constant 0 : index
      %23 = vector.load %arg7[%c0_19, %c0_20] : memref<256x128xf32, #tpu.memory_space<vmem>>, vector<256x128xf32>
      %24 = arith.addf %22, %23 : vector<256x128xf32>
      %c0_21 = arith.constant 0 : index
      %c0_22 = arith.constant 0 : index
      %25 = vector.load %arg8[%c0_21, %c0_22] : memref<256x128xf32, #tpu.memory_space<vmem>>, vector<256x128xf32>
      tpu.vector_store %arg8[%c0_21, %c0_22], %24 {strides = array<i32>} : memref<256x128xf32, #tpu.memory_space<vmem>>, vector<256x128xf32>,
    } else {
    }
    return
  }
  func.func @transform_0(%arg0: i32, %arg1: i32) -> (i32, i32) {
    %c0_i32 = arith.constant 0 : i32
    %c0_i32_0 = arith.constant 0 : i32
    return %arg0, %c0_i32 : i32, i32
  }
  func.func @transform_1(%arg0: i32, %arg1: i32) -> (i32, i32) {
    %c0_i32 = arith.constant 0 : i32
    %c0_i32_0 = arith.constant 0 : i32
    return %c0_i32, %arg1 : i32, i32
  }
  func.func @transform_2(%arg0: i32, %arg1: i32) -> (i32, i32) {
    %c0_i32 = arith.constant 0 : i32
    %c0_i32_0 = arith.constant 0 : i32
    return %c0_i32, %arg1 : i32, i32
  }
  func.func @transform_3(%arg0: i32, %arg1: i32) -> (i32, i32) {
    %c0_i32 = arith.constant 0 : i32
    %c0_i32_0 = arith.constant 0 : i32
    return %arg1, %c0_i32 : i32, i32
  }
  func.func @transform_4(%arg0: i32, %arg1: i32) -> (i32, i32) {
    %c0_i32 = arith.constant 0 : i32
    %c0_i32_0 = arith.constant 0 : i32
    %c0_i32_1 = arith.constant 0 : i32
    return %c0_i32, %c0_i32_0 : i32, i32
  }
  func.func @transform_5(%arg0: i32, %arg1: i32) -> (i32, i32) {
    %c0_i32 = arith.constant 0 : i32
    %c0_i32_0 = arith.constant 0 : i32
    return %arg0, %c0_i32 : i32, i32
  }
  func.func @transform_6(%arg0: i32, %arg1: i32) -> (i32, i32) {
    %c0_i32 = arith.constant 0 : i32
    %c0_i32_0 = arith.constant 0 : i32
    return %arg0, %c0_i32 : i32, i32
  }
}

</mosaic_0001>

<bundles_post_ra>
// kernel: encoder_forward.12
= control target key start
LH: loop header
LB: loop body
LE: loop exit
PB: predicated region body
PF: predicated region fallthrough
CT: control target
= control target key end

     0   :  { %8 = vsyncpa [#allocation3], 0  ;;  %s621_s12 = smov [#allocation2]   ;;  %s1114_s0 = inlined_call_operand.hbm [shape: f32[256,128], index: 0, kind: input, shape index: {}]   ;;  %s1115_s1 = inlined_call_operand.vmem [shape: f32[1,128], index: 1, kind: input, shape index: {}]   ;;  %s1116_s2 = inlined_call_operand.vmem [shape: f32[1,128], index: 2, kind: input, shape index: {}]   ;;  %s1117_s3 = inlined_call_operand.vmem [shape: f32[256,128], index: 3, kind: output, shape index: {}]  }
   0x1   :  { %s14_s13 = sshll.u32 %s621_s12, 4  ;;  %s597_s16 = scalar_lea.hbm %s1114_s0, 4096  ;;  %s15_s13 = int_to_ptr.vmem [resolvable:$true] %s14_s13 }
   0x2   :  { %p598_p0 = scmp.ne.s32.totalorder %s1114_s0, %s597_s16  ;;  %p601_p1 = scmp.lt.u32.totalorder %s597_s16, %s1114_s0 }
   0x4   :  { %p603_p2 = pnand %p601_p1, %p598_p0 }
   0x6   :  { %606 = shalt.err (!%p603_p2)
}
   0x7   :  { %s607_s21 = scalar_lea.vmem %s15_s13, 4096  ;;  %p612_p4 = scmp.lt.s32.totalorder %s15_s13, %s15_s13 }
   0x8   :  { %p608_p3 = scmp.ne.s32.totalorder %s15_s13, %s607_s21  ;;  %p613_p5 = scmp.lt.s32.totalorder %s607_s21, %s607_s21 }
   0xa   :  { %p614_p6 = por %p613_p5, %p612_p4 }
   0xc   :  { %p615_p7 = pnand %p614_p6, %p608_p3 }
   0xe   :  { %618 = shalt.err (!%p615_p7)
}
   0xf   :  { %s622_s22 = smov 128   ;;  %s623_s23 = smov 8  }
  0x10   :  { %20 = dma.hbm_to_vmem [thread:$0]  %s1114_s0, 4096, %s15_s13, [#allocation3], %s622_s22, %s622_s22, %s623_s23  }
  0x11   :  { %619 = dma.done.wait [#allocation3], 4096  }
  0x12   :  { %620 = vsyncadd [#allocation3], 4294963200  ;;  %v656_v0 = vld [vmem:[#allocation2] sm:$0xff]  ;;  %v658_v1 = vld [vmem:[#allocation2 + $0x10] sm:$0xff] }
  0x13   :  { %60 = vadd.xlane.f32.xlu0 %v656_v0  ;;  %64 = vadd.xlane.f32.xlu1 %v658_v1  ;;  %v662_v2 = vld [vmem:[#allocation2 + $0x8] sm:$0xff]  ;;  %v664_v3 = vld [vmem:[#allocation2 + $0x18] sm:$0xff]  ;;  %v668_v4 = vld [vmem:[#allocation2 + $0x20] sm:$0xff] }
  0x14   :  { %v670_v5 = vld [vmem:[#allocation2 + $0x28] sm:$0xff]  ;;  %v674_v6 = vld [vmem:[#allocation2 + $0x30] sm:$0xff]  ;;  %v676_v7 = vld [vmem:[#allocation2 + $0x38] sm:$0xff] }
  0x15   :  { %v680_v8 = vld [vmem:[#allocation2 + $0x40] sm:$0xff]  ;;  %v682_v9 = vld [vmem:[#allocation2 + $0x48] sm:$0xff]  ;;  %v686_v10 = vld [vmem:[#allocation2 + $0x50] sm:$0xff] }
  0x16   :  { %v688_v11 = vld [vmem:[#allocation2 + $0x58] sm:$0xff]  ;;  %v692_v12 = vld [vmem:[#allocation2 + $0x60] sm:$0xff]  ;;  %v694_v13 = vld [vmem:[#allocation2 + $0x68] sm:$0xff] }
  0x17   :  { %62 = vadd.xlane.f32.xlu0 %v662_v2  ;;  %66 = vadd.xlane.f32.xlu1 %v664_v3  ;;  %v698_v14 = vld [vmem:[#allocation2 + $0x70] sm:$0xff]  ;;  %v700_v15 = vld [vmem:[#allocation2 + $0x78] sm:$0xff]  ;;  %v704_v16 = vld [vmem:[#allocation2 + $0x80] sm:$0xff] }
  0x18   :  { %v706_v17 = vld [vmem:[#allocation2 + $0x88] sm:$0xff]  ;;  %v710_v18 = vld [vmem:[#allocation2 + $0x90] sm:$0xff]  ;;  %v712_v19 = vld [vmem:[#allocation2 + $0x98] sm:$0xff] }
  0x19   :  { %v716_v20 = vld [vmem:[#allocation2 + $0xa0] sm:$0xff]  ;;  %v718_v21 = vld [vmem:[#allocation2 + $0xa8] sm:$0xff]  ;;  %v722_v22 = vld [vmem:[#allocation2 + $0xb0] sm:$0xff] }
  0x1a   :  { %v724_v23 = vld [vmem:[#allocation2 + $0xb8] sm:$0xff]  ;;  %v728_v24 = vld [vmem:[#allocation2 + $0xc0] sm:$0xff]  ;;  %v730_v25 = vld [vmem:[#allocation2 + $0xc8] sm:$0xff] }
  0x1b   :  { %68 = vadd.xlane.f32.xlu0 %v668_v4  ;;  %70 = vadd.xlane.f32.xlu1 %v670_v5  ;;  %v734_v26 = vld [vmem:[#allocation2 + $0xd0] sm:$0xff]  ;;  %v736_v27 = vld [vmem:[#allocation2 + $0xd8] sm:$0xff]  ;;  %v740_v28 = vld [vmem:[#allocation2 + $0xe0] sm:$0xff] }
  0x1c   :  { %v742_v29 = vld [vmem:[#allocation2 + $0xe8] sm:$0xff]  ;;  %v746_v30 = vld [vmem:[#allocation2 + $0xf0] sm:$0xff]  ;;  %v748_v31 = vld [vmem:[#allocation2 + $0xf8] sm:$0xff] }
  0x1f   :  { %72 = vadd.xlane.f32.xlu0 %v674_v6  ;;  %74 = vadd.xlane.f32.xlu1 %v676_v7 }
  0x23   :  { %76 = vadd.xlane.f32.xlu0 %v680_v8  ;;  %78 = vadd.xlane.f32.xlu1 %v682_v9 }
  0x27   :  { %80 = vadd.xlane.f32.xlu0 %v686_v10  ;;  %82 = vadd.xlane.f32.xlu1 %v688_v11 }
  0x2b   :  { %84 = vadd.xlane.f32.xlu0 %v692_v12  ;;  %86 = vadd.xlane.f32.xlu1 %v694_v13 }
  0x2f   :  { %88 = vadd.xlane.f32.xlu0 %v698_v14  ;;  %90 = vadd.xlane.f32.xlu1 %v700_v15 }
  0x33   :  { %92 = vadd.xlane.f32.xlu0 %v704_v16  ;;  %94 = vadd.xlane.f32.xlu1 %v706_v17 }
  0x37   :  { %96 = vadd.xlane.f32.xlu0 %v710_v18  ;;  %98 = vadd.xlane.f32.xlu1 %v712_v19 }
  0x3b   :  { %100 = vadd.xlane.f32.xlu0 %v716_v20  ;;  %102 = vadd.xlane.f32.xlu1 %v718_v21 }
  0x3f   :  { %104 = vadd.xlane.f32.xlu0 %v722_v22  ;;  %106 = vadd.xlane.f32.xlu1 %v724_v23 }
  0x43   :  { %108 = vadd.xlane.f32.xlu0 %v728_v24  ;;  %110 = vadd.xlane.f32.xlu1 %v730_v25 }
  0x47   :  { %112 = vadd.xlane.f32.xlu0 %v734_v26  ;;  %114 = vadd.xlane.f32.xlu1 %v736_v27 }
  0x4b   :  { %116 = vadd.xlane.f32.xlu0 %v740_v28  ;;  %118 = vadd.xlane.f32.xlu1 %v742_v29 }
  0x4f   :  { %120 = vadd.xlane.f32.xlu0 %v746_v30  ;;  %122 = vadd.xlane.f32.xlu1 %v748_v31 }
  0xa0   :  { %v61_v32 = vpop.xlane.xlu0 %60  ;;  %v65_v33 = vpop.xlane.xlu1 %64 }
  0xa1   :  { %v125_v34 = vmul.f32 0.0078125, %v61_v32  ;;  %v127_v35 = vmul.f32 0.0078125, %v65_v33 }
  0xa3   :  { %v753_v36 = vsub.f32 %v656_v0, %v125_v34  ;;  %v756_v37 = vsub.f32 %v658_v1, %v127_v35 }
  0xa4   :  { %v63_v38 = vpop.xlane.xlu0 %62  ;;  %v67_v39 = vpop.xlane.xlu1 %66 }
  0xa5   :  { %v126_v40 = vmul.f32 0.0078125, %v63_v38  ;;  %v189_v41 = vmul.f32 %v753_v36, %v753_v36  ;;  %v128_v42 = vmul.f32 0.0078125, %v67_v39  ;;  %v191_v45 = vmul.f32 %v756_v37, %v756_v37 }
  0xa7   :  { %v761_v43 = vsub.f32 %v662_v2, %v126_v40  ;;  %221 = vadd.xlane.f32.xlu0 %v189_v41  ;;  %v764_v44 = vsub.f32 %v664_v3, %v128_v42 }
  0xa8   :  { %v69_v46 = vpop.xlane.xlu0 %68  ;;  %v71_v47 = vpop.xlane.xlu1 %70 }
  0xa9   :  { %v129_v48 = vmul.f32 0.0078125, %v69_v46  ;;  %v190_v49 = vmul.f32 %v761_v43, %v761_v43  ;;  %v130_v50 = vmul.f32 0.0078125, %v71_v47  ;;  %v192_v53 = vmul.f32 %v764_v44, %v764_v44 }
  0xab   :  { %v771_v51 = vsub.f32 %v668_v4, %v129_v48  ;;  %225 = vadd.xlane.f32.xlu0 %v191_v45  ;;  %223 = vadd.xlane.f32.xlu1 %v190_v49  ;;  %v774_v52 = vsub.f32 %v670_v5, %v130_v50 }
  0xac   :  { %v73_v54 = vpop.xlane.xlu0 %72  ;;  %v75_v55 = vpop.xlane.xlu1 %74 }
  0xad   :  { %v131_v56 = vmul.f32 0.0078125, %v73_v54  ;;  %v193_v57 = vmul.f32 %v771_v51, %v771_v51  ;;  %v132_v58 = vmul.f32 0.0078125, %v75_v55  ;;  %v194_v61 = vmul.f32 %v774_v52, %v774_v52 }
  0xaf   :  { %v781_v59 = vsub.f32 %v674_v6, %v131_v56  ;;  %227 = vadd.xlane.f32.xlu1 %v192_v53  ;;  %229 = vadd.xlane.f32.xlu0 %v193_v57  ;;  %v784_v60 = vsub.f32 %v676_v7, %v132_v58 }
  0xb0   :  { %v77_v62 = vpop.xlane.xlu0 %76  ;;  %v79_v63 = vpop.xlane.xlu1 %78 }
  0xb1   :  { %v133_v0 = vmul.f32 0.0078125, %v77_v62  ;;  %v195_v1 = vmul.f32 %v781_v59, %v781_v59  ;;  %v134_v2 = vmul.f32 0.0078125, %v79_v63  ;;  %v196_v5 = vmul.f32 %v784_v60, %v784_v60 }
  0xb3   :  { %v791_v3 = vsub.f32 %v680_v8, %v133_v0  ;;  %231 = vadd.xlane.f32.xlu1 %v194_v61  ;;  %233 = vadd.xlane.f32.xlu0 %v195_v1  ;;  %v794_v4 = vsub.f32 %v682_v9, %v134_v2 }
  0xb4   :  { %v81_v6 = vpop.xlane.xlu0 %80  ;;  %v83_v7 = vpop.xlane.xlu1 %82 }
  0xb5   :  { %v135_v32 = vmul.f32 0.0078125, %v81_v6  ;;  %v197_v33 = vmul.f32 %v791_v3, %v791_v3  ;;  %v136_v34 = vmul.f32 0.0078125, %v83_v7  ;;  %v198_v9 = vmul.f32 %v794_v4, %v794_v4 }
  0xb7   :  { %v801_v35 = vsub.f32 %v686_v10, %v135_v32  ;;  %235 = vadd.xlane.f32.xlu1 %v196_v5  ;;  %237 = vadd.xlane.f32.xlu0 %v197_v33  ;;  %v804_v8 = vsub.f32 %v688_v11, %v136_v34 }
  0xb8   :  { %v85_v38 = vpop.xlane.xlu0 %84  ;;  %v87_v39 = vpop.xlane.xlu1 %86 }
  0xb9   :  { %v137_v40 = vmul.f32 0.0078125, %v85_v38  ;;  %v199_v41 = vmul.f32 %v801_v35, %v801_v35  ;;  %v138_v42 = vmul.f32 0.0078125, %v87_v39  ;;  %v200_v11 = vmul.f32 %v804_v8, %v804_v8 }
  0xbb   :  { %v811_v45 = vsub.f32 %v692_v12, %v137_v40  ;;  %239 = vadd.xlane.f32.xlu1 %v198_v9  ;;  %241 = vadd.xlane.f32.xlu0 %v199_v41  ;;  %v814_v10 = vsub.f32 %v694_v13, %v138_v42 }
  0xbc   :  { %v89_v46 = vpop.xlane.xlu0 %88  ;;  %v91_v47 = vpop.xlane.xlu1 %90 }
  0xbd   :  { %v139_v48 = vmul.f32 0.0078125, %v89_v46  ;;  %v201_v49 = vmul.f32 %v811_v45, %v811_v45  ;;  %v140_v50 = vmul.f32 0.0078125, %v91_v47  ;;  %v202_v13 = vmul.f32 %v814_v10, %v814_v10 }
  0xbf   :  { %v821_v53 = vsub.f32 %v698_v14, %v139_v48  ;;  %243 = vadd.xlane.f32.xlu1 %v200_v11  ;;  %245 = vadd.xlane.f32.xlu0 %v201_v49  ;;  %v824_v12 = vsub.f32 %v700_v15, %v140_v50 }
  0xc0   :  { %v93_v54 = vpop.xlane.xlu0 %92  ;;  %v95_v55 = vpop.xlane.xlu1 %94 }
  0xc1   :  { %v141_v56 = vmul.f32 0.0078125, %v93_v54  ;;  %v203_v57 = vmul.f32 %v821_v53, %v821_v53  ;;  %v142_v58 = vmul.f32 0.0078125, %v95_v55  ;;  %v204_v15 = vmul.f32 %v824_v12, %v824_v12 }
  0xc3   :  { %v831_v61 = vsub.f32 %v704_v16, %v141_v56  ;;  %247 = vadd.xlane.f32.xlu1 %v202_v13  ;;  %249 = vadd.xlane.f32.xlu0 %v203_v57  ;;  %v834_v14 = vsub.f32 %v706_v17, %v142_v58 }
  0xc4   :  { %v97_v62 = vpop.xlane.xlu0 %96  ;;  %v99_v63 = vpop.xlane.xlu1 %98 }
  0xc5   :  { %v143_v0 = vmul.f32 0.0078125, %v97_v62  ;;  %v205_v1 = vmul.f32 %v831_v61, %v831_v61  ;;  %v144_v2 = vmul.f32 0.0078125, %v99_v63  ;;  %v206_v17 = vmul.f32 %v834_v14, %v834_v14 }
  0xc7   :  { %v841_v5 = vsub.f32 %v710_v18, %v143_v0  ;;  %251 = vadd.xlane.f32.xlu1 %v204_v15  ;;  %253 = vadd.xlane.f32.xlu0 %v205_v1  ;;  %v844_v16 = vsub.f32 %v712_v19, %v144_v2 }
  0xc8   :  { %v101_v6 = vpop.xlane.xlu0 %100  ;;  %v103_v7 = vpop.xlane.xlu1 %102 }
  0xc9   :  { %v145_v32 = vmul.f32 0.0078125, %v101_v6  ;;  %v207_v33 = vmul.f32 %v841_v5, %v841_v5  ;;  %v146_v34 = vmul.f32 0.0078125, %v103_v7  ;;  %v208_v19 = vmul.f32 %v844_v16, %v844_v16 }
  0xcb   :  { %v851_v9 = vsub.f32 %v716_v20, %v145_v32  ;;  %255 = vadd.xlane.f32.xlu1 %v206_v17  ;;  %257 = vadd.xlane.f32.xlu0 %v207_v33  ;;  %v854_v18 = vsub.f32 %v718_v21, %v146_v34 }
  0xcc   :  { %v105_v38 = vpop.xlane.xlu0 %104  ;;  %v107_v39 = vpop.xlane.xlu1 %106 }
  0xcd   :  { %v147_v40 = vmul.f32 0.0078125, %v105_v38  ;;  %v209_v41 = vmul.f32 %v851_v9, %v851_v9  ;;  %v148_v42 = vmul.f32 0.0078125, %v107_v39  ;;  %v210_v21 = vmul.f32 %v854_v18, %v854_v18 }
  0xcf   :  { %v861_v11 = vsub.f32 %v722_v22, %v147_v40  ;;  %259 = vadd.xlane.f32.xlu1 %v208_v19  ;;  %261 = vadd.xlane.f32.xlu0 %v209_v41  ;;  %v864_v20 = vsub.f32 %v724_v23, %v148_v42 }
  0xd0   :  { %v109_v46 = vpop.xlane.xlu0 %108  ;;  %v111_v47 = vpop.xlane.xlu1 %110 }
  0xd1   :  { %v149_v48 = vmul.f32 0.0078125, %v109_v46  ;;  %v211_v49 = vmul.f32 %v861_v11, %v861_v11  ;;  %v150_v50 = vmul.f32 0.0078125, %v111_v47  ;;  %v212_v23 = vmul.f32 %v864_v20, %v864_v20 }
  0xd3   :  { %v871_v13 = vsub.f32 %v728_v24, %v149_v48  ;;  %263 = vadd.xlane.f32.xlu1 %v210_v21  ;;  %265 = vadd.xlane.f32.xlu0 %v211_v49  ;;  %v874_v22 = vsub.f32 %v730_v25, %v150_v50 }
  0xd4   :  { %v113_v54 = vpop.xlane.xlu0 %112  ;;  %v115_v55 = vpop.xlane.xlu1 %114 }
  0xd5   :  { %v151_v56 = vmul.f32 0.0078125, %v113_v54  ;;  %v213_v57 = vmul.f32 %v871_v13, %v871_v13  ;;  %v152_v58 = vmul.f32 0.0078125, %v115_v55  ;;  %v214_v25 = vmul.f32 %v874_v22, %v874_v22 }
  0xd7   :  { %v881_v15 = vsub.f32 %v734_v26, %v151_v56  ;;  %267 = vadd.xlane.f32.xlu1 %v212_v23  ;;  %269 = vadd.xlane.f32.xlu0 %v213_v57  ;;  %v884_v24 = vsub.f32 %v736_v27, %v152_v58 }
  0xd8   :  { %v117_v62 = vpop.xlane.xlu0 %116  ;;  %v119_v63 = vpop.xlane.xlu1 %118 }
  0xd9   :  { %v153_v0 = vmul.f32 0.0078125, %v117_v62  ;;  %v215_v1 = vmul.f32 %v881_v15, %v881_v15  ;;  %v154_v2 = vmul.f32 0.0078125, %v119_v63  ;;  %v216_v27 = vmul.f32 %v884_v24, %v884_v24 }
  0xdb   :  { %v891_v17 = vsub.f32 %v740_v28, %v153_v0  ;;  %271 = vadd.xlane.f32.xlu1 %v214_v25  ;;  %273 = vadd.xlane.f32.xlu0 %v215_v1  ;;  %v894_v26 = vsub.f32 %v742_v29, %v154_v2  ;;  %v915_v0 = vld [vmem:[%s1115_s1] ss:$0 sm:$0xff] }
  0xdc   :  { %v121_v6 = vpop.xlane.xlu0 %120  ;;  %v123_v7 = vpop.xlane.xlu1 %122 }
  0xdd   :  { %v155_v32 = vmul.f32 0.0078125, %v121_v6  ;;  %v217_v33 = vmul.f32 %v891_v17, %v891_v17  ;;  %v156_v34 = vmul.f32 0.0078125, %v123_v7  ;;  %v218_v29 = vmul.f32 %v894_v26, %v894_v26 }
  0xdf   :  { %v901_v19 = vsub.f32 %v746_v30, %v155_v32  ;;  %275 = vadd.xlane.f32.xlu1 %v216_v27  ;;  %277 = vadd.xlane.f32.xlu0 %v217_v33  ;;  %v904_v28 = vsub.f32 %v748_v31, %v156_v34  ;;  %v921_v32 = vld [vmem:[%s1116_s2] ss:$0 sm:$0xff] }
  0xe1   :  { %v219_v38 = vmul.f32 %v901_v19, %v901_v19  ;;  %v220_v39 = vmul.f32 %v904_v28, %v904_v28 }
  0xe3   :  { %279 = vadd.xlane.f32.xlu1 %v218_v29  ;;  %281 = vadd.xlane.f32.xlu0 %v219_v38 }
  0xe7   :  { %283 = vadd.xlane.f32.xlu1 %v220_v39 }
 0x134   :  { %v222_v40 = vpop.xlane.xlu0 %221 }
 0x135   :  { %v285_v30 = vmul.f32 0.0078125, %v222_v40 }
 0x137   :  { %v317_v41 = vadd.f32 1e-05, %v285_v30 }
 0x138   :  { %v224_v42 = vpop.xlane.xlu1 %223  ;;  %v226_v21 = vpop.xlane.xlu0 %225 }
 0x139   :  { %533 = vrsqrt.f32 %v317_v41  ;;  %v286_v31 = vmul.f32 0.0078125, %v224_v42  ;;  %v287_v46 = vmul.f32 0.0078125, %v226_v21 }
 0x13b   :  { %v318_v47 = vadd.f32 1e-05, %v286_v31  ;;  %v319_v48 = vadd.f32 1e-05, %v287_v46 }
 0x13c   :  { %v228_v49 = vpop.xlane.xlu1 %227  ;;  %v230_v50 = vpop.xlane.xlu0 %229 }
 0x13d   :  { %535 = vrsqrt.f32 %v318_v47  ;;  %v288_v23 = vmul.f32 0.0078125, %v228_v49  ;;  %v289_v54 = vmul.f32 0.0078125, %v230_v50 }
 0x13e   :  { %537 = vrsqrt.f32 %v319_v48 }
 0x13f   :  { %v320_v55 = vadd.f32 1e-05, %v288_v23  ;;  %v321_v56 = vadd.f32 1e-05, %v289_v54 }
 0x140   :  { %v232_v57 = vpop.xlane.xlu1 %231  ;;  %v234_v58 = vpop.xlane.xlu0 %233 }
 0x141   :  { %539 = vrsqrt.f32 %v320_v55  ;;  %v290_v25 = vmul.f32 0.0078125, %v232_v57  ;;  %v291_v62 = vmul.f32 0.0078125, %v234_v58 }
 0x142   :  { %541 = vrsqrt.f32 %v321_v56 }
 0x143   :  { %v534_v63 = vpop.eup %533  ;;  %v322_v1 = vadd.f32 1e-05, %v290_v25  ;;  %v323_v2 = vadd.f32 1e-05, %v291_v62 }
 0x144   :  { %v381_v27 = vmul.f32 %v534_v63, %v753_v36  ;;  %v236_v6 = vpop.xlane.xlu1 %235  ;;  %v238_v7 = vpop.xlane.xlu0 %237 }
 0x145   :  { %543 = vrsqrt.f32 %v322_v1  ;;  %v292_v33 = vmul.f32 0.0078125, %v236_v6  ;;  %v293_v34 = vmul.f32 0.0078125, %v238_v7 }
 0x146   :  { %v420_v29 = vmul.f32 %v915_v0, %v381_v27  ;;  %545 = vrsqrt.f32 %v323_v2 }
 0x147   :  { %v536_v38 = vpop.eup %535  ;;  %v324_v39 = vadd.f32 1e-05, %v292_v33  ;;  %v325_v40 = vadd.f32 1e-05, %v293_v34 }
 0x148   :  { %v538_v30 = vpop.eup %537  ;;  %v459_v41 = vadd.f32 %v921_v32, %v420_v29  ;;  %v382_v36 = vmul.f32 %v536_v38, %v761_v43  ;;  %v240_v42 = vpop.xlane.xlu1 %239 }
 0x149   :  { %v242_v21 = vpop.xlane.xlu0 %241  ;;  %v383_v31 = vmul.f32 %v538_v30, %v756_v37  ;;  %547 = vrsqrt.f32 %v324_v39  ;;  %v294_v46 = vmul.f32 0.0078125, %v240_v42 }
 0x14a   :  { %v295_v47 = vmul.f32 0.0078125, %v242_v21  ;;  %491 = vst [vmem:[%s1117_s3] sm:$0xff] %v459_v41  ;;  %v421_v48 = vmul.f32 %v915_v0, %v382_v36  ;;  %549 = vrsqrt.f32 %v325_v40 }
 0x14b   :  { %v540_v49 = vpop.eup %539  ;;  %v422_v50 = vmul.f32 %v915_v0, %v383_v31  ;;  %v326_v23 = vadd.f32 1e-05, %v294_v46 }
 0x14c   :  { %v327_v54 = vadd.f32 1e-05, %v295_v47  ;;  %v542_v43 = vpop.eup %541  ;;  %v460_v55 = vadd.f32 %v921_v32, %v421_v48  ;;  %v384_v37 = vmul.f32 %v540_v49, %v764_v44  ;;  %v244_v56 = vpop.xlane.xlu1 %243 }
 0x14d   :  { %v246_v57 = vpop.xlane.xlu0 %245  ;;  %v461_v58 = vadd.f32 %v921_v32, %v422_v50  ;;  %v385_v25 = vmul.f32 %v542_v43, %v771_v51  ;;  %551 = vrsqrt.f32 %v326_v23  ;;  %v296_v62 = vmul.f32 0.0078125, %v244_v56 }
 0x14e   :  { %492 = vst [vmem:[%s1117_s3 + $0x8] sm:$0xff] %v460_v55  ;;  %v423_v63 = vmul.f32 %v915_v0, %v384_v37  ;;  %553 = vrsqrt.f32 %v327_v54  ;;  %v297_v1 = vmul.f32 0.0078125, %v246_v57 }
 0x14f   :  { %v544_v2 = vpop.eup %543  ;;  %493 = vst [vmem:[%s1117_s3 + $0x10] sm:$0xff] %v461_v58  ;;  %v424_v44 = vmul.f32 %v915_v0, %v385_v25  ;;  %v328_v27 = vadd.f32 1e-05, %v296_v62 }
 0x150   :  { %v546_v6 = vpop.eup %545  ;;  %v462_v51 = vadd.f32 %v921_v32, %v423_v63  ;;  %v386_v7 = vmul.f32 %v544_v2, %v774_v52  ;;  %v329_v33 = vadd.f32 1e-05, %v297_v1  ;;  %v248_v34 = vpop.xlane.xlu1 %247 }
 0x151   :  { %v250_v29 = vpop.xlane.xlu0 %249  ;;  %v463_v38 = vadd.f32 %v921_v32, %v424_v44  ;;  %v387_v39 = vmul.f32 %v546_v6, %v781_v59  ;;  %555 = vrsqrt.f32 %v328_v27  ;;  %v298_v40 = vmul.f32 0.0078125, %v248_v34 }
 0x152   :  { %494 = vst [vmem:[%s1117_s3 + $0x18] sm:$0xff] %v462_v51  ;;  %v425_v30 = vmul.f32 %v915_v0, %v386_v7  ;;  %557 = vrsqrt.f32 %v329_v33  ;;  %v299_v41 = vmul.f32 0.0078125, %v250_v29 }
 0x153   :  { %v548_v36 = vpop.eup %547  ;;  %495 = vst [vmem:[%s1117_s3 + $0x20] sm:$0xff] %v463_v38  ;;  %v426_v52 = vmul.f32 %v915_v0, %v387_v39  ;;  %v330_v42 = vadd.f32 1e-05, %v298_v40 }
 0x154   :  { %v550_v21 = vpop.eup %549  ;;  %v464_v59 = vadd.f32 %v921_v32, %v425_v30  ;;  %v388_v31 = vmul.f32 %v548_v36, %v784_v60  ;;  %v331_v46 = vadd.f32 1e-05, %v299_v41  ;;  %v252_v47 = vpop.xlane.xlu1 %251 }
 0x155   :  { %v254_v48 = vpop.xlane.xlu0 %253  ;;  %v465_v49 = vadd.f32 %v921_v32, %v426_v52  ;;  %v389_v50 = vmul.f32 %v550_v21, %v791_v3  ;;  %559 = vrsqrt.f32 %v330_v42  ;;  %v300_v23 = vmul.f32 0.0078125, %v252_v47 }
 0x156   :  { %496 = vst [vmem:[%s1117_s3 + $0x28] sm:$0xff] %v464_v59  ;;  %v427_v54 = vmul.f32 %v915_v0, %v388_v31  ;;  %561 = vrsqrt.f32 %v331_v46  ;;  %v301_v43 = vmul.f32 0.0078125, %v254_v48 }
 0x157   :  { %v552_v55 = vpop.eup %551  ;;  %497 = vst [vmem:[%s1117_s3 + $0x30] sm:$0xff] %v465_v49  ;;  %v428_v60 = vmul.f32 %v915_v0, %v389_v50  ;;  %v332_v37 = vadd.f32 1e-05, %v300_v23 }
 0x158   :  { %v554_v56 = vpop.eup %553  ;;  %v466_v3 = vadd.f32 %v921_v32, %v427_v54  ;;  %v390_v57 = vmul.f32 %v552_v55, %v794_v4  ;;  %v333_v58 = vadd.f32 1e-05, %v301_v43  ;;  %v256_v25 = vpop.xlane.xlu1 %255 }
 0x159   :  { %v258_v62 = vpop.xlane.xlu0 %257  ;;  %v467_v63 = vadd.f32 %v921_v32, %v428_v60  ;;  %v391_v1 = vmul.f32 %v554_v56, %v801_v35  ;;  %563 = vrsqrt.f32 %v332_v37  ;;  %v302_v2 = vmul.f32 0.0078125, %v256_v25 }
 0x15a   :  { %498 = vst [vmem:[%s1117_s3 + $0x38] sm:$0xff] %v466_v3  ;;  %v429_v44 = vmul.f32 %v915_v0, %v390_v57  ;;  %565 = vrsqrt.f32 %v333_v58  ;;  %v303_v27 = vmul.f32 0.0078125, %v258_v62 }
 0x15b   :  { %v556_v6 = vpop.eup %555  ;;  %499 = vst [vmem:[%s1117_s3 + $0x40] sm:$0xff] %v467_v63  ;;  %v430_v4 = vmul.f32 %v915_v0, %v391_v1  ;;  %v334_v51 = vadd.f32 1e-05, %v302_v2 }
 0x15c   :  { %v558_v7 = vpop.eup %557  ;;  %v468_v35 = vadd.f32 %v921_v32, %v429_v44  ;;  %v392_v33 = vmul.f32 %v556_v6, %v804_v8  ;;  %v335_v34 = vadd.f32 1e-05, %v303_v27  ;;  %v260_v29 = vpop.xlane.xlu1 %259 }
 0x15d   :  { %v262_v38 = vpop.xlane.xlu0 %261  ;;  %v469_v39 = vadd.f32 %v921_v32, %v430_v4  ;;  %v393_v40 = vmul.f32 %v558_v7, %v811_v45  ;;  %567 = vrsqrt.f32 %v334_v51  ;;  %v304_v30 = vmul.f32 0.0078125, %v260_v29 }
 0x15e   :  { %500 = vst [vmem:[%s1117_s3 + $0x48] sm:$0xff] %v468_v35  ;;  %v431_v41 = vmul.f32 %v915_v0, %v392_v33  ;;  %569 = vrsqrt.f32 %v335_v34  ;;  %v305_v36 = vmul.f32 0.0078125, %v262_v38 }
 0x15f   :  { %v560_v52 = vpop.eup %559  ;;  %501 = vst [vmem:[%s1117_s3 + $0x50] sm:$0xff] %v469_v39  ;;  %v432_v8 = vmul.f32 %v915_v0, %v393_v40  ;;  %v336_v42 = vadd.f32 1e-05, %v304_v30 }
 0x160   :  { %v562_v21 = vpop.eup %561  ;;  %v470_v45 = vadd.f32 %v921_v32, %v431_v41  ;;  %v394_v59 = vmul.f32 %v560_v52, %v814_v10  ;;  %v337_v31 = vadd.f32 1e-05, %v305_v36  ;;  %v264_v46 = vpop.xlane.xlu1 %263 }
 0x161   :  { %v266_v47 = vpop.xlane.xlu0 %265  ;;  %v471_v48 = vadd.f32 %v921_v32, %v432_v8  ;;  %v395_v49 = vmul.f32 %v562_v21, %v821_v53  ;;  %571 = vrsqrt.f32 %v336_v42  ;;  %v306_v50 = vmul.f32 0.0078125, %v264_v46 }
 0x162   :  { %502 = vst [vmem:[%s1117_s3 + $0x58] sm:$0xff] %v470_v45  ;;  %v433_v23 = vmul.f32 %v915_v0, %v394_v59  ;;  %573 = vrsqrt.f32 %v337_v31  ;;  %v307_v54 = vmul.f32 0.0078125, %v266_v47 }
 0x163   :  { %v564_v43 = vpop.eup %563  ;;  %503 = vst [vmem:[%s1117_s3 + $0x60] sm:$0xff] %v471_v48  ;;  %v434_v10 = vmul.f32 %v915_v0, %v395_v49  ;;  %v338_v55 = vadd.f32 1e-05, %v306_v50 }
 0x164   :  { %v566_v60 = vpop.eup %565  ;;  %v472_v53 = vadd.f32 %v921_v32, %v433_v23  ;;  %v396_v37 = vmul.f32 %v564_v43, %v824_v12  ;;  %v339_v56 = vadd.f32 1e-05, %v307_v54  ;;  %v268_v3 = vpop.xlane.xlu1 %267 }
 0x165   :  { %v270_v57 = vpop.xlane.xlu0 %269  ;;  %v473_v58 = vadd.f32 %v921_v32, %v434_v10  ;;  %v397_v25 = vmul.f32 %v566_v60, %v831_v61  ;;  %575 = vrsqrt.f32 %v338_v55  ;;  %v308_v62 = vmul.f32 0.0078125, %v268_v3 }
 0x166   :  { %504 = vst [vmem:[%s1117_s3 + $0x68] sm:$0xff] %v472_v53  ;;  %v435_v63 = vmul.f32 %v915_v0, %v396_v37  ;;  %577 = vrsqrt.f32 %v339_v56  ;;  %v309_v1 = vmul.f32 0.0078125, %v270_v57 }
 0x167   :  { %v568_v2 = vpop.eup %567  ;;  %505 = vst [vmem:[%s1117_s3 + $0x70] sm:$0xff] %v473_v58  ;;  %v436_v12 = vmul.f32 %v915_v0, %v397_v25  ;;  %v340_v44 = vadd.f32 1e-05, %v308_v62 }
 0x168   :  { %v570_v27 = vpop.eup %569  ;;  %v474_v61 = vadd.f32 %v921_v32, %v435_v63  ;;  %v398_v6 = vmul.f32 %v568_v2, %v834_v14  ;;  %v341_v4 = vadd.f32 1e-05, %v309_v1  ;;  %v272_v51 = vpop.xlane.xlu1 %271 }
 0x169   :  { %v274_v7 = vpop.xlane.xlu0 %273  ;;  %v475_v35 = vadd.f32 %v921_v32, %v436_v12  ;;  %v399_v33 = vmul.f32 %v570_v27, %v841_v5  ;;  %579 = vrsqrt.f32 %v340_v44  ;;  %v310_v34 = vmul.f32 0.0078125, %v272_v51 }
 0x16a   :  { %506 = vst [vmem:[%s1117_s3 + $0x78] sm:$0xff] %v474_v61  ;;  %v437_v29 = vmul.f32 %v915_v0, %v398_v6  ;;  %581 = vrsqrt.f32 %v341_v4  ;;  %v311_v38 = vmul.f32 0.0078125, %v274_v7 }
 0x16b   :  { %v572_v39 = vpop.eup %571  ;;  %507 = vst [vmem:[%s1117_s3 + $0x80] sm:$0xff] %v475_v35  ;;  %v438_v14 = vmul.f32 %v915_v0, %v399_v33  ;;  %v342_v40 = vadd.f32 1e-05, %v310_v34 }
 0x16c   :  { %v574_v30 = vpop.eup %573  ;;  %v476_v5 = vadd.f32 %v921_v32, %v437_v29  ;;  %v400_v41 = vmul.f32 %v572_v39, %v844_v16  ;;  %v343_v36 = vadd.f32 1e-05, %v311_v38  ;;  %v276_v52 = vpop.xlane.xlu1 %275 }
 0x16d   :  { %v278_v8 = vpop.xlane.xlu0 %277  ;;  %v477_v42 = vadd.f32 %v921_v32, %v438_v14  ;;  %v401_v21 = vmul.f32 %v574_v30, %v851_v9  ;;  %583 = vrsqrt.f32 %v342_v40  ;;  %v312_v45 = vmul.f32 0.0078125, %v276_v52 }
 0x16e   :  { %508 = vst [vmem:[%s1117_s3 + $0x88] sm:$0xff] %v476_v5  ;;  %v439_v59 = vmul.f32 %v915_v0, %v400_v41  ;;  %585 = vrsqrt.f32 %v343_v36  ;;  %v313_v31 = vmul.f32 0.0078125, %v278_v8 }
 0x16f   :  { %v576_v46 = vpop.eup %575  ;;  %509 = vst [vmem:[%s1117_s3 + $0x90] sm:$0xff] %v477_v42  ;;  %v440_v16 = vmul.f32 %v915_v0, %v401_v21  ;;  %v344_v47 = vadd.f32 1e-05, %v312_v45 }
 0x170   :  { %v578_v48 = vpop.eup %577  ;;  %v478_v9 = vadd.f32 %v921_v32, %v439_v59  ;;  %v402_v49 = vmul.f32 %v576_v46, %v854_v18  ;;  %v345_v50 = vadd.f32 1e-05, %v313_v31  ;;  %v280_v23 = vpop.xlane.xlu1 %279 }
 0x171   :  { %v282_v54 = vpop.xlane.xlu0 %281  ;;  %v479_v43 = vadd.f32 %v921_v32, %v440_v16  ;;  %v403_v10 = vmul.f32 %v578_v48, %v861_v11  ;;  %587 = vrsqrt.f32 %v344_v47  ;;  %v314_v55 = vmul.f32 0.0078125, %v280_v23 }
 0x172   :  { %510 = vst [vmem:[%s1117_s3 + $0x98] sm:$0xff] %v478_v9  ;;  %v441_v60 = vmul.f32 %v915_v0, %v402_v49  ;;  %589 = vrsqrt.f32 %v345_v50  ;;  %v315_v53 = vmul.f32 0.0078125, %v282_v54 }
 0x173   :  { %v580_v37 = vpop.eup %579  ;;  %511 = vst [vmem:[%s1117_s3 + $0xa0] sm:$0xff] %v479_v43  ;;  %v442_v18 = vmul.f32 %v915_v0, %v403_v10  ;;  %v346_v56 = vadd.f32 1e-05, %v314_v55 }
 0x174   :  { %v582_v3 = vpop.eup %581  ;;  %v480_v11 = vadd.f32 %v921_v32, %v441_v60  ;;  %v404_v57 = vmul.f32 %v580_v37, %v864_v20  ;;  %v347_v58 = vadd.f32 1e-05, %v315_v53  ;;  %v284_v25 = vpop.xlane.xlu1 %283 }
 0x175   :  { %v481_v62 = vadd.f32 %v921_v32, %v442_v18  ;;  %v405_v63 = vmul.f32 %v582_v3, %v871_v13  ;;  %591 = vrsqrt.f32 %v346_v56  ;;  %v316_v1 = vmul.f32 0.0078125, %v284_v25 }
 0x176   :  { %512 = vst [vmem:[%s1117_s3 + $0xa8] sm:$0xff] %v480_v11  ;;  %v443_v2 = vmul.f32 %v915_v0, %v404_v57  ;;  %593 = vrsqrt.f32 %v347_v58 }
 0x177   :  { %v584_v12 = vpop.eup %583  ;;  %513 = vst [vmem:[%s1117_s3 + $0xb0] sm:$0xff] %v481_v62  ;;  %v444_v20 = vmul.f32 %v915_v0, %v405_v63  ;;  %v348_v44 = vadd.f32 1e-05, %v316_v1 }
 0x178   :  { %v586_v27 = vpop.eup %585  ;;  %v482_v13 = vadd.f32 %v921_v32, %v443_v2  ;;  %v406_v61 = vmul.f32 %v584_v12, %v874_v22 }
 0x179   :  { %v483_v6 = vadd.f32 %v921_v32, %v444_v20  ;;  %v407_v4 = vmul.f32 %v586_v27, %v881_v15  ;;  %595 = vrsqrt.f32 %v348_v44 }
 0x17a   :  { %514 = vst [vmem:[%s1117_s3 + $0xb8] sm:$0xff] %v482_v13  ;;  %v445_v51 = vmul.f32 %v915_v0, %v406_v61 }
 0x17b   :  { %v588_v7 = vpop.eup %587  ;;  %515 = vst [vmem:[%s1117_s3 + $0xc0] sm:$0xff] %v483_v6  ;;  %v446_v35 = vmul.f32 %v915_v0, %v407_v4 }
 0x17c   :  { %v590_v33 = vpop.eup %589  ;;  %v484_v22 = vadd.f32 %v921_v32, %v445_v51  ;;  %v408_v34 = vmul.f32 %v588_v7, %v884_v24 }
 0x17d   :  { %v485_v15 = vadd.f32 %v921_v32, %v446_v35  ;;  %v409_v29 = vmul.f32 %v590_v33, %v891_v17 }
 0x17e   :  { %516 = vst [vmem:[%s1117_s3 + $0xc8] sm:$0xff] %v484_v22  ;;  %v447_v38 = vmul.f32 %v915_v0, %v408_v34 }
 0x17f   :  { %v592_v39 = vpop.eup %591  ;;  %517 = vst [vmem:[%s1117_s3 + $0xd0] sm:$0xff] %v485_v15  ;;  %v448_v14 = vmul.f32 %v915_v0, %v409_v29 }
 0x180   :  { %v594_v40 = vpop.eup %593  ;;  %v486_v24 = vadd.f32 %v921_v32, %v447_v38  ;;  %v410_v30 = vmul.f32 %v592_v39, %v894_v26 }
 0x181   :  { %v487_v17 = vadd.f32 %v921_v32, %v448_v14  ;;  %v411_v5 = vmul.f32 %v594_v40, %v901_v19 }
 0x182   :  { %518 = vst [vmem:[%s1117_s3 + $0xd8] sm:$0xff] %v486_v24  ;;  %v449_v41 = vmul.f32 %v915_v0, %v410_v30 }
 0x183   :  { %v596_v36 = vpop.eup %595  ;;  %519 = vst [vmem:[%s1117_s3 + $0xe0] sm:$0xff] %v487_v17  ;;  %v450_v52 = vmul.f32 %v915_v0, %v411_v5 }
 0x184   :  { %v488_v8 = vadd.f32 %v921_v32, %v449_v41  ;;  %v412_v26 = vmul.f32 %v596_v36, %v904_v28 }
 0x185   :  { %v489_v42 = vadd.f32 %v921_v32, %v450_v52 }
 0x186   :  { %520 = vst [vmem:[%s1117_s3 + $0xe8] sm:$0xff] %v488_v8  ;;  %v451_v19 = vmul.f32 %v915_v0, %v412_v26 }
 0x187   :  { %521 = vst [vmem:[%s1117_s3 + $0xf0] sm:$0xff] %v489_v42 }
 0x188   :  { %v490_v21 = vadd.f32 %v921_v32, %v451_v19 }
 0x18a   :  { %522 = vst [vmem:[%s1117_s3 + $0xf8] sm:$0xff] %v490_v21 }
 0x18b   :  { %527 = vsyncpa [#allocation3], 1 }

// kernel: encoder_forward.13
= control target key start
LH: loop header
LB: loop body
LE: loop exit
PB: predicated region body
PF: predicated region fallthrough
CT: control target
= control target key end

     0   :  { %v902_v3 = vmov 0.0   ;;  %s1642_s1 = inlined_call_operand.vmem [shape: f32[128,384], index: 1, kind: input, shape index: {}]   ;;  %s1643_s0 = inlined_call_operand.vmem [shape: f32[256,128], index: 0, kind: input, shape index: {}]   ;;  %s1644_s2 = inlined_call_operand.vmem [shape: f32[1,384], index: 2, kind: input, shape index: {}]   ;;  %s1645_s3 = inlined_call_operand.vmem [shape: f32[256,384], index: 3, kind: output, shape index: {}]  }
   0x1   :  { %v47_v0 = vld [vmem:[%s1642_s1 + $0x8] sm:$0xff]  ;;  %v50_v1 = vld [vmem:[%s1642_s1 + $0x20] sm:$0xff]  ;;  %175 = vmatprep.mubr.f32.mxu0 %v902_v3  ;;  %319 = vmatprep.mubr.f32.mxu1 %v902_v3  ;;  %v49_v5 = vld [vmem:[%s1642_s1 + $0x18] sm:$0xff] }
   0x2   :  { %v46_v2 = vld [vmem:[%s1642_s1] sm:$0xff]  ;;  %v821_v4 = vpack.c.bf16 %v50_v1, %v47_v0  ;;  %v53_v6 = vld [vmem:[%s1642_s1 + $0x38] sm:$0xff]  ;;  %v56_v7 = vld [vmem:[%s1642_s1 + $0x50] sm:$0xff] }
   0x3   :  { %v823_v8 = vpack.c.bf16 %v49_v5, %v46_v2  ;;  %v825_v9 = vpack.c.bf16 %v56_v7, %v53_v6  ;;  %v52_v10 = vld [vmem:[%s1642_s1 + $0x30] sm:$0xff]  ;;  %v55_v11 = vld [vmem:[%s1642_s1 + $0x48] sm:$0xff]  ;;  %v62_v13 = vld [vmem:[%s1642_s1 + $0x80] sm:$0xff] }
   0x4   :  { %v59_v12 = vld [vmem:[%s1642_s1 + $0x68] sm:$0xff]  ;;  %822 = vmatprep.subr.bf16.mxu0 %v821_v4  ;;  %885 = vmatprep.subr.bf16.mxu1 %v821_v4  ;;  %v827_v14 = vpack.c.bf16 %v55_v11, %v52_v10  ;;  %v58_v16 = vld [vmem:[%s1642_s1 + $0x60] sm:$0xff]  ;;  %v61_v17 = vld [vmem:[%s1642_s1 + $0x78] sm:$0xff] }
   0x5   :  { %824 = vmatpush1.bf16.msra.mxu0 %v823_v8  ;;  %893 = vmatpush1.bf16.msra.mxu1 %v823_v8  ;;  %v829_v15 = vpack.c.bf16 %v62_v13, %v59_v12  ;;  %v65_v18 = vld [vmem:[%s1642_s1 + $0x98] sm:$0xff]  ;;  %v68_v19 = vld [vmem:[%s1642_s1 + $0xb0] sm:$0xff]  ;;  %v831_v20 = vpack.c.bf16 %v61_v17, %v58_v16  ;;  %v67_v23 = vld [vmem:[%s1642_s1 + $0xa8] sm:$0xff] }
   0x6   :  { %826 = vmatprep.subr.bf16.mxu0 %v825_v9  ;;  %886 = vmatprep.subr.bf16.mxu1 %v825_v9  ;;  %v833_v21 = vpack.c.bf16 %v68_v19, %v65_v18  ;;  %v64_v22 = vld [vmem:[%s1642_s1 + $0x90] sm:$0xff]  ;;  %v71_v24 = vld [vmem:[%s1642_s1 + $0xc8] sm:$0xff]  ;;  %v74_v25 = vld [vmem:[%s1642_s1 + $0xe0] sm:$0xff] }
   0x7   :  { %v835_v26 = vpack.c.bf16 %v67_v23, %v64_v22  ;;  %v837_v27 = vpack.c.bf16 %v74_v25, %v71_v24  ;;  %v70_v28 = vld [vmem:[%s1642_s1 + $0xc0] sm:$0xff]  ;;  %v73_v29 = vld [vmem:[%s1642_s1 + $0xd8] sm:$0xff]  ;;  %v80_v31 = vld [vmem:[%s1642_s1 + $0x110] sm:$0xff] }
   0x8   :  { %v77_v30 = vld [vmem:[%s1642_s1 + $0xf8] sm:$0xff]  ;;  %v839_v32 = vpack.c.bf16 %v73_v29, %v70_v28  ;;  %v76_v34 = vld [vmem:[%s1642_s1 + $0xf0] sm:$0xff]  ;;  %v79_v35 = vld [vmem:[%s1642_s1 + $0x108] sm:$0xff] }
   0x9   :  { %828 = vmatpush1.bf16.msra.mxu0 %v827_v14  ;;  %894 = vmatpush1.bf16.msra.mxu1 %v827_v14  ;;  %v841_v33 = vpack.c.bf16 %v80_v31, %v77_v30  ;;  %v83_v36 = vld [vmem:[%s1642_s1 + $0x128] sm:$0xff]  ;;  %v86_v37 = vld [vmem:[%s1642_s1 + $0x140] sm:$0xff]  ;;  %v843_v38 = vpack.c.bf16 %v79_v35, %v76_v34  ;;  %v85_v41 = vld [vmem:[%s1642_s1 + $0x138] sm:$0xff] }
   0xa   :  { %830 = vmatprep.subr.bf16.mxu0 %v829_v15  ;;  %887 = vmatprep.subr.bf16.mxu1 %v829_v15  ;;  %v845_v39 = vpack.c.bf16 %v86_v37, %v83_v36  ;;  %v82_v40 = vld [vmem:[%s1642_s1 + $0x120] sm:$0xff]  ;;  %v89_v42 = vld [vmem:[%s1642_s1 + $0x158] sm:$0xff]  ;;  %v92_v43 = vld [vmem:[%s1642_s1 + $0x170] sm:$0xff] }
   0xb   :  { %v847_v44 = vpack.c.bf16 %v85_v41, %v82_v40  ;;  %v849_v45 = vpack.c.bf16 %v92_v43, %v89_v42  ;;  %v88_v46 = vld [vmem:[%s1642_s1 + $0x150] sm:$0xff]  ;;  %v91_v47 = vld [vmem:[%s1642_s1 + $0x168] sm:$0xff]  ;;  %v54_v52 = vld [vmem:[%s1642_s1 + $0x40] sm:$0xff]  ;;  %v96_v42 = vlaneseq }
   0xc   :  { %v48_v48 = vld [vmem:[%s1642_s1 + $0x10] sm:$0xff]  ;;  %v51_v49 = vld [vmem:[%s1642_s1 + $0x28] sm:$0xff]  ;;  %v851_v50 = vpack.c.bf16 %v91_v47, %v88_v46  ;;  %v57_v53 = vld [vmem:[%s1642_s1 + $0x58] sm:$0xff] }
   0xd   :  { %832 = vmatpush1.bf16.msra.mxu0 %v831_v20  ;;  %895 = vmatpush1.bf16.msra.mxu1 %v831_v20  ;;  %v853_v51 = vpack.c.bf16 %v51_v49, %v48_v48  ;;  %v1036_v54 = vld [vmem:[%s1643_s0] sm:$0xff]  ;;  %v857_v56 = vpack.c.bf16 %v57_v53, %v54_v52  ;;  %v60_v57 = vld [vmem:[%s1642_s1 + $0x70] sm:$0xff]  ;;  %v63_v58 = vld [vmem:[%s1642_s1 + $0x88] sm:$0xff]  ;;  %v1239_v43 = vshrl.u32 %v96_v42, 7 }
   0xe   :  { %834 = vmatprep.subr.bf16.mxu0 %v833_v21  ;;  %888 = vmatprep.subr.bf16.mxu1 %v833_v21  ;;  %v1041_v55 = vld [vmem:[%s1643_s0 + $0xc0] sm:$0xff]  ;;  %v1055_v59 = vld [vmem:[%s1643_s0 + $0x8] sm:$0xff]  ;;  %v861_v61 = vpack.c.bf16 %v63_v58, %v60_v57  ;;  %v69_v63 = vld [vmem:[%s1642_s1 + $0xb8] sm:$0xff] }
   0xf   :  { %v1060_v60 = vld [vmem:[%s1643_s0 + $0xc8] sm:$0xff]  ;;  %v66_v62 = vld [vmem:[%s1642_s1 + $0xa0] sm:$0xff]  ;;  %v1075_v0 = vld [vmem:[%s1643_s0 + $0x10] sm:$0xff]  ;;  %v102_v46 = vsub.s32 1, %v1239_v43 }
  0x10   :  { %v1080_v1 = vld [vmem:[%s1643_s0 + $0xd0] sm:$0xff]  ;;  %v865_v2 = vpack.c.bf16 %v69_v63, %v66_v62  ;;  %v75_v5 = vld [vmem:[%s1642_s1 + $0xe8] sm:$0xff]  ;;  %v17_v6 = vld [vmem:[%s1643_s0 + $0x18] sm:$0xff] }
  0x11   :  { %836 = vmatpush1.bf16.msra.mxu0 %v835_v26  ;;  %896 = vmatpush1.bf16.msra.mxu1 %v835_v26  ;;  %v72_v4 = vld [vmem:[%s1642_s1 + $0xd0] sm:$0xff]  ;;  %v1098_v7 = vld [vmem:[%s1643_s0 + $0xd8] sm:$0xff]  ;;  %v78_v9 = vld [vmem:[%s1642_s1 + $0x100] sm:$0xff] }
  0x12   :  { %838 = vmatprep.subr.bf16.mxu0 %v837_v27  ;;  %889 = vmatprep.subr.bf16.mxu1 %v837_v27  ;;  %v869_v8 = vpack.c.bf16 %v75_v5, %v72_v4  ;;  %v81_v10 = vld [vmem:[%s1642_s1 + $0x118] sm:$0xff]  ;;  %v18_v11 = vld [vmem:[%s1643_s0 + $0x20] sm:$0xff]  ;;  %v84_v14 = vld [vmem:[%s1642_s1 + $0x130] sm:$0xff] }
  0x13   :  { %v1115_v12 = vld [vmem:[%s1643_s0 + $0xe0] sm:$0xff]  ;;  %v873_v13 = vpack.c.bf16 %v81_v10, %v78_v9  ;;  %v87_v15 = vld [vmem:[%s1642_s1 + $0x148] sm:$0xff]  ;;  %v93_v20 = vld [vmem:[%s1642_s1 + $0x178] sm:$0xff] }
  0x14   :  { %v19_v16 = vld [vmem:[%s1643_s0 + $0x28] sm:$0xff]  ;;  %v877_v18 = vpack.c.bf16 %v87_v15, %v84_v14  ;;  %v90_v19 = vld [vmem:[%s1642_s1 + $0x160] sm:$0xff]  ;;  %v20_v21 = vld [vmem:[%s1643_s0 + $0x30] sm:$0xff] }
  0x15   :  { %840 = vmatpush1.bf16.msra.mxu0 %v839_v32  ;;  %897 = vmatpush1.bf16.msra.mxu1 %v839_v32  ;;  %v1132_v17 = vld [vmem:[%s1643_s0 + $0xe8] sm:$0xff]  ;;  %v1149_v22 = vld [vmem:[%s1643_s0 + $0xf0] sm:$0xff]  ;;  %v881_v23 = vpack.c.bf16 %v93_v20, %v90_v19  ;;  %v21_v24 = vld [vmem:[%s1643_s0 + $0x38] sm:$0xff] }
  0x16   :  { %842 = vmatprep.subr.bf16.mxu0 %v841_v33  ;;  %890 = vmatprep.subr.bf16.mxu1 %v841_v33  ;;  %v1160_v25 = vld [vmem:[%s1643_s0 + $0xf8] sm:$0xff]  ;;  %v22_v26 = vld [vmem:[%s1643_s0 + $0x40] sm:$0xff]  ;;  %v23_v27 = vld [vmem:[%s1643_s0 + $0x48] sm:$0xff] }
  0x17   :  { %v24_v28 = vld [vmem:[%s1643_s0 + $0x50] sm:$0xff]  ;;  %v25_v29 = vld [vmem:[%s1643_s0 + $0x58] sm:$0xff]  ;;  %v26_v30 = vld [vmem:[%s1643_s0 + $0x60] sm:$0xff] }
  0x18   :  { %v27_v31 = vld [vmem:[%s1643_s0 + $0x68] sm:$0xff]  ;;  %v28_v32 = vld [vmem:[%s1643_s0 + $0x70] sm:$0xff]  ;;  %v29_v33 = vld [vmem:[%s1643_s0 + $0x78] sm:$0xff] }
  0x19   :  { %844 = vmatpush1.bf16.msra.mxu0 %v843_v38  ;;  %898 = vmatpush1.bf16.msra.mxu1 %v843_v38  ;;  %v30_v34 = vld [vmem:[%s1643_s0 + $0x80] sm:$0xff]  ;;  %v31_v35 = vld [vmem:[%s1643_s0 + $0x88] sm:$0xff]  ;;  %v32_v36 = vld [vmem:[%s1643_s0 + $0x90] sm:$0xff] }
  0x1a   :  { %846 = vmatprep.subr.bf16.mxu0 %v845_v39  ;;  %891 = vmatprep.subr.bf16.mxu1 %v845_v39  ;;  %v33_v37 = vld [vmem:[%s1643_s0 + $0x98] sm:$0xff]  ;;  %v34_v38 = vld [vmem:[%s1643_s0 + $0xa0] sm:$0xff]  ;;  %v35_v39 = vld [vmem:[%s1643_s0 + $0xa8] sm:$0xff] }
  0x1b   :  { %v36_v40 = vld [vmem:[%s1643_s0 + $0xb0] sm:$0xff]  ;;  %v37_v41 = vld [vmem:[%s1643_s0 + $0xb8] sm:$0xff] }
  0x1d   :  { %848 = vmatpush1.bf16.msra.mxu0 %v847_v44  ;;  %899 = vmatpush1.bf16.msra.mxu1 %v847_v44  ;;  %v98_v44 = vsub.s32 0, %v1239_v43 }
  0x1e   :  { %850 = vmatprep.subr.bf16.mxu0 %v849_v45  ;;  %892 = vmatprep.subr.bf16.mxu1 %v849_v45  ;;  %v1245_v45 = vld [vmem:[%s1644_s2] sm:$0x7] }
  0x1f   :  { %v1249_v47 = vrot.slane %v1245_v45, %v98_v44 }
  0x21   :  { %852 = vmatpush1.bf16.msra.mxu0 %v851_v50  ;;  %900 = vmatpush1.bf16.msra.mxu1 %v851_v50 }
  0x22   :  { %854 = vmatprep.subr.bf16.mxu1 %v853_v51 }
  0x24   :  { %176 = vmatmul.mubr.f32.vlgmr.msra.gmra.mrb[0].mxu0 %v1036_v54  ;;  %320 = vmatmul.mubr.f32.vlgmr.msra.gmra.mrb[0].mxu1 %v1041_v55 }
  0x25   :  { %856 = vmatpush3.bf16.msra.mxu1 %v853_v51  ;;  %181 = vmatprep.mubr.f32.mxu0 %v902_v3 }
  0x26   :  { %325 = vmatprep.mubr.f32.mxu1 %v902_v3  ;;  %858 = vmatprep.subr.bf16.mxu1 %v857_v56 }
  0x28   :  { %182 = vmatmul.mubr.f32.gmra.mrb[2].mxu0 %v1055_v59  ;;  %326 = vmatmul.mubr.f32.gmra.mrb[2].mxu1 %v1060_v60 }
  0x29   :  { %860 = vmatpush3.bf16.msra.mxu1 %v857_v56  ;;  %187 = vmatprep.mubr.f32.mxu0 %v902_v3 }
  0x2a   :  { %331 = vmatprep.mubr.f32.mxu1 %v902_v3  ;;  %862 = vmatprep.subr.bf16.mxu1 %v861_v61 }
  0x2c   :  { %188 = vmatmul.mubr.f32.gmra.mrb[4].mxu0 %v1075_v0  ;;  %332 = vmatmul.mubr.f32.gmra.mrb[4].mxu1 %v1080_v1 }
  0x2d   :  { %864 = vmatpush3.bf16.msra.mxu1 %v861_v61  ;;  %193 = vmatprep.mubr.f32.mxu0 %v902_v3 }
  0x2e   :  { %337 = vmatprep.mubr.f32.mxu1 %v902_v3  ;;  %866 = vmatprep.subr.bf16.mxu1 %v865_v2 }
  0x30   :  { %194 = vmatmul.mubr.f32.gmra.mrb[6].mxu0 %v17_v6  ;;  %338 = vmatmul.mubr.f32.gmra.mrb[6].mxu1 %v1098_v7 }
  0x31   :  { %868 = vmatpush3.bf16.msra.mxu1 %v865_v2  ;;  %199 = vmatprep.mubr.f32.mxu0 %v902_v3 }
  0x32   :  { %343 = vmatprep.mubr.f32.mxu1 %v902_v3  ;;  %870 = vmatprep.subr.bf16.mxu1 %v869_v8 }
  0x34   :  { %200 = vmatmul.mubr.f32.gmra.mrb[8].mxu0 %v18_v11  ;;  %344 = vmatmul.mubr.f32.gmra.mrb[8].mxu1 %v1115_v12 }
  0x35   :  { %872 = vmatpush3.bf16.msra.mxu1 %v869_v8  ;;  %205 = vmatprep.mubr.f32.mxu0 %v902_v3 }
  0x36   :  { %349 = vmatprep.mubr.f32.mxu1 %v902_v3  ;;  %874 = vmatprep.subr.bf16.mxu1 %v873_v13 }
  0x38   :  { %206 = vmatmul.mubr.f32.gmra.mrb[10].mxu0 %v19_v16  ;;  %350 = vmatmul.mubr.f32.gmra.mrb[10].mxu1 %v1132_v17 }
  0x39   :  { %876 = vmatpush3.bf16.msra.mxu1 %v873_v13  ;;  %211 = vmatprep.mubr.f32.mxu0 %v902_v3 }
  0x3a   :  { %355 = vmatprep.mubr.f32.mxu1 %v902_v3  ;;  %878 = vmatprep.subr.bf16.mxu1 %v877_v18 }
  0x3c   :  { %212 = vmatmul.mubr.f32.gmra.mrb[12].mxu0 %v20_v21  ;;  %356 = vmatmul.mubr.f32.gmra.mrb[12].mxu1 %v1149_v22 }
  0x3d   :  { %880 = vmatpush3.bf16.msra.mxu1 %v877_v18  ;;  %217 = vmatprep.mubr.f32.mxu0 %v902_v3 }
  0x3e   :  { %361 = vmatprep.mubr.f32.mxu1 %v902_v3  ;;  %882 = vmatprep.subr.bf16.mxu1 %v881_v23 }
  0x40   :  { %218 = vmatmul.mubr.f32.gmra.mrb[14].mxu0 %v21_v24  ;;  %362 = vmatmul.mubr.f32.gmra.mrb[14].mxu1 %v1160_v25 }
  0x41   :  { %884 = vmatpush3.bf16.msra.mxu1 %v881_v23  ;;  %223 = vmatprep.mubr.f32.mxu0 %v902_v3 }
  0x42   :  { %773 = vmatprep.mubr.f32.mxu1 %v1036_v54 }
  0x44   :  { %224 = vmatmul.mubr.f32.gmra.mrb[16].mxu0 %v22_v26  ;;  %774 = vmatmul.mubr.f32.vlgmr.msra.gmra.mrb[16].mxu1 %v1055_v59 }
  0x45   :  { %229 = vmatprep.mubr.f32.mxu0 %v902_v3  ;;  %776 = vmatprep.mubr.f32.mxu1 %v1075_v0 }
  0x48   :  { %230 = vmatmul.mubr.f32.gmra.mrb[18].mxu0 %v23_v27  ;;  %777 = vmatmul.mubr.f32.gmra.mrb[18].mxu1 %v17_v6 }
  0x49   :  { %235 = vmatprep.mubr.f32.mxu0 %v902_v3  ;;  %779 = vmatprep.mubr.f32.mxu1 %v18_v11 }
  0x4c   :  { %236 = vmatmul.mubr.f32.gmra.mrb[20].mxu0 %v24_v28  ;;  %780 = vmatmul.mubr.f32.gmra.mrb[20].mxu1 %v19_v16 }
  0x4d   :  { %241 = vmatprep.mubr.f32.mxu0 %v902_v3  ;;  %782 = vmatprep.mubr.f32.mxu1 %v20_v21 }
  0x50   :  { %242 = vmatmul.mubr.f32.gmra.mrb[22].mxu0 %v25_v29  ;;  %783 = vmatmul.mubr.f32.gmra.mrb[22].mxu1 %v21_v24 }
  0x51   :  { %247 = vmatprep.mubr.f32.mxu0 %v902_v3  ;;  %785 = vmatprep.mubr.f32.mxu1 %v22_v26 }
  0x54   :  { %248 = vmatmul.mubr.f32.gmra.mrb[24].mxu0 %v26_v30  ;;  %786 = vmatmul.mubr.f32.gmra.mrb[24].mxu1 %v23_v27 }
  0x55   :  { %253 = vmatprep.mubr.f32.mxu0 %v902_v3  ;;  %788 = vmatprep.mubr.f32.mxu1 %v24_v28 }
  0x58   :  { %254 = vmatmul.mubr.f32.gmra.mrb[26].mxu0 %v27_v31  ;;  %789 = vmatmul.mubr.f32.gmra.mrb[26].mxu1 %v25_v29 }
  0x59   :  { %259 = vmatprep.mubr.f32.mxu0 %v902_v3  ;;  %791 = vmatprep.mubr.f32.mxu1 %v26_v30 }
  0x5c   :  { %260 = vmatmul.mubr.f32.gmra.mrb[28].mxu0 %v28_v32  ;;  %792 = vmatmul.mubr.f32.gmra.mrb[28].mxu1 %v27_v31 }
  0x5d   :  { %265 = vmatprep.mubr.f32.mxu0 %v902_v3  ;;  %794 = vmatprep.mubr.f32.mxu1 %v28_v32 }
  0x60   :  { %266 = vmatmul.mubr.f32.gmra.mrb[30].mxu0 %v29_v33  ;;  %795 = vmatmul.mubr.f32.gmra.mrb[30].mxu1 %v29_v33 }
  0x61   :  { %271 = vmatprep.mubr.f32.mxu0 %v902_v3  ;;  %797 = vmatprep.mubr.f32.mxu1 %v30_v34 }
  0x64   :  { %272 = vmatmul.mubr.f32.gmra.mrb[32].mxu0 %v30_v34  ;;  %798 = vmatmul.mubr.f32.gmra.mrb[32].mxu1 %v31_v35 }
  0x65   :  { %277 = vmatprep.mubr.f32.mxu0 %v902_v3  ;;  %800 = vmatprep.mubr.f32.mxu1 %v32_v36 }
  0x68   :  { %278 = vmatmul.mubr.f32.gmra.mrb[34].mxu0 %v31_v35  ;;  %801 = vmatmul.mubr.f32.gmra.mrb[34].mxu1 %v33_v37 }
  0x69   :  { %283 = vmatprep.mubr.f32.mxu0 %v902_v3  ;;  %803 = vmatprep.mubr.f32.mxu1 %v34_v38 }
  0x6c   :  { %284 = vmatmul.mubr.f32.gmra.mrb[36].mxu0 %v32_v36  ;;  %804 = vmatmul.mubr.f32.gmra.mrb[36].mxu1 %v35_v39 }
  0x6d   :  { %289 = vmatprep.mubr.f32.mxu0 %v902_v3  ;;  %806 = vmatprep.mubr.f32.mxu1 %v36_v40 }
  0x70   :  { %290 = vmatmul.mubr.f32.gmra.mrb[38].mxu0 %v33_v37  ;;  %807 = vmatmul.mubr.f32.gmra.mrb[38].mxu1 %v37_v41 }
  0x71   :  { %295 = vmatprep.mubr.f32.mxu0 %v902_v3  ;;  %809 = vmatprep.mubr.f32.mxu1 %v1041_v55 }
  0x74   :  { %296 = vmatmul.mubr.f32.gmra.mrb[40].mxu0 %v34_v38  ;;  %810 = vmatmul.mubr.f32.gmra.mrb[40].mxu1 %v1060_v60 }
  0x75   :  { %301 = vmatprep.mubr.f32.mxu0 %v902_v3  ;;  %812 = vmatprep.mubr.f32.mxu1 %v1080_v1 }
  0x78   :  { %302 = vmatmul.mubr.f32.gmra.mrb[42].mxu0 %v35_v39  ;;  %813 = vmatmul.mubr.f32.gmra.mrb[42].mxu1 %v1098_v7  ;;  %v106_v39 = vsub.s32 2, %v1239_v43 }
  0x79   :  { %307 = vmatprep.mubr.f32.mxu0 %v902_v3  ;;  %815 = vmatprep.mubr.f32.mxu1 %v1115_v12 }
  0x7c   :  { %308 = vmatmul.mubr.f32.gmra.mrb[44].mxu0 %v36_v40  ;;  %816 = vmatmul.mubr.f32.gmra.mrb[44].mxu1 %v1132_v17 }
  0x7d   :  { %313 = vmatprep.mubr.f32.mxu0 %v902_v3  ;;  %818 = vmatprep.mubr.f32.mxu1 %v1149_v22  ;;  %v1252_v3 = vrot.slane %v1245_v45, %v102_v46 }
  0x80   :  { %314 = vmatmul.mubr.f32.gmra.mrb[46].mxu0 %v37_v41  ;;  %819 = vmatmul.mubr.f32.gmra.mrb[46].mxu1 %v1160_v25 }
  0xf7   :  { %v177_v48 = vpop.f32.mrb[0].mxu0  ;;  %v321_v49 = vpop.f32.mrb[0].mxu1 }
  0xf8   :  { %v178_v50 = vadd.f32 %v177_v48, %v1249_v47  ;;  %v322_v51 = vadd.f32 %v321_v49, %v1249_v47  ;;  %v179_v52 = vpop.f32.mrb[1].mxu0  ;;  %v323_v53 = vpop.f32.mrb[1].mxu1 }
  0xf9   :  { %v180_v54 = vadd.f32 %v179_v52, %v1252_v3  ;;  %v324_v55 = vadd.f32 %v323_v53, %v1252_v3 }
  0xfa   :  { %593 = vst [vmem:[%s1645_s3] sm:$0xff] %v178_v50  ;;  %665 = vst [vmem:[%s1645_s3 + $0x240] sm:$0xff] %v322_v51  ;;  %v1370_v50 = vrot.slane %v1245_v45, %v106_v39 }
  0xfb   :  { %594 = vst [vmem:[%s1645_s3 + $0x8] sm:$0xff] %v180_v54  ;;  %666 = vst [vmem:[%s1645_s3 + $0x248] sm:$0xff] %v324_v55  ;;  %v183_v56 = vpop.f32.mrb[2].mxu0  ;;  %v327_v57 = vpop.f32.mrb[2].mxu1 }
  0xfc   :  { %v184_v58 = vadd.f32 %v183_v56, %v1249_v47  ;;  %v328_v59 = vadd.f32 %v327_v57, %v1249_v47  ;;  %v185_v60 = vpop.f32.mrb[3].mxu0  ;;  %v329_v61 = vpop.f32.mrb[3].mxu1 }
  0xfd   :  { %v186_v62 = vadd.f32 %v185_v60, %v1252_v3  ;;  %v330_v63 = vadd.f32 %v329_v61, %v1252_v3 }
  0xfe   :  { %596 = vst [vmem:[%s1645_s3 + $0x18] sm:$0xff] %v184_v58  ;;  %668 = vst [vmem:[%s1645_s3 + $0x258] sm:$0xff] %v328_v59 }
  0xff   :  { %597 = vst [vmem:[%s1645_s3 + $0x20] sm:$0xff] %v186_v62  ;;  %669 = vst [vmem:[%s1645_s3 + $0x260] sm:$0xff] %v330_v63  ;;  %v189_v0 = vpop.f32.mrb[4].mxu0  ;;  %v333_v1 = vpop.f32.mrb[4].mxu1 }
 0x100   :  { %v190_v2 = vadd.f32 %v189_v0, %v1249_v47  ;;  %v334_v4 = vadd.f32 %v333_v1, %v1249_v47  ;;  %v191_v5 = vpop.f32.mrb[5].mxu0  ;;  %v335_v6 = vpop.f32.mrb[5].mxu1 }
 0x101   :  { %v192_v7 = vadd.f32 %v191_v5, %v1252_v3  ;;  %v336_v8 = vadd.f32 %v335_v6, %v1252_v3 }
 0x102   :  { %599 = vst [vmem:[%s1645_s3 + $0x30] sm:$0xff] %v190_v2  ;;  %671 = vst [vmem:[%s1645_s3 + $0x270] sm:$0xff] %v334_v4 }
 0x103   :  { %600 = vst [vmem:[%s1645_s3 + $0x38] sm:$0xff] %v192_v7  ;;  %672 = vst [vmem:[%s1645_s3 + $0x278] sm:$0xff] %v336_v8  ;;  %v195_v9 = vpop.f32.mrb[6].mxu0  ;;  %v339_v10 = vpop.f32.mrb[6].mxu1 }
 0x104   :  { %v196_v11 = vadd.f32 %v195_v9, %v1249_v47  ;;  %v340_v12 = vadd.f32 %v339_v10, %v1249_v47  ;;  %v197_v13 = vpop.f32.mrb[7].mxu0  ;;  %v341_v14 = vpop.f32.mrb[7].mxu1 }
 0x105   :  { %v198_v15 = vadd.f32 %v197_v13, %v1252_v3  ;;  %v342_v16 = vadd.f32 %v341_v14, %v1252_v3 }
 0x106   :  { %602 = vst [vmem:[%s1645_s3 + $0x48] sm:$0xff] %v196_v11  ;;  %674 = vst [vmem:[%s1645_s3 + $0x288] sm:$0xff] %v340_v12 }
 0x107   :  { %603 = vst [vmem:[%s1645_s3 + $0x50] sm:$0xff] %v198_v15  ;;  %675 = vst [vmem:[%s1645_s3 + $0x290] sm:$0xff] %v342_v16  ;;  %v201_v17 = vpop.f32.mrb[8].mxu0  ;;  %v345_v18 = vpop.f32.mrb[8].mxu1 }
 0x108   :  { %v202_v19 = vadd.f32 %v201_v17, %v1249_v47  ;;  %v346_v20 = vadd.f32 %v345_v18, %v1249_v47  ;;  %v203_v21 = vpop.f32.mrb[9].mxu0  ;;  %v347_v22 = vpop.f32.mrb[9].mxu1 }
 0x109   :  { %v204_v23 = vadd.f32 %v203_v21, %v1252_v3  ;;  %v348_v24 = vadd.f32 %v347_v22, %v1252_v3 }
 0x10a   :  { %605 = vst [vmem:[%s1645_s3 + $0x60] sm:$0xff] %v202_v19  ;;  %677 = vst [vmem:[%s1645_s3 + $0x2a0] sm:$0xff] %v346_v20 }
 0x10b   :  { %606 = vst [vmem:[%s1645_s3 + $0x68] sm:$0xff] %v204_v23  ;;  %678 = vst [vmem:[%s1645_s3 + $0x2a8] sm:$0xff] %v348_v24  ;;  %v207_v25 = vpop.f32.mrb[10].mxu0  ;;  %v351_v26 = vpop.f32.mrb[10].mxu1 }
 0x10c   :  { %v208_v27 = vadd.f32 %v207_v25, %v1249_v47  ;;  %v352_v28 = vadd.f32 %v351_v26, %v1249_v47  ;;  %v209_v29 = vpop.f32.mrb[11].mxu0  ;;  %v353_v30 = vpop.f32.mrb[11].mxu1 }
 0x10d   :  { %v210_v31 = vadd.f32 %v209_v29, %v1252_v3  ;;  %v354_v32 = vadd.f32 %v353_v30, %v1252_v3 }
 0x10e   :  { %608 = vst [vmem:[%s1645_s3 + $0x78] sm:$0xff] %v208_v27  ;;  %680 = vst [vmem:[%s1645_s3 + $0x2b8] sm:$0xff] %v352_v28 }
 0x10f   :  { %609 = vst [vmem:[%s1645_s3 + $0x80] sm:$0xff] %v210_v31  ;;  %681 = vst [vmem:[%s1645_s3 + $0x2c0] sm:$0xff] %v354_v32  ;;  %v213_v33 = vpop.f32.mrb[12].mxu0  ;;  %v357_v34 = vpop.f32.mrb[12].mxu1 }
 0x110   :  { %v214_v35 = vadd.f32 %v213_v33, %v1249_v47  ;;  %v358_v36 = vadd.f32 %v357_v34, %v1249_v47  ;;  %v215_v37 = vpop.f32.mrb[13].mxu0  ;;  %v359_v38 = vpop.f32.mrb[13].mxu1 }
 0x111   :  { %v216_v40 = vadd.f32 %v215_v37, %v1252_v3  ;;  %v360_v41 = vadd.f32 %v359_v38, %v1252_v3 }
 0x112   :  { %611 = vst [vmem:[%s1645_s3 + $0x90] sm:$0xff] %v214_v35  ;;  %683 = vst [vmem:[%s1645_s3 + $0x2d0] sm:$0xff] %v358_v36 }
 0x113   :  { %612 = vst [vmem:[%s1645_s3 + $0x98] sm:$0xff] %v216_v40  ;;  %684 = vst [vmem:[%s1645_s3 + $0x2d8] sm:$0xff] %v360_v41  ;;  %v219_v42 = vpop.f32.mrb[14].mxu0  ;;  %v363_v43 = vpop.f32.mrb[14].mxu1 }
 0x114   :  { %v220_v44 = vadd.f32 %v219_v42, %v1249_v47  ;;  %v364_v46 = vadd.f32 %v363_v43, %v1249_v47  ;;  %v221_v48 = vpop.f32.mrb[15].mxu0  ;;  %v365_v49 = vpop.f32.mrb[15].mxu1 }
 0x115   :  { %v222_v51 = vadd.f32 %v221_v48, %v1252_v3  ;;  %v366_v52 = vadd.f32 %v365_v49, %v1252_v3 }
 0x116   :  { %614 = vst [vmem:[%s1645_s3 + $0xa8] sm:$0xff] %v220_v44  ;;  %686 = vst [vmem:[%s1645_s3 + $0x2e8] sm:$0xff] %v364_v46 }
 0x117   :  { %615 = vst [vmem:[%s1645_s3 + $0xb0] sm:$0xff] %v222_v51  ;;  %687 = vst [vmem:[%s1645_s3 + $0x2f0] sm:$0xff] %v366_v52  ;;  %v225_v45 = vpop.f32.mrb[16].mxu0  ;;  %v775_v53 = vpop.f32.mrb[16].mxu1 }
 0x118   :  { %v226_v54 = vadd.f32 %v225_v45, %v1249_v47  ;;  %v440_v55 = vadd.f32 %v775_v53, %v1370_v50  ;;  %v227_v56 = vpop.f32.mrb[17].mxu0  ;;  %v434_v57 = vpop.f32.mrb[17].mxu1 }
 0x119   :  { %v228_v58 = vadd.f32 %v227_v56, %v1252_v3  ;;  %v435_v59 = vadd.f32 %v434_v57, %v1370_v50 }
 0x11a   :  { %617 = vst [vmem:[%s1645_s3 + $0xc0] sm:$0xff] %v226_v54  ;;  %598 = vst [vmem:[%s1645_s3 + $0x28] sm:$0xff] %v440_v55 }
 0x11b   :  { %618 = vst [vmem:[%s1645_s3 + $0xc8] sm:$0xff] %v228_v58  ;;  %595 = vst [vmem:[%s1645_s3 + $0x10] sm:$0xff] %v435_v59  ;;  %v231_v60 = vpop.f32.mrb[18].mxu0  ;;  %v778_v61 = vpop.f32.mrb[18].mxu1 }
 0x11c   :  { %v232_v62 = vadd.f32 %v231_v60, %v1249_v47  ;;  %v450_v63 = vadd.f32 %v778_v61, %v1370_v50  ;;  %v233_v0 = vpop.f32.mrb[19].mxu0  ;;  %v444_v1 = vpop.f32.mrb[19].mxu1 }
 0x11d   :  { %v234_v2 = vadd.f32 %v233_v0, %v1252_v3  ;;  %v445_v4 = vadd.f32 %v444_v1, %v1370_v50 }
 0x11e   :  { %620 = vst [vmem:[%s1645_s3 + $0xd8] sm:$0xff] %v232_v62  ;;  %604 = vst [vmem:[%s1645_s3 + $0x58] sm:$0xff] %v450_v63 }
 0x11f   :  { %621 = vst [vmem:[%s1645_s3 + $0xe0] sm:$0xff] %v234_v2  ;;  %601 = vst [vmem:[%s1645_s3 + $0x40] sm:$0xff] %v445_v4  ;;  %v237_v5 = vpop.f32.mrb[20].mxu0  ;;  %v781_v6 = vpop.f32.mrb[20].mxu1 }
 0x120   :  { %v238_v7 = vadd.f32 %v237_v5, %v1249_v47  ;;  %v460_v8 = vadd.f32 %v781_v6, %v1370_v50  ;;  %v239_v9 = vpop.f32.mrb[21].mxu0  ;;  %v454_v10 = vpop.f32.mrb[21].mxu1 }
 0x121   :  { %v240_v11 = vadd.f32 %v239_v9, %v1252_v3  ;;  %v455_v12 = vadd.f32 %v454_v10, %v1370_v50 }
 0x122   :  { %623 = vst [vmem:[%s1645_s3 + $0xf0] sm:$0xff] %v238_v7  ;;  %610 = vst [vmem:[%s1645_s3 + $0x88] sm:$0xff] %v460_v8 }
 0x123   :  { %624 = vst [vmem:[%s1645_s3 + $0xf8] sm:$0xff] %v240_v11  ;;  %607 = vst [vmem:[%s1645_s3 + $0x70] sm:$0xff] %v455_v12  ;;  %v243_v13 = vpop.f32.mrb[22].mxu0  ;;  %v784_v14 = vpop.f32.mrb[22].mxu1 }
 0x124   :  { %v244_v15 = vadd.f32 %v243_v13, %v1249_v47  ;;  %v470_v16 = vadd.f32 %v784_v14, %v1370_v50  ;;  %v245_v17 = vpop.f32.mrb[23].mxu0  ;;  %v464_v18 = vpop.f32.mrb[23].mxu1 }
 0x125   :  { %v246_v19 = vadd.f32 %v245_v17, %v1252_v3  ;;  %v465_v20 = vadd.f32 %v464_v18, %v1370_v50 }
 0x126   :  { %626 = vst [vmem:[%s1645_s3 + $0x108] sm:$0xff] %v244_v15  ;;  %616 = vst [vmem:[%s1645_s3 + $0xb8] sm:$0xff] %v470_v16 }
 0x127   :  { %627 = vst [vmem:[%s1645_s3 + $0x110] sm:$0xff] %v246_v19  ;;  %613 = vst [vmem:[%s1645_s3 + $0xa0] sm:$0xff] %v465_v20  ;;  %v249_v21 = vpop.f32.mrb[24].mxu0  ;;  %v787_v22 = vpop.f32.mrb[24].mxu1 }
 0x128   :  { %v250_v23 = vadd.f32 %v249_v21, %v1249_v47  ;;  %v480_v24 = vadd.f32 %v787_v22, %v1370_v50  ;;  %v251_v25 = vpop.f32.mrb[25].mxu0  ;;  %v474_v26 = vpop.f32.mrb[25].mxu1 }
 0x129   :  { %v252_v27 = vadd.f32 %v251_v25, %v1252_v3  ;;  %v475_v28 = vadd.f32 %v474_v26, %v1370_v50 }
 0x12a   :  { %629 = vst [vmem:[%s1645_s3 + $0x120] sm:$0xff] %v250_v23  ;;  %622 = vst [vmem:[%s1645_s3 + $0xe8] sm:$0xff] %v480_v24 }
 0x12b   :  { %630 = vst [vmem:[%s1645_s3 + $0x128] sm:$0xff] %v252_v27  ;;  %619 = vst [vmem:[%s1645_s3 + $0xd0] sm:$0xff] %v475_v28  ;;  %v255_v29 = vpop.f32.mrb[26].mxu0  ;;  %v790_v30 = vpop.f32.mrb[26].mxu1 }
 0x12c   :  { %v256_v31 = vadd.f32 %v255_v29, %v1249_v47  ;;  %v490_v32 = vadd.f32 %v790_v30, %v1370_v50  ;;  %v257_v33 = vpop.f32.mrb[27].mxu0  ;;  %v484_v34 = vpop.f32.mrb[27].mxu1 }
 0x12d   :  { %v258_v35 = vadd.f32 %v257_v33, %v1252_v3  ;;  %v485_v36 = vadd.f32 %v484_v34, %v1370_v50 }
 0x12e   :  { %632 = vst [vmem:[%s1645_s3 + $0x138] sm:$0xff] %v256_v31  ;;  %628 = vst [vmem:[%s1645_s3 + $0x118] sm:$0xff] %v490_v32 }
 0x12f   :  { %633 = vst [vmem:[%s1645_s3 + $0x140] sm:$0xff] %v258_v35  ;;  %625 = vst [vmem:[%s1645_s3 + $0x100] sm:$0xff] %v485_v36  ;;  %v261_v37 = vpop.f32.mrb[28].mxu0  ;;  %v793_v38 = vpop.f32.mrb[28].mxu1 }
 0x130   :  { %v262_v39 = vadd.f32 %v261_v37, %v1249_v47  ;;  %v500_v40 = vadd.f32 %v793_v38, %v1370_v50  ;;  %v263_v41 = vpop.f32.mrb[29].mxu0  ;;  %v494_v42 = vpop.f32.mrb[29].mxu1 }
 0x131   :  { %v264_v43 = vadd.f32 %v263_v41, %v1252_v3  ;;  %v495_v44 = vadd.f32 %v494_v42, %v1370_v50 }
 0x132   :  { %635 = vst [vmem:[%s1645_s3 + $0x150] sm:$0xff] %v262_v39  ;;  %634 = vst [vmem:[%s1645_s3 + $0x148] sm:$0xff] %v500_v40 }
 0x133   :  { %636 = vst [vmem:[%s1645_s3 + $0x158] sm:$0xff] %v264_v43  ;;  %631 = vst [vmem:[%s1645_s3 + $0x130] sm:$0xff] %v495_v44  ;;  %v267_v46 = vpop.f32.mrb[30].mxu0  ;;  %v796_v48 = vpop.f32.mrb[30].mxu1 }
 0x134   :  { %v268_v49 = vadd.f32 %v267_v46, %v1249_v47  ;;  %v510_v51 = vadd.f32 %v796_v48, %v1370_v50  ;;  %v269_v52 = vpop.f32.mrb[31].mxu0  ;;  %v504_v45 = vpop.f32.mrb[31].mxu1 }
 0x135   :  { %v270_v53 = vadd.f32 %v269_v52, %v1252_v3  ;;  %v505_v54 = vadd.f32 %v504_v45, %v1370_v50 }
 0x136   :  { %638 = vst [vmem:[%s1645_s3 + $0x168] sm:$0xff] %v268_v49  ;;  %640 = vst [vmem:[%s1645_s3 + $0x178] sm:$0xff] %v510_v51 }
 0x137   :  { %639 = vst [vmem:[%s1645_s3 + $0x170] sm:$0xff] %v270_v53  ;;  %637 = vst [vmem:[%s1645_s3 + $0x160] sm:$0xff] %v505_v54  ;;  %v273_v55 = vpop.f32.mrb[32].mxu0  ;;  %v799_v56 = vpop.f32.mrb[32].mxu1 }
 0x138   :  { %v274_v57 = vadd.f32 %v273_v55, %v1249_v47  ;;  %v520_v58 = vadd.f32 %v799_v56, %v1370_v50  ;;  %v275_v59 = vpop.f32.mrb[33].mxu0  ;;  %v514_v60 = vpop.f32.mrb[33].mxu1 }
 0x139   :  { %v276_v61 = vadd.f32 %v275_v59, %v1252_v3  ;;  %v515_v62 = vadd.f32 %v514_v60, %v1370_v50 }
 0x13a   :  { %641 = vst [vmem:[%s1645_s3 + $0x180] sm:$0xff] %v274_v57  ;;  %646 = vst [vmem:[%s1645_s3 + $0x1a8] sm:$0xff] %v520_v58 }
 0x13b   :  { %642 = vst [vmem:[%s1645_s3 + $0x188] sm:$0xff] %v276_v61  ;;  %643 = vst [vmem:[%s1645_s3 + $0x190] sm:$0xff] %v515_v62  ;;  %v279_v63 = vpop.f32.mrb[34].mxu0  ;;  %v802_v0 = vpop.f32.mrb[34].mxu1 }
 0x13c   :  { %v280_v1 = vadd.f32 %v279_v63, %v1249_v47  ;;  %v530_v2 = vadd.f32 %v802_v0, %v1370_v50  ;;  %v281_v4 = vpop.f32.mrb[35].mxu0  ;;  %v524_v5 = vpop.f32.mrb[35].mxu1 }
 0x13d   :  { %v282_v6 = vadd.f32 %v281_v4, %v1252_v3  ;;  %v525_v7 = vadd.f32 %v524_v5, %v1370_v50 }
 0x13e   :  { %644 = vst [vmem:[%s1645_s3 + $0x198] sm:$0xff] %v280_v1  ;;  %652 = vst [vmem:[%s1645_s3 + $0x1d8] sm:$0xff] %v530_v2 }
 0x13f   :  { %645 = vst [vmem:[%s1645_s3 + $0x1a0] sm:$0xff] %v282_v6  ;;  %649 = vst [vmem:[%s1645_s3 + $0x1c0] sm:$0xff] %v525_v7  ;;  %v285_v8 = vpop.f32.mrb[36].mxu0  ;;  %v805_v9 = vpop.f32.mrb[36].mxu1 }
 0x140   :  { %v286_v10 = vadd.f32 %v285_v8, %v1249_v47  ;;  %v540_v11 = vadd.f32 %v805_v9, %v1370_v50  ;;  %v287_v12 = vpop.f32.mrb[37].mxu0  ;;  %v534_v13 = vpop.f32.mrb[37].mxu1 }
 0x141   :  { %v288_v14 = vadd.f32 %v287_v12, %v1252_v3  ;;  %v535_v15 = vadd.f32 %v534_v13, %v1370_v50 }
 0x142   :  { %647 = vst [vmem:[%s1645_s3 + $0x1b0] sm:$0xff] %v286_v10  ;;  %658 = vst [vmem:[%s1645_s3 + $0x208] sm:$0xff] %v540_v11 }
 0x143   :  { %648 = vst [vmem:[%s1645_s3 + $0x1b8] sm:$0xff] %v288_v14  ;;  %655 = vst [vmem:[%s1645_s3 + $0x1f0] sm:$0xff] %v535_v15  ;;  %v291_v16 = vpop.f32.mrb[38].mxu0  ;;  %v808_v17 = vpop.f32.mrb[38].mxu1 }
 0x144   :  { %v292_v18 = vadd.f32 %v291_v16, %v1249_v47  ;;  %v550_v19 = vadd.f32 %v808_v17, %v1370_v50  ;;  %v293_v20 = vpop.f32.mrb[39].mxu0  ;;  %v544_v21 = vpop.f32.mrb[39].mxu1 }
 0x145   :  { %v294_v22 = vadd.f32 %v293_v20, %v1252_v3  ;;  %v545_v23 = vadd.f32 %v544_v21, %v1370_v50 }
 0x146   :  { %650 = vst [vmem:[%s1645_s3 + $0x1c8] sm:$0xff] %v292_v18  ;;  %664 = vst [vmem:[%s1645_s3 + $0x238] sm:$0xff] %v550_v19 }
 0x147   :  { %651 = vst [vmem:[%s1645_s3 + $0x1d0] sm:$0xff] %v294_v22  ;;  %661 = vst [vmem:[%s1645_s3 + $0x220] sm:$0xff] %v545_v23  ;;  %v297_v24 = vpop.f32.mrb[40].mxu0  ;;  %v811_v25 = vpop.f32.mrb[40].mxu1 }
 0x148   :  { %v298_v26 = vadd.f32 %v297_v24, %v1249_v47  ;;  %v560_v27 = vadd.f32 %v811_v25, %v1370_v50  ;;  %v299_v28 = vpop.f32.mrb[41].mxu0  ;;  %v554_v29 = vpop.f32.mrb[41].mxu1 }
 0x149   :  { %v300_v30 = vadd.f32 %v299_v28, %v1252_v3  ;;  %v555_v31 = vadd.f32 %v554_v29, %v1370_v50 }
 0x14a   :  { %653 = vst [vmem:[%s1645_s3 + $0x1e0] sm:$0xff] %v298_v26  ;;  %670 = vst [vmem:[%s1645_s3 + $0x268] sm:$0xff] %v560_v27 }
 0x14b   :  { %654 = vst [vmem:[%s1645_s3 + $0x1e8] sm:$0xff] %v300_v30  ;;  %667 = vst [vmem:[%s1645_s3 + $0x250] sm:$0xff] %v555_v31  ;;  %v303_v32 = vpop.f32.mrb[42].mxu0  ;;  %v814_v33 = vpop.f32.mrb[42].mxu1 }
 0x14c   :  { %v304_v34 = vadd.f32 %v303_v32, %v1249_v47  ;;  %v570_v35 = vadd.f32 %v814_v33, %v1370_v50  ;;  %v305_v36 = vpop.f32.mrb[43].mxu0  ;;  %v564_v37 = vpop.f32.mrb[43].mxu1 }
 0x14d   :  { %v306_v38 = vadd.f32 %v305_v36, %v1252_v3  ;;  %v565_v39 = vadd.f32 %v564_v37, %v1370_v50 }
 0x14e   :  { %656 = vst [vmem:[%s1645_s3 + $0x1f8] sm:$0xff] %v304_v34  ;;  %676 = vst [vmem:[%s1645_s3 + $0x298] sm:$0xff] %v570_v35 }
 0x14f   :  { %657 = vst [vmem:[%s1645_s3 + $0x200] sm:$0xff] %v306_v38  ;;  %673 = vst [vmem:[%s1645_s3 + $0x280] sm:$0xff] %v565_v39  ;;  %v309_v40 = vpop.f32.mrb[44].mxu0  ;;  %v817_v41 = vpop.f32.mrb[44].mxu1 }
 0x150   :  { %v310_v42 = vadd.f32 %v309_v40, %v1249_v47  ;;  %v580_v43 = vadd.f32 %v817_v41, %v1370_v50  ;;  %v311_v44 = vpop.f32.mrb[45].mxu0  ;;  %v574_v46 = vpop.f32.mrb[45].mxu1 }
 0x151   :  { %v312_v48 = vadd.f32 %v311_v44, %v1252_v3  ;;  %v575_v49 = vadd.f32 %v574_v46, %v1370_v50 }
 0x152   :  { %659 = vst [vmem:[%s1645_s3 + $0x210] sm:$0xff] %v310_v42  ;;  %682 = vst [vmem:[%s1645_s3 + $0x2c8] sm:$0xff] %v580_v43 }
 0x153   :  { %660 = vst [vmem:[%s1645_s3 + $0x218] sm:$0xff] %v312_v48  ;;  %679 = vst [vmem:[%s1645_s3 + $0x2b0] sm:$0xff] %v575_v49  ;;  %v315_v51 = vpop.f32.mrb[46].mxu0  ;;  %v820_v52 = vpop.f32.mrb[46].mxu1 }
 0x154   :  { %v316_v45 = vadd.f32 %v315_v51, %v1249_v47  ;;  %v590_v53 = vadd.f32 %v820_v52, %v1370_v50  ;;  %v317_v54 = vpop.f32.mrb[47].mxu0  ;;  %v584_v55 = vpop.f32.mrb[47].mxu1 }
 0x155   :  { %v318_v56 = vadd.f32 %v317_v54, %v1252_v3  ;;  %v585_v57 = vadd.f32 %v584_v55, %v1370_v50 }
 0x156   :  { %662 = vst [vmem:[%s1645_s3 + $0x228] sm:$0xff] %v316_v45  ;;  %688 = vst [vmem:[%s1645_s3 + $0x2f8] sm:$0xff] %v590_v53 }
 0x157   :  { %663 = vst [vmem:[%s1645_s3 + $0x230] sm:$0xff] %v318_v56  ;;  %685 = vst [vmem:[%s1645_s3 + $0x2e0] sm:$0xff] %v585_v57 }

// kernel: encoder_forward.15
= control target key start
LH: loop header
LB: loop body
LE: loop exit
PB: predicated region body
PF: predicated region fallthrough
CT: control target
= control target key end

     0   :  { %s972_s1 = inlined_call_operand.vmem [shape: f32[128,128], index: 1, kind: input, shape index: {}]   ;;  %s973_s0 = inlined_call_operand.vmem [shape: f32[256,128], index: 0, kind: input, shape index: {}]   ;;  %s974_s2 = inlined_call_operand.vmem [shape: f32[1,128], index: 2, kind: input, shape index: {}]   ;;  %s975_s3 = inlined_call_operand.vmem [shape: f32[256,128], index: 3, kind: input, shape index: {}]   ;;  %s976_s4 = inlined_call_operand.vmem [shape: f32[256,128], index: 4, kind: output, shape index: {}]  }
   0x1   :  { %v49_v0 = vld [vmem:[%s972_s1] sm:$0xff]  ;;  %v50_v1 = vld [vmem:[%s972_s1 + $0x8] sm:$0xff]  ;;  %v51_v2 = vld [vmem:[%s972_s1 + $0x10] sm:$0xff] }
   0x2   :  { %v526_v3 = vpack.c.bf16 %v50_v1, %v49_v0  ;;  %v52_v4 = vld [vmem:[%s972_s1 + $0x18] sm:$0xff]  ;;  %v53_v6 = vld [vmem:[%s972_s1 + $0x20] sm:$0xff]  ;;  %v54_v7 = vld [vmem:[%s972_s1 + $0x28] sm:$0xff] }
   0x3   :  { %v530_v5 = vpack.c.bf16 %v52_v4, %v51_v2  ;;  %v534_v8 = vpack.c.bf16 %v54_v7, %v53_v6  ;;  %v17_v9 = vld [vmem:[%s973_s0] sm:$0xff]  ;;  %v55_v11 = vld [vmem:[%s972_s1 + $0x30] sm:$0xff]  ;;  %v56_v12 = vld [vmem:[%s972_s1 + $0x38] sm:$0xff] }
   0x4   :  { %527 = vmatprep.subr.bf16.mxu0 %v526_v3  ;;  %558 = vmatprep.subr.bf16.mxu1 %v526_v3  ;;  %v33_v10 = vld [vmem:[%s973_s0 + $0x80] sm:$0xff]  ;;  %v538_v13 = vpack.c.bf16 %v56_v12, %v55_v11  ;;  %v58_v15 = vld [vmem:[%s972_s1 + $0x48] sm:$0xff]  ;;  %v59_v17 = vld [vmem:[%s972_s1 + $0x50] sm:$0xff] }
   0x5   :  { %529 = vmatpush3.bf16.msra.mxu0 %v526_v3  ;;  %566 = vmatpush3.bf16.msra.mxu1 %v526_v3  ;;  %v57_v14 = vld [vmem:[%s972_s1 + $0x40] sm:$0xff]  ;;  %v60_v18 = vld [vmem:[%s972_s1 + $0x58] sm:$0xff]  ;;  %v62_v21 = vld [vmem:[%s972_s1 + $0x68] sm:$0xff] }
   0x6   :  { %531 = vmatprep.subr.bf16.mxu0 %v530_v5  ;;  %559 = vmatprep.subr.bf16.mxu1 %v530_v5  ;;  %v542_v16 = vpack.c.bf16 %v58_v15, %v57_v14  ;;  %v546_v19 = vpack.c.bf16 %v60_v18, %v59_v17  ;;  %v61_v20 = vld [vmem:[%s972_s1 + $0x60] sm:$0xff]  ;;  %v63_v23 = vld [vmem:[%s972_s1 + $0x70] sm:$0xff]  ;;  %v64_v24 = vld [vmem:[%s972_s1 + $0x78] sm:$0xff] }
   0x7   :  { %478 = vmatprep.mubr.f32.mxu0 %v17_v9  ;;  %502 = vmatprep.mubr.f32.mxu1 %v33_v10  ;;  %v550_v22 = vpack.c.bf16 %v62_v21, %v61_v20  ;;  %v554_v25 = vpack.c.bf16 %v64_v24, %v63_v23  ;;  %v18_v26 = vld [vmem:[%s973_s0 + $0x8] sm:$0xff]  ;;  %v19_v28 = vld [vmem:[%s973_s0 + $0x10] sm:$0xff]  ;;  %v20_v30 = vld [vmem:[%s973_s0 + $0x18] sm:$0xff] }
   0x8   :  { %v34_v27 = vld [vmem:[%s973_s0 + $0x88] sm:$0xff]  ;;  %v35_v29 = vld [vmem:[%s973_s0 + $0x90] sm:$0xff]  ;;  %v36_v31 = vld [vmem:[%s973_s0 + $0x98] sm:$0xff] }
   0x9   :  { %533 = vmatpush3.bf16.msra.mxu0 %v530_v5  ;;  %567 = vmatpush3.bf16.msra.mxu1 %v530_v5  ;;  %v21_v32 = vld [vmem:[%s973_s0 + $0x20] sm:$0xff]  ;;  %v22_v34 = vld [vmem:[%s973_s0 + $0x28] sm:$0xff]  ;;  %v23_v36 = vld [vmem:[%s973_s0 + $0x30] sm:$0xff] }
   0xa   :  { %535 = vmatprep.subr.bf16.mxu0 %v534_v8  ;;  %560 = vmatprep.subr.bf16.mxu1 %v534_v8  ;;  %v37_v33 = vld [vmem:[%s973_s0 + $0xa0] sm:$0xff]  ;;  %v38_v35 = vld [vmem:[%s973_s0 + $0xa8] sm:$0xff]  ;;  %v39_v37 = vld [vmem:[%s973_s0 + $0xb0] sm:$0xff] }
   0xb   :  { %v24_v38 = vld [vmem:[%s973_s0 + $0x38] sm:$0xff]  ;;  %v25_v40 = vld [vmem:[%s973_s0 + $0x40] sm:$0xff]  ;;  %v26_v42 = vld [vmem:[%s973_s0 + $0x48] sm:$0xff] }
   0xc   :  { %v40_v39 = vld [vmem:[%s973_s0 + $0xb8] sm:$0xff]  ;;  %v41_v41 = vld [vmem:[%s973_s0 + $0xc0] sm:$0xff]  ;;  %v42_v43 = vld [vmem:[%s973_s0 + $0xc8] sm:$0xff] }
   0xd   :  { %537 = vmatpush3.bf16.msra.mxu0 %v534_v8  ;;  %568 = vmatpush3.bf16.msra.mxu1 %v534_v8  ;;  %v27_v44 = vld [vmem:[%s973_s0 + $0x50] sm:$0xff]  ;;  %v28_v46 = vld [vmem:[%s973_s0 + $0x58] sm:$0xff]  ;;  %v29_v48 = vld [vmem:[%s973_s0 + $0x60] sm:$0xff] }
   0xe   :  { %539 = vmatprep.subr.bf16.mxu0 %v538_v13  ;;  %561 = vmatprep.subr.bf16.mxu1 %v538_v13  ;;  %v43_v45 = vld [vmem:[%s973_s0 + $0xd0] sm:$0xff]  ;;  %v44_v47 = vld [vmem:[%s973_s0 + $0xd8] sm:$0xff]  ;;  %v45_v49 = vld [vmem:[%s973_s0 + $0xe0] sm:$0xff] }
   0xf   :  { %v30_v50 = vld [vmem:[%s973_s0 + $0x68] sm:$0xff]  ;;  %v31_v52 = vld [vmem:[%s973_s0 + $0x70] sm:$0xff]  ;;  %v32_v54 = vld [vmem:[%s973_s0 + $0x78] sm:$0xff] }
  0x10   :  { %v46_v51 = vld [vmem:[%s973_s0 + $0xe8] sm:$0xff]  ;;  %v47_v53 = vld [vmem:[%s973_s0 + $0xf0] sm:$0xff]  ;;  %v48_v55 = vld [vmem:[%s973_s0 + $0xf8] sm:$0xff] }
  0x11   :  { %541 = vmatpush3.bf16.msra.mxu0 %v538_v13  ;;  %569 = vmatpush3.bf16.msra.mxu1 %v538_v13  ;;  %v746_v56 = vld [vmem:[%s974_s2] ss:$0 sm:$0xff]  ;;  %v298_v58 = vld [vmem:[%s975_s3 + $0x8] sm:$0xff]  ;;  %v300_v10 = vld [vmem:[%s975_s3 + $0x18] sm:$0xff] }
  0x12   :  { %543 = vmatprep.subr.bf16.mxu0 %v542_v16  ;;  %562 = vmatprep.subr.bf16.mxu1 %v542_v16  ;;  %v314_v60 = vld [vmem:[%s975_s3 + $0x88] sm:$0xff]  ;;  %v297_v0 = vld [vmem:[%s975_s3] sm:$0xff]  ;;  %v316_v12 = vld [vmem:[%s975_s3 + $0x98] sm:$0xff] }
  0x13   :  { %v313_v2 = vld [vmem:[%s975_s3 + $0x80] sm:$0xff]  ;;  %v315_v18 = vld [vmem:[%s975_s3 + $0x90] sm:$0xff] }
  0x15   :  { %545 = vmatpush3.bf16.msra.mxu0 %v542_v16  ;;  %570 = vmatpush3.bf16.msra.mxu1 %v542_v16  ;;  %v299_v16 = vld [vmem:[%s975_s3 + $0x10] sm:$0xff] }
  0x16   :  { %547 = vmatprep.subr.bf16.mxu0 %v546_v19  ;;  %563 = vmatprep.subr.bf16.mxu1 %v546_v19 }
  0x19   :  { %549 = vmatpush3.bf16.msra.mxu0 %v546_v19  ;;  %571 = vmatpush3.bf16.msra.mxu1 %v546_v19 }
  0x1a   :  { %551 = vmatprep.subr.bf16.mxu0 %v550_v22  ;;  %564 = vmatprep.subr.bf16.mxu1 %v550_v22 }
  0x1d   :  { %553 = vmatpush3.bf16.msra.mxu0 %v550_v22  ;;  %572 = vmatpush3.bf16.msra.mxu1 %v550_v22 }
  0x1e   :  { %555 = vmatprep.subr.bf16.mxu0 %v554_v25  ;;  %565 = vmatprep.subr.bf16.mxu1 %v554_v25 }
  0x21   :  { %557 = vmatpush3.bf16.msra.mxu0 %v554_v25  ;;  %573 = vmatpush3.bf16.msra.mxu1 %v554_v25 }
  0x24   :  { %479 = vmatmul.mubr.f32.vlgmr.msra.gmra.mrb[0].mxu0 %v18_v26  ;;  %503 = vmatmul.mubr.f32.vlgmr.msra.gmra.mrb[0].mxu1 %v34_v27  ;;  %v302_v26 = vld [vmem:[%s975_s3 + $0x28] sm:$0xff] }
  0x25   :  { %481 = vmatprep.mubr.f32.mxu0 %v19_v28  ;;  %505 = vmatprep.mubr.f32.mxu1 %v35_v29  ;;  %v318_v28 = vld [vmem:[%s975_s3 + $0xa8] sm:$0xff] }
  0x28   :  { %482 = vmatmul.mubr.f32.gmra.mrb[2].mxu0 %v20_v30  ;;  %506 = vmatmul.mubr.f32.gmra.mrb[2].mxu1 %v36_v31 }
  0x29   :  { %484 = vmatprep.mubr.f32.mxu0 %v21_v32  ;;  %508 = vmatprep.mubr.f32.mxu1 %v37_v33  ;;  %v301_v32 = vld [vmem:[%s975_s3 + $0x20] sm:$0xff] }
  0x2c   :  { %485 = vmatmul.mubr.f32.gmra.mrb[4].mxu0 %v22_v34  ;;  %509 = vmatmul.mubr.f32.gmra.mrb[4].mxu1 %v38_v35  ;;  %v317_v34 = vld [vmem:[%s975_s3 + $0xa0] sm:$0xff] }
  0x2d   :  { %487 = vmatprep.mubr.f32.mxu0 %v23_v36  ;;  %511 = vmatprep.mubr.f32.mxu1 %v39_v37 }
  0x30   :  { %488 = vmatmul.mubr.f32.gmra.mrb[6].mxu0 %v24_v38  ;;  %512 = vmatmul.mubr.f32.gmra.mrb[6].mxu1 %v40_v39 }
  0x31   :  { %490 = vmatprep.mubr.f32.mxu0 %v25_v40  ;;  %514 = vmatprep.mubr.f32.mxu1 %v41_v41 }
  0x34   :  { %491 = vmatmul.mubr.f32.gmra.mrb[8].mxu0 %v26_v42  ;;  %515 = vmatmul.mubr.f32.gmra.mrb[8].mxu1 %v42_v43  ;;  %v304_v42 = vld [vmem:[%s975_s3 + $0x38] sm:$0xff] }
  0x35   :  { %493 = vmatprep.mubr.f32.mxu0 %v27_v44  ;;  %517 = vmatprep.mubr.f32.mxu1 %v43_v45  ;;  %v320_v44 = vld [vmem:[%s975_s3 + $0xb8] sm:$0xff] }
  0x38   :  { %494 = vmatmul.mubr.f32.gmra.mrb[10].mxu0 %v28_v46  ;;  %518 = vmatmul.mubr.f32.gmra.mrb[10].mxu1 %v44_v47 }
  0x39   :  { %496 = vmatprep.mubr.f32.mxu0 %v29_v48  ;;  %520 = vmatprep.mubr.f32.mxu1 %v45_v49  ;;  %v303_v48 = vld [vmem:[%s975_s3 + $0x30] sm:$0xff] }
  0x3c   :  { %497 = vmatmul.mubr.f32.gmra.mrb[12].mxu0 %v30_v50  ;;  %521 = vmatmul.mubr.f32.gmra.mrb[12].mxu1 %v46_v51  ;;  %v319_v50 = vld [vmem:[%s975_s3 + $0xb0] sm:$0xff] }
  0x3d   :  { %499 = vmatprep.mubr.f32.mxu0 %v31_v52  ;;  %523 = vmatprep.mubr.f32.mxu1 %v47_v53 }
  0x40   :  { %500 = vmatmul.mubr.f32.gmra.mrb[14].mxu0 %v32_v54  ;;  %524 = vmatmul.mubr.f32.gmra.mrb[14].mxu1 %v48_v55 }
  0xf7   :  { %v480_v57 = vpop.f32.mrb[0].mxu0  ;;  %v504_v59 = vpop.f32.mrb[0].mxu1 }
  0xf8   :  { %v144_v61 = vadd.f32 %v480_v57, %v746_v56  ;;  %v224_v62 = vadd.f32 %v504_v59, %v746_v56  ;;  %v138_v63 = vpop.f32.mrb[1].mxu0  ;;  %v218_v1 = vpop.f32.mrb[1].mxu1  ;;  %v306_v59 = vld [vmem:[%s975_s3 + $0x48] sm:$0xff] }
  0xf9   :  { %v139_v3 = vadd.f32 %v746_v56, %v138_v63  ;;  %v219_v4 = vadd.f32 %v746_v56, %v218_v1  ;;  %v305_v1 = vld [vmem:[%s975_s3 + $0x40] sm:$0xff] }
  0xfa   :  { %v330_v5 = vadd.f32 %v298_v58, %v144_v61  ;;  %v346_v6 = vadd.f32 %v314_v60, %v224_v62  ;;  %v322_v61 = vld [vmem:[%s975_s3 + $0xc8] sm:$0xff] }
  0xfb   :  { %v329_v7 = vadd.f32 %v297_v0, %v139_v3  ;;  %v345_v8 = vadd.f32 %v313_v2, %v219_v4  ;;  %v483_v9 = vpop.f32.mrb[2].mxu0  ;;  %v507_v11 = vpop.f32.mrb[2].mxu1  ;;  %v321_v3 = vld [vmem:[%s975_s3 + $0xc0] sm:$0xff] }
  0xfc   :  { %362 = vst [vmem:[%s976_s4 + $0x8] sm:$0xff] %v330_v5  ;;  %378 = vst [vmem:[%s976_s4 + $0x88] sm:$0xff] %v346_v6  ;;  %v154_v13 = vadd.f32 %v483_v9, %v746_v56  ;;  %v234_v14 = vadd.f32 %v507_v11, %v746_v56  ;;  %v148_v15 = vpop.f32.mrb[3].mxu0  ;;  %v228_v17 = vpop.f32.mrb[3].mxu1  ;;  %v308_v11 = vld [vmem:[%s975_s3 + $0x58] sm:$0xff] }
  0xfd   :  { %361 = vst [vmem:[%s976_s4] sm:$0xff] %v329_v7  ;;  %377 = vst [vmem:[%s976_s4 + $0x80] sm:$0xff] %v345_v8  ;;  %v149_v19 = vadd.f32 %v746_v56, %v148_v15  ;;  %v229_v20 = vadd.f32 %v746_v56, %v228_v17  ;;  %v307_v17 = vld [vmem:[%s975_s3 + $0x50] sm:$0xff] }
  0xfe   :  { %v332_v21 = vadd.f32 %v300_v10, %v154_v13  ;;  %v348_v22 = vadd.f32 %v316_v12, %v234_v14  ;;  %v324_v13 = vld [vmem:[%s975_s3 + $0xd8] sm:$0xff] }
  0xff   :  { %v331_v23 = vadd.f32 %v299_v16, %v149_v19  ;;  %v347_v24 = vadd.f32 %v315_v18, %v229_v20  ;;  %v486_v25 = vpop.f32.mrb[4].mxu0  ;;  %v510_v27 = vpop.f32.mrb[4].mxu1  ;;  %v323_v19 = vld [vmem:[%s975_s3 + $0xd0] sm:$0xff] }
 0x100   :  { %364 = vst [vmem:[%s976_s4 + $0x18] sm:$0xff] %v332_v21  ;;  %380 = vst [vmem:[%s976_s4 + $0x98] sm:$0xff] %v348_v22  ;;  %v164_v29 = vadd.f32 %v486_v25, %v746_v56  ;;  %v244_v30 = vadd.f32 %v510_v27, %v746_v56  ;;  %v158_v31 = vpop.f32.mrb[5].mxu0  ;;  %v238_v33 = vpop.f32.mrb[5].mxu1  ;;  %v310_v27 = vld [vmem:[%s975_s3 + $0x68] sm:$0xff] }
 0x101   :  { %363 = vst [vmem:[%s976_s4 + $0x10] sm:$0xff] %v331_v23  ;;  %379 = vst [vmem:[%s976_s4 + $0x90] sm:$0xff] %v347_v24  ;;  %v159_v35 = vadd.f32 %v746_v56, %v158_v31  ;;  %v239_v36 = vadd.f32 %v746_v56, %v238_v33  ;;  %v309_v33 = vld [vmem:[%s975_s3 + $0x60] sm:$0xff] }
 0x102   :  { %v334_v37 = vadd.f32 %v302_v26, %v164_v29  ;;  %v350_v38 = vadd.f32 %v318_v28, %v244_v30  ;;  %v326_v29 = vld [vmem:[%s975_s3 + $0xe8] sm:$0xff] }
 0x103   :  { %v333_v39 = vadd.f32 %v301_v32, %v159_v35  ;;  %v349_v40 = vadd.f32 %v317_v34, %v239_v36  ;;  %v489_v41 = vpop.f32.mrb[6].mxu0  ;;  %v513_v43 = vpop.f32.mrb[6].mxu1  ;;  %v325_v35 = vld [vmem:[%s975_s3 + $0xe0] sm:$0xff] }
 0x104   :  { %366 = vst [vmem:[%s976_s4 + $0x28] sm:$0xff] %v334_v37  ;;  %382 = vst [vmem:[%s976_s4 + $0xa8] sm:$0xff] %v350_v38  ;;  %v174_v45 = vadd.f32 %v489_v41, %v746_v56  ;;  %v254_v46 = vadd.f32 %v513_v43, %v746_v56  ;;  %v168_v47 = vpop.f32.mrb[7].mxu0  ;;  %v248_v49 = vpop.f32.mrb[7].mxu1  ;;  %v312_v43 = vld [vmem:[%s975_s3 + $0x78] sm:$0xff] }
 0x105   :  { %365 = vst [vmem:[%s976_s4 + $0x20] sm:$0xff] %v333_v39  ;;  %381 = vst [vmem:[%s976_s4 + $0xa0] sm:$0xff] %v349_v40  ;;  %v169_v51 = vadd.f32 %v746_v56, %v168_v47  ;;  %v249_v52 = vadd.f32 %v746_v56, %v248_v49  ;;  %v311_v49 = vld [vmem:[%s975_s3 + $0x70] sm:$0xff] }
 0x106   :  { %v336_v53 = vadd.f32 %v304_v42, %v174_v45  ;;  %v352_v54 = vadd.f32 %v320_v44, %v254_v46  ;;  %v328_v45 = vld [vmem:[%s975_s3 + $0xf8] sm:$0xff] }
 0x107   :  { %v335_v55 = vadd.f32 %v303_v48, %v169_v51  ;;  %v351_v57 = vadd.f32 %v319_v50, %v249_v52  ;;  %v492_v58 = vpop.f32.mrb[8].mxu0  ;;  %v516_v60 = vpop.f32.mrb[8].mxu1  ;;  %v327_v51 = vld [vmem:[%s975_s3 + $0xf0] sm:$0xff] }
 0x108   :  { %368 = vst [vmem:[%s976_s4 + $0x38] sm:$0xff] %v336_v53  ;;  %384 = vst [vmem:[%s976_s4 + $0xb8] sm:$0xff] %v352_v54  ;;  %v184_v62 = vadd.f32 %v492_v58, %v746_v56  ;;  %v264_v63 = vadd.f32 %v516_v60, %v746_v56  ;;  %v178_v0 = vpop.f32.mrb[9].mxu0  ;;  %v258_v2 = vpop.f32.mrb[9].mxu1 }
 0x109   :  { %367 = vst [vmem:[%s976_s4 + $0x30] sm:$0xff] %v335_v55  ;;  %383 = vst [vmem:[%s976_s4 + $0xb0] sm:$0xff] %v351_v57  ;;  %v179_v4 = vadd.f32 %v746_v56, %v178_v0  ;;  %v259_v5 = vadd.f32 %v746_v56, %v258_v2 }
 0x10a   :  { %v338_v6 = vadd.f32 %v306_v59, %v184_v62  ;;  %v354_v7 = vadd.f32 %v322_v61, %v264_v63 }
 0x10b   :  { %v337_v8 = vadd.f32 %v305_v1, %v179_v4  ;;  %v353_v9 = vadd.f32 %v321_v3, %v259_v5  ;;  %v495_v10 = vpop.f32.mrb[10].mxu0  ;;  %v519_v12 = vpop.f32.mrb[10].mxu1 }
 0x10c   :  { %370 = vst [vmem:[%s976_s4 + $0x48] sm:$0xff] %v338_v6  ;;  %386 = vst [vmem:[%s976_s4 + $0xc8] sm:$0xff] %v354_v7  ;;  %v194_v14 = vadd.f32 %v495_v10, %v746_v56  ;;  %v274_v15 = vadd.f32 %v519_v12, %v746_v56  ;;  %v188_v16 = vpop.f32.mrb[11].mxu0  ;;  %v268_v18 = vpop.f32.mrb[11].mxu1 }
 0x10d   :  { %369 = vst [vmem:[%s976_s4 + $0x40] sm:$0xff] %v337_v8  ;;  %385 = vst [vmem:[%s976_s4 + $0xc0] sm:$0xff] %v353_v9  ;;  %v189_v20 = vadd.f32 %v746_v56, %v188_v16  ;;  %v269_v21 = vadd.f32 %v746_v56, %v268_v18 }
 0x10e   :  { %v340_v22 = vadd.f32 %v308_v11, %v194_v14  ;;  %v356_v23 = vadd.f32 %v324_v13, %v274_v15 }
 0x10f   :  { %v339_v24 = vadd.f32 %v307_v17, %v189_v20  ;;  %v355_v25 = vadd.f32 %v323_v19, %v269_v21  ;;  %v498_v26 = vpop.f32.mrb[12].mxu0  ;;  %v522_v28 = vpop.f32.mrb[12].mxu1 }
 0x110   :  { %372 = vst [vmem:[%s976_s4 + $0x58] sm:$0xff] %v340_v22  ;;  %388 = vst [vmem:[%s976_s4 + $0xd8] sm:$0xff] %v356_v23  ;;  %v204_v30 = vadd.f32 %v498_v26, %v746_v56  ;;  %v284_v31 = vadd.f32 %v522_v28, %v746_v56  ;;  %v198_v32 = vpop.f32.mrb[13].mxu0  ;;  %v278_v34 = vpop.f32.mrb[13].mxu1 }
 0x111   :  { %371 = vst [vmem:[%s976_s4 + $0x50] sm:$0xff] %v339_v24  ;;  %387 = vst [vmem:[%s976_s4 + $0xd0] sm:$0xff] %v355_v25  ;;  %v199_v36 = vadd.f32 %v746_v56, %v198_v32  ;;  %v279_v37 = vadd.f32 %v746_v56, %v278_v34 }
 0x112   :  { %v342_v38 = vadd.f32 %v310_v27, %v204_v30  ;;  %v358_v39 = vadd.f32 %v326_v29, %v284_v31 }
 0x113   :  { %v341_v40 = vadd.f32 %v309_v33, %v199_v36  ;;  %v357_v41 = vadd.f32 %v325_v35, %v279_v37  ;;  %v501_v42 = vpop.f32.mrb[14].mxu0  ;;  %v525_v44 = vpop.f32.mrb[14].mxu1 }
 0x114   :  { %374 = vst [vmem:[%s976_s4 + $0x68] sm:$0xff] %v342_v38  ;;  %390 = vst [vmem:[%s976_s4 + $0xe8] sm:$0xff] %v358_v39  ;;  %v214_v46 = vadd.f32 %v501_v42, %v746_v56  ;;  %v294_v47 = vadd.f32 %v525_v44, %v746_v56  ;;  %v208_v48 = vpop.f32.mrb[15].mxu0  ;;  %v288_v50 = vpop.f32.mrb[15].mxu1 }
 0x115   :  { %373 = vst [vmem:[%s976_s4 + $0x60] sm:$0xff] %v341_v40  ;;  %389 = vst [vmem:[%s976_s4 + $0xe0] sm:$0xff] %v357_v41  ;;  %v209_v52 = vadd.f32 %v746_v56, %v208_v48  ;;  %v289_v53 = vadd.f32 %v746_v56, %v288_v50 }
 0x116   :  { %v344_v54 = vadd.f32 %v312_v43, %v214_v46  ;;  %v360_v55 = vadd.f32 %v328_v45, %v294_v47 }
 0x117   :  { %v343_v57 = vadd.f32 %v311_v49, %v209_v52  ;;  %v359_v58 = vadd.f32 %v327_v51, %v289_v53 }
 0x118   :  { %376 = vst [vmem:[%s976_s4 + $0x78] sm:$0xff] %v344_v54  ;;  %392 = vst [vmem:[%s976_s4 + $0xf8] sm:$0xff] %v360_v55 }
 0x119   :  { %375 = vst [vmem:[%s976_s4 + $0x70] sm:$0xff] %v343_v57  ;;  %391 = vst [vmem:[%s976_s4 + $0xf0] sm:$0xff] %v359_v58 }

// kernel: encoder_forward.16
= control target key start
LH: loop header
LB: loop body
LE: loop exit
PB: predicated region body
PF: predicated region fallthrough
CT: control target
= control target key end

     0   :  { %s1153_s0 = inlined_call_operand.vmem [shape: f32[256,128], index: 0, kind: input, shape index: {}]   ;;  %s1154_s1 = inlined_call_operand.vmem [shape: f32[1,128], index: 1, kind: input, shape index: {}]   ;;  %s1155_s2 = inlined_call_operand.vmem [shape: f32[1,128], index: 2, kind: input, shape index: {}]   ;;  %s1156_s3 = inlined_call_operand.vmem [shape: f32[256,128], index: 3, kind: output, shape index: {}]  }
   0x1   :  { %v602_v0 = vld [vmem:[%s1153_s0] sm:$0xff]  ;;  %v607_v1 = vld [vmem:[%s1153_s0 + $0x10] sm:$0xff]  ;;  %v614_v2 = vld [vmem:[%s1153_s0 + $0x8] sm:$0xff] }
   0x2   :  { %46 = vadd.xlane.f32.xlu0 %v602_v0  ;;  %50 = vadd.xlane.f32.xlu1 %v607_v1  ;;  %v619_v3 = vld [vmem:[%s1153_s0 + $0x18] sm:$0xff]  ;;  %v626_v4 = vld [vmem:[%s1153_s0 + $0x20] sm:$0xff]  ;;  %v631_v5 = vld [vmem:[%s1153_s0 + $0x28] sm:$0xff] }
   0x3   :  { %v638_v6 = vld [vmem:[%s1153_s0 + $0x30] sm:$0xff]  ;;  %v643_v7 = vld [vmem:[%s1153_s0 + $0x38] sm:$0xff]  ;;  %v650_v8 = vld [vmem:[%s1153_s0 + $0x40] sm:$0xff] }
   0x4   :  { %v655_v9 = vld [vmem:[%s1153_s0 + $0x48] sm:$0xff]  ;;  %v662_v10 = vld [vmem:[%s1153_s0 + $0x50] sm:$0xff]  ;;  %v667_v11 = vld [vmem:[%s1153_s0 + $0x58] sm:$0xff] }
   0x5   :  { %v674_v12 = vld [vmem:[%s1153_s0 + $0x60] sm:$0xff]  ;;  %v679_v13 = vld [vmem:[%s1153_s0 + $0x68] sm:$0xff]  ;;  %v686_v14 = vld [vmem:[%s1153_s0 + $0x70] sm:$0xff] }
   0x6   :  { %48 = vadd.xlane.f32.xlu0 %v614_v2  ;;  %52 = vadd.xlane.f32.xlu1 %v619_v3  ;;  %v691_v15 = vld [vmem:[%s1153_s0 + $0x78] sm:$0xff]  ;;  %v698_v16 = vld [vmem:[%s1153_s0 + $0x80] sm:$0xff]  ;;  %v703_v17 = vld [vmem:[%s1153_s0 + $0x88] sm:$0xff] }
   0x7   :  { %v710_v18 = vld [vmem:[%s1153_s0 + $0x90] sm:$0xff]  ;;  %v715_v19 = vld [vmem:[%s1153_s0 + $0x98] sm:$0xff]  ;;  %v722_v20 = vld [vmem:[%s1153_s0 + $0xa0] sm:$0xff] }
   0x8   :  { %v727_v21 = vld [vmem:[%s1153_s0 + $0xa8] sm:$0xff]  ;;  %v734_v22 = vld [vmem:[%s1153_s0 + $0xb0] sm:$0xff]  ;;  %v739_v23 = vld [vmem:[%s1153_s0 + $0xb8] sm:$0xff] }
   0x9   :  { %v746_v24 = vld [vmem:[%s1153_s0 + $0xc0] sm:$0xff]  ;;  %v751_v25 = vld [vmem:[%s1153_s0 + $0xc8] sm:$0xff]  ;;  %v758_v26 = vld [vmem:[%s1153_s0 + $0xd0] sm:$0xff] }
   0xa   :  { %54 = vadd.xlane.f32.xlu0 %v626_v4  ;;  %56 = vadd.xlane.f32.xlu1 %v631_v5  ;;  %v763_v27 = vld [vmem:[%s1153_s0 + $0xd8] sm:$0xff]  ;;  %v770_v28 = vld [vmem:[%s1153_s0 + $0xe0] sm:$0xff]  ;;  %v775_v29 = vld [vmem:[%s1153_s0 + $0xe8] sm:$0xff] }
   0xb   :  { %v782_v30 = vld [vmem:[%s1153_s0 + $0xf0] sm:$0xff]  ;;  %v787_v31 = vld [vmem:[%s1153_s0 + $0xf8] sm:$0xff] }
   0xe   :  { %58 = vadd.xlane.f32.xlu0 %v638_v6  ;;  %60 = vadd.xlane.f32.xlu1 %v643_v7 }
  0x12   :  { %62 = vadd.xlane.f32.xlu0 %v650_v8  ;;  %64 = vadd.xlane.f32.xlu1 %v655_v9 }
  0x16   :  { %66 = vadd.xlane.f32.xlu0 %v662_v10  ;;  %68 = vadd.xlane.f32.xlu1 %v667_v11 }
  0x1a   :  { %70 = vadd.xlane.f32.xlu0 %v674_v12  ;;  %72 = vadd.xlane.f32.xlu1 %v679_v13 }
  0x1e   :  { %74 = vadd.xlane.f32.xlu0 %v686_v14  ;;  %76 = vadd.xlane.f32.xlu1 %v691_v15 }
  0x22   :  { %78 = vadd.xlane.f32.xlu0 %v698_v16  ;;  %80 = vadd.xlane.f32.xlu1 %v703_v17 }
  0x26   :  { %82 = vadd.xlane.f32.xlu0 %v710_v18  ;;  %84 = vadd.xlane.f32.xlu1 %v715_v19 }
  0x2a   :  { %86 = vadd.xlane.f32.xlu0 %v722_v20  ;;  %88 = vadd.xlane.f32.xlu1 %v727_v21 }
  0x2e   :  { %90 = vadd.xlane.f32.xlu0 %v734_v22  ;;  %92 = vadd.xlane.f32.xlu1 %v739_v23 }
  0x32   :  { %94 = vadd.xlane.f32.xlu0 %v746_v24  ;;  %96 = vadd.xlane.f32.xlu1 %v751_v25 }
  0x36   :  { %98 = vadd.xlane.f32.xlu0 %v758_v26  ;;  %100 = vadd.xlane.f32.xlu1 %v763_v27 }
  0x3a   :  { %102 = vadd.xlane.f32.xlu0 %v770_v28  ;;  %104 = vadd.xlane.f32.xlu1 %v775_v29 }
  0x3e   :  { %106 = vadd.xlane.f32.xlu0 %v782_v30  ;;  %108 = vadd.xlane.f32.xlu1 %v787_v31 }
  0x8f   :  { %v47_v32 = vpop.xlane.xlu0 %46  ;;  %v51_v33 = vpop.xlane.xlu1 %50 }
  0x90   :  { %v111_v34 = vmul.f32 0.0078125, %v47_v32  ;;  %v113_v35 = vmul.f32 0.0078125, %v51_v33 }
  0x92   :  { %v792_v36 = vsub.f32 %v602_v0, %v111_v34  ;;  %v795_v37 = vsub.f32 %v607_v1, %v113_v35 }
  0x93   :  { %v49_v38 = vpop.xlane.xlu0 %48  ;;  %v53_v39 = vpop.xlane.xlu1 %52 }
  0x94   :  { %v112_v40 = vmul.f32 0.0078125, %v49_v38  ;;  %v175_v41 = vmul.f32 %v792_v36, %v792_v36  ;;  %v114_v42 = vmul.f32 0.0078125, %v53_v39  ;;  %v177_v45 = vmul.f32 %v795_v37, %v795_v37 }
  0x96   :  { %v800_v43 = vsub.f32 %v614_v2, %v112_v40  ;;  %207 = vadd.xlane.f32.xlu0 %v175_v41  ;;  %v803_v44 = vsub.f32 %v619_v3, %v114_v42 }
  0x97   :  { %v55_v46 = vpop.xlane.xlu0 %54  ;;  %v57_v47 = vpop.xlane.xlu1 %56 }
  0x98   :  { %v115_v48 = vmul.f32 0.0078125, %v55_v46  ;;  %v176_v49 = vmul.f32 %v800_v43, %v800_v43  ;;  %v116_v50 = vmul.f32 0.0078125, %v57_v47  ;;  %v178_v53 = vmul.f32 %v803_v44, %v803_v44 }
  0x9a   :  { %v810_v51 = vsub.f32 %v626_v4, %v115_v48  ;;  %211 = vadd.xlane.f32.xlu0 %v177_v45  ;;  %209 = vadd.xlane.f32.xlu1 %v176_v49  ;;  %v813_v52 = vsub.f32 %v631_v5, %v116_v50 }
  0x9b   :  { %v59_v54 = vpop.xlane.xlu0 %58  ;;  %v61_v55 = vpop.xlane.xlu1 %60 }
  0x9c   :  { %v117_v56 = vmul.f32 0.0078125, %v59_v54  ;;  %v179_v57 = vmul.f32 %v810_v51, %v810_v51  ;;  %v118_v58 = vmul.f32 0.0078125, %v61_v55  ;;  %v180_v61 = vmul.f32 %v813_v52, %v813_v52 }
  0x9e   :  { %v820_v59 = vsub.f32 %v638_v6, %v117_v56  ;;  %213 = vadd.xlane.f32.xlu1 %v178_v53  ;;  %215 = vadd.xlane.f32.xlu0 %v179_v57  ;;  %v823_v60 = vsub.f32 %v643_v7, %v118_v58 }
  0x9f   :  { %v63_v62 = vpop.xlane.xlu0 %62  ;;  %v65_v63 = vpop.xlane.xlu1 %64 }
  0xa0   :  { %v119_v0 = vmul.f32 0.0078125, %v63_v62  ;;  %v181_v1 = vmul.f32 %v820_v59, %v820_v59  ;;  %v120_v2 = vmul.f32 0.0078125, %v65_v63  ;;  %v182_v5 = vmul.f32 %v823_v60, %v823_v60 }
  0xa2   :  { %v830_v3 = vsub.f32 %v650_v8, %v119_v0  ;;  %217 = vadd.xlane.f32.xlu1 %v180_v61  ;;  %219 = vadd.xlane.f32.xlu0 %v181_v1  ;;  %v833_v4 = vsub.f32 %v655_v9, %v120_v2 }
  0xa3   :  { %v67_v6 = vpop.xlane.xlu0 %66  ;;  %v69_v7 = vpop.xlane.xlu1 %68 }
  0xa4   :  { %v121_v32 = vmul.f32 0.0078125, %v67_v6  ;;  %v183_v33 = vmul.f32 %v830_v3, %v830_v3  ;;  %v122_v34 = vmul.f32 0.0078125, %v69_v7  ;;  %v184_v9 = vmul.f32 %v833_v4, %v833_v4 }
  0xa6   :  { %v840_v35 = vsub.f32 %v662_v10, %v121_v32  ;;  %221 = vadd.xlane.f32.xlu1 %v182_v5  ;;  %223 = vadd.xlane.f32.xlu0 %v183_v33  ;;  %v843_v8 = vsub.f32 %v667_v11, %v122_v34 }
  0xa7   :  { %v71_v38 = vpop.xlane.xlu0 %70  ;;  %v73_v39 = vpop.xlane.xlu1 %72 }
  0xa8   :  { %v123_v40 = vmul.f32 0.0078125, %v71_v38  ;;  %v185_v41 = vmul.f32 %v840_v35, %v840_v35  ;;  %v124_v42 = vmul.f32 0.0078125, %v73_v39  ;;  %v186_v11 = vmul.f32 %v843_v8, %v843_v8 }
  0xaa   :  { %v850_v45 = vsub.f32 %v674_v12, %v123_v40  ;;  %225 = vadd.xlane.f32.xlu1 %v184_v9  ;;  %227 = vadd.xlane.f32.xlu0 %v185_v41  ;;  %v853_v10 = vsub.f32 %v679_v13, %v124_v42 }
  0xab   :  { %v75_v46 = vpop.xlane.xlu0 %74  ;;  %v77_v47 = vpop.xlane.xlu1 %76 }
  0xac   :  { %v125_v48 = vmul.f32 0.0078125, %v75_v46  ;;  %v187_v49 = vmul.f32 %v850_v45, %v850_v45  ;;  %v126_v50 = vmul.f32 0.0078125, %v77_v47  ;;  %v188_v13 = vmul.f32 %v853_v10, %v853_v10 }
  0xae   :  { %v860_v53 = vsub.f32 %v686_v14, %v125_v48  ;;  %229 = vadd.xlane.f32.xlu1 %v186_v11  ;;  %231 = vadd.xlane.f32.xlu0 %v187_v49  ;;  %v863_v12 = vsub.f32 %v691_v15, %v126_v50 }
  0xaf   :  { %v79_v54 = vpop.xlane.xlu0 %78  ;;  %v81_v55 = vpop.xlane.xlu1 %80 }
  0xb0   :  { %v127_v56 = vmul.f32 0.0078125, %v79_v54  ;;  %v189_v57 = vmul.f32 %v860_v53, %v860_v53  ;;  %v128_v58 = vmul.f32 0.0078125, %v81_v55  ;;  %v190_v15 = vmul.f32 %v863_v12, %v863_v12 }
  0xb2   :  { %v870_v61 = vsub.f32 %v698_v16, %v127_v56  ;;  %233 = vadd.xlane.f32.xlu1 %v188_v13  ;;  %235 = vadd.xlane.f32.xlu0 %v189_v57  ;;  %v873_v14 = vsub.f32 %v703_v17, %v128_v58 }
  0xb3   :  { %v83_v62 = vpop.xlane.xlu0 %82  ;;  %v85_v63 = vpop.xlane.xlu1 %84 }
  0xb4   :  { %v129_v0 = vmul.f32 0.0078125, %v83_v62  ;;  %v191_v1 = vmul.f32 %v870_v61, %v870_v61  ;;  %v130_v2 = vmul.f32 0.0078125, %v85_v63  ;;  %v192_v17 = vmul.f32 %v873_v14, %v873_v14 }
  0xb6   :  { %v880_v5 = vsub.f32 %v710_v18, %v129_v0  ;;  %237 = vadd.xlane.f32.xlu1 %v190_v15  ;;  %239 = vadd.xlane.f32.xlu0 %v191_v1  ;;  %v883_v16 = vsub.f32 %v715_v19, %v130_v2 }
  0xb7   :  { %v87_v6 = vpop.xlane.xlu0 %86  ;;  %v89_v7 = vpop.xlane.xlu1 %88 }
  0xb8   :  { %v131_v32 = vmul.f32 0.0078125, %v87_v6  ;;  %v193_v33 = vmul.f32 %v880_v5, %v880_v5  ;;  %v132_v34 = vmul.f32 0.0078125, %v89_v7  ;;  %v194_v19 = vmul.f32 %v883_v16, %v883_v16 }
  0xba   :  { %v890_v9 = vsub.f32 %v722_v20, %v131_v32  ;;  %241 = vadd.xlane.f32.xlu1 %v192_v17  ;;  %243 = vadd.xlane.f32.xlu0 %v193_v33  ;;  %v893_v18 = vsub.f32 %v727_v21, %v132_v34 }
  0xbb   :  { %v91_v38 = vpop.xlane.xlu0 %90  ;;  %v93_v39 = vpop.xlane.xlu1 %92 }
  0xbc   :  { %v133_v40 = vmul.f32 0.0078125, %v91_v38  ;;  %v195_v41 = vmul.f32 %v890_v9, %v890_v9  ;;  %v134_v42 = vmul.f32 0.0078125, %v93_v39  ;;  %v196_v21 = vmul.f32 %v893_v18, %v893_v18 }
  0xbe   :  { %v900_v11 = vsub.f32 %v734_v22, %v133_v40  ;;  %245 = vadd.xlane.f32.xlu1 %v194_v19  ;;  %247 = vadd.xlane.f32.xlu0 %v195_v41  ;;  %v903_v20 = vsub.f32 %v739_v23, %v134_v42 }
  0xbf   :  { %v95_v46 = vpop.xlane.xlu0 %94  ;;  %v97_v47 = vpop.xlane.xlu1 %96 }
  0xc0   :  { %v135_v48 = vmul.f32 0.0078125, %v95_v46  ;;  %v197_v49 = vmul.f32 %v900_v11, %v900_v11  ;;  %v136_v50 = vmul.f32 0.0078125, %v97_v47  ;;  %v198_v23 = vmul.f32 %v903_v20, %v903_v20 }
  0xc2   :  { %v910_v13 = vsub.f32 %v746_v24, %v135_v48  ;;  %249 = vadd.xlane.f32.xlu1 %v196_v21  ;;  %251 = vadd.xlane.f32.xlu0 %v197_v49  ;;  %v913_v22 = vsub.f32 %v751_v25, %v136_v50 }
  0xc3   :  { %v99_v54 = vpop.xlane.xlu0 %98  ;;  %v101_v55 = vpop.xlane.xlu1 %100 }
  0xc4   :  { %v137_v56 = vmul.f32 0.0078125, %v99_v54  ;;  %v199_v57 = vmul.f32 %v910_v13, %v910_v13  ;;  %v138_v58 = vmul.f32 0.0078125, %v101_v55  ;;  %v200_v25 = vmul.f32 %v913_v22, %v913_v22 }
  0xc6   :  { %v920_v15 = vsub.f32 %v758_v26, %v137_v56  ;;  %253 = vadd.xlane.f32.xlu1 %v198_v23  ;;  %255 = vadd.xlane.f32.xlu0 %v199_v57  ;;  %v923_v24 = vsub.f32 %v763_v27, %v138_v58 }
  0xc7   :  { %v103_v62 = vpop.xlane.xlu0 %102  ;;  %v105_v63 = vpop.xlane.xlu1 %104 }
  0xc8   :  { %v139_v0 = vmul.f32 0.0078125, %v103_v62  ;;  %v201_v1 = vmul.f32 %v920_v15, %v920_v15  ;;  %v140_v2 = vmul.f32 0.0078125, %v105_v63  ;;  %v202_v27 = vmul.f32 %v923_v24, %v923_v24 }
  0xca   :  { %v930_v17 = vsub.f32 %v770_v28, %v139_v0  ;;  %257 = vadd.xlane.f32.xlu1 %v200_v25  ;;  %259 = vadd.xlane.f32.xlu0 %v201_v1  ;;  %v933_v26 = vsub.f32 %v775_v29, %v140_v2  ;;  %v954_v0 = vld [vmem:[%s1154_s1] ss:$0 sm:$0xff] }
  0xcb   :  { %v107_v6 = vpop.xlane.xlu0 %106  ;;  %v109_v7 = vpop.xlane.xlu1 %108 }
  0xcc   :  { %v141_v32 = vmul.f32 0.0078125, %v107_v6  ;;  %v203_v33 = vmul.f32 %v930_v17, %v930_v17  ;;  %v142_v34 = vmul.f32 0.0078125, %v109_v7  ;;  %v204_v29 = vmul.f32 %v933_v26, %v933_v26 }
  0xce   :  { %v940_v19 = vsub.f32 %v782_v30, %v141_v32  ;;  %261 = vadd.xlane.f32.xlu1 %v202_v27  ;;  %263 = vadd.xlane.f32.xlu0 %v203_v33  ;;  %v943_v28 = vsub.f32 %v787_v31, %v142_v34  ;;  %v960_v32 = vld [vmem:[%s1155_s2] ss:$0 sm:$0xff] }
  0xd0   :  { %v205_v38 = vmul.f32 %v940_v19, %v940_v19  ;;  %v206_v39 = vmul.f32 %v943_v28, %v943_v28 }
  0xd2   :  { %265 = vadd.xlane.f32.xlu1 %v204_v29  ;;  %267 = vadd.xlane.f32.xlu0 %v205_v38 }
  0xd6   :  { %269 = vadd.xlane.f32.xlu1 %v206_v39 }
 0x123   :  { %v208_v40 = vpop.xlane.xlu0 %207 }
 0x124   :  { %v271_v30 = vmul.f32 0.0078125, %v208_v40 }
 0x126   :  { %v303_v41 = vadd.f32 1e-05, %v271_v30 }
 0x127   :  { %v210_v42 = vpop.xlane.xlu1 %209  ;;  %v212_v21 = vpop.xlane.xlu0 %211 }
 0x128   :  { %515 = vrsqrt.f32 %v303_v41  ;;  %v272_v31 = vmul.f32 0.0078125, %v210_v42  ;;  %v273_v46 = vmul.f32 0.0078125, %v212_v21 }
 0x12a   :  { %v304_v47 = vadd.f32 1e-05, %v272_v31  ;;  %v305_v48 = vadd.f32 1e-05, %v273_v46 }
 0x12b   :  { %v214_v49 = vpop.xlane.xlu1 %213  ;;  %v216_v50 = vpop.xlane.xlu0 %215 }
 0x12c   :  { %517 = vrsqrt.f32 %v304_v47  ;;  %v274_v23 = vmul.f32 0.0078125, %v214_v49  ;;  %v275_v54 = vmul.f32 0.0078125, %v216_v50 }
 0x12d   :  { %519 = vrsqrt.f32 %v305_v48 }
 0x12e   :  { %v306_v55 = vadd.f32 1e-05, %v274_v23  ;;  %v307_v56 = vadd.f32 1e-05, %v275_v54 }
 0x12f   :  { %v218_v57 = vpop.xlane.xlu1 %217  ;;  %v220_v58 = vpop.xlane.xlu0 %219 }
 0x130   :  { %521 = vrsqrt.f32 %v306_v55  ;;  %v276_v25 = vmul.f32 0.0078125, %v218_v57  ;;  %v277_v62 = vmul.f32 0.0078125, %v220_v58 }
 0x131   :  { %523 = vrsqrt.f32 %v307_v56 }
 0x132   :  { %v516_v63 = vpop.eup %515  ;;  %v308_v1 = vadd.f32 1e-05, %v276_v25  ;;  %v309_v2 = vadd.f32 1e-05, %v277_v62 }
 0x133   :  { %v367_v27 = vmul.f32 %v516_v63, %v792_v36  ;;  %v222_v6 = vpop.xlane.xlu1 %221  ;;  %v224_v7 = vpop.xlane.xlu0 %223 }
 0x134   :  { %525 = vrsqrt.f32 %v308_v1  ;;  %v278_v33 = vmul.f32 0.0078125, %v222_v6  ;;  %v279_v34 = vmul.f32 0.0078125, %v224_v7 }
 0x135   :  { %v406_v29 = vmul.f32 %v954_v0, %v367_v27  ;;  %527 = vrsqrt.f32 %v309_v2 }
 0x136   :  { %v518_v38 = vpop.eup %517  ;;  %v310_v39 = vadd.f32 1e-05, %v278_v33  ;;  %v311_v40 = vadd.f32 1e-05, %v279_v34 }
 0x137   :  { %v520_v30 = vpop.eup %519  ;;  %v445_v41 = vadd.f32 %v960_v32, %v406_v29  ;;  %v368_v36 = vmul.f32 %v518_v38, %v800_v43  ;;  %v226_v42 = vpop.xlane.xlu1 %225 }
 0x138   :  { %v228_v21 = vpop.xlane.xlu0 %227  ;;  %v369_v31 = vmul.f32 %v520_v30, %v795_v37  ;;  %529 = vrsqrt.f32 %v310_v39  ;;  %v280_v46 = vmul.f32 0.0078125, %v226_v42 }
 0x139   :  { %v281_v47 = vmul.f32 0.0078125, %v228_v21  ;;  %477 = vst [vmem:[%s1156_s3] sm:$0xff] %v445_v41  ;;  %v407_v48 = vmul.f32 %v954_v0, %v368_v36  ;;  %531 = vrsqrt.f32 %v311_v40 }
 0x13a   :  { %v522_v49 = vpop.eup %521  ;;  %v408_v50 = vmul.f32 %v954_v0, %v369_v31  ;;  %v312_v23 = vadd.f32 1e-05, %v280_v46 }
 0x13b   :  { %v313_v54 = vadd.f32 1e-05, %v281_v47  ;;  %v524_v43 = vpop.eup %523  ;;  %v446_v55 = vadd.f32 %v960_v32, %v407_v48  ;;  %v370_v37 = vmul.f32 %v522_v49, %v803_v44  ;;  %v230_v56 = vpop.xlane.xlu1 %229 }
 0x13c   :  { %v232_v57 = vpop.xlane.xlu0 %231  ;;  %v447_v58 = vadd.f32 %v960_v32, %v408_v50  ;;  %v371_v25 = vmul.f32 %v524_v43, %v810_v51  ;;  %533 = vrsqrt.f32 %v312_v23  ;;  %v282_v62 = vmul.f32 0.0078125, %v230_v56 }
 0x13d   :  { %478 = vst [vmem:[%s1156_s3 + $0x8] sm:$0xff] %v446_v55  ;;  %v409_v63 = vmul.f32 %v954_v0, %v370_v37  ;;  %535 = vrsqrt.f32 %v313_v54  ;;  %v283_v1 = vmul.f32 0.0078125, %v232_v57 }
 0x13e   :  { %v526_v2 = vpop.eup %525  ;;  %479 = vst [vmem:[%s1156_s3 + $0x10] sm:$0xff] %v447_v58  ;;  %v410_v44 = vmul.f32 %v954_v0, %v371_v25  ;;  %v314_v27 = vadd.f32 1e-05, %v282_v62 }
 0x13f   :  { %v528_v6 = vpop.eup %527  ;;  %v448_v51 = vadd.f32 %v960_v32, %v409_v63  ;;  %v372_v7 = vmul.f32 %v526_v2, %v813_v52  ;;  %v315_v33 = vadd.f32 1e-05, %v283_v1  ;;  %v234_v34 = vpop.xlane.xlu1 %233 }
 0x140   :  { %v236_v29 = vpop.xlane.xlu0 %235  ;;  %v449_v38 = vadd.f32 %v960_v32, %v410_v44  ;;  %v373_v39 = vmul.f32 %v528_v6, %v820_v59  ;;  %537 = vrsqrt.f32 %v314_v27  ;;  %v284_v40 = vmul.f32 0.0078125, %v234_v34 }
 0x141   :  { %480 = vst [vmem:[%s1156_s3 + $0x18] sm:$0xff] %v448_v51  ;;  %v411_v30 = vmul.f32 %v954_v0, %v372_v7  ;;  %539 = vrsqrt.f32 %v315_v33  ;;  %v285_v41 = vmul.f32 0.0078125, %v236_v29 }
 0x142   :  { %v530_v36 = vpop.eup %529  ;;  %481 = vst [vmem:[%s1156_s3 + $0x20] sm:$0xff] %v449_v38  ;;  %v412_v52 = vmul.f32 %v954_v0, %v373_v39  ;;  %v316_v42 = vadd.f32 1e-05, %v284_v40 }
 0x143   :  { %v532_v21 = vpop.eup %531  ;;  %v450_v59 = vadd.f32 %v960_v32, %v411_v30  ;;  %v374_v31 = vmul.f32 %v530_v36, %v823_v60  ;;  %v317_v46 = vadd.f32 1e-05, %v285_v41  ;;  %v238_v47 = vpop.xlane.xlu1 %237 }
 0x144   :  { %v240_v48 = vpop.xlane.xlu0 %239  ;;  %v451_v49 = vadd.f32 %v960_v32, %v412_v52  ;;  %v375_v50 = vmul.f32 %v532_v21, %v830_v3  ;;  %541 = vrsqrt.f32 %v316_v42  ;;  %v286_v23 = vmul.f32 0.0078125, %v238_v47 }
 0x145   :  { %482 = vst [vmem:[%s1156_s3 + $0x28] sm:$0xff] %v450_v59  ;;  %v413_v54 = vmul.f32 %v954_v0, %v374_v31  ;;  %543 = vrsqrt.f32 %v317_v46  ;;  %v287_v43 = vmul.f32 0.0078125, %v240_v48 }
 0x146   :  { %v534_v55 = vpop.eup %533  ;;  %483 = vst [vmem:[%s1156_s3 + $0x30] sm:$0xff] %v451_v49  ;;  %v414_v60 = vmul.f32 %v954_v0, %v375_v50  ;;  %v318_v37 = vadd.f32 1e-05, %v286_v23 }
 0x147   :  { %v536_v56 = vpop.eup %535  ;;  %v452_v3 = vadd.f32 %v960_v32, %v413_v54  ;;  %v376_v57 = vmul.f32 %v534_v55, %v833_v4  ;;  %v319_v58 = vadd.f32 1e-05, %v287_v43  ;;  %v242_v25 = vpop.xlane.xlu1 %241 }
 0x148   :  { %v244_v62 = vpop.xlane.xlu0 %243  ;;  %v453_v63 = vadd.f32 %v960_v32, %v414_v60  ;;  %v377_v1 = vmul.f32 %v536_v56, %v840_v35  ;;  %545 = vrsqrt.f32 %v318_v37  ;;  %v288_v2 = vmul.f32 0.0078125, %v242_v25 }
 0x149   :  { %484 = vst [vmem:[%s1156_s3 + $0x38] sm:$0xff] %v452_v3  ;;  %v415_v44 = vmul.f32 %v954_v0, %v376_v57  ;;  %547 = vrsqrt.f32 %v319_v58  ;;  %v289_v27 = vmul.f32 0.0078125, %v244_v62 }
 0x14a   :  { %v538_v6 = vpop.eup %537  ;;  %485 = vst [vmem:[%s1156_s3 + $0x40] sm:$0xff] %v453_v63  ;;  %v416_v4 = vmul.f32 %v954_v0, %v377_v1  ;;  %v320_v51 = vadd.f32 1e-05, %v288_v2 }
 0x14b   :  { %v540_v7 = vpop.eup %539  ;;  %v454_v35 = vadd.f32 %v960_v32, %v415_v44  ;;  %v378_v33 = vmul.f32 %v538_v6, %v843_v8  ;;  %v321_v34 = vadd.f32 1e-05, %v289_v27  ;;  %v246_v29 = vpop.xlane.xlu1 %245 }
 0x14c   :  { %v248_v38 = vpop.xlane.xlu0 %247  ;;  %v455_v39 = vadd.f32 %v960_v32, %v416_v4  ;;  %v379_v40 = vmul.f32 %v540_v7, %v850_v45  ;;  %549 = vrsqrt.f32 %v320_v51  ;;  %v290_v30 = vmul.f32 0.0078125, %v246_v29 }
 0x14d   :  { %486 = vst [vmem:[%s1156_s3 + $0x48] sm:$0xff] %v454_v35  ;;  %v417_v41 = vmul.f32 %v954_v0, %v378_v33  ;;  %551 = vrsqrt.f32 %v321_v34  ;;  %v291_v36 = vmul.f32 0.0078125, %v248_v38 }
 0x14e   :  { %v542_v52 = vpop.eup %541  ;;  %487 = vst [vmem:[%s1156_s3 + $0x50] sm:$0xff] %v455_v39  ;;  %v418_v8 = vmul.f32 %v954_v0, %v379_v40  ;;  %v322_v42 = vadd.f32 1e-05, %v290_v30 }
 0x14f   :  { %v544_v21 = vpop.eup %543  ;;  %v456_v45 = vadd.f32 %v960_v32, %v417_v41  ;;  %v380_v59 = vmul.f32 %v542_v52, %v853_v10  ;;  %v323_v31 = vadd.f32 1e-05, %v291_v36  ;;  %v250_v46 = vpop.xlane.xlu1 %249 }
 0x150   :  { %v252_v47 = vpop.xlane.xlu0 %251  ;;  %v457_v48 = vadd.f32 %v960_v32, %v418_v8  ;;  %v381_v49 = vmul.f32 %v544_v21, %v860_v53  ;;  %553 = vrsqrt.f32 %v322_v42  ;;  %v292_v50 = vmul.f32 0.0078125, %v250_v46 }
 0x151   :  { %488 = vst [vmem:[%s1156_s3 + $0x58] sm:$0xff] %v456_v45  ;;  %v419_v23 = vmul.f32 %v954_v0, %v380_v59  ;;  %555 = vrsqrt.f32 %v323_v31  ;;  %v293_v54 = vmul.f32 0.0078125, %v252_v47 }
 0x152   :  { %v546_v43 = vpop.eup %545  ;;  %489 = vst [vmem:[%s1156_s3 + $0x60] sm:$0xff] %v457_v48  ;;  %v420_v10 = vmul.f32 %v954_v0, %v381_v49  ;;  %v324_v55 = vadd.f32 1e-05, %v292_v50 }
 0x153   :  { %v548_v60 = vpop.eup %547  ;;  %v458_v53 = vadd.f32 %v960_v32, %v419_v23  ;;  %v382_v37 = vmul.f32 %v546_v43, %v863_v12  ;;  %v325_v56 = vadd.f32 1e-05, %v293_v54  ;;  %v254_v3 = vpop.xlane.xlu1 %253 }
 0x154   :  { %v256_v57 = vpop.xlane.xlu0 %255  ;;  %v459_v58 = vadd.f32 %v960_v32, %v420_v10  ;;  %v383_v25 = vmul.f32 %v548_v60, %v870_v61  ;;  %557 = vrsqrt.f32 %v324_v55  ;;  %v294_v62 = vmul.f32 0.0078125, %v254_v3 }
 0x155   :  { %490 = vst [vmem:[%s1156_s3 + $0x68] sm:$0xff] %v458_v53  ;;  %v421_v63 = vmul.f32 %v954_v0, %v382_v37  ;;  %559 = vrsqrt.f32 %v325_v56  ;;  %v295_v1 = vmul.f32 0.0078125, %v256_v57 }
 0x156   :  { %v550_v2 = vpop.eup %549  ;;  %491 = vst [vmem:[%s1156_s3 + $0x70] sm:$0xff] %v459_v58  ;;  %v422_v12 = vmul.f32 %v954_v0, %v383_v25  ;;  %v326_v44 = vadd.f32 1e-05, %v294_v62 }
 0x157   :  { %v552_v27 = vpop.eup %551  ;;  %v460_v61 = vadd.f32 %v960_v32, %v421_v63  ;;  %v384_v6 = vmul.f32 %v550_v2, %v873_v14  ;;  %v327_v4 = vadd.f32 1e-05, %v295_v1  ;;  %v258_v51 = vpop.xlane.xlu1 %257 }
 0x158   :  { %v260_v7 = vpop.xlane.xlu0 %259  ;;  %v461_v35 = vadd.f32 %v960_v32, %v422_v12  ;;  %v385_v33 = vmul.f32 %v552_v27, %v880_v5  ;;  %561 = vrsqrt.f32 %v326_v44  ;;  %v296_v34 = vmul.f32 0.0078125, %v258_v51 }
 0x159   :  { %492 = vst [vmem:[%s1156_s3 + $0x78] sm:$0xff] %v460_v61  ;;  %v423_v29 = vmul.f32 %v954_v0, %v384_v6  ;;  %563 = vrsqrt.f32 %v327_v4  ;;  %v297_v38 = vmul.f32 0.0078125, %v260_v7 }
 0x15a   :  { %v554_v39 = vpop.eup %553  ;;  %493 = vst [vmem:[%s1156_s3 + $0x80] sm:$0xff] %v461_v35  ;;  %v424_v14 = vmul.f32 %v954_v0, %v385_v33  ;;  %v328_v40 = vadd.f32 1e-05, %v296_v34 }
 0x15b   :  { %v556_v30 = vpop.eup %555  ;;  %v462_v5 = vadd.f32 %v960_v32, %v423_v29  ;;  %v386_v41 = vmul.f32 %v554_v39, %v883_v16  ;;  %v329_v36 = vadd.f32 1e-05, %v297_v38  ;;  %v262_v52 = vpop.xlane.xlu1 %261 }
 0x15c   :  { %v264_v8 = vpop.xlane.xlu0 %263  ;;  %v463_v42 = vadd.f32 %v960_v32, %v424_v14  ;;  %v387_v21 = vmul.f32 %v556_v30, %v890_v9  ;;  %565 = vrsqrt.f32 %v328_v40  ;;  %v298_v45 = vmul.f32 0.0078125, %v262_v52 }
 0x15d   :  { %494 = vst [vmem:[%s1156_s3 + $0x88] sm:$0xff] %v462_v5  ;;  %v425_v59 = vmul.f32 %v954_v0, %v386_v41  ;;  %567 = vrsqrt.f32 %v329_v36  ;;  %v299_v31 = vmul.f32 0.0078125, %v264_v8 }
 0x15e   :  { %v558_v46 = vpop.eup %557  ;;  %495 = vst [vmem:[%s1156_s3 + $0x90] sm:$0xff] %v463_v42  ;;  %v426_v16 = vmul.f32 %v954_v0, %v387_v21  ;;  %v330_v47 = vadd.f32 1e-05, %v298_v45 }
 0x15f   :  { %v560_v48 = vpop.eup %559  ;;  %v464_v9 = vadd.f32 %v960_v32, %v425_v59  ;;  %v388_v49 = vmul.f32 %v558_v46, %v893_v18  ;;  %v331_v50 = vadd.f32 1e-05, %v299_v31  ;;  %v266_v23 = vpop.xlane.xlu1 %265 }
 0x160   :  { %v268_v54 = vpop.xlane.xlu0 %267  ;;  %v465_v43 = vadd.f32 %v960_v32, %v426_v16  ;;  %v389_v10 = vmul.f32 %v560_v48, %v900_v11  ;;  %569 = vrsqrt.f32 %v330_v47  ;;  %v300_v55 = vmul.f32 0.0078125, %v266_v23 }
 0x161   :  { %496 = vst [vmem:[%s1156_s3 + $0x98] sm:$0xff] %v464_v9  ;;  %v427_v60 = vmul.f32 %v954_v0, %v388_v49  ;;  %571 = vrsqrt.f32 %v331_v50  ;;  %v301_v53 = vmul.f32 0.0078125, %v268_v54 }
 0x162   :  { %v562_v37 = vpop.eup %561  ;;  %497 = vst [vmem:[%s1156_s3 + $0xa0] sm:$0xff] %v465_v43  ;;  %v428_v18 = vmul.f32 %v954_v0, %v389_v10  ;;  %v332_v56 = vadd.f32 1e-05, %v300_v55 }
 0x163   :  { %v564_v3 = vpop.eup %563  ;;  %v466_v11 = vadd.f32 %v960_v32, %v427_v60  ;;  %v390_v57 = vmul.f32 %v562_v37, %v903_v20  ;;  %v333_v58 = vadd.f32 1e-05, %v301_v53  ;;  %v270_v25 = vpop.xlane.xlu1 %269 }
 0x164   :  { %v467_v62 = vadd.f32 %v960_v32, %v428_v18  ;;  %v391_v63 = vmul.f32 %v564_v3, %v910_v13  ;;  %573 = vrsqrt.f32 %v332_v56  ;;  %v302_v1 = vmul.f32 0.0078125, %v270_v25 }
 0x165   :  { %498 = vst [vmem:[%s1156_s3 + $0xa8] sm:$0xff] %v466_v11  ;;  %v429_v2 = vmul.f32 %v954_v0, %v390_v57  ;;  %575 = vrsqrt.f32 %v333_v58 }
 0x166   :  { %v566_v12 = vpop.eup %565  ;;  %499 = vst [vmem:[%s1156_s3 + $0xb0] sm:$0xff] %v467_v62  ;;  %v430_v20 = vmul.f32 %v954_v0, %v391_v63  ;;  %v334_v44 = vadd.f32 1e-05, %v302_v1 }
 0x167   :  { %v568_v27 = vpop.eup %567  ;;  %v468_v13 = vadd.f32 %v960_v32, %v429_v2  ;;  %v392_v61 = vmul.f32 %v566_v12, %v913_v22 }
 0x168   :  { %v469_v6 = vadd.f32 %v960_v32, %v430_v20  ;;  %v393_v4 = vmul.f32 %v568_v27, %v920_v15  ;;  %577 = vrsqrt.f32 %v334_v44 }
 0x169   :  { %500 = vst [vmem:[%s1156_s3 + $0xb8] sm:$0xff] %v468_v13  ;;  %v431_v51 = vmul.f32 %v954_v0, %v392_v61 }
 0x16a   :  { %v570_v7 = vpop.eup %569  ;;  %501 = vst [vmem:[%s1156_s3 + $0xc0] sm:$0xff] %v469_v6  ;;  %v432_v35 = vmul.f32 %v954_v0, %v393_v4 }
 0x16b   :  { %v572_v33 = vpop.eup %571  ;;  %v470_v22 = vadd.f32 %v960_v32, %v431_v51  ;;  %v394_v34 = vmul.f32 %v570_v7, %v923_v24 }
 0x16c   :  { %v471_v15 = vadd.f32 %v960_v32, %v432_v35  ;;  %v395_v29 = vmul.f32 %v572_v33, %v930_v17 }
 0x16d   :  { %502 = vst [vmem:[%s1156_s3 + $0xc8] sm:$0xff] %v470_v22  ;;  %v433_v38 = vmul.f32 %v954_v0, %v394_v34 }
 0x16e   :  { %v574_v39 = vpop.eup %573  ;;  %503 = vst [vmem:[%s1156_s3 + $0xd0] sm:$0xff] %v471_v15  ;;  %v434_v14 = vmul.f32 %v954_v0, %v395_v29 }
 0x16f   :  { %v576_v40 = vpop.eup %575  ;;  %v472_v24 = vadd.f32 %v960_v32, %v433_v38  ;;  %v396_v30 = vmul.f32 %v574_v39, %v933_v26 }
 0x170   :  { %v473_v17 = vadd.f32 %v960_v32, %v434_v14  ;;  %v397_v5 = vmul.f32 %v576_v40, %v940_v19 }
 0x171   :  { %504 = vst [vmem:[%s1156_s3 + $0xd8] sm:$0xff] %v472_v24  ;;  %v435_v41 = vmul.f32 %v954_v0, %v396_v30 }
 0x172   :  { %v578_v36 = vpop.eup %577  ;;  %505 = vst [vmem:[%s1156_s3 + $0xe0] sm:$0xff] %v473_v17  ;;  %v436_v52 = vmul.f32 %v954_v0, %v397_v5 }
 0x173   :  { %v474_v8 = vadd.f32 %v960_v32, %v435_v41  ;;  %v398_v26 = vmul.f32 %v578_v36, %v943_v28 }
 0x174   :  { %v475_v42 = vadd.f32 %v960_v32, %v436_v52 }
 0x175   :  { %506 = vst [vmem:[%s1156_s3 + $0xe8] sm:$0xff] %v474_v8  ;;  %v437_v19 = vmul.f32 %v954_v0, %v398_v26 }
 0x176   :  { %507 = vst [vmem:[%s1156_s3 + $0xf0] sm:$0xff] %v475_v42 }
 0x177   :  { %v476_v21 = vadd.f32 %v960_v32, %v437_v19 }
 0x179   :  { %508 = vst [vmem:[%s1156_s3 + $0xf8] sm:$0xff] %v476_v21 }

// kernel: encoder_forward.14
= control target key start
LH: loop header
LB: loop body
LE: loop exit
PB: predicated region body
PF: predicated region fallthrough
CT: control target
= control target key end

     0   :  { %s4194_s12 = smov 0   ;;  %s5269_s0 = inlined_call_operand.vmem [shape: f32[2,4,128,32], index: 0, kind: input, shape index: {}]   ;;  %s5270_s1 = inlined_call_operand.vmem [shape: f32[2,4,128,32], index: 1, kind: input, shape index: {}]   ;;  %s5271_s2 = inlined_call_operand.vmem [shape: f32[2,4,128,32], index: 2, kind: input, shape index: {}]   ;;  %s5272_s3 = inlined_call_operand.vmem [shape: f32[2,4,128,32], index: 3, kind: output, shape index: {}]  }
   0x1 LB: > { %s2731_s13 = sadd.s32 4294967295, %s4172_s12   ;;  %p2735_p0 = scmp.ge.s32.totalorder %s4172_s12, 1  ;;  %s4172_s12 = sphi %s4194_s12, %s13_s12  }
   0x2   : > { %p157_p1 = scmp.lt.s32.totalorder %s4172_s12, 3 }
   0x4   : > { %p158_p2 = pnand %p2735_p0, %p157_p1 }
   0x6   : > { %161 = sbr.rel (%p158_p2) target bundleno = 955 (0x3bb), region = 32 }
   0xd   : > { %p191_p3 = scmp.lt.s32.totalorder %s2731_s13, 1  ;;  %vm403_vm0 = vcmask 261120  }
   0xe   : > { %vm4212_vm1 = vmpackc.low %vm403_vm0, %vm403_vm0 }
   0xf   : > { %s5378_s13 = smov (!%p191_p3, %s2731_s13), 1 }
  0x10   : > { %s4202_s14 = sshll.u32 %s5378_s13, 9 }
  0x11   : > { %s4208_s17 = scalar_lea.vmem %s5270_s1, %s4202_s14  ;;  %s4244_s20 = scalar_lea.vmem %s5269_s0, %s4202_s14 }
  0x12   : > { %v275_v1 = vld [vmem:[%s4208_s17] sm:$0xff]  ;;  %v276_v2 = vld [vmem:[%s4208_s17 + $0x8] sm:$0xff]  ;;  %v277_v6 = vld [vmem:[%s4208_s17 + $0x10] sm:$0xff]  ;;  %s4745_s23 = scalar_lea.vmem %s5271_s2, %s4202_s14  ;;  %s5136_s26 = scalar_lea.vmem %s5272_s3, %s4202_s14 }
  0x13   : > { %v291_v3 = vld [vmem:[%s4208_s17 + $0x80] sm:$0xff]  ;;  %v3582_v4 = vpack.c.bf16 %v276_v2, %v275_v1  ;;  %v292_v5 = vld [vmem:[%s4208_s17 + $0x88] sm:$0xff]  ;;  %v278_v7 = vld [vmem:[%s4208_s17 + $0x18] sm:$0xff] }
  0x14   : > { %v3630_v8 = vpack.c.bf16 %v292_v5, %v291_v3  ;;  %v3588_v9 = vpack.c.bf16 %v278_v7, %v277_v6  ;;  %v293_v10 = vld [vmem:[%s4208_s17 + $0x90] sm:$0xff]  ;;  %v294_v11 = vld [vmem:[%s4208_s17 + $0x98] sm:$0xff]  ;;  %v279_v13 = vld [vmem:[%s4208_s17 + $0x20] sm:$0xff] }
  0x15   : > { %3584 = vmatprep.subr.msk.bf16.mxu0 %vm4212_vm1, %v3582_v4  ;;  %v3636_v12 = vpack.c.bf16 %v294_v11, %v293_v10  ;;  %v280_v14 = vld [vmem:[%s4208_s17 + $0x28] sm:$0xff]  ;;  %v295_v15 = vld [vmem:[%s4208_s17 + $0xa0] sm:$0xff]  ;;  %v281_v21 = vld [vmem:[%s4208_s17 + $0x30] sm:$0xff] }
  0x16   : > { %3632 = vmatprep.subr.msk.bf16.mxu1 %vm4212_vm1, %v3630_v8  ;;  %3587 = vmatpush3.bf16.xpose.msk.msra.mxu0 %vm4212_vm1, %v3582_v4  ;;  %v296_v16 = vld [vmem:[%s4208_s17 + $0xa8] sm:$0xff]  ;;  %v3594_v17 = vpack.c.bf16 %v280_v14, %v279_v13  ;;  %v211_v19 = vld [vmem:[%s4244_s20] sm:$0xff]  ;;  %v282_v22 = vld [vmem:[%s4208_s17 + $0x38] sm:$0xff] }
  0x17   : > { %3635 = vmatpush3.bf16.xpose.msk.msra.mxu1 %vm4212_vm1, %v3630_v8  ;;  %3590 = vmatprep.subr.msk.bf16.mxu0 %vm4212_vm1, %v3588_v9  ;;  %v3642_v18 = vpack.c.bf16 %v296_v16, %v295_v15  ;;  %v227_v20 = vld [vmem:[%s4244_s20 + $0x80] sm:$0xff]  ;;  %v297_v23 = vld [vmem:[%s4208_s17 + $0xb0] sm:$0xff]  ;;  %v298_v24 = vld [vmem:[%s4208_s17 + $0xb8] sm:$0xff]  ;;  %v3600_v25 = vpack.c.bf16 %v282_v22, %v281_v21 }
  0x18   : > { %3638 = vmatprep.subr.msk.bf16.mxu1 %vm4212_vm1, %v3636_v12  ;;  %3166 = vmatprep.mubr.msk.f32.mxu0 %vm403_vm0, %v211_v19  ;;  %v3648_v26 = vpack.c.bf16 %v298_v24, %v297_v23  ;;  %v283_v27 = vld [vmem:[%s4208_s17 + $0x40] sm:$0xff]  ;;  %v284_v28 = vld [vmem:[%s4208_s17 + $0x48] sm:$0xff]  ;;  %v285_v33 = vld [vmem:[%s4208_s17 + $0x50] sm:$0xff] }
  0x19   : > { %3222 = vmatprep.mubr.msk.f32.mxu1 %vm403_vm0, %v227_v20  ;;  %v299_v29 = vld [vmem:[%s4208_s17 + $0xc0] sm:$0xff]  ;;  %v300_v30 = vld [vmem:[%s4208_s17 + $0xc8] sm:$0xff]  ;;  %v3606_v31 = vpack.c.bf16 %v284_v28, %v283_v27  ;;  %v286_v34 = vld [vmem:[%s4208_s17 + $0x58] sm:$0xff] }
  0x1a   : > { %v3654_v32 = vpack.c.bf16 %v300_v30, %v299_v29  ;;  %v301_v35 = vld [vmem:[%s4208_s17 + $0xd0] sm:$0xff]  ;;  %v302_v36 = vld [vmem:[%s4208_s17 + $0xd8] sm:$0xff]  ;;  %v3612_v37 = vpack.c.bf16 %v286_v34, %v285_v33  ;;  %v287_v39 = vld [vmem:[%s4208_s17 + $0x60] sm:$0xff] }
  0x1b   : > { %v3660_v38 = vpack.c.bf16 %v302_v36, %v301_v35  ;;  %v288_v40 = vld [vmem:[%s4208_s17 + $0x68] sm:$0xff]  ;;  %v303_v41 = vld [vmem:[%s4208_s17 + $0xe0] sm:$0xff]  ;;  %v289_v45 = vld [vmem:[%s4208_s17 + $0x70] sm:$0xff] }
  0x1c   : > { %v304_v42 = vld [vmem:[%s4208_s17 + $0xe8] sm:$0xff]  ;;  %v3618_v43 = vpack.c.bf16 %v288_v40, %v287_v39  ;;  %v290_v46 = vld [vmem:[%s4208_s17 + $0x78] sm:$0xff]  ;;  %v305_v47 = vld [vmem:[%s4208_s17 + $0xf0] sm:$0xff] }
  0x1d   : > { %v3666_v44 = vpack.c.bf16 %v304_v42, %v303_v41  ;;  %v306_v48 = vld [vmem:[%s4208_s17 + $0xf8] sm:$0xff]  ;;  %v3624_v49 = vpack.c.bf16 %v290_v46, %v289_v45  ;;  %v307_v51 = vld [vmem:[%s4208_s17 + $0x100] sm:$0xff]  ;;  %v308_v52 = vld [vmem:[%s4208_s17 + $0x108] sm:$0xff] }
  0x1e   : > { %3593 = vmatpush3.bf16.xpose.msk.msra.mxu0 %vm4212_vm1, %v3588_v9  ;;  %v3672_v50 = vpack.c.bf16 %v306_v48, %v305_v47  ;;  %v323_v53 = vld [vmem:[%s4208_s17 + $0x180] sm:$0xff]  ;;  %v324_v54 = vld [vmem:[%s4208_s17 + $0x188] sm:$0xff]  ;;  %v3678_v55 = vpack.c.bf16 %v308_v52, %v307_v51  ;;  %v309_v57 = vld [vmem:[%s4208_s17 + $0x110] sm:$0xff] }
  0x1f   : > { %3641 = vmatpush3.bf16.xpose.msk.msra.mxu1 %vm4212_vm1, %v3636_v12  ;;  %3596 = vmatprep.subr.msk.bf16.mxu0 %vm4212_vm1, %v3594_v17  ;;  %v3726_v56 = vpack.c.bf16 %v324_v54, %v323_v53  ;;  %v310_v58 = vld [vmem:[%s4208_s17 + $0x118] sm:$0xff]  ;;  %v212_v59 = vld [vmem:[%s4244_s20 + $0x8] sm:$0xff]  ;;  %v325_v60 = vld [vmem:[%s4208_s17 + $0x190] sm:$0xff] }
  0x20   : > { %3644 = vmatprep.subr.msk.bf16.mxu1 %vm4212_vm1, %v3642_v18  ;;  %v326_v61 = vld [vmem:[%s4208_s17 + $0x198] sm:$0xff]  ;;  %v228_v62 = vld [vmem:[%s4244_s20 + $0x88] sm:$0xff]  ;;  %v213_v63 = vld [vmem:[%s4244_s20 + $0x10] sm:$0xff]  ;;  %v3684_v1 = vpack.c.bf16 %v310_v58, %v309_v57 }
  0x21   : > { %v229_v2 = vld [vmem:[%s4244_s20 + $0x90] sm:$0xff]  ;;  %v3732_v3 = vpack.c.bf16 %v326_v61, %v325_v60  ;;  %v214_v4 = vld [vmem:[%s4244_s20 + $0x18] sm:$0xff]  ;;  %v215_v6 = vld [vmem:[%s4244_s20 + $0x20] sm:$0xff] }
  0x22   : > { %v230_v5 = vld [vmem:[%s4244_s20 + $0x98] sm:$0xff]  ;;  %v231_v7 = vld [vmem:[%s4244_s20 + $0xa0] sm:$0xff]  ;;  %v312_v9 = vld [vmem:[%s4208_s17 + $0x128] sm:$0xff] }
  0x23   : > { %v311_v8 = vld [vmem:[%s4208_s17 + $0x120] sm:$0xff]  ;;  %v328_v11 = vld [vmem:[%s4208_s17 + $0x1a8] sm:$0xff]  ;;  %v217_v16 = vld [vmem:[%s4244_s20 + $0x30] sm:$0xff] }
  0x24   : > { %v327_v10 = vld [vmem:[%s4208_s17 + $0x1a0] sm:$0xff]  ;;  %v216_v12 = vld [vmem:[%s4244_s20 + $0x28] sm:$0xff]  ;;  %v3690_v14 = vpack.c.bf16 %v312_v9, %v311_v8  ;;  %v234_v19 = vld [vmem:[%s4244_s20 + $0xb8] sm:$0xff] }
  0x25   : > { %v232_v13 = vld [vmem:[%s4244_s20 + $0xa8] sm:$0xff]  ;;  %v3738_v15 = vpack.c.bf16 %v328_v11, %v327_v10  ;;  %v219_v20 = vld [vmem:[%s4244_s20 + $0x40] sm:$0xff]  ;;  %v313_v21 = vld [vmem:[%s4208_s17 + $0x130] sm:$0xff] }
  0x26   : > { %3599 = vmatpush3.bf16.xpose.msk.msra.mxu0 %vm4212_vm1, %v3594_v17  ;;  %v233_v17 = vld [vmem:[%s4244_s20 + $0xb0] sm:$0xff]  ;;  %v314_v22 = vld [vmem:[%s4208_s17 + $0x138] sm:$0xff]  ;;  %v235_v23 = vld [vmem:[%s4244_s20 + $0xc0] sm:$0xff] }
  0x27   : > { %3647 = vmatpush3.bf16.xpose.msk.msra.mxu1 %vm4212_vm1, %v3642_v18  ;;  %3602 = vmatprep.subr.msk.bf16.mxu0 %vm4212_vm1, %v3600_v25  ;;  %v218_v18 = vld [vmem:[%s4244_s20 + $0x38] sm:$0xff]  ;;  %v329_v24 = vld [vmem:[%s4208_s17 + $0x1b0] sm:$0xff]  ;;  %v3696_v27 = vpack.c.bf16 %v314_v22, %v313_v21  ;;  %v236_v28 = vld [vmem:[%s4244_s20 + $0xc8] sm:$0xff] }
  0x28   : > { %3650 = vmatprep.subr.msk.bf16.mxu1 %vm4212_vm1, %v3648_v26  ;;  %v221_v30 = vld [vmem:[%s4244_s20 + $0x50] sm:$0xff]  ;;  %v238_v33 = vld [vmem:[%s4244_s20 + $0xd8] sm:$0xff]  ;;  %v223_v34 = vld [vmem:[%s4244_s20 + $0x60] sm:$0xff] }
  0x29   : > { %v315_v35 = vld [vmem:[%s4208_s17 + $0x140] sm:$0xff]  ;;  %v316_v36 = vld [vmem:[%s4208_s17 + $0x148] sm:$0xff]  ;;  %v241_v45 = vld [vmem:[%s4244_s20 + $0xf0] sm:$0xff] }
  0x2a   : > { %v332_v39 = vld [vmem:[%s4208_s17 + $0x1c8] sm:$0xff]  ;;  %v3702_v41 = vpack.c.bf16 %v316_v36, %v315_v35  ;;  %v226_v46 = vld [vmem:[%s4244_s20 + $0x78] sm:$0xff]  ;;  %v243_v48 = vld [vmem:[%s4244_s20 + $0x100] sm:$0xff] }
  0x2b   : > { %v224_v40 = vld [vmem:[%s4244_s20 + $0x68] sm:$0xff]  ;;  %v242_v47 = vld [vmem:[%s4244_s20 + $0xf8] sm:$0xff]  ;;  %v259_v51 = vld [vmem:[%s4244_s20 + $0x180] sm:$0xff] }
  0x2c   : > { %v240_v42 = vld [vmem:[%s4244_s20 + $0xe8] sm:$0xff]  ;;  %v333_v52 = vld [vmem:[%s4208_s17 + $0x1d0] sm:$0xff]  ;;  %v334_v53 = vld [vmem:[%s4208_s17 + $0x1d8] sm:$0xff] }
  0x2d   : > { %v320_v57 = vld [vmem:[%s4208_s17 + $0x168] sm:$0xff]  ;;  %v335_v58 = vld [vmem:[%s4208_s17 + $0x1e0] sm:$0xff]  ;;  %v261_v8 = vld [vmem:[%s4244_s20 + $0x190] sm:$0xff] }
  0x2e   : > { %3605 = vmatpush3.bf16.xpose.msk.msra.mxu0 %vm4212_vm1, %v3600_v25  ;;  %v330_v25 = vld [vmem:[%s4208_s17 + $0x1b8] sm:$0xff]  ;;  %v247_v10 = vld [vmem:[%s4244_s20 + $0x120] sm:$0xff]  ;;  %v268_v21 = vld [vmem:[%s4244_s20 + $0x1c8] sm:$0xff] }
  0x2f   : > { %3653 = vmatpush3.bf16.xpose.msk.msra.mxu1 %vm4212_vm1, %v3648_v26  ;;  %3608 = vmatprep.subr.msk.bf16.mxu0 %vm4212_vm1, %v3606_v31  ;;  %v220_v26 = vld [vmem:[%s4244_s20 + $0x48] sm:$0xff]  ;;  %v3744_v29 = vpack.c.bf16 %v330_v25, %v329_v24  ;;  %v246_v9 = vld [vmem:[%s4244_s20 + $0x118] sm:$0xff]  ;;  %v263_v11 = vld [vmem:[%s4244_s20 + $0x1a0] sm:$0xff] }
  0x30   : > { %3656 = vmatprep.subr.msk.bf16.mxu1 %vm4212_vm1, %v3654_v32  ;;  %v262_v0 = vld [vmem:[%s4244_s20 + $0x198] sm:$0xff]  ;;  %v253_v22 = vld [vmem:[%s4244_s20 + $0x150] sm:$0xff] }
  0x31   : > { %v254_v24 = vld [vmem:[%s4244_s20 + $0x158] sm:$0xff] }
  0x32   : > { %v270_v25 = vld [vmem:[%s4244_s20 + $0x1d8] sm:$0xff] }
  0x36   : > { %3611 = vmatpush3.bf16.xpose.msk.msra.mxu0 %vm4212_vm1, %v3606_v31  ;;  %v237_v31 = vld [vmem:[%s4244_s20 + $0xd0] sm:$0xff] }
  0x37   : > { %3659 = vmatpush3.bf16.xpose.msk.msra.mxu1 %vm4212_vm1, %v3654_v32  ;;  %3614 = vmatprep.subr.msk.bf16.mxu0 %vm4212_vm1, %v3612_v37  ;;  %v222_v32 = vld [vmem:[%s4244_s20 + $0x58] sm:$0xff] }
  0x38   : > { %3662 = vmatprep.subr.msk.bf16.mxu1 %vm4212_vm1, %v3660_v38 }
  0x3e   : > { %3617 = vmatpush3.bf16.xpose.msk.msra.mxu0 %vm4212_vm1, %v3612_v37  ;;  %v239_v37 = vld [vmem:[%s4244_s20 + $0xe0] sm:$0xff] }
  0x3f   : > { %3665 = vmatpush3.bf16.xpose.msk.msra.mxu1 %vm4212_vm1, %v3660_v38  ;;  %3620 = vmatprep.subr.msk.bf16.mxu0 %vm4212_vm1, %v3618_v43  ;;  %v331_v38 = vld [vmem:[%s4208_s17 + $0x1c0] sm:$0xff] }
  0x40   : > { %3668 = vmatprep.subr.msk.bf16.mxu1 %vm4212_vm1, %v3666_v44 }
  0x46   : > { %3623 = vmatpush3.bf16.xpose.msk.msra.mxu0 %vm4212_vm1, %v3618_v43  ;;  %v3750_v43 = vpack.c.bf16 %v332_v39, %v331_v38 }
  0x47   : > { %3671 = vmatpush3.bf16.xpose.msk.msra.mxu1 %vm4212_vm1, %v3666_v44  ;;  %3626 = vmatprep.subr.msk.bf16.mxu0 %vm4212_vm1, %v3624_v49  ;;  %v225_v44 = vld [vmem:[%s4244_s20 + $0x70] sm:$0xff] }
  0x48   : > { %3674 = vmatprep.subr.msk.bf16.mxu1 %vm4212_vm1, %v3672_v50 }
  0x4e   : > { %3629 = vmatpush3.bf16.xpose.msk.msra.mxu0 %vm4212_vm1, %v3624_v49  ;;  %v317_v49 = vld [vmem:[%s4208_s17 + $0x150] sm:$0xff] }
  0x4f   : > { %3677 = vmatpush3.bf16.xpose.msk.msra.mxu1 %vm4212_vm1, %v3672_v50  ;;  %3680 = vmatprep.subr.msk.bf16.mxu0 %vm4212_vm1, %v3678_v55  ;;  %v318_v50 = vld [vmem:[%s4208_s17 + $0x158] sm:$0xff] }
  0x50   : > { %3728 = vmatprep.subr.msk.bf16.mxu1 %vm4212_vm1, %v3726_v56  ;;  %v3708_v54 = vpack.c.bf16 %v318_v50, %v317_v49 }
  0x55   : > { %3167 = vmatmul.mubr.msk.f32.vlgmr.msra.gmra.mrb[0].mxu0 %vm403_vm0, %v212_v59  ;;  %v336_v59 = vld [vmem:[%s4208_s17 + $0x1e8] sm:$0xff] }
  0x56   : > { %3223 = vmatmul.mubr.msk.f32.vlgmr.msra.gmra.mrb[0].mxu1 %vm403_vm0, %v228_v62  ;;  %3683 = vmatpush3.bf16.xpose.msk.msra.mxu0 %vm4212_vm1, %v3678_v55  ;;  %v3756_v55 = vpack.c.bf16 %v334_v53, %v333_v52  ;;  %v3762_v61 = vpack.c.bf16 %v336_v59, %v335_v58  ;;  %v321_v62 = vld [vmem:[%s4208_s17 + $0x170] sm:$0xff] }
  0x57   : > { %3731 = vmatpush3.bf16.xpose.msk.msra.mxu1 %vm4212_vm1, %v3726_v56  ;;  %3169 = vmatprep.mubr.msk.f32.mxu0 %vm403_vm0, %v213_v63  ;;  %v319_v56 = vld [vmem:[%s4208_s17 + $0x160] sm:$0xff]  ;;  %v322_v63 = vld [vmem:[%s4208_s17 + $0x178] sm:$0xff] }
  0x58   : > { %3225 = vmatprep.mubr.msk.f32.mxu1 %vm403_vm0, %v229_v2  ;;  %3686 = vmatprep.subr.msk.bf16.mxu0 %vm4212_vm1, %v3684_v1  ;;  %v3714_v60 = vpack.c.bf16 %v320_v57, %v319_v56  ;;  %v338_v2 = vld [vmem:[%s4208_s17 + $0x1f8] sm:$0xff] }
  0x59   : > { %3170 = vmatmul.mubr.msk.f32.gmra.mrb[2].mxu0 %vm403_vm0, %v214_v4  ;;  %3734 = vmatprep.subr.msk.bf16.mxu1 %vm4212_vm1, %v3732_v3 }
  0x5a   : > { %3226 = vmatmul.mubr.msk.f32.gmra.mrb[2].mxu1 %vm403_vm0, %v230_v5  ;;  %3172 = vmatprep.mubr.msk.f32.mxu0 %vm403_vm0, %v215_v6  ;;  %v244_v5 = vld [vmem:[%s4244_s20 + $0x108] sm:$0xff] }
  0x5b   : > { %3228 = vmatprep.mubr.msk.f32.mxu1 %vm403_vm0, %v231_v7  ;;  %v260_v6 = vld [vmem:[%s4244_s20 + $0x188] sm:$0xff]  ;;  %v245_v7 = vld [vmem:[%s4244_s20 + $0x110] sm:$0xff] }
  0x5d   : > { %3173 = vmatmul.mubr.msk.f32.gmra.mrb[4].mxu0 %vm403_vm0, %v216_v12  ;;  %v248_v12 = vld [vmem:[%s4244_s20 + $0x128] sm:$0xff] }
  0x5e   : > { %3689 = vmatpush3.bf16.xpose.msk.msra.mxu0 %vm4212_vm1, %v3684_v1  ;;  %3229 = vmatmul.mubr.msk.f32.gmra.mrb[4].mxu1 %vm403_vm0, %v232_v13  ;;  %v337_v1 = vld [vmem:[%s4208_s17 + $0x1f0] sm:$0xff]  ;;  %v264_v13 = vld [vmem:[%s4244_s20 + $0x1a8] sm:$0xff] }
  0x5f   : > { %3737 = vmatpush3.bf16.xpose.msk.msra.mxu1 %vm4212_vm1, %v3732_v3  ;;  %3692 = vmatprep.subr.msk.bf16.mxu0 %vm4212_vm1, %v3690_v14  ;;  %v3720_v3 = vpack.c.bf16 %v322_v63, %v321_v62  ;;  %v3768_v4 = vpack.c.bf16 %v338_v2, %v337_v1 }
  0x60   : > { %3740 = vmatprep.subr.msk.bf16.mxu1 %vm4212_vm1, %v3738_v15  ;;  %3175 = vmatprep.mubr.msk.f32.mxu0 %vm403_vm0, %v217_v16  ;;  %v250_v16 = vld [vmem:[%s4244_s20 + $0x138] sm:$0xff] }
  0x61   : > { %3231 = vmatprep.mubr.msk.f32.mxu1 %vm403_vm0, %v233_v17  ;;  %3176 = vmatmul.mubr.msk.f32.gmra.mrb[6].mxu0 %vm403_vm0, %v218_v18  ;;  %v266_v17 = vld [vmem:[%s4244_s20 + $0x1b8] sm:$0xff]  ;;  %v251_v18 = vld [vmem:[%s4244_s20 + $0x140] sm:$0xff] }
  0x62   : > { %3232 = vmatmul.mubr.msk.f32.gmra.mrb[6].mxu1 %vm403_vm0, %v234_v19  ;;  %3178 = vmatprep.mubr.msk.f32.mxu0 %vm403_vm0, %v219_v20  ;;  %v267_v19 = vld [vmem:[%s4244_s20 + $0x1c0] sm:$0xff]  ;;  %v252_v20 = vld [vmem:[%s4244_s20 + $0x148] sm:$0xff] }
  0x63   : > { %3234 = vmatprep.mubr.msk.f32.mxu1 %vm403_vm0, %v235_v23  ;;  %v269_v23 = vld [vmem:[%s4244_s20 + $0x1d0] sm:$0xff] }
  0x65   : > { %3179 = vmatmul.mubr.msk.f32.gmra.mrb[8].mxu0 %vm403_vm0, %v220_v26  ;;  %v255_v26 = vld [vmem:[%s4244_s20 + $0x160] sm:$0xff] }
  0x66   : > { %3695 = vmatpush3.bf16.xpose.msk.msra.mxu0 %vm4212_vm1, %v3690_v14  ;;  %3235 = vmatmul.mubr.msk.f32.gmra.mrb[8].mxu1 %vm403_vm0, %v236_v28  ;;  %v249_v14 = vld [vmem:[%s4244_s20 + $0x130] sm:$0xff]  ;;  %v256_v28 = vld [vmem:[%s4244_s20 + $0x168] sm:$0xff] }
  0x67   : > { %3743 = vmatpush3.bf16.xpose.msk.msra.mxu1 %vm4212_vm1, %v3738_v15  ;;  %3698 = vmatprep.subr.msk.bf16.mxu0 %vm4212_vm1, %v3696_v27  ;;  %v265_v15 = vld [vmem:[%s4244_s20 + $0x1b0] sm:$0xff] }
  0x68   : > { %3746 = vmatprep.subr.msk.bf16.mxu1 %vm4212_vm1, %v3744_v29  ;;  %3181 = vmatprep.mubr.msk.f32.mxu0 %vm403_vm0, %v221_v30  ;;  %v257_v30 = vld [vmem:[%s4244_s20 + $0x170] sm:$0xff] }
  0x69   : > { %3237 = vmatprep.mubr.msk.f32.mxu1 %vm403_vm0, %v237_v31  ;;  %3182 = vmatmul.mubr.msk.f32.gmra.mrb[10].mxu0 %vm403_vm0, %v222_v32  ;;  %v273_v31 = vld [vmem:[%s4244_s20 + $0x1f0] sm:$0xff]  ;;  %v258_v32 = vld [vmem:[%s4244_s20 + $0x178] sm:$0xff] }
  0x6a   : > { %3238 = vmatmul.mubr.msk.f32.gmra.mrb[10].mxu1 %vm403_vm0, %v238_v33  ;;  %3184 = vmatprep.mubr.msk.f32.mxu0 %vm403_vm0, %v223_v34  ;;  %v274_v33 = vld [vmem:[%s4244_s20 + $0x1f8] sm:$0xff] }
  0x6b   : > { %3240 = vmatprep.mubr.msk.f32.mxu1 %vm403_vm0, %v239_v37 }
  0x6d   : > { %3185 = vmatmul.mubr.msk.f32.gmra.mrb[12].mxu0 %vm403_vm0, %v224_v40 }
  0x6e   : > { %3701 = vmatpush3.bf16.xpose.msk.msra.mxu0 %vm4212_vm1, %v3696_v27  ;;  %3241 = vmatmul.mubr.msk.f32.gmra.mrb[12].mxu1 %vm403_vm0, %v240_v42  ;;  %v271_v27 = vld [vmem:[%s4244_s20 + $0x1e0] sm:$0xff] }
  0x6f   : > { %3749 = vmatpush3.bf16.xpose.msk.msra.mxu1 %vm4212_vm1, %v3744_v29  ;;  %3704 = vmatprep.subr.msk.bf16.mxu0 %vm4212_vm1, %v3702_v41  ;;  %v272_v29 = vld [vmem:[%s4244_s20 + $0x1e8] sm:$0xff] }
  0x70   : > { %3752 = vmatprep.subr.msk.bf16.mxu1 %vm4212_vm1, %v3750_v43  ;;  %3187 = vmatprep.mubr.msk.f32.mxu0 %vm403_vm0, %v225_v44 }
  0x71   : > { %3243 = vmatprep.mubr.msk.f32.mxu1 %vm403_vm0, %v241_v45  ;;  %3188 = vmatmul.mubr.msk.f32.gmra.mrb[14].mxu0 %vm403_vm0, %v226_v46 }
  0x72   : > { %3244 = vmatmul.mubr.msk.f32.gmra.mrb[14].mxu1 %vm403_vm0, %v242_v47  ;;  %3278 = vmatprep.mubr.msk.f32.mxu0 %vm403_vm0, %v243_v48 }
  0x73   : > { %3334 = vmatprep.mubr.msk.f32.mxu1 %vm403_vm0, %v259_v51 }
  0x76   : > { %3707 = vmatpush3.bf16.xpose.msk.msra.mxu0 %vm4212_vm1, %v3702_v41 }
  0x77   : > { %3755 = vmatpush3.bf16.xpose.msk.msra.mxu1 %vm4212_vm1, %v3750_v43  ;;  %3710 = vmatprep.subr.msk.bf16.mxu0 %vm4212_vm1, %v3708_v54 }
  0x78   : > { %3758 = vmatprep.subr.msk.bf16.mxu1 %vm4212_vm1, %v3756_v55 }
  0x7e   : > { %3713 = vmatpush3.bf16.xpose.msk.msra.mxu0 %vm4212_vm1, %v3708_v54 }
  0x7f   : > { %3761 = vmatpush3.bf16.xpose.msk.msra.mxu1 %vm4212_vm1, %v3756_v55  ;;  %3716 = vmatprep.subr.msk.bf16.mxu0 %vm4212_vm1, %v3714_v60 }
  0x80   : > { %3764 = vmatprep.subr.msk.bf16.mxu1 %vm4212_vm1, %v3762_v61 }
  0x86   : > { %3719 = vmatpush3.bf16.xpose.msk.msra.mxu0 %vm4212_vm1, %v3714_v60 }
  0x87   : > { %3767 = vmatpush3.bf16.xpose.msk.msra.mxu1 %vm4212_vm1, %v3762_v61  ;;  %3722 = vmatprep.subr.msk.bf16.mxu0 %vm4212_vm1, %v3720_v3 }
  0x88   : > { %3770 = vmatprep.subr.msk.bf16.mxu1 %vm4212_vm1, %v3768_v4 }
  0x8e   : > { %3725 = vmatpush3.bf16.xpose.msk.msra.mxu0 %vm4212_vm1, %v3720_v3 }
  0x8f   : > { %3773 = vmatpush3.bf16.xpose.msk.msra.mxu1 %vm4212_vm1, %v3768_v4 }
  0x95   : > { %3279 = vmatmul.mubr.msk.f32.vlgmr.msra.gmra.mrb[16].mxu0 %vm403_vm0, %v244_v5 }
  0x96   : > { %3335 = vmatmul.mubr.msk.f32.vlgmr.msra.gmra.mrb[16].mxu1 %vm403_vm0, %v260_v6  ;;  %3281 = vmatprep.mubr.msk.f32.mxu0 %vm403_vm0, %v245_v7 }
  0x97   : > { %3337 = vmatprep.mubr.msk.f32.mxu1 %vm403_vm0, %v261_v8 }
  0x99   : > { %3282 = vmatmul.mubr.msk.f32.gmra.mrb[18].mxu0 %vm403_vm0, %v246_v9 }
  0x9a   : > { %3338 = vmatmul.mubr.msk.f32.gmra.mrb[18].mxu1 %vm403_vm0, %v262_v0  ;;  %3284 = vmatprep.mubr.msk.f32.mxu0 %vm403_vm0, %v247_v10 }
  0x9b   : > { %3340 = vmatprep.mubr.msk.f32.mxu1 %vm403_vm0, %v263_v11 }
  0x9d   : > { %3285 = vmatmul.mubr.msk.f32.gmra.mrb[20].mxu0 %vm403_vm0, %v248_v12 }
  0x9e   : > { %3341 = vmatmul.mubr.msk.f32.gmra.mrb[20].mxu1 %vm403_vm0, %v264_v13  ;;  %3287 = vmatprep.mubr.msk.f32.mxu0 %vm403_vm0, %v249_v14 }
  0x9f   : > { %3343 = vmatprep.mubr.msk.f32.mxu1 %vm403_vm0, %v265_v15 }
  0xa1   : > { %3288 = vmatmul.mubr.msk.f32.gmra.mrb[22].mxu0 %vm403_vm0, %v250_v16 }
  0xa2   : > { %3344 = vmatmul.mubr.msk.f32.gmra.mrb[22].mxu1 %vm403_vm0, %v266_v17  ;;  %3290 = vmatprep.mubr.msk.f32.mxu0 %vm403_vm0, %v251_v18 }
  0xa3   : > { %3346 = vmatprep.mubr.msk.f32.mxu1 %vm403_vm0, %v267_v19 }
  0xa5   : > { %3291 = vmatmul.mubr.msk.f32.gmra.mrb[24].mxu0 %vm403_vm0, %v252_v20 }
  0xa6   : > { %3347 = vmatmul.mubr.msk.f32.gmra.mrb[24].mxu1 %vm403_vm0, %v268_v21  ;;  %3293 = vmatprep.mubr.msk.f32.mxu0 %vm403_vm0, %v253_v22 }
  0xa7   : > { %3349 = vmatprep.mubr.msk.f32.mxu1 %vm403_vm0, %v269_v23 }
  0xa9   : > { %3294 = vmatmul.mubr.msk.f32.gmra.mrb[26].mxu0 %vm403_vm0, %v254_v24 }
  0xaa   : > { %3350 = vmatmul.mubr.msk.f32.gmra.mrb[26].mxu1 %vm403_vm0, %v270_v25  ;;  %3296 = vmatprep.mubr.msk.f32.mxu0 %vm403_vm0, %v255_v26 }
  0xab   : > { %3352 = vmatprep.mubr.msk.f32.mxu1 %vm403_vm0, %v271_v27 }
  0xad   : > { %3297 = vmatmul.mubr.msk.f32.gmra.mrb[28].mxu0 %vm403_vm0, %v256_v28 }
  0xae   : > { %3353 = vmatmul.mubr.msk.f32.gmra.mrb[28].mxu1 %vm403_vm0, %v272_v29  ;;  %3299 = vmatprep.mubr.msk.f32.mxu0 %vm403_vm0, %v257_v30 }
  0xaf   : > { %3355 = vmatprep.mubr.msk.f32.mxu1 %vm403_vm0, %v273_v31 }
  0xb1   : > { %3300 = vmatmul.mubr.msk.f32.gmra.mrb[30].mxu0 %vm403_vm0, %v258_v32 }
  0xb2   : > { %3356 = vmatmul.mubr.msk.f32.gmra.mrb[30].mxu1 %vm403_vm0, %v274_v33 }
 0x128   : > { %v3168_v34 = vpop.f32.mrb[0].mxu0 }
 0x129   : > { %v4542_v35 = vmul.f32 0.088388346, %v3168_v34  ;;  %v566_v36 = vpop.f32.mrb[1].mxu0  ;;  %v3224_v37 = vpop.f32.mrb[0].mxu1 }
 0x12a   : > { %v4544_v38 = vmul.f32 0.088388346, %v566_v36  ;;  %v807_v39 = vpop.f32.mrb[1].mxu1  ;;  %v4548_v41 = vmul.f32 0.088388346, %v3224_v37 }
 0x12b   : > { %1434 = vmax.xlane.f32.xlu1 %v4542_v35  ;;  %v4550_v44 = vmul.f32 0.088388346, %v807_v39 }
 0x12c   : > { %1432 = vmax.xlane.f32.xlu0 %v4544_v38  ;;  %v3171_v40 = vpop.f32.mrb[2].mxu0 }
 0x12d   : > { %v3227_v42 = vpop.f32.mrb[2].mxu1  ;;  %v576_v43 = vpop.f32.mrb[3].mxu0  ;;  %v4556_v47 = vmul.f32 0.088388346, %v3171_v40 }
 0x12e   : > { %v817_v45 = vpop.f32.mrb[3].mxu1  ;;  %v4553_v46 = vmul.f32 0.088388346, %v3227_v42  ;;  %v4562_v56 = vmul.f32 0.088388346, %v576_v43 }
 0x12f   : > { %1466 = vmax.xlane.f32.xlu1 %v4548_v41  ;;  %v4560_v53 = vmul.f32 0.088388346, %v817_v45 }
 0x130   : > { %1464 = vmax.xlane.f32.xlu0 %v4550_v44  ;;  %v3174_v48 = vpop.f32.mrb[4].mxu0 }
 0x131   : > { %v3230_v49 = vpop.f32.mrb[4].mxu1  ;;  %v586_v50 = vpop.f32.mrb[5].mxu0  ;;  %v4568_v59 = vmul.f32 0.088388346, %v3174_v48 }
 0x132   : > { %v827_v51 = vpop.f32.mrb[5].mxu1  ;;  %v4565_v58 = vmul.f32 0.088388346, %v3230_v49  ;;  %v4574_v5 = vmul.f32 0.088388346, %v586_v50 }
 0x133   : > { %1470 = vmax.xlane.f32.xlu1 %v4553_v46  ;;  %v4572_v2 = vmul.f32 0.088388346, %v827_v51 }
 0x134   : > { %1438 = vmax.xlane.f32.xlu0 %v4556_v47  ;;  %v3177_v52 = vpop.f32.mrb[6].mxu0 }
 0x135   : > { %v3233_v54 = vpop.f32.mrb[6].mxu1  ;;  %v596_v55 = vpop.f32.mrb[7].mxu0  ;;  %v4580_v8 = vmul.f32 0.088388346, %v3177_v52 }
 0x136   : > { %v837_v57 = vpop.f32.mrb[7].mxu1  ;;  %v4577_v7 = vmul.f32 0.088388346, %v3233_v54  ;;  %v4586_v16 = vmul.f32 0.088388346, %v596_v55 }
 0x137   : > { %1468 = vmax.xlane.f32.xlu1 %v4560_v53  ;;  %v4584_v13 = vmul.f32 0.088388346, %v837_v57 }
 0x138   : > { %1436 = vmax.xlane.f32.xlu0 %v4562_v56  ;;  %v3180_v60 = vpop.f32.mrb[8].mxu0 }
 0x139   : > { %v3236_v61 = vpop.f32.mrb[8].mxu1  ;;  %v606_v62 = vpop.f32.mrb[9].mxu0  ;;  %v4592_v19 = vmul.f32 0.088388346, %v3180_v60 }
 0x13a   : > { %v847_v63 = vpop.f32.mrb[9].mxu1  ;;  %v4589_v18 = vmul.f32 0.088388346, %v3236_v61  ;;  %v4598_v21 = vmul.f32 0.088388346, %v606_v62 }
 0x13b   : > { %1474 = vmax.xlane.f32.xlu1 %v4565_v58  ;;  %v4596_v20 = vmul.f32 0.088388346, %v847_v63 }
 0x13c   : > { %1442 = vmax.xlane.f32.xlu0 %v4568_v59  ;;  %v3183_v1 = vpop.f32.mrb[10].mxu0 }
 0x13d   : > { %v3239_v3 = vpop.f32.mrb[10].mxu1  ;;  %v616_v4 = vpop.f32.mrb[11].mxu0  ;;  %v4604_v23 = vmul.f32 0.088388346, %v3183_v1 }
 0x13e   : > { %v857_v6 = vpop.f32.mrb[11].mxu1  ;;  %v4601_v22 = vmul.f32 0.088388346, %v3239_v3  ;;  %v4610_v25 = vmul.f32 0.088388346, %v616_v4 }
 0x13f   : > { %1472 = vmax.xlane.f32.xlu1 %v4572_v2  ;;  %v4608_v24 = vmul.f32 0.088388346, %v857_v6 }
 0x140   : > { %1440 = vmax.xlane.f32.xlu0 %v4574_v5  ;;  %v3186_v9 = vpop.f32.mrb[12].mxu0 }
 0x141   : > { %v3242_v0 = vpop.f32.mrb[12].mxu1  ;;  %v626_v10 = vpop.f32.mrb[13].mxu0  ;;  %v4616_v27 = vmul.f32 0.088388346, %v3186_v9 }
 0x142   : > { %v867_v11 = vpop.f32.mrb[13].mxu1  ;;  %v4613_v26 = vmul.f32 0.088388346, %v3242_v0  ;;  %v4622_v29 = vmul.f32 0.088388346, %v626_v10 }
 0x143   : > { %1478 = vmax.xlane.f32.xlu1 %v4577_v7  ;;  %v4620_v28 = vmul.f32 0.088388346, %v867_v11 }
 0x144   : > { %1446 = vmax.xlane.f32.xlu0 %v4580_v8  ;;  %v3189_v12 = vpop.f32.mrb[14].mxu0 }
 0x145   : > { %v3245_v14 = vpop.f32.mrb[14].mxu1  ;;  %v636_v15 = vpop.f32.mrb[15].mxu0  ;;  %v4628_v31 = vmul.f32 0.088388346, %v3189_v12 }
 0x146   : > { %v877_v17 = vpop.f32.mrb[15].mxu1  ;;  %v4625_v30 = vmul.f32 0.088388346, %v3245_v14  ;;  %v4634_v33 = vmul.f32 0.088388346, %v636_v15 }
 0x147   : > { %1476 = vmax.xlane.f32.xlu1 %v4584_v13  ;;  %v4632_v32 = vmul.f32 0.088388346, %v877_v17 }
 0x148   : > { %1444 = vmax.xlane.f32.xlu0 %v4586_v16 }
 0x14b   : > { %1482 = vmax.xlane.f32.xlu1 %v4589_v18 }
 0x14c   : > { %1450 = vmax.xlane.f32.xlu0 %v4592_v19 }
 0x14f   : > { %1480 = vmax.xlane.f32.xlu1 %v4596_v20 }
 0x150   : > { %1448 = vmax.xlane.f32.xlu0 %v4598_v21 }
 0x153   : > { %1486 = vmax.xlane.f32.xlu1 %v4601_v22 }
 0x154   : > { %1454 = vmax.xlane.f32.xlu0 %v4604_v23 }
 0x157   : > { %1484 = vmax.xlane.f32.xlu1 %v4608_v24 }
 0x158   : > { %1452 = vmax.xlane.f32.xlu0 %v4610_v25 }
 0x15b   : > { %1490 = vmax.xlane.f32.xlu1 %v4613_v26 }
 0x15c   : > { %1458 = vmax.xlane.f32.xlu0 %v4616_v27 }
 0x15f   : > { %1488 = vmax.xlane.f32.xlu1 %v4620_v28 }
 0x160   : > { %1456 = vmax.xlane.f32.xlu0 %v4622_v29 }
 0x163   : > { %1494 = vmax.xlane.f32.xlu1 %v4625_v30 }
 0x164   : > { %1462 = vmax.xlane.f32.xlu0 %v4628_v31 }
 0x167   : > { %1492 = vmax.xlane.f32.xlu1 %v4632_v32 }
 0x168   : > { %1460 = vmax.xlane.f32.xlu0 %v4634_v33  ;;  %v3280_v34 = vpop.f32.mrb[16].mxu0 }
 0x169   : > { %v3336_v36 = vpop.f32.mrb[16].mxu1  ;;  %v4638_v37 = vmul.f32 0.088388346, %v3280_v34  ;;  %v1048_v39 = vpop.f32.mrb[17].mxu0 }
 0x16a   : > { %v4640_v40 = vmul.f32 0.088388346, %v3336_v36  ;;  %v1289_v42 = vpop.f32.mrb[17].mxu1  ;;  %v4644_v49 = vmul.f32 0.088388346, %v1048_v39 }
 0x16b   : > { %v4646_v50 = vmul.f32 0.088388346, %v1289_v42 }
 0x16c   : > { %1530 = vmax.xlane.f32.xlu1 %v4640_v40  ;;  %1498 = vmax.xlane.f32.xlu0 %v4638_v37  ;;  %v3283_v43 = vpop.f32.mrb[18].mxu0 }
 0x16d   : > { %v3339_v45 = vpop.f32.mrb[18].mxu1  ;;  %v1058_v48 = vpop.f32.mrb[19].mxu0  ;;  %v4652_v54 = vmul.f32 0.088388346, %v3283_v43 }
 0x16e   : > { %v1299_v51 = vpop.f32.mrb[19].mxu1  ;;  %v4649_v52 = vmul.f32 0.088388346, %v3339_v45  ;;  %v4656_v3 = vmul.f32 0.088388346, %v1058_v48 }
 0x16f   : > { %v4658_v4 = vmul.f32 0.088388346, %v1299_v51 }
 0x170   : > { %1528 = vmax.xlane.f32.xlu1 %v4646_v50  ;;  %1496 = vmax.xlane.f32.xlu0 %v4644_v49  ;;  %v3286_v55 = vpop.f32.mrb[20].mxu0 }
 0x171   : > { %v3342_v57 = vpop.f32.mrb[20].mxu1  ;;  %v1068_v60 = vpop.f32.mrb[21].mxu0  ;;  %v4664_v0 = vmul.f32 0.088388346, %v3286_v55 }
 0x172   : > { %v1309_v61 = vpop.f32.mrb[21].mxu1  ;;  %v4661_v9 = vmul.f32 0.088388346, %v3342_v57  ;;  %v4668_v36 = vmul.f32 0.088388346, %v1068_v60 }
 0x173   : > { %5310 = vst [vmem:[#allocation3_spill] sm:$0xff] %v4664_v0  ;;  %v4670_v39 = vmul.f32 0.088388346, %v1309_v61 }
 0x174   : > { %1534 = vmax.xlane.f32.xlu1 %v4649_v52  ;;  %1502 = vmax.xlane.f32.xlu0 %v4652_v54  ;;  %v3289_v62 = vpop.f32.mrb[22].mxu0  ;;  %5309 = vst [vmem:[#allocation2_spill] sm:$0xff] %v4661_v9  ;;  %5311 = vst [vmem:[#allocation4_spill] sm:$0xff] %v4668_v36 }
 0x175   : > { %v3345_v63 = vpop.f32.mrb[22].mxu1  ;;  %v1078_v1 = vpop.f32.mrb[23].mxu0  ;;  %5312 = vst [vmem:[#allocation5_spill] sm:$0xff] %v4670_v39  ;;  %v4676_v45 = vmul.f32 0.088388346, %v3289_v62 }
 0x176   : > { %v1319_v6 = vpop.f32.mrb[23].mxu1  ;;  %v4673_v43 = vmul.f32 0.088388346, %v3345_v63 }
 0x177   : > { %5314 = vst [vmem:[#allocation7_spill] sm:$0xff] %v4676_v45 }
 0x178   : > { %1532 = vmax.xlane.f32.xlu1 %v4658_v4  ;;  %1500 = vmax.xlane.f32.xlu0 %v4656_v3  ;;  %v3292_v10 = vpop.f32.mrb[24].mxu0  ;;  %5313 = vst [vmem:[#allocation6_spill] sm:$0xff] %v4673_v43 }
 0x179   : > { %v3348_v11 = vpop.f32.mrb[24].mxu1  ;;  %v1088_v12 = vpop.f32.mrb[25].mxu0 }
 0x17a   : > { %v1329_v14 = vpop.f32.mrb[25].mxu1  ;;  %v4685_v62 = vmul.f32 0.088388346, %v3348_v11 }
 0x17c   : > { %1538 = vmax.xlane.f32.xlu1 %v4661_v9  ;;  %1506 = vmax.xlane.f32.xlu0 %v4664_v0  ;;  %v3295_v15 = vpop.f32.mrb[26].mxu0  ;;  %v4680_v9 = vmul.f32 0.088388346, %v1078_v1 }
 0x17d   : > { %v3351_v17 = vpop.f32.mrb[26].mxu1  ;;  %v1098_v34 = vpop.f32.mrb[27].mxu0 }
 0x17e   : > { %v1339_v42 = vpop.f32.mrb[27].mxu1  ;;  %v4697_v1 = vmul.f32 0.088388346, %v3351_v17 }
 0x17f   : > { %v4706_v11 = vmul.f32 0.088388346, %v1339_v42 }
 0x180   : > { %1536 = vmax.xlane.f32.xlu1 %v4670_v39  ;;  %1504 = vmax.xlane.f32.xlu0 %v4668_v36  ;;  %v3298_v48 = vpop.f32.mrb[28].mxu0  ;;  %v4682_v39 = vmul.f32 0.088388346, %v1319_v6  ;;  %v4688_v36 = vmul.f32 0.088388346, %v3292_v10 }
 0x181   : > { %v3354_v51 = vpop.f32.mrb[28].mxu1  ;;  %v1108_v55 = vpop.f32.mrb[29].mxu0  ;;  %v4700_v6 = vmul.f32 0.088388346, %v3295_v15  ;;  %v4704_v10 = vmul.f32 0.088388346, %v1098_v34 }
 0x182   : > { %v1349_v57 = vpop.f32.mrb[29].mxu1  ;;  %v4716_v15 = vmul.f32 0.088388346, %v1108_v55 }
 0x183   : > { %v4718_v17 = vmul.f32 0.088388346, %v1349_v57 }
 0x184   : > { %1542 = vmax.xlane.f32.xlu1 %v4673_v43  ;;  %1510 = vmax.xlane.f32.xlu0 %v4676_v45  ;;  %v3301_v60 = vpop.f32.mrb[30].mxu0  ;;  %v4692_v45 = vmul.f32 0.088388346, %v1088_v12  ;;  %v4694_v43 = vmul.f32 0.088388346, %v1329_v14  ;;  %5316 = vst [vmem:[#allocation9_spill] sm:$0xff] %v4716_v15 }
 0x185   : > { %v3357_v61 = vpop.f32.mrb[30].mxu1  ;;  %v1118_v0 = vpop.f32.mrb[31].mxu0  ;;  %v4709_v12 = vmul.f32 0.088388346, %v3354_v51  ;;  %v4712_v14 = vmul.f32 0.088388346, %v3298_v48 }
 0x186   : > { %v1359_v63 = vpop.f32.mrb[31].mxu1  ;;  %5317 = vst [vmem:[#allocation10_spill] sm:$0xff] %v4718_v17  ;;  %v4721_v34 = vmul.f32 0.088388346, %v3357_v61  ;;  %v4724_v42 = vmul.f32 0.088388346, %v3301_v60 }
 0x187   : > { %5315 = vst [vmem:[#allocation8_spill] sm:$0xff] %v4712_v14  ;;  %v4728_v48 = vmul.f32 0.088388346, %v1118_v0  ;;  %v4730_v51 = vmul.f32 0.088388346, %v1359_v63 }
 0x188   : > { %1540 = vmax.xlane.f32.xlu1 %v4682_v39  ;;  %1508 = vmax.xlane.f32.xlu0 %v4680_v9  ;;  %5318 = vst [vmem:[#allocation11_spill] sm:$0xff] %v4721_v34  ;;  %5319 = vst [vmem:[#allocation12_spill] sm:$0xff] %v4724_v42 }
 0x189   : > { %5320 = vst [vmem:[#allocation13_spill] sm:$0xff] %v4728_v48  ;;  %5321 = vst [vmem:[#allocation14_spill] sm:$0xff] %v4730_v51 }
 0x18c   : > { %1546 = vmax.xlane.f32.xlu1 %v4685_v62  ;;  %1514 = vmax.xlane.f32.xlu0 %v4688_v36 }
 0x190   : > { %1544 = vmax.xlane.f32.xlu1 %v4694_v43  ;;  %1512 = vmax.xlane.f32.xlu0 %v4692_v45 }
 0x194   : > { %1550 = vmax.xlane.f32.xlu1 %v4697_v1  ;;  %1518 = vmax.xlane.f32.xlu0 %v4700_v6 }
 0x198   : > { %1548 = vmax.xlane.f32.xlu1 %v4706_v11  ;;  %1516 = vmax.xlane.f32.xlu0 %v4704_v10 }
 0x19c   : > { %1554 = vmax.xlane.f32.xlu1 %v4709_v12  ;;  %1522 = vmax.xlane.f32.xlu0 %v4712_v14 }
 0x1a0   : > { %1552 = vmax.xlane.f32.xlu1 %v4718_v17  ;;  %1520 = vmax.xlane.f32.xlu0 %v4716_v15 }
 0x1a4   : > { %1558 = vmax.xlane.f32.xlu1 %v4721_v34  ;;  %1526 = vmax.xlane.f32.xlu0 %v4724_v42 }
 0x1a8   : > { %1556 = vmax.xlane.f32.xlu1 %v4730_v51  ;;  %1524 = vmax.xlane.f32.xlu0 %v4728_v48 }
 0x1b8   : > { %v1435_v55 = vpop.xlane.xlu1 %1434 }
 0x1b9   : > { %v1561_v57 = vsub.f32 %v4542_v35, %v1435_v55  ;;  %v1433_v61 = vpop.xlane.xlu0 %1432 }
 0x1ba   : > { %v1560_v15 = vsub.f32 %v4544_v38, %v1433_v61 }
 0x1bb   : > { %v1626_v60 = vmul.f32 1.442695, %v1561_v57 }
 0x1bc   : > { %v1624_v17 = vmul.f32 1.442695, %v1560_v15  ;;  %v1467_v14 = vpop.xlane.xlu1 %1466 }
 0x1bd   : > { %3910 = vpow2.f32 %v1626_v60  ;;  %v1577_v42 = vsub.f32 %v4548_v41, %v1467_v14  ;;  %v1465_v0 = vpop.xlane.xlu0 %1464 }
 0x1be   : > { %v1576_v63 = vsub.f32 %v4550_v44, %v1465_v0  ;;  %3912 = vpow2.f32 %v1624_v17 }
 0x1bf   : > { %v1658_v34 = vmul.f32 1.442695, %v1577_v42 }
 0x1c0   : > { %v1471_v51 = vpop.xlane.xlu1 %1470  ;;  %v1656_v48 = vmul.f32 1.442695, %v1576_v63  ;;  %v341_v63 = vld [vmem:[%s4745_s23 + $0x10] sm:$0xff] }
 0x1c1   : > { %3914 = vpow2.f32 %v1658_v34  ;;  %v1579_v35 = vsub.f32 %v4553_v46, %v1471_v51  ;;  %v1439_v55 = vpop.xlane.xlu0 %1438  ;;  %v339_v46 = vld [vmem:[%s4745_s23] sm:$0xff] }
 0x1c2   : > { %v1563_v38 = vsub.f32 %v4556_v47, %v1439_v55  ;;  %3916 = vpow2.f32 %v1656_v48  ;;  %v340_v47 = vld [vmem:[%s4745_s23 + $0x8] sm:$0xff]  ;;  %v355_v55 = vld [vmem:[%s4745_s23 + $0x80] sm:$0xff] }
 0x1c3   : > { %v1662_v61 = vmul.f32 1.442695, %v1579_v35  ;;  %v3774_v34 = vpack.c.bf16 %v340_v47, %v339_v46  ;;  %v342_v35 = vld [vmem:[%s4745_s23 + $0x18] sm:$0xff]  ;;  %v357_v46 = vld [vmem:[%s4745_s23 + $0x90] sm:$0xff] }
 0x1c4   : > { %v1630_v57 = vmul.f32 1.442695, %v1563_v38  ;;  %v1469_v15 = vpop.xlane.xlu1 %1468  ;;  %v358_v47 = vld [vmem:[%s4745_s23 + $0x98] sm:$0xff] }
 0x1c5   : > { %v1578_v41 = vsub.f32 %v4560_v53, %v1469_v15  ;;  %v1437_v14 = vpop.xlane.xlu0 %1436  ;;  %3775 = vmatprep.subr.bf16.mxu0 %v3774_v34  ;;  %v356_v15 = vld [vmem:[%s4745_s23 + $0x88] sm:$0xff] }
 0x1c6   : > { %3918 = vpow2.f32 %v1630_v57  ;;  %v1562_v44 = vsub.f32 %v4562_v56, %v1437_v14  ;;  %3777 = vmatpush3.bf16.msra.mxu0 %v3774_v34  ;;  %v3778_v57 = vpack.c.bf16 %v342_v35, %v341_v63  ;;  %v3806_v14 = vpack.c.bf16 %v356_v15, %v355_v55  ;;  %v345_v34 = vld [vmem:[%s4745_s23 + $0x30] sm:$0xff]  ;;  %v359_v35 = vld [vmem:[%s4745_s23 + $0xa0] sm:$0xff] }
 0x1c7   : > { %v4750_v17 = vpop.eup %3910  ;;  %3920 = vpow2.f32 %v1662_v61  ;;  %v1660_v48 = vmul.f32 1.442695, %v1578_v41  ;;  %v343_v61 = vld [vmem:[%s4745_s23 + $0x20] sm:$0xff]  ;;  %v3810_v63 = vpack.c.bf16 %v358_v47, %v357_v46 }
 0x1c8   : > { %5322 = vst [vmem:[#allocation15_spill] sm:$0xff] %v4750_v17  ;;  %v1628_v53 = vmul.f32 1.442695, %v1562_v44  ;;  %v1475_v42 = vpop.xlane.xlu1 %1474  ;;  %1754 = vadd.xlane.f32.xlu0 %v4750_v17  ;;  %v4754_v60 = vpop.eup %3912  ;;  %3779 = vmatprep.subr.bf16.mxu0 %v3778_v57  ;;  %v360_v17 = vld [vmem:[%s4745_s23 + $0xa8] sm:$0xff]  ;;  %v347_v47 = vld [vmem:[%s4745_s23 + $0x40] sm:$0xff] }
 0x1c9   : > { %v1581_v51 = vsub.f32 %v4565_v58, %v1475_v42  ;;  %v1443_v56 = vpop.xlane.xlu0 %1442  ;;  %v344_v58 = vld [vmem:[%s4745_s23 + $0x28] sm:$0xff]  ;;  %3807 = vmatprep.subr.bf16.mxu1 %v3806_v14 }
 0x1ca   : > { %3922 = vpow2.f32 %v1628_v53  ;;  %v1565_v0 = vsub.f32 %v4568_v59, %v1443_v56  ;;  %v3782_v44 = vpack.c.bf16 %v344_v58, %v343_v61  ;;  %3781 = vmatpush3.bf16.msra.mxu0 %v3778_v57  ;;  %3809 = vmatpush3.bf16.msra.mxu1 %v3806_v14  ;;  %v3814_v61 = vpack.c.bf16 %v360_v17, %v359_v35 }
 0x1cb   : > { %v4760_v38 = vpop.eup %3914  ;;  %3924 = vpow2.f32 %v1660_v48  ;;  %v1666_v53 = vmul.f32 1.442695, %v1581_v51  ;;  %3811 = vmatprep.subr.bf16.mxu1 %v3810_v63 }
 0x1cc   : > { %5323 = vst [vmem:[#allocation16_spill] sm:$0xff] %v4760_v38  ;;  %v1634_v41 = vmul.f32 1.442695, %v1565_v0  ;;  %1786 = vadd.xlane.f32.xlu1 %v4760_v38  ;;  %v1473_v59 = vpop.xlane.xlu1 %1472  ;;  %1752 = vadd.xlane.f32.xlu0 %v4754_v60  ;;  %v346_v0 = vld [vmem:[%s4745_s23 + $0x38] sm:$0xff]  ;;  %v4775_v55 = vpop.eup %3916 }
 0x1cd   : > { %v1580_v42 = vsub.f32 %v4572_v2, %v1473_v59  ;;  %v1441_v56 = vpop.xlane.xlu0 %1440  ;;  %3783 = vmatprep.subr.bf16.mxu0 %v3782_v44  ;;  %v3786_v15 = vpack.c.bf16 %v346_v0, %v345_v34  ;;  %v348_v34 = vld [vmem:[%s4745_s23 + $0x48] sm:$0xff] }
 0x1ce   : > { %3926 = vpow2.f32 %v1634_v41  ;;  %v1564_v38 = vsub.f32 %v4574_v5, %v1441_v56  ;;  %3785 = vmatpush3.bf16.msra.mxu0 %v3782_v44  ;;  %3813 = vmatpush3.bf16.msra.mxu1 %v3810_v63  ;;  %v3790_v56 = vpack.c.bf16 %v348_v34, %v347_v47  ;;  %v362_v63 = vld [vmem:[%s4745_s23 + $0xb8] sm:$0xff] }
 0x1cf   : > { %3928 = vpow2.f32 %v1666_v53  ;;  %v1664_v58 = vmul.f32 1.442695, %v1580_v42  ;;  %3787 = vmatprep.subr.bf16.mxu0 %v3786_v15  ;;  %3815 = vmatprep.subr.bf16.mxu1 %v3814_v61  ;;  %v361_v53 = vld [vmem:[%s4745_s23 + $0xb0] sm:$0xff] }
 0x1d0   : > { %v4777_v48 = vpop.eup %3918  ;;  %v1632_v51 = vmul.f32 1.442695, %v1564_v38  ;;  %v1479_v2 = vpop.xlane.xlu1 %1478  ;;  %1784 = vadd.xlane.f32.xlu1 %v4775_v55 }
 0x1d1   : > { %v1583_v41 = vsub.f32 %v4577_v7, %v1479_v2  ;;  %v1447_v5 = vpop.xlane.xlu0 %1446  ;;  %1758 = vadd.xlane.f32.xlu0 %v4777_v48  ;;  %v4783_v59 = vpop.eup %3920 }
 0x1d2   : > { %3930 = vpow2.f32 %v1632_v51  ;;  %v1567_v57 = vsub.f32 %v4580_v8, %v1447_v5  ;;  %3789 = vmatpush3.bf16.msra.mxu0 %v3786_v15  ;;  %3817 = vmatpush3.bf16.msra.mxu1 %v3814_v61  ;;  %v3818_v51 = vpack.c.bf16 %v362_v63, %v361_v53  ;;  %v363_v5 = vld [vmem:[%s4745_s23 + $0xc0] sm:$0xff]  ;;  %v365_v63 = vld [vmem:[%s4745_s23 + $0xd0] sm:$0xff] }
 0x1d3   : > { %3932 = vpow2.f32 %v1664_v58  ;;  %v1670_v7 = vmul.f32 1.442695, %v1583_v41  ;;  %3791 = vmatprep.subr.bf16.mxu0 %v3790_v56  ;;  %v349_v58 = vld [vmem:[%s4745_s23 + $0x50] sm:$0xff]  ;;  %v350_v41 = vld [vmem:[%s4745_s23 + $0x58] sm:$0xff]  ;;  %v351_v53 = vld [vmem:[%s4745_s23 + $0x60] sm:$0xff] }
 0x1d4   : > { %v4785_v38 = vpop.eup %3922  ;;  %v1638_v17 = vmul.f32 1.442695, %v1567_v57  ;;  %v1477_v14 = vpop.xlane.xlu1 %1476  ;;  %1790 = vadd.xlane.f32.xlu1 %v4783_v59  ;;  %3819 = vmatprep.subr.bf16.mxu1 %v3818_v51 }
 0x1d5   : > { %v1582_v8 = vsub.f32 %v4584_v13, %v1477_v14  ;;  %v1445_v44 = vpop.xlane.xlu0 %1444  ;;  %1756 = vadd.xlane.f32.xlu0 %v4785_v38  ;;  %v4794_v42 = vpop.eup %3924  ;;  %v364_v14 = vld [vmem:[%s4745_s23 + $0xc8] sm:$0xff] }
 0x1d6   : > { %3934 = vpow2.f32 %v1638_v17  ;;  %v1566_v46 = vsub.f32 %v4586_v16, %v1445_v44  ;;  %3793 = vmatpush3.bf16.msra.mxu0 %v3790_v56  ;;  %3821 = vmatpush3.bf16.msra.mxu1 %v3818_v51  ;;  %v3794_v17 = vpack.c.bf16 %v350_v41, %v349_v58  ;;  %v352_v56 = vld [vmem:[%s4745_s23 + $0x68] sm:$0xff]  ;;  %v366_v51 = vld [vmem:[%s4745_s23 + $0xd8] sm:$0xff] }
 0x1d7   : > { %3936 = vpow2.f32 %v1670_v7  ;;  %v1668_v16 = vmul.f32 1.442695, %v1582_v8 }
 0x1d8   : > { %v4797_v0 = vpop.eup %3926  ;;  %v1636_v13 = vmul.f32 1.442695, %v1566_v46  ;;  %v1483_v35 = vpop.xlane.xlu1 %1482  ;;  %1788 = vadd.xlane.f32.xlu1 %v4794_v42  ;;  %3795 = vmatprep.subr.bf16.mxu0 %v3794_v17 }
 0x1d9   : > { %v1585_v15 = vsub.f32 %v4589_v18, %v1483_v35  ;;  %v1451_v2 = vpop.xlane.xlu0 %1450  ;;  %1762 = vadd.xlane.f32.xlu0 %v4797_v0  ;;  %v4806_v57 = vpop.eup %3928  ;;  %v3798_v35 = vpack.c.bf16 %v352_v56, %v351_v53 }
 0x1da   : > { %3938 = vpow2.f32 %v1636_v13  ;;  %v1569_v61 = vsub.f32 %v4592_v19, %v1451_v2  ;;  %v3822_v19 = vpack.c.bf16 %v364_v14, %v363_v5  ;;  %3797 = vmatpush3.bf16.msra.mxu0 %v3794_v17  ;;  %v353_v5 = vld [vmem:[%s4745_s23 + $0x70] sm:$0xff]  ;;  %v354_v17 = vld [vmem:[%s4745_s23 + $0x78] sm:$0xff]  ;;  %v367_v14 = vld [vmem:[%s4745_s23 + $0xe0] sm:$0xff] }
 0x1db   : > { %3940 = vpow2.f32 %v1668_v16  ;;  %v1674_v44 = vmul.f32 1.442695, %v1585_v15  ;;  %3799 = vmatprep.subr.bf16.mxu0 %v3798_v35 }
 0x1dc   : > { %v4809_v7 = vpop.eup %3930  ;;  %v1642_v18 = vmul.f32 1.442695, %v1569_v61  ;;  %v1481_v8 = vpop.xlane.xlu1 %1480  ;;  %1794 = vadd.xlane.f32.xlu1 %v4806_v57  ;;  %3823 = vmatprep.subr.bf16.mxu1 %v3822_v19 }
 0x1dd   : > { %v1584_v46 = vsub.f32 %v4596_v20, %v1481_v8  ;;  %v1449_v47 = vpop.xlane.xlu0 %1448  ;;  %1760 = vadd.xlane.f32.xlu0 %v4809_v7  ;;  %v4818_v13 = vpop.eup %3932  ;;  %3825 = vmatpush3.bf16.msra.mxu1 %v3822_v19  ;;  %v3802_v8 = vpack.c.bf16 %v354_v17, %v353_v5  ;;  %v368_v19 = vld [vmem:[%s4745_s23 + $0xe8] sm:$0xff] }
 0x1de   : > { %3942 = vpow2.f32 %v1642_v18  ;;  %v1568_v34 = vsub.f32 %v4598_v21, %v1449_v47  ;;  %v3826_v21 = vpack.c.bf16 %v366_v51, %v365_v63  ;;  %3801 = vmatpush3.bf16.msra.mxu0 %v3798_v35  ;;  %v3830_v47 = vpack.c.bf16 %v368_v19, %v367_v14  ;;  %v369_v63 = vld [vmem:[%s4745_s23 + $0xf0] sm:$0xff]  ;;  %v370_v35 = vld [vmem:[%s4745_s23 + $0xf8] sm:$0xff] }
 0x1df   : > { %3944 = vpow2.f32 %v1674_v44  ;;  %v1672_v2 = vmul.f32 1.442695, %v1584_v46  ;;  %3803 = vmatprep.subr.bf16.mxu0 %v3802_v8 }
 0x1e0   : > { %v4821_v16 = vpop.eup %3934  ;;  %v1640_v20 = vmul.f32 1.442695, %v1568_v34  ;;  %v1487_v15 = vpop.xlane.xlu1 %1486  ;;  %1792 = vadd.xlane.f32.xlu1 %v4818_v13  ;;  %3827 = vmatprep.subr.bf16.mxu1 %v3826_v21 }
 0x1e1   : > { %v1587_v61 = vsub.f32 %v4601_v22, %v1487_v15  ;;  %v1455_v58 = vpop.xlane.xlu0 %1454  ;;  %1766 = vadd.xlane.f32.xlu0 %v4821_v16  ;;  %v4830_v18 = vpop.eup %3936  ;;  %3829 = vmatpush3.bf16.msra.mxu1 %v3826_v21 }
 0x1e2   : > { %3946 = vpow2.f32 %v1640_v20  ;;  %v1571_v41 = vsub.f32 %v4604_v23, %v1455_v58  ;;  %3831 = vmatprep.subr.bf16.mxu1 %v3830_v47  ;;  %3805 = vmatpush3.bf16.msra.mxu0 %v3802_v8  ;;  %v3834_v20 = vpack.c.bf16 %v370_v35, %v369_v63 }
 0x1e3   : > { %3948 = vpow2.f32 %v1672_v2  ;;  %v1678_v23 = vmul.f32 1.442695, %v1587_v61 }
 0x1e4   : > { %v4833_v44 = vpop.eup %3938  ;;  %v1646_v22 = vmul.f32 1.442695, %v1571_v41  ;;  %v1485_v46 = vpop.xlane.xlu1 %1484  ;;  %1798 = vadd.xlane.f32.xlu1 %v4830_v18 }
 0x1e5   : > { %v1586_v34 = vsub.f32 %v4608_v24, %v1485_v46  ;;  %v1453_v53 = vpop.xlane.xlu0 %1452  ;;  %1764 = vadd.xlane.f32.xlu0 %v4833_v44  ;;  %v4841_v51 = vpop.eup %3940  ;;  %3833 = vmatpush3.bf16.msra.mxu1 %v3830_v47 }
 0x1e6   : > { %3950 = vpow2.f32 %v1646_v22  ;;  %v1570_v56 = vsub.f32 %v4610_v25, %v1453_v53  ;;  %3835 = vmatprep.subr.bf16.mxu1 %v3834_v20 }
 0x1e7   : > { %3952 = vpow2.f32 %v1678_v23  ;;  %v1676_v24 = vmul.f32 1.442695, %v1586_v34 }
 0x1e8   : > { %v4843_v15 = vpop.eup %3942  ;;  %v1644_v21 = vmul.f32 1.442695, %v1570_v56  ;;  %v1491_v2 = vpop.xlane.xlu1 %1490  ;;  %1796 = vadd.xlane.f32.xlu1 %v4841_v51 }
 0x1e9   : > { %v1589_v61 = vsub.f32 %v4613_v26, %v1491_v2  ;;  %v1459_v58 = vpop.xlane.xlu0 %1458  ;;  %1770 = vadd.xlane.f32.xlu0 %v4843_v15  ;;  %v4849_v41 = vpop.eup %3944  ;;  %3837 = vmatpush3.bf16.msra.mxu1 %v3834_v20 }
 0x1ea   : > { %3954 = vpow2.f32 %v1644_v21  ;;  %v1573_v25 = vsub.f32 %v4616_v27, %v1459_v58 }
 0x1eb   : > { %3956 = vpow2.f32 %v1676_v24  ;;  %v1682_v8 = vmul.f32 1.442695, %v1589_v61 }
 0x1ec   : > { %v4851_v5 = vpop.eup %3946  ;;  %v1650_v17 = vmul.f32 1.442695, %v1573_v25  ;;  %v1489_v14 = vpop.xlane.xlu1 %1488  ;;  %1802 = vadd.xlane.f32.xlu1 %v4849_v41 }
 0x1ed   : > { %v1588_v26 = vsub.f32 %v4620_v28, %v1489_v14  ;;  %v1457_v19 = vpop.xlane.xlu0 %1456  ;;  %1768 = vadd.xlane.f32.xlu0 %v4851_v5  ;;  %v4857_v27 = vpop.eup %3948 }
 0x1ee   : > { %3958 = vpow2.f32 %v1650_v17  ;;  %v1572_v22 = vsub.f32 %v4622_v29, %v1457_v19 }
 0x1ef   : > { %3960 = vpow2.f32 %v1682_v8  ;;  %v1680_v34 = vmul.f32 1.442695, %v1588_v26 }
 0x1f0   : > { %v4859_v46 = vpop.eup %3950  ;;  %v1648_v47 = vmul.f32 1.442695, %v1572_v22  ;;  %v1495_v23 = vpop.xlane.xlu1 %1494  ;;  %1800 = vadd.xlane.f32.xlu1 %v4857_v27 }
 0x1f1   : > { %v1591_v53 = vsub.f32 %v4625_v30, %v1495_v23  ;;  %v1463_v56 = vpop.xlane.xlu0 %1462  ;;  %1774 = vadd.xlane.f32.xlu0 %v4859_v46  ;;  %v4865_v63 = vpop.eup %3952 }
 0x1f2   : > { %3962 = vpow2.f32 %v1648_v47  ;;  %v1575_v28 = vsub.f32 %v4628_v31, %v1463_v56 }
 0x1f3   : > { %3964 = vpow2.f32 %v1680_v34  ;;  %v1686_v21 = vmul.f32 1.442695, %v1591_v53 }
 0x1f4   : > { %v4867_v29 = vpop.eup %3954  ;;  %v1654_v35 = vmul.f32 1.442695, %v1575_v28  ;;  %v1493_v20 = vpop.xlane.xlu1 %1492  ;;  %1806 = vadd.xlane.f32.xlu1 %v4865_v63 }
 0x1f5   : > { %v1590_v2 = vsub.f32 %v4632_v32, %v1493_v20  ;;  %v1461_v24 = vpop.xlane.xlu0 %1460  ;;  %1772 = vadd.xlane.f32.xlu0 %v4867_v29  ;;  %v4873_v61 = vpop.eup %3956 }
 0x1f6   : > { %3966 = vpow2.f32 %v1654_v35  ;;  %v1574_v30 = vsub.f32 %v4634_v33, %v1461_v24 }
 0x1f7   : > { %3968 = vpow2.f32 %v1686_v21  ;;  %v1684_v25 = vmul.f32 1.442695, %v1590_v2 }
 0x1f8   : > { %v4875_v31 = vpop.eup %3958  ;;  %v1652_v58 = vmul.f32 1.442695, %v1574_v30  ;;  %1804 = vadd.xlane.f32.xlu1 %v4873_v61 }
 0x1f9   : > { %v1531_v17 = vpop.xlane.xlu1 %1530  ;;  %v1499_v14 = vpop.xlane.xlu0 %1498  ;;  %1778 = vadd.xlane.f32.xlu0 %v4875_v31 }
 0x1fa   : > { %3970 = vpow2.f32 %v1652_v58  ;;  %v1609_v32 = vsub.f32 %v4640_v40, %v1531_v17  ;;  %v1593_v8 = vsub.f32 %v4638_v37, %v1499_v14  ;;  %v4881_v26 = vpop.eup %3960  ;;  %v371_v14 = vld [vmem:[%s4745_s23 + $0x100] sm:$0xff] }
 0x1fb   : > { %3972 = vpow2.f32 %v1684_v25 }
 0x1fc   : > { %v4883_v33 = vpop.eup %3962  ;;  %v1690_v19 = vmul.f32 1.442695, %v1593_v8  ;;  %1810 = vadd.xlane.f32.xlu1 %v4881_v26  ;;  %v1722_v22 = vmul.f32 1.442695, %v1609_v32  ;;  %v372_v32 = vld [vmem:[%s4745_s23 + $0x108] sm:$0xff] }
 0x1fd   : > { %v1529_v47 = vpop.xlane.xlu1 %1528  ;;  %v1497_v23 = vpop.xlane.xlu0 %1496  ;;  %1776 = vadd.xlane.f32.xlu0 %v4883_v33 }
 0x1fe   : > { %v1608_v34 = vsub.f32 %v4646_v50, %v1529_v47  ;;  %v1592_v53 = vsub.f32 %v4644_v49, %v1497_v23  ;;  %v4889_v40 = vpop.eup %3964  ;;  %3974 = vpow2.f32 %v1690_v19  ;;  %v4910_v19 = vpack.c.bf16 %v372_v32, %v371_v14  ;;  %v5327_v14 = vld [vmem:[#allocation4_spill] sm:$0xff] }
 0x1ff   : > { %3976 = vpow2.f32 %v1722_v22 }
 0x200   : > { %v4891_v37 = vpop.eup %3966  ;;  %v1688_v56 = vmul.f32 1.442695, %v1592_v53  ;;  %1808 = vadd.xlane.f32.xlu1 %v4889_v40  ;;  %v1720_v28 = vmul.f32 1.442695, %v1608_v34  ;;  %v5324_v34 = vld [vmem:[#allocation2_spill] sm:$0xff]  ;;  %v5325_v53 = vld [vmem:[#allocation3_spill] sm:$0xff]  ;;  %3839 = vmatprep.subr.bf16.mxu0 %v4910_v19 }
 0x201   : > { %v1535_v35 = vpop.xlane.xlu1 %1534  ;;  %v1503_v20 = vpop.xlane.xlu0 %1502  ;;  %1782 = vadd.xlane.f32.xlu0 %v4891_v37 }
 0x202   : > { %v1611_v21 = vsub.f32 %v4649_v52, %v1535_v35  ;;  %v1595_v50 = vsub.f32 %v4652_v54, %v1503_v20  ;;  %v4897_v49 = vpop.eup %3968  ;;  %3978 = vpow2.f32 %v1688_v56  ;;  %v388_v35 = vld [vmem:[%s4745_s23 + $0x188] sm:$0xff] }
 0x203   : > { %3980 = vpow2.f32 %v1720_v28  ;;  %v387_v28 = vld [vmem:[%s4745_s23 + $0x180] sm:$0xff] }
 0x204   : > { %v4899_v2 = vpop.eup %3970  ;;  %v1694_v24 = vmul.f32 1.442695, %v1595_v50  ;;  %1814 = vadd.xlane.f32.xlu1 %v4897_v49  ;;  %v1726_v30 = vmul.f32 1.442695, %v1611_v21  ;;  %v4922_v21 = vpack.c.bf16 %v388_v35, %v387_v28  ;;  %v5329_v28 = vld [vmem:[#allocation7_spill] sm:$0xff] }
 0x205   : > { %v1533_v58 = vpop.xlane.xlu1 %1532  ;;  %v1501_v25 = vpop.xlane.xlu0 %1500  ;;  %1780 = vadd.xlane.f32.xlu0 %v4899_v2 }
 0x206   : > { %v1610_v52 = vsub.f32 %v4658_v4, %v1533_v58  ;;  %v1594_v17 = vsub.f32 %v4656_v3, %v1501_v25  ;;  %v4905_v54 = vpop.eup %3972  ;;  %3982 = vpow2.f32 %v1694_v24  ;;  %3871 = vmatprep.subr.bf16.mxu1 %v4922_v21 }
 0x207   : > { %3984 = vpow2.f32 %v1726_v30 }
 0x208   : > { %v1692_v8 = vmul.f32 1.442695, %v1594_v17  ;;  %1812 = vadd.xlane.f32.xlu1 %v4905_v54  ;;  %v4912_v22 = vpop.eup %3974  ;;  %v1724_v47 = vmul.f32 1.442695, %v1610_v52  ;;  %v5326_v52 = vld [vmem:[#allocation5_spill] sm:$0xff] }
 0x209   : > { %v1539_v23 = vpop.xlane.xlu1 %1538  ;;  %v1507_v4 = vpop.xlane.xlu0 %1506  ;;  %1818 = vadd.xlane.f32.xlu0 %v4912_v22 }
 0x20a   : > { %v1613_v3 = vsub.f32 %v5324_v34, %v1539_v23  ;;  %v1597_v56 = vsub.f32 %v5325_v53, %v1507_v4  ;;  %v4920_v20 = vpop.eup %3976  ;;  %3986 = vpow2.f32 %v1692_v8  ;;  %v5328_v53 = vld [vmem:[#allocation6_spill] sm:$0xff] }
 0x20b   : > { %3988 = vpow2.f32 %v1724_v47 }
 0x20c   : > { %v1698_v50 = vmul.f32 1.442695, %v1597_v56  ;;  %1850 = vadd.xlane.f32.xlu1 %v4920_v20  ;;  %v4925_v24 = vpop.eup %3978  ;;  %v1730_v30 = vmul.f32 1.442695, %v1613_v3 }
 0x20d   : > { %v1537_v58 = vpop.xlane.xlu1 %1536  ;;  %v1505_v25 = vpop.xlane.xlu0 %1504  ;;  %1816 = vadd.xlane.f32.xlu0 %v4925_v24 }
 0x20e   : > { %v1612_v17 = vsub.f32 %v5326_v52, %v1537_v58  ;;  %v1596_v32 = vsub.f32 %v5327_v14, %v1505_v25  ;;  %v4931_v8 = vpop.eup %3980  ;;  %3990 = vpow2.f32 %v1698_v50 }
 0x20f   : > { %3992 = vpow2.f32 %v1730_v30 }
 0x210   : > { %v1696_v23 = vmul.f32 1.442695, %v1596_v32  ;;  %1848 = vadd.xlane.f32.xlu1 %v4931_v8  ;;  %v4934_v4 = vpop.eup %3982  ;;  %v1728_v47 = vmul.f32 1.442695, %v1612_v17 }
 0x211   : > { %v1543_v34 = vpop.xlane.xlu1 %1542  ;;  %v1511_v3 = vpop.xlane.xlu0 %1510  ;;  %1822 = vadd.xlane.f32.xlu0 %v4934_v4 }
 0x212   : > { %v1615_v56 = vsub.f32 %v5328_v53, %v1543_v34  ;;  %v1599_v35 = vsub.f32 %v5329_v28, %v1511_v3  ;;  %v4939_v58 = vpop.eup %3984  ;;  %3994 = vpow2.f32 %v1696_v23 }
 0x213   : > { %3996 = vpow2.f32 %v1728_v47 }
 0x214   : > { %v1702_v25 = vmul.f32 1.442695, %v1599_v35  ;;  %1854 = vadd.xlane.f32.xlu1 %v4939_v58  ;;  %v4942_v50 = vpop.eup %3986  ;;  %v1734_v52 = vmul.f32 1.442695, %v1615_v56 }
 0x215   : > { %v1541_v30 = vpop.xlane.xlu1 %1540  ;;  %v1509_v17 = vpop.xlane.xlu0 %1508  ;;  %1820 = vadd.xlane.f32.xlu0 %v4942_v50 }
 0x216   : > { %v1614_v14 = vsub.f32 %v4682_v39, %v1541_v30  ;;  %v1598_v32 = vsub.f32 %v4680_v9, %v1509_v17  ;;  %v4947_v34 = vpop.eup %3988  ;;  %3998 = vpow2.f32 %v1702_v25 }
 0x217   : > { %4000 = vpow2.f32 %v1734_v52 }
 0x218   : > { %v1700_v3 = vmul.f32 1.442695, %v1598_v32  ;;  %1852 = vadd.xlane.f32.xlu1 %v4947_v34  ;;  %v4950_v23 = vpop.eup %3990  ;;  %v1732_v53 = vmul.f32 1.442695, %v1614_v14 }
 0x219   : > { %v1547_v47 = vpop.xlane.xlu1 %1546  ;;  %v1515_v56 = vpop.xlane.xlu0 %1514  ;;  %1826 = vadd.xlane.f32.xlu0 %v4950_v23 }
 0x21a   : > { %v1617_v28 = vsub.f32 %v4685_v62, %v1547_v47  ;;  %v1601_v39 = vsub.f32 %v4688_v36, %v1515_v56  ;;  %v4955_v9 = vpop.eup %3992  ;;  %4002 = vpow2.f32 %v1700_v3 }
 0x21b   : > { %4004 = vpow2.f32 %v1732_v53 }
 0x21c   : > { %v1706_v35 = vmul.f32 1.442695, %v1601_v39  ;;  %1858 = vadd.xlane.f32.xlu1 %v4955_v9  ;;  %v4958_v25 = vpop.eup %3994  ;;  %v1738_v30 = vmul.f32 1.442695, %v1617_v28 }
 0x21d   : > { %v1545_v52 = vpop.xlane.xlu1 %1544  ;;  %v1513_v17 = vpop.xlane.xlu0 %1512  ;;  %1824 = vadd.xlane.f32.xlu0 %v4958_v25 }
 0x21e   : > { %v1616_v14 = vsub.f32 %v4694_v43, %v1545_v52  ;;  %v1600_v62 = vsub.f32 %v4692_v45, %v1513_v17  ;;  %v4963_v36 = vpop.eup %3996  ;;  %4006 = vpow2.f32 %v1706_v35 }
 0x21f   : > { %4008 = vpow2.f32 %v1738_v30 }
 0x220   : > { %v1704_v32 = vmul.f32 1.442695, %v1600_v62  ;;  %1856 = vadd.xlane.f32.xlu1 %v4963_v36  ;;  %v4966_v3 = vpop.eup %3998  ;;  %v1736_v47 = vmul.f32 1.442695, %v1616_v14 }
 0x221   : > { %5330 = vst [vmem:[#allocation2_spill] sm:$0xff] %v4966_v3  ;;  %v1551_v53 = vpop.xlane.xlu1 %1550  ;;  %v1519_v56 = vpop.xlane.xlu0 %1518  ;;  %1830 = vadd.xlane.f32.xlu0 %v4966_v3  ;;  %v378_v3 = vld [vmem:[%s4745_s23 + $0x138] sm:$0xff] }
 0x222   : > { %v1619_v28 = vsub.f32 %v4697_v1, %v1551_v53  ;;  %v1603_v43 = vsub.f32 %v4700_v6, %v1519_v56  ;;  %v4971_v45 = vpop.eup %4000  ;;  %4010 = vpow2.f32 %v1704_v32 }
 0x223   : > { %5331 = vst [vmem:[#allocation3_spill] sm:$0xff] %v4971_v45  ;;  %4012 = vpow2.f32 %v1736_v47 }
 0x224   : > { %v1710_v39 = vmul.f32 1.442695, %v1603_v43  ;;  %1862 = vadd.xlane.f32.xlu1 %v4971_v45  ;;  %v4974_v35 = vpop.eup %4002  ;;  %v1742_v52 = vmul.f32 1.442695, %v1619_v28  ;;  %v5334_v43 = vld [vmem:[#allocation8_spill] sm:$0xff] }
 0x225   : > { %v1549_v30 = vpop.xlane.xlu1 %1548  ;;  %v1517_v17 = vpop.xlane.xlu0 %1516  ;;  %1828 = vadd.xlane.f32.xlu0 %v4974_v35 }
 0x226   : > { %v1618_v14 = vsub.f32 %v4706_v11, %v1549_v30  ;;  %v1602_v1 = vsub.f32 %v4704_v10, %v1517_v17  ;;  %v4979_v6 = vpop.eup %4004  ;;  %4014 = vpow2.f32 %v1710_v39 }
 0x227   : > { %5332 = vst [vmem:[#allocation5_spill] sm:$0xff] %v4979_v6  ;;  %4016 = vpow2.f32 %v1742_v52 }
 0x228   : > { %v1708_v62 = vmul.f32 1.442695, %v1602_v1  ;;  %1860 = vadd.xlane.f32.xlu1 %v4979_v6  ;;  %v4982_v32 = vpop.eup %4006  ;;  %v1740_v53 = vmul.f32 1.442695, %v1618_v14  ;;  %v5337_v1 = vld [vmem:[#allocation10_spill] sm:$0xff]  ;;  %v5338_v6 = vld [vmem:[#allocation9_spill] sm:$0xff] }
 0x229   : > { %5333 = vst [vmem:[#allocation4_spill] sm:$0xff] %v4982_v32  ;;  %v1555_v47 = vpop.xlane.xlu1 %1554  ;;  %v1523_v56 = vpop.xlane.xlu0 %1522  ;;  %1834 = vadd.xlane.f32.xlu0 %v4982_v32 }
 0x22a   : > { %v1621_v28 = vsub.f32 %v4709_v12, %v1555_v47  ;;  %v1605_v11 = vsub.f32 %v5334_v43, %v1523_v56  ;;  %v4987_v10 = vpop.eup %4008  ;;  %4018 = vpow2.f32 %v1708_v62 }
 0x22b   : > { %5335 = vst [vmem:[#allocation6_spill] sm:$0xff] %v4987_v10  ;;  %4020 = vpow2.f32 %v1740_v53 }
 0x22c   : > { %v1714_v30 = vmul.f32 1.442695, %v1605_v11  ;;  %1866 = vadd.xlane.f32.xlu1 %v4987_v10  ;;  %v4990_v39 = vpop.eup %4010  ;;  %v1746_v17 = vmul.f32 1.442695, %v1621_v28 }
 0x22d   : > { %5336 = vst [vmem:[#allocation7_spill] sm:$0xff] %v4990_v39  ;;  %v1553_v52 = vpop.xlane.xlu1 %1552  ;;  %v1521_v14 = vpop.xlane.xlu0 %1520  ;;  %1832 = vadd.xlane.f32.xlu0 %v4990_v39 }
 0x22e   : > { %v1620_v45 = vsub.f32 %v5337_v1, %v1553_v52  ;;  %v1604_v12 = vsub.f32 %v5338_v6, %v1521_v14  ;;  %v4995_v47 = vpop.eup %4012  ;;  %4022 = vpow2.f32 %v1714_v30  ;;  %v5343_v14 = vld [vmem:[#allocation11_spill] sm:$0xff] }
 0x22f   : > { %5339 = vst [vmem:[#allocation8_spill] sm:$0xff] %v4995_v47  ;;  %4024 = vpow2.f32 %v1746_v17 }
 0x230   : > { %v1712_v56 = vmul.f32 1.442695, %v1604_v12  ;;  %1864 = vadd.xlane.f32.xlu1 %v4995_v47  ;;  %v4998_v62 = vpop.eup %4014  ;;  %v1744_v43 = vmul.f32 1.442695, %v1620_v45  ;;  %v5344_v12 = vld [vmem:[#allocation14_spill] sm:$0xff]  ;;  %v5345_v45 = vld [vmem:[#allocation13_spill] sm:$0xff] }
 0x231   : > { %5340 = vst [vmem:[#allocation10_spill] sm:$0xff] %v4998_v62  ;;  %v1559_v53 = vpop.xlane.xlu1 %1558  ;;  %v1527_v28 = vpop.xlane.xlu0 %1526  ;;  %1838 = vadd.xlane.f32.xlu0 %v4998_v62  ;;  %v5347_v62 = vld [vmem:[#allocation12_spill] sm:$0xff] }
 0x232   : > { %v5001_v11 = vpop.eup %4016  ;;  %4026 = vpow2.f32 %v1712_v56  ;;  %v1623_v1 = vsub.f32 %v5343_v14, %v1559_v53  ;;  %v1607_v32 = vsub.f32 %v5347_v62, %v1527_v28 }
 0x233   : > { %5341 = vst [vmem:[#allocation9_spill] sm:$0xff] %v5001_v11  ;;  %4028 = vpow2.f32 %v1744_v43 }
 0x234   : > { %1870 = vadd.xlane.f32.xlu1 %v5001_v11  ;;  %v5004_v6 = vpop.eup %4018  ;;  %v1750_v43 = vmul.f32 1.442695, %v1623_v1 }
 0x235   : > { %5342 = vst [vmem:[#allocation17_spill] sm:$0xff] %v5004_v6  ;;  %v1557_v30 = vpop.xlane.xlu1 %1556  ;;  %v1525_v52 = vpop.xlane.xlu0 %1524  ;;  %1836 = vadd.xlane.f32.xlu0 %v5004_v6  ;;  %v5357_v6 = vld [vmem:[#allocation16_spill] sm:$0xff] }
 0x236   : > { %v1622_v10 = vsub.f32 %v5344_v12, %v1557_v30  ;;  %v1606_v17 = vsub.f32 %v5345_v45, %v1525_v52  ;;  %v5010_v47 = vpop.eup %4020  ;;  %v1718_v30 = vmul.f32 1.442695, %v1607_v32 }
 0x237   : > { %5346 = vst [vmem:[#allocation11_spill] sm:$0xff] %v5010_v47 }
 0x238   : > { %v1748_v56 = vmul.f32 1.442695, %v1622_v10  ;;  %v1716_v39 = vmul.f32 1.442695, %v1606_v17  ;;  %1868 = vadd.xlane.f32.xlu1 %v5010_v47  ;;  %v5014_v11 = vpop.eup %4022  ;;  %v376_v47 = vld [vmem:[%s4745_s23 + $0x128] sm:$0xff] }
 0x239   : > { %5348 = vst [vmem:[#allocation14_spill] sm:$0xff] %v5014_v11  ;;  %1842 = vadd.xlane.f32.xlu0 %v5014_v11  ;;  %v5017_v53 = vpop.eup %4024  ;;  %v390_v11 = vld [vmem:[%s4745_s23 + $0x198] sm:$0xff] }
 0x23a   : > { %4030 = vpow2.f32 %v1748_v56  ;;  %5349 = vst [vmem:[#allocation13_spill] sm:$0xff] %v5017_v53 }
 0x23b   : > { %4032 = vpow2.f32 %v1716_v39 }
 0x23c   : > { %1874 = vadd.xlane.f32.xlu1 %v5017_v53  ;;  %v5020_v52 = vpop.eup %4026  ;;  %4034 = vpow2.f32 %v1750_v43 }
 0x23d   : > { %5350 = vst [vmem:[#allocation12_spill] sm:$0xff] %v5020_v52  ;;  %1840 = vadd.xlane.f32.xlu0 %v5020_v52  ;;  %v5023_v10 = vpop.eup %4028  ;;  %4036 = vpow2.f32 %v1718_v30 }
 0x23e   : > { %5351 = vst [vmem:[#allocation18_spill] sm:$0xff] %v5023_v10 }
 0x240   : > { %1872 = vadd.xlane.f32.xlu1 %v5023_v10 }
 0x244   : > { %v5026_v62 = vpop.eup %4030 }
 0x245   : > { %5352 = vst [vmem:[#allocation19_spill] sm:$0xff] %v5026_v62  ;;  %v5028_v28 = vpop.eup %4032  ;;  %1876 = vadd.xlane.f32.xlu1 %v5026_v62 }
 0x246   : > { %5353 = vst [vmem:[#allocation20_spill] sm:$0xff] %v5028_v28  ;;  %1844 = vadd.xlane.f32.xlu0 %v5028_v28  ;;  %v5032_v32 = vpop.eup %4034 }
 0x247   : > { %5354 = vst [vmem:[#allocation21_spill] sm:$0xff] %v5032_v32  ;;  %v5034_v39 = vpop.eup %4036 }
 0x248   : > { %5355 = vst [vmem:[#allocation22_spill] sm:$0xff] %v5034_v39 }
 0x249   : > { %1878 = vadd.xlane.f32.xlu1 %v5032_v32  ;;  %v373_v32 = vld [vmem:[%s4745_s23 + $0x110] sm:$0xff] }
 0x24a   : > { %1846 = vadd.xlane.f32.xlu0 %v5034_v39  ;;  %v374_v39 = vld [vmem:[%s4745_s23 + $0x118] sm:$0xff] }
 0x24b   : > { %v3842_v10 = vpack.c.bf16 %v374_v39, %v373_v32 }
 0x255   : > { %v1755_v14 = vpop.xlane.xlu0 %1754 }
 0x256   : > { %4038 = vrcp.f32 %v1755_v14 }
 0x259   : > { %v1787_v1 = vpop.xlane.xlu1 %1786  ;;  %v1753_v12 = vpop.xlane.xlu0 %1752 }
 0x25a   : > { %4040 = vrcp.f32 %v1753_v12 }
 0x25b   : > { %4042 = vrcp.f32 %v1787_v1 }
 0x25d   : > { %v1785_v45 = vpop.xlane.xlu1 %1784 }
 0x25e   : > { %4044 = vrcp.f32 %v1785_v45  ;;  %v1759_v17 = vpop.xlane.xlu0 %1758  ;;  %v5356_v45 = vld [vmem:[#allocation15_spill] sm:$0xff] }
 0x25f   : > { %4046 = vrcp.f32 %v1759_v17  ;;  %v389_v17 = vld [vmem:[%s4745_s23 + $0x190] sm:$0xff] }
 0x260   : > { %v4039_v30 = vpop.eup %4038  ;;  %v3874_v32 = vpack.c.bf16 %v390_v11, %v389_v17  ;;  %v393_v17 = vld [vmem:[%s4745_s23 + $0x1b0] sm:$0xff] }
 0x261   : > { %v1791_v56 = vpop.xlane.xlu1 %1790  ;;  %v1883_v53 = vmul.f32 %v4039_v30, %v5356_v45  ;;  %v391_v30 = vld [vmem:[%s4745_s23 + $0x1a0] sm:$0xff] }
 0x262   : > { %v1757_v43 = vpop.xlane.xlu0 %1756 }
 0x263   : > { %4048 = vrcp.f32 %v1757_v43  ;;  %v375_v43 = vld [vmem:[%s4745_s23 + $0x120] sm:$0xff] }
 0x264   : > { %v4041_v28 = vpop.eup %4040  ;;  %4050 = vrcp.f32 %v1791_v56  ;;  %v3846_v39 = vpack.c.bf16 %v376_v47, %v375_v43  ;;  %v394_v43 = vld [vmem:[%s4745_s23 + $0x1b8] sm:$0xff] }
 0x265   : > { %v1789_v62 = vpop.xlane.xlu1 %1788  ;;  %v1881_v1 = vmul.f32 %v4041_v28, %v4754_v60  ;;  %v4043_v12 = vpop.eup %4042 }
 0x266   : > { %4052 = vrcp.f32 %v1789_v62  ;;  %v1763_v14 = vpop.xlane.xlu0 %1762  ;;  %v1915_v60 = vmul.f32 %v4043_v12, %v5357_v6 }
 0x267   : > { %3390 = vmatprep.mubr.f32.mxu0 %v1881_v1  ;;  %4054 = vrcp.f32 %v1763_v14  ;;  %v392_v1 = vld [vmem:[%s4745_s23 + $0x1a8] sm:$0xff] }
 0x268   : > { %v4045_v52 = vpop.eup %4044  ;;  %3391 = vmatmul.mubr.f32.vlgmr.msra.gmra.mrb[32].mxu0 %v1883_v53  ;;  %v377_v53 = vld [vmem:[%s4745_s23 + $0x130] sm:$0xff]  ;;  %v3878_v47 = vpack.c.bf16 %v392_v1, %v391_v30  ;;  %v395_v30 = vld [vmem:[%s4745_s23 + $0x1c0] sm:$0xff]  ;;  %v396_v1 = vld [vmem:[%s4745_s23 + $0x1c8] sm:$0xff] }
 0x269   : > { %v1795_v56 = vpop.xlane.xlu1 %1794  ;;  %v1913_v62 = vmul.f32 %v4045_v52, %v4775_v55  ;;  %3841 = vmatpush3.bf16.msra.mxu0 %v4910_v19  ;;  %v4047_v45 = vpop.eup %4046  ;;  %v3850_v12 = vpack.c.bf16 %v378_v3, %v377_v53  ;;  %v3882_v3 = vpack.c.bf16 %v394_v43, %v393_v17  ;;  %v381_v53 = vld [vmem:[%s4745_s23 + $0x150] sm:$0xff]  ;;  %v398_v17 = vld [vmem:[%s4745_s23 + $0x1d8] sm:$0xff] }
 0x26a   : > { %v1761_v28 = vpop.xlane.xlu0 %1760  ;;  %3843 = vmatprep.subr.bf16.mxu0 %v3842_v10  ;;  %v1887_v14 = vmul.f32 %v4047_v45, %v4777_v48 }
 0x26b   : > { %4056 = vrcp.f32 %v1761_v28  ;;  %3446 = vmatprep.mubr.f32.mxu1 %v1913_v62  ;;  %v379_v62 = vld [vmem:[%s4745_s23 + $0x140] sm:$0xff] }
 0x26c   : > { %3447 = vmatmul.mubr.f32.vlgmr.msra.gmra.mrb[32].mxu1 %v1915_v60  ;;  %4058 = vrcp.f32 %v1795_v56 }
 0x26d   : > { %v4049_v55 = vpop.eup %4048  ;;  %v1793_v6 = vpop.xlane.xlu1 %1792  ;;  %3873 = vmatpush3.bf16.msra.mxu1 %v4922_v21  ;;  %3845 = vmatpush3.bf16.msra.mxu0 %v3842_v10  ;;  %v380_v21 = vld [vmem:[%s4745_s23 + $0x148] sm:$0xff] }
 0x26e   : > { %4060 = vrcp.f32 %v1793_v6  ;;  %v1767_v19 = vpop.xlane.xlu0 %1766  ;;  %v1885_v11 = vmul.f32 %v4049_v55, %v4785_v38  ;;  %3875 = vmatprep.subr.bf16.mxu1 %v3874_v32  ;;  %v4051_v52 = vpop.eup %4050  ;;  %3847 = vmatprep.subr.bf16.mxu0 %v3846_v39  ;;  %v3854_v28 = vpack.c.bf16 %v380_v21, %v379_v62  ;;  %v3886_v6 = vpack.c.bf16 %v396_v1, %v395_v30  ;;  %v385_v30 = vld [vmem:[%s4745_s23 + $0x170] sm:$0xff] }
 0x26f   : > { %4062 = vrcp.f32 %v1767_v19  ;;  %v1919_v48 = vmul.f32 %v4051_v52, %v4783_v59 }
 0x270   : > { %v4053_v56 = vpop.eup %4052  ;;  %3393 = vmatprep.mubr.f32.mxu0 %v1885_v11 }
 0x271   : > { %v1799_v60 = vpop.xlane.xlu1 %1798  ;;  %3394 = vmatmul.mubr.f32.gmra.mrb[34].mxu0 %v1887_v14  ;;  %v1917_v38 = vmul.f32 %v4053_v56, %v4794_v42  ;;  %3877 = vmatpush3.bf16.msra.mxu1 %v3874_v32  ;;  %v4055_v45 = vpop.eup %4054  ;;  %v382_v42 = vld [vmem:[%s4745_s23 + $0x158] sm:$0xff]  ;;  %v397_v14 = vld [vmem:[%s4745_s23 + $0x1d0] sm:$0xff]  ;;  %v383_v56 = vld [vmem:[%s4745_s23 + $0x160] sm:$0xff] }
 0x272   : > { %v1765_v10 = vpop.xlane.xlu0 %1764  ;;  %3849 = vmatpush3.bf16.msra.mxu0 %v3846_v39  ;;  %3879 = vmatprep.subr.bf16.mxu1 %v3878_v47  ;;  %v1891_v11 = vmul.f32 %v4055_v45, %v4797_v0  ;;  %v3858_v52 = vpack.c.bf16 %v382_v42, %v381_v53  ;;  %v3890_v21 = vpack.c.bf16 %v398_v17, %v397_v14 }
 0x273   : > { %4064 = vrcp.f32 %v1765_v10  ;;  %3449 = vmatprep.mubr.f32.mxu1 %v1917_v38  ;;  %3851 = vmatprep.subr.bf16.mxu0 %v3850_v12  ;;  %v399_v38 = vld [vmem:[%s4745_s23 + $0x1e0] sm:$0xff]  ;;  %v400_v10 = vld [vmem:[%s4745_s23 + $0x1e8] sm:$0xff] }
 0x274   : > { %3450 = vmatmul.mubr.f32.gmra.mrb[34].mxu1 %v1919_v48  ;;  %4066 = vrcp.f32 %v1799_v60  ;;  %v3894_v45 = vpack.c.bf16 %v400_v10, %v399_v38 }
 0x275   : > { %v4057_v32 = vpop.eup %4056  ;;  %v1797_v55 = vpop.xlane.xlu1 %1796  ;;  %3881 = vmatpush3.bf16.msra.mxu1 %v3878_v47  ;;  %v384_v47 = vld [vmem:[%s4745_s23 + $0x168] sm:$0xff] }
 0x276   : > { %4068 = vrcp.f32 %v1797_v55  ;;  %v1771_v59 = vpop.xlane.xlu0 %1770  ;;  %v1889_v39 = vmul.f32 %v4057_v32, %v4809_v7  ;;  %3853 = vmatpush3.bf16.msra.mxu0 %v3850_v12  ;;  %3883 = vmatprep.subr.bf16.mxu1 %v3882_v3  ;;  %v4059_v19 = vpop.eup %4058  ;;  %v3862_v60 = vpack.c.bf16 %v384_v47, %v383_v56  ;;  %v401_v55 = vld [vmem:[%s4745_s23 + $0x1f0] sm:$0xff] }
 0x277   : > { %3855 = vmatprep.subr.bf16.mxu0 %v3854_v28  ;;  %4070 = vrcp.f32 %v1771_v59  ;;  %v1923_v0 = vmul.f32 %v4059_v19, %v4806_v57  ;;  %v402_v59 = vld [vmem:[%s4745_s23 + $0x1f8] sm:$0xff] }
 0x278   : > { %v4061_v43 = vpop.eup %4060  ;;  %3396 = vmatprep.mubr.f32.mxu0 %v1889_v39 }
 0x279   : > { %v1803_v62 = vpop.xlane.xlu1 %1802  ;;  %3397 = vmatmul.mubr.f32.gmra.mrb[36].mxu0 %v1891_v11  ;;  %v1921_v7 = vmul.f32 %v4061_v43, %v4818_v13  ;;  %3885 = vmatpush3.bf16.msra.mxu1 %v3882_v3  ;;  %v4063_v48 = vpop.eup %4062  ;;  %v386_v13 = vld [vmem:[%s4745_s23 + $0x178] sm:$0xff] }
 0x27a   : > { %v1769_v12 = vpop.xlane.xlu0 %1768  ;;  %3857 = vmatpush3.bf16.msra.mxu0 %v3854_v28  ;;  %3887 = vmatprep.subr.bf16.mxu1 %v3886_v6  ;;  %v1895_v42 = vmul.f32 %v4063_v48, %v4821_v16  ;;  %v3866_v32 = vpack.c.bf16 %v386_v13, %v385_v30 }
 0x27b   : > { %4072 = vrcp.f32 %v1769_v12  ;;  %3452 = vmatprep.mubr.f32.mxu1 %v1921_v7  ;;  %3859 = vmatprep.subr.bf16.mxu0 %v3858_v52 }
 0x27c   : > { %3453 = vmatmul.mubr.f32.gmra.mrb[36].mxu1 %v1923_v0  ;;  %4074 = vrcp.f32 %v1803_v62 }
 0x27d   : > { %v4065_v3 = vpop.eup %4064  ;;  %v1801_v1 = vpop.xlane.xlu1 %1800  ;;  %3889 = vmatpush3.bf16.msra.mxu1 %v3886_v6 }
 0x27e   : > { %4076 = vrcp.f32 %v1801_v1  ;;  %v1775_v57 = vpop.xlane.xlu0 %1774  ;;  %v1893_v28 = vmul.f32 %v4065_v3, %v4833_v44  ;;  %3861 = vmatpush3.bf16.msra.mxu0 %v3858_v52  ;;  %3891 = vmatprep.subr.bf16.mxu1 %v3890_v21  ;;  %v4067_v53 = vpop.eup %4066  ;;  %v3898_v52 = vpack.c.bf16 %v402_v59, %v401_v55 }
 0x27f   : > { %3863 = vmatprep.subr.bf16.mxu0 %v3862_v60  ;;  %4078 = vrcp.f32 %v1775_v57  ;;  %v1927_v44 = vmul.f32 %v4067_v53, %v4830_v18 }
 0x280   : > { %v4069_v39 = vpop.eup %4068  ;;  %3399 = vmatprep.mubr.f32.mxu0 %v1893_v28 }
 0x281   : > { %v1807_v19 = vpop.xlane.xlu1 %1806  ;;  %3400 = vmatmul.mubr.f32.gmra.mrb[38].mxu0 %v1895_v42  ;;  %v1925_v6 = vmul.f32 %v4069_v39, %v4841_v51  ;;  %3893 = vmatpush3.bf16.msra.mxu1 %v3890_v21  ;;  %v4071_v16 = vpop.eup %4070 }
 0x282   : > { %v1773_v11 = vpop.xlane.xlu0 %1772  ;;  %3865 = vmatpush3.bf16.msra.mxu0 %v3862_v60  ;;  %3895 = vmatprep.subr.bf16.mxu1 %v3894_v45  ;;  %v1899_v18 = vmul.f32 %v4071_v16, %v4843_v15 }
 0x283   : > { %4080 = vrcp.f32 %v1773_v11  ;;  %3455 = vmatprep.mubr.f32.mxu1 %v1925_v6  ;;  %3867 = vmatprep.subr.bf16.mxu0 %v3866_v32 }
 0x284   : > { %3456 = vmatmul.mubr.f32.gmra.mrb[38].mxu1 %v1927_v44  ;;  %4082 = vrcp.f32 %v1807_v19 }
 0x285   : > { %v4073_v14 = vpop.eup %4072  ;;  %v1805_v17 = vpop.xlane.xlu1 %1804  ;;  %3897 = vmatpush3.bf16.msra.mxu1 %v3894_v45 }
 0x286   : > { %4084 = vrcp.f32 %v1805_v17  ;;  %v1779_v43 = vpop.xlane.xlu0 %1778  ;;  %v1897_v51 = vmul.f32 %v4073_v14, %v4851_v5  ;;  %3869 = vmatpush3.bf16.msra.mxu0 %v3866_v32  ;;  %3899 = vmatprep.subr.bf16.mxu1 %v3898_v52  ;;  %v4075_v56 = vpop.eup %4074 }
 0x287   : > { %4086 = vrcp.f32 %v1779_v43  ;;  %v1931_v0 = vmul.f32 %v4075_v56, %v4849_v41 }
 0x288   : > { %v4077_v47 = vpop.eup %4076  ;;  %3402 = vmatprep.mubr.f32.mxu0 %v1897_v51 }
 0x289   : > { %v1811_v62 = vpop.xlane.xlu1 %1810  ;;  %3403 = vmatmul.mubr.f32.gmra.mrb[40].mxu0 %v1899_v18  ;;  %v1929_v7 = vmul.f32 %v4077_v47, %v4857_v27  ;;  %3901 = vmatpush3.bf16.msra.mxu1 %v3898_v52  ;;  %v4079_v21 = vpop.eup %4078 }
 0x28a   : > { %v1777_v12 = vpop.xlane.xlu0 %1776  ;;  %v1903_v48 = vmul.f32 %v4079_v21, %v4859_v46 }
 0x28b   : > { %4088 = vrcp.f32 %v1777_v12  ;;  %3458 = vmatprep.mubr.f32.mxu1 %v1929_v7 }
 0x28c   : > { %3459 = vmatmul.mubr.f32.gmra.mrb[40].mxu1 %v1931_v0  ;;  %4090 = vrcp.f32 %v1811_v62 }
 0x28d   : > { %v4081_v5 = vpop.eup %4080  ;;  %v1809_v60 = vpop.xlane.xlu1 %1808 }
 0x28e   : > { %4092 = vrcp.f32 %v1809_v60  ;;  %v1783_v15 = vpop.xlane.xlu0 %1782  ;;  %v1901_v38 = vmul.f32 %v4081_v5, %v4867_v29  ;;  %v4083_v10 = vpop.eup %4082 }
 0x28f   : > { %4094 = vrcp.f32 %v1783_v15  ;;  %v1935_v3 = vmul.f32 %v4083_v10, %v4865_v63 }
 0x290   : > { %v4085_v27 = vpop.eup %4084  ;;  %3405 = vmatprep.mubr.f32.mxu0 %v1901_v38 }
 0x291   : > { %v1815_v30 = vpop.xlane.xlu1 %1814  ;;  %3406 = vmatmul.mubr.f32.gmra.mrb[42].mxu0 %v1903_v48  ;;  %v1933_v41 = vmul.f32 %v4085_v27, %v4873_v61  ;;  %v4087_v1 = vpop.eup %4086 }
 0x292   : > { %v1781_v13 = vpop.xlane.xlu0 %1780  ;;  %v1907_v53 = vmul.f32 %v4087_v1, %v4875_v31 }
 0x293   : > { %4096 = vrcp.f32 %v1781_v13  ;;  %3461 = vmatprep.mubr.f32.mxu1 %v1933_v41 }
 0x294   : > { %3462 = vmatmul.mubr.f32.gmra.mrb[42].mxu1 %v1935_v3  ;;  %4098 = vrcp.f32 %v1815_v30 }
 0x295   : > { %v4089_v57 = vpop.eup %4088  ;;  %v1813_v29 = vpop.xlane.xlu1 %1812 }
 0x296   : > { %4100 = vrcp.f32 %v1813_v29  ;;  %v1905_v46 = vmul.f32 %v4089_v57, %v4883_v33  ;;  %v4091_v28 = vpop.eup %4090  ;;  %v1819_v45 = vpop.xlane.xlu0 %1818 }
 0x297   : > { %v1939_v32 = vmul.f32 %v4091_v28, %v4881_v26  ;;  %4102 = vrcp.f32 %v1819_v45 }
 0x298   : > { %v4093_v42 = vpop.eup %4092  ;;  %3408 = vmatprep.mubr.f32.mxu0 %v1905_v46 }
 0x299   : > { %v1851_v61 = vpop.xlane.xlu1 %1850  ;;  %3409 = vmatmul.mubr.f32.gmra.mrb[44].mxu0 %v1907_v53  ;;  %v1937_v63 = vmul.f32 %v4093_v42, %v4889_v40  ;;  %v4095_v59 = vpop.eup %4094  ;;  %v5358_v53 = vld [vmem:[#allocation2_spill] sm:$0xff] }
 0x29a   : > { %v1817_v55 = vpop.xlane.xlu0 %1816  ;;  %v1911_v11 = vmul.f32 %v4095_v59, %v4891_v37 }
 0x29b   : > { %3464 = vmatprep.mubr.f32.mxu1 %v1937_v63  ;;  %4104 = vrcp.f32 %v1817_v55  ;;  %v5360_v63 = vld [vmem:[#allocation3_spill] sm:$0xff] }
 0x29c   : > { %3465 = vmatmul.mubr.f32.gmra.mrb[44].mxu1 %v1939_v32  ;;  %4106 = vrcp.f32 %v1851_v61 }
 0x29d   : > { %v4097_v39 = vpop.eup %4096  ;;  %v1849_v33 = vpop.xlane.xlu1 %1848 }
 0x29e   : > { %4108 = vrcp.f32 %v1849_v33  ;;  %v1909_v31 = vmul.f32 %v4097_v39, %v4899_v2  ;;  %v4099_v19 = vpop.eup %4098  ;;  %v1823_v6 = vpop.xlane.xlu0 %1822 }
 0x29f   : > { %v1943_v52 = vmul.f32 %v4099_v19, %v4897_v49  ;;  %4110 = vrcp.f32 %v1823_v6  ;;  %v5361_v19 = vld [vmem:[#allocation7_spill] sm:$0xff] }
 0x2a0   : > { %v4101_v44 = vpop.eup %4100  ;;  %3411 = vmatprep.mubr.f32.mxu0 %v1909_v31 }
 0x2a1   : > { %v1855_v40 = vpop.xlane.xlu1 %1854  ;;  %3412 = vmatmul.mubr.f32.gmra.mrb[46].mxu0 %v1911_v11  ;;  %v1941_v26 = vmul.f32 %v4101_v44, %v4905_v54  ;;  %v4103_v14 = vpop.eup %4102  ;;  %v5362_v44 = vld [vmem:[#allocation4_spill] sm:$0xff] }
 0x2a2   : > { %v1821_v16 = vpop.xlane.xlu0 %1820  ;;  %v1947_v18 = vmul.f32 %v4103_v14, %v4912_v22  ;;  %v5364_v14 = vld [vmem:[#allocation6_spill] sm:$0xff] }
 0x2a3   : > { %3467 = vmatprep.mubr.f32.mxu1 %v1941_v26  ;;  %4112 = vrcp.f32 %v1821_v16 }
 0x2a4   : > { %3468 = vmatmul.mubr.f32.gmra.mrb[46].mxu1 %v1943_v52  ;;  %4114 = vrcp.f32 %v1855_v40  ;;  %v5363_v52 = vld [vmem:[#allocation8_spill] sm:$0xff] }
 0x2a5   : > { %v1853_v2 = vpop.xlane.xlu1 %1852  ;;  %v4105_v17 = vpop.eup %4104 }
 0x2a6   : > { %4116 = vrcp.f32 %v1853_v2  ;;  %v4107_v43 = vpop.eup %4106  ;;  %v1827_v37 = vpop.xlane.xlu0 %1826  ;;  %v1945_v51 = vmul.f32 %v4105_v17, %v4925_v24 }
 0x2a7   : > { %v1979_v47 = vmul.f32 %v4107_v43, %v4920_v20  ;;  %4118 = vrcp.f32 %v1827_v37 }
 0x2a8   : > { %v4109_v56 = vpop.eup %4108  ;;  %3502 = vmatprep.mubr.f32.mxu0 %v1945_v51 }
 0x2a9   : > { %v1859_v54 = vpop.xlane.xlu1 %1858  ;;  %v1977_v49 = vmul.f32 %v4109_v56, %v4931_v8  ;;  %3503 = vmatmul.mubr.f32.vlgmr.msra.gmra.mrb[48].mxu0 %v1947_v18  ;;  %v4111_v7 = vpop.eup %4110  ;;  %v5365_v18 = vld [vmem:[#allocation17_spill] sm:$0xff] }
 0x2aa   : > { %v1825_v62 = vpop.xlane.xlu0 %1824  ;;  %v1951_v8 = vmul.f32 %v4111_v7, %v4934_v4  ;;  %v5367_v7 = vld [vmem:[#allocation11_spill] sm:$0xff] }
 0x2ab   : > { %3558 = vmatprep.mubr.f32.mxu1 %v1977_v49  ;;  %4120 = vrcp.f32 %v1825_v62 }
 0x2ac   : > { %3559 = vmatmul.mubr.f32.vlgmr.msra.gmra.mrb[48].mxu1 %v1979_v47  ;;  %4122 = vrcp.f32 %v1859_v54  ;;  %v5366_v47 = vld [vmem:[#allocation10_spill] sm:$0xff] }
 0x2ad   : > { %v1857_v12 = vpop.xlane.xlu1 %1856  ;;  %v4113_v0 = vpop.eup %4112 }
 0x2ae   : > { %4124 = vrcp.f32 %v1857_v12  ;;  %v4115_v24 = vpop.eup %4114  ;;  %v1831_v21 = vpop.xlane.xlu0 %1830  ;;  %v1949_v22 = vmul.f32 %v4113_v0, %v4942_v50 }
 0x2af   : > { %v1983_v15 = vmul.f32 %v4115_v24, %v4939_v58  ;;  %4126 = vrcp.f32 %v1831_v21  ;;  %v5368_v24 = vld [vmem:[#allocation9_spill] sm:$0xff] }
 0x2b0   : > { %v4117_v5 = vpop.eup %4116  ;;  %3505 = vmatprep.mubr.f32.mxu0 %v1949_v22 }
 0x2b1   : > { %v1863_v20 = vpop.xlane.xlu1 %1862  ;;  %v1981_v60 = vmul.f32 %v4117_v5, %v4947_v34  ;;  %3506 = vmatmul.mubr.f32.gmra.mrb[50].mxu0 %v1951_v8  ;;  %v4119_v10 = vpop.eup %4118 }
 0x2b2   : > { %v1829_v38 = vpop.xlane.xlu0 %1828  ;;  %v1955_v34 = vmul.f32 %v4119_v10, %v4950_v23 }
 0x2b3   : > { %3561 = vmatprep.mubr.f32.mxu1 %v1981_v60  ;;  %4128 = vrcp.f32 %v1829_v38  ;;  %v5369_v38 = vld [vmem:[#allocation12_spill] sm:$0xff] }
 0x2b4   : > { %3562 = vmatmul.mubr.f32.gmra.mrb[50].mxu1 %v1983_v15  ;;  %4130 = vrcp.f32 %v1863_v20 }
 0x2b5   : > { %v1861_v48 = vpop.xlane.xlu1 %1860  ;;  %v4121_v27 = vpop.eup %4120 }
 0x2b6   : > { %4132 = vrcp.f32 %v1861_v48  ;;  %v4123_v50 = vpop.eup %4122  ;;  %v1835_v30 = vpop.xlane.xlu0 %1834  ;;  %v1953_v4 = vmul.f32 %v4121_v27, %v4958_v25  ;;  %v5370_v27 = vld [vmem:[#allocation14_spill] sm:$0xff] }
 0x2b7   : > { %v1987_v3 = vmul.f32 %v4123_v50, %v4955_v9  ;;  %4134 = vrcp.f32 %v1835_v30  ;;  %v5359_v9 = vld [vmem:[#allocation5_spill] sm:$0xff]  ;;  %v5371_v30 = vld [vmem:[#allocation18_spill] sm:$0xff] }
 0x2b8   : > { %v4125_v41 = vpop.eup %4124  ;;  %3508 = vmatprep.mubr.f32.mxu0 %v1953_v4 }
 0x2b9   : > { %v1867_v13 = vpop.xlane.xlu1 %1866  ;;  %v1985_v58 = vmul.f32 %v4125_v41, %v4963_v36  ;;  %3509 = vmatmul.mubr.f32.gmra.mrb[52].mxu0 %v1955_v34  ;;  %v4127_v57 = vpop.eup %4126  ;;  %v5372_v41 = vld [vmem:[#allocation13_spill] sm:$0xff] }
 0x2ba   : > { %v1833_v1 = vpop.xlane.xlu0 %1832  ;;  %v1959_v36 = vmul.f32 %v4127_v57, %v5358_v53  ;;  %v5374_v57 = vld [vmem:[#allocation20_spill] sm:$0xff] }
 0x2bb   : > { %3564 = vmatprep.mubr.f32.mxu1 %v1985_v58  ;;  %4136 = vrcp.f32 %v1833_v1 }
 0x2bc   : > { %3565 = vmatmul.mubr.f32.gmra.mrb[52].mxu1 %v1987_v3  ;;  %4138 = vrcp.f32 %v1867_v13  ;;  %v5373_v3 = vld [vmem:[#allocation19_spill] sm:$0xff] }
 0x2bd   : > { %v1865_v29 = vpop.xlane.xlu1 %1864  ;;  %v4129_v46 = vpop.eup %4128 }
 0x2be   : > { %4140 = vrcp.f32 %v1865_v29  ;;  %v4131_v25 = vpop.eup %4130  ;;  %v1839_v28 = vpop.xlane.xlu0 %1838  ;;  %v1957_v23 = vmul.f32 %v4129_v46, %v4974_v35 }
 0x2bf   : > { %v1991_v32 = vmul.f32 %v4131_v25, %v5360_v63  ;;  %4142 = vrcp.f32 %v1839_v28  ;;  %v5375_v28 = vld [vmem:[#allocation21_spill] sm:$0xff] }
 0x2c0   : > { %v4133_v45 = vpop.eup %4132  ;;  %3511 = vmatprep.mubr.f32.mxu0 %v1957_v23 }
 0x2c1   : > { %v1871_v42 = vpop.xlane.xlu1 %1870  ;;  %v1989_v61 = vmul.f32 %v4133_v45, %v5359_v9  ;;  %3512 = vmatmul.mubr.f32.gmra.mrb[54].mxu0 %v1959_v36  ;;  %v4135_v59 = vpop.eup %4134  ;;  %v5376_v45 = vld [vmem:[#allocation22_spill] sm:$0xff] }
 0x2c2   : > { %v1837_v55 = vpop.xlane.xlu0 %1836  ;;  %v1963_v40 = vmul.f32 %v4135_v59, %v5362_v44 }
 0x2c3   : > { %3567 = vmatprep.mubr.f32.mxu1 %v1989_v61  ;;  %4144 = vrcp.f32 %v1837_v55 }
 0x2c4   : > { %3568 = vmatmul.mubr.f32.gmra.mrb[54].mxu1 %v1991_v32  ;;  %4146 = vrcp.f32 %v1871_v42 }
 0x2c5   : > { %v1869_v39 = vpop.xlane.xlu1 %1868  ;;  %v4137_v33 = vpop.eup %4136 }
 0x2c6   : > { %4148 = vrcp.f32 %v1869_v39  ;;  %v4139_v35 = vpop.eup %4138  ;;  %v1843_v31 = vpop.xlane.xlu0 %1842  ;;  %v1961_v6 = vmul.f32 %v4137_v33, %v5361_v19 }
 0x2c7   : > { %v1995_v2 = vmul.f32 %v4139_v35, %v5364_v14  ;;  %4150 = vrcp.f32 %v1843_v31 }
 0x2c8   : > { %v4141_v11 = vpop.eup %4140  ;;  %3514 = vmatprep.mubr.f32.mxu0 %v1961_v6 }
 0x2c9   : > { %v1875_v26 = vpop.xlane.xlu1 %1874  ;;  %v1993_v16 = vmul.f32 %v4141_v11, %v5363_v52  ;;  %3515 = vmatmul.mubr.f32.gmra.mrb[56].mxu0 %v1963_v40  ;;  %v4143_v43 = vpop.eup %4142 }
 0x2ca   : > { %v1841_v17 = vpop.xlane.xlu0 %1840  ;;  %v1967_v62 = vmul.f32 %v4143_v43, %v5366_v47 }
 0x2cb   : > { %3570 = vmatprep.mubr.f32.mxu1 %v1993_v16  ;;  %4152 = vrcp.f32 %v1841_v17 }
 0x2cc   : > { %3571 = vmatmul.mubr.f32.gmra.mrb[56].mxu1 %v1995_v2  ;;  %4154 = vrcp.f32 %v1875_v26 }
 0x2cd   : > { %v1873_v37 = vpop.xlane.xlu1 %1872  ;;  %v4145_v51 = vpop.eup %4144 }
 0x2ce   : > { %4156 = vrcp.f32 %v1873_v37  ;;  %v4147_v56 = vpop.eup %4146  ;;  %v1965_v54 = vmul.f32 %v4145_v51, %v5365_v18 }
 0x2cf   : > { %v1999_v21 = vmul.f32 %v4147_v56, %v5368_v24 }
 0x2d0   : > { %v4149_v49 = vpop.eup %4148  ;;  %3517 = vmatprep.mubr.f32.mxu0 %v1965_v54 }
 0x2d1   : > { %v1997_v12 = vmul.f32 %v4149_v49, %v5367_v7  ;;  %3518 = vmatmul.mubr.f32.gmra.mrb[58].mxu0 %v1967_v62  ;;  %v4151_v5 = vpop.eup %4150 }
 0x2d2   : > { %v1877_v0 = vpop.xlane.xlu1 %1876  ;;  %v1971_v50 = vmul.f32 %v4151_v5, %v5370_v27 }
 0x2d3   : > { %4158 = vrcp.f32 %v1877_v0  ;;  %v1845_v22 = vpop.xlane.xlu0 %1844  ;;  %3573 = vmatprep.mubr.f32.mxu1 %v1997_v12 }
 0x2d4   : > { %4160 = vrcp.f32 %v1845_v22  ;;  %3574 = vmatmul.mubr.f32.gmra.mrb[58].mxu1 %v1999_v21 }
 0x2d5   : > { %v4153_v8 = vpop.eup %4152 }
 0x2d6   : > { %v1879_v20 = vpop.xlane.xlu1 %1878  ;;  %v4155_v60 = vpop.eup %4154  ;;  %v1969_v10 = vmul.f32 %v4153_v8, %v5369_v38 }
 0x2d7   : > { %4162 = vrcp.f32 %v1879_v20  ;;  %v1847_v15 = vpop.xlane.xlu0 %1846  ;;  %v2003_v34 = vmul.f32 %v4155_v60, %v5372_v41 }
 0x2d8   : > { %v4157_v48 = vpop.eup %4156  ;;  %4164 = vrcp.f32 %v1847_v15  ;;  %3520 = vmatprep.mubr.f32.mxu0 %v1969_v10 }
 0x2d9   : > { %v2001_v4 = vmul.f32 %v4157_v48, %v5371_v30  ;;  %3521 = vmatmul.mubr.f32.gmra.mrb[60].mxu0 %v1971_v50 }
 0x2db   : > { %3576 = vmatprep.mubr.f32.mxu1 %v2001_v4 }
 0x2dc   : > { %3577 = vmatmul.mubr.f32.gmra.mrb[60].mxu1 %v2003_v34 }
 0x2dd   : > { %v4159_v13 = vpop.eup %4158 }
 0x2de   : > { %v4161_v58 = vpop.eup %4160  ;;  %v2005_v1 = vmul.f32 %v4159_v13, %v5373_v3 }
 0x2df   : > { %v1973_v29 = vmul.f32 %v4161_v58, %v5374_v57 }
 0x2e0   : > { %3579 = vmatprep.mubr.f32.mxu1 %v2005_v1 }
 0x2e1   : > { %v4163_v46 = vpop.eup %4162  ;;  %3523 = vmatprep.mubr.f32.mxu0 %v1973_v29 }
 0x2e2   : > { %v4165_v25 = vpop.eup %4164  ;;  %v2007_v23 = vmul.f32 %v4163_v46, %v5375_v28 }
 0x2e3   : > { %v1975_v53 = vmul.f32 %v4165_v25, %v5376_v45 }
 0x2e4   : > { %3580 = vmatmul.mubr.f32.gmra.mrb[62].mxu1 %v2007_v23 }
 0x2e5   : > { %3524 = vmatmul.mubr.f32.gmra.mrb[62].mxu0 %v1975_v53 }
 0x33b   : > { %v3392_v36 = vpop.f32.mrb[32].mxu0 }
 0x33c   : > { %2589 = vst.msk [vmem:[%s5136_s26 + $0x8] sm:$0xff] %vm403_vm0, %v3392_v36  ;;  %v2074_v42 = vpop.f32.mrb[33].mxu0 }
 0x33d   : > { %2588 = vst.msk [vmem:[%s5136_s26] sm:$0xff] %vm403_vm0, %v2074_v42 }
 0x33f   : > { %v3448_v9 = vpop.f32.mrb[32].mxu1 }
 0x340   : > { %2605 = vst.msk [vmem:[%s5136_s26 + $0x88] sm:$0xff] %vm403_vm0, %v3448_v9  ;;  %v2219_v61 = vpop.f32.mrb[33].mxu1 }
 0x341   : > { %2604 = vst.msk [vmem:[%s5136_s26 + $0x80] sm:$0xff] %vm403_vm0, %v2219_v61 }
 0x344   : > { %v3395_v63 = vpop.f32.mrb[34].mxu0 }
 0x345   : > { %2591 = vst.msk [vmem:[%s5136_s26 + $0x18] sm:$0xff] %vm403_vm0, %v3395_v63  ;;  %v2084_v32 = vpop.f32.mrb[35].mxu0 }
 0x346   : > { %2590 = vst.msk [vmem:[%s5136_s26 + $0x10] sm:$0xff] %vm403_vm0, %v2084_v32 }
 0x347   : > { %v3451_v55 = vpop.f32.mrb[34].mxu1 }
 0x348   : > { %2607 = vst.msk [vmem:[%s5136_s26 + $0x98] sm:$0xff] %vm403_vm0, %v3451_v55  ;;  %v2229_v59 = vpop.f32.mrb[35].mxu1 }
 0x349   : > { %2606 = vst.msk [vmem:[%s5136_s26 + $0x90] sm:$0xff] %vm403_vm0, %v2229_v59 }
 0x34c   : > { %v3398_v39 = vpop.f32.mrb[36].mxu0 }
 0x34d   : > { %2593 = vst.msk [vmem:[%s5136_s26 + $0x28] sm:$0xff] %vm403_vm0, %v3398_v39  ;;  %v2094_v33 = vpop.f32.mrb[37].mxu0 }
 0x34e   : > { %2592 = vst.msk [vmem:[%s5136_s26 + $0x20] sm:$0xff] %vm403_vm0, %v2094_v33 }
 0x34f   : > { %v3454_v35 = vpop.f32.mrb[36].mxu1 }
 0x350   : > { %2609 = vst.msk [vmem:[%s5136_s26 + $0xa8] sm:$0xff] %vm403_vm0, %v3454_v35  ;;  %v2239_v31 = vpop.f32.mrb[37].mxu1 }
 0x351   : > { %2608 = vst.msk [vmem:[%s5136_s26 + $0xa0] sm:$0xff] %vm403_vm0, %v2239_v31 }
 0x354   : > { %v3401_v19 = vpop.f32.mrb[38].mxu0 }
 0x355   : > { %2595 = vst.msk [vmem:[%s5136_s26 + $0x38] sm:$0xff] %vm403_vm0, %v3401_v19  ;;  %v2104_v6 = vpop.f32.mrb[39].mxu0 }
 0x356   : > { %2594 = vst.msk [vmem:[%s5136_s26 + $0x30] sm:$0xff] %vm403_vm0, %v2104_v6 }
 0x357   : > { %v3457_v11 = vpop.f32.mrb[38].mxu1 }
 0x358   : > { %2611 = vst.msk [vmem:[%s5136_s26 + $0xb8] sm:$0xff] %vm403_vm0, %v3457_v11  ;;  %v2249_v44 = vpop.f32.mrb[39].mxu1 }
 0x359   : > { %2610 = vst.msk [vmem:[%s5136_s26 + $0xb0] sm:$0xff] %vm403_vm0, %v2249_v44 }
 0x35c   : > { %v3404_v40 = vpop.f32.mrb[40].mxu0 }
 0x35d   : > { %2597 = vst.msk [vmem:[%s5136_s26 + $0x48] sm:$0xff] %vm403_vm0, %v3404_v40  ;;  %v2114_v26 = vpop.f32.mrb[41].mxu0 }
 0x35e   : > { %2596 = vst.msk [vmem:[%s5136_s26 + $0x40] sm:$0xff] %vm403_vm0, %v2114_v26 }
 0x35f   : > { %v3460_v52 = vpop.f32.mrb[40].mxu1 }
 0x360   : > { %2613 = vst.msk [vmem:[%s5136_s26 + $0xc8] sm:$0xff] %vm403_vm0, %v3460_v52  ;;  %v2259_v16 = vpop.f32.mrb[41].mxu1 }
 0x361   : > { %2612 = vst.msk [vmem:[%s5136_s26 + $0xc0] sm:$0xff] %vm403_vm0, %v2259_v16 }
 0x364   : > { %v3407_v14 = vpop.f32.mrb[42].mxu0 }
 0x365   : > { %2599 = vst.msk [vmem:[%s5136_s26 + $0x58] sm:$0xff] %vm403_vm0, %v3407_v14  ;;  %v2124_v2 = vpop.f32.mrb[43].mxu0 }
 0x366   : > { %2598 = vst.msk [vmem:[%s5136_s26 + $0x50] sm:$0xff] %vm403_vm0, %v2124_v2 }
 0x367   : > { %v3463_v17 = vpop.f32.mrb[42].mxu1 }
 0x368   : > { %2615 = vst.msk [vmem:[%s5136_s26 + $0xd8] sm:$0xff] %vm403_vm0, %v3463_v17  ;;  %v2269_v43 = vpop.f32.mrb[43].mxu1 }
 0x369   : > { %2614 = vst.msk [vmem:[%s5136_s26 + $0xd0] sm:$0xff] %vm403_vm0, %v2269_v43 }
 0x36c   : > { %v3410_v37 = vpop.f32.mrb[44].mxu0 }
 0x36d   : > { %2601 = vst.msk [vmem:[%s5136_s26 + $0x68] sm:$0xff] %vm403_vm0, %v3410_v37  ;;  %v2134_v51 = vpop.f32.mrb[45].mxu0 }
 0x36e   : > { %2600 = vst.msk [vmem:[%s5136_s26 + $0x60] sm:$0xff] %vm403_vm0, %v2134_v51 }
 0x36f   : > { %v3466_v56 = vpop.f32.mrb[44].mxu1 }
 0x370   : > { %2617 = vst.msk [vmem:[%s5136_s26 + $0xe8] sm:$0xff] %vm403_vm0, %v3466_v56  ;;  %v2279_v18 = vpop.f32.mrb[45].mxu1 }
 0x371   : > { %2616 = vst.msk [vmem:[%s5136_s26 + $0xe0] sm:$0xff] %vm403_vm0, %v2279_v18 }
 0x374   : > { %v3413_v54 = vpop.f32.mrb[46].mxu0 }
 0x375   : > { %2603 = vst.msk [vmem:[%s5136_s26 + $0x78] sm:$0xff] %vm403_vm0, %v3413_v54  ;;  %v2144_v49 = vpop.f32.mrb[47].mxu0 }
 0x376   : > { %2602 = vst.msk [vmem:[%s5136_s26 + $0x70] sm:$0xff] %vm403_vm0, %v2144_v49 }
 0x377   : > { %v3469_v47 = vpop.f32.mrb[46].mxu1 }
 0x378   : > { %2619 = vst.msk [vmem:[%s5136_s26 + $0xf8] sm:$0xff] %vm403_vm0, %v3469_v47  ;;  %v2289_v62 = vpop.f32.mrb[47].mxu1 }
 0x379   : > { %2618 = vst.msk [vmem:[%s5136_s26 + $0xf0] sm:$0xff] %vm403_vm0, %v2289_v62 }
 0x37c   : > { %v3504_v7 = vpop.f32.mrb[48].mxu0 }
 0x37d   : > { %2621 = vst.msk [vmem:[%s5136_s26 + $0x108] sm:$0xff] %vm403_vm0, %v3504_v7  ;;  %v2364_v12 = vpop.f32.mrb[49].mxu0 }
 0x37e   : > { %2620 = vst.msk [vmem:[%s5136_s26 + $0x100] sm:$0xff] %vm403_vm0, %v2364_v12 }
 0x37f   : > { %v3560_v0 = vpop.f32.mrb[48].mxu1 }
 0x380   : > { %2637 = vst.msk [vmem:[%s5136_s26 + $0x188] sm:$0xff] %vm403_vm0, %v3560_v0  ;;  %v2509_v24 = vpop.f32.mrb[49].mxu1 }
 0x381   : > { %2636 = vst.msk [vmem:[%s5136_s26 + $0x180] sm:$0xff] %vm403_vm0, %v2509_v24 }
 0x384   : > { %v3507_v21 = vpop.f32.mrb[50].mxu0 }
 0x385   : > { %2623 = vst.msk [vmem:[%s5136_s26 + $0x118] sm:$0xff] %vm403_vm0, %v3507_v21  ;;  %v2374_v22 = vpop.f32.mrb[51].mxu0 }
 0x386   : > { %2622 = vst.msk [vmem:[%s5136_s26 + $0x110] sm:$0xff] %vm403_vm0, %v2374_v22 }
 0x387   : > { %v3563_v5 = vpop.f32.mrb[50].mxu1 }
 0x388   : > { %2639 = vst.msk [vmem:[%s5136_s26 + $0x198] sm:$0xff] %vm403_vm0, %v3563_v5  ;;  %v2519_v8 = vpop.f32.mrb[51].mxu1 }
 0x389   : > { %2638 = vst.msk [vmem:[%s5136_s26 + $0x190] sm:$0xff] %vm403_vm0, %v2519_v8 }
 0x38c   : > { %v3510_v20 = vpop.f32.mrb[52].mxu0 }
 0x38d   : > { %2625 = vst.msk [vmem:[%s5136_s26 + $0x128] sm:$0xff] %vm403_vm0, %v3510_v20  ;;  %v2384_v60 = vpop.f32.mrb[53].mxu0 }
 0x38e   : > { %2624 = vst.msk [vmem:[%s5136_s26 + $0x120] sm:$0xff] %vm403_vm0, %v2384_v60 }
 0x38f   : > { %v3566_v15 = vpop.f32.mrb[52].mxu1 }
 0x390   : > { %2641 = vst.msk [vmem:[%s5136_s26 + $0x1a8] sm:$0xff] %vm403_vm0, %v3566_v15  ;;  %v2529_v38 = vpop.f32.mrb[53].mxu1 }
 0x391   : > { %2640 = vst.msk [vmem:[%s5136_s26 + $0x1a0] sm:$0xff] %vm403_vm0, %v2529_v38 }
 0x394   : > { %v3513_v10 = vpop.f32.mrb[54].mxu0 }
 0x395   : > { %2627 = vst.msk [vmem:[%s5136_s26 + $0x138] sm:$0xff] %vm403_vm0, %v3513_v10  ;;  %v2394_v48 = vpop.f32.mrb[55].mxu0 }
 0x396   : > { %2626 = vst.msk [vmem:[%s5136_s26 + $0x130] sm:$0xff] %vm403_vm0, %v2394_v48 }
 0x397   : > { %v3569_v27 = vpop.f32.mrb[54].mxu1 }
 0x398   : > { %2643 = vst.msk [vmem:[%s5136_s26 + $0x1b8] sm:$0xff] %vm403_vm0, %v3569_v27  ;;  %v2539_v50 = vpop.f32.mrb[55].mxu1 }
 0x399   : > { %2642 = vst.msk [vmem:[%s5136_s26 + $0x1b0] sm:$0xff] %vm403_vm0, %v2539_v50 }
 0x39c   : > { %v3516_v30 = vpop.f32.mrb[56].mxu0 }
 0x39d   : > { %2629 = vst.msk [vmem:[%s5136_s26 + $0x148] sm:$0xff] %vm403_vm0, %v3516_v30  ;;  %v2404_v4 = vpop.f32.mrb[57].mxu0 }
 0x39e   : > { %2628 = vst.msk [vmem:[%s5136_s26 + $0x140] sm:$0xff] %vm403_vm0, %v2404_v4 }
 0x39f   : > { %v3572_v41 = vpop.f32.mrb[56].mxu1 }
 0x3a0   : > { %2645 = vst.msk [vmem:[%s5136_s26 + $0x1c8] sm:$0xff] %vm403_vm0, %v3572_v41  ;;  %v2549_v34 = vpop.f32.mrb[57].mxu1 }
 0x3a1   : > { %2644 = vst.msk [vmem:[%s5136_s26 + $0x1c0] sm:$0xff] %vm403_vm0, %v2549_v34 }
 0x3a4   : > { %v3519_v13 = vpop.f32.mrb[58].mxu0 }
 0x3a5   : > { %2631 = vst.msk [vmem:[%s5136_s26 + $0x158] sm:$0xff] %vm403_vm0, %v3519_v13  ;;  %v2414_v58 = vpop.f32.mrb[59].mxu0 }
 0x3a6   : > { %2630 = vst.msk [vmem:[%s5136_s26 + $0x150] sm:$0xff] %vm403_vm0, %v2414_v58 }
 0x3a7   : > { %v3575_v3 = vpop.f32.mrb[58].mxu1 }
 0x3a8   : > { %2647 = vst.msk [vmem:[%s5136_s26 + $0x1d8] sm:$0xff] %vm403_vm0, %v3575_v3  ;;  %v2559_v1 = vpop.f32.mrb[59].mxu1 }
 0x3a9   : > { %2646 = vst.msk [vmem:[%s5136_s26 + $0x1d0] sm:$0xff] %vm403_vm0, %v2559_v1 }
 0x3ac   : > { %v3522_v57 = vpop.f32.mrb[60].mxu0 }
 0x3ad   : > { %2633 = vst.msk [vmem:[%s5136_s26 + $0x168] sm:$0xff] %vm403_vm0, %v3522_v57  ;;  %v2424_v29 = vpop.f32.mrb[61].mxu0 }
 0x3ae   : > { %2632 = vst.msk [vmem:[%s5136_s26 + $0x160] sm:$0xff] %vm403_vm0, %v2424_v29 }
 0x3af   : > { %v3578_v46 = vpop.f32.mrb[60].mxu1 }
 0x3b0   : > { %2649 = vst.msk [vmem:[%s5136_s26 + $0x1e8] sm:$0xff] %vm403_vm0, %v3578_v46  ;;  %v2569_v25 = vpop.f32.mrb[61].mxu1 }
 0x3b1   : > { %2648 = vst.msk [vmem:[%s5136_s26 + $0x1e0] sm:$0xff] %vm403_vm0, %v2569_v25 }
 0x3b7   : > { %v3581_v28 = vpop.f32.mrb[62].mxu1 }
 0x3b8   : > { %2651 = vst.msk [vmem:[%s5136_s26 + $0x1f8] sm:$0xff] %vm403_vm0, %v3581_v28  ;;  %v3525_v23 = vpop.f32.mrb[62].mxu0  ;;  %v2579_v45 = vpop.f32.mrb[63].mxu1 }
 0x3b9   : > { %2635 = vst.msk [vmem:[%s5136_s26 + $0x178] sm:$0xff] %vm403_vm0, %v3525_v23  ;;  %2650 = vst.msk [vmem:[%s5136_s26 + $0x1f0] sm:$0xff] %vm403_vm0, %v2579_v45  ;;  %v2434_v53 = vpop.f32.mrb[63].mxu0 }
 0x3ba   : > { %2634 = vst.msk [vmem:[%s5136_s26 + $0x170] sm:$0xff] %vm403_vm0, %v2434_v53 }
 0x3bb PF: > { %s13_s12 = sadd.s32 1, %s4172_s12  }
 0x3bc   : > { %p10_p4 = scmp.ge.s32.totalorder %s13_s12, 4  }
 0x3be   :  { %12 = sbr.rel (!%p10_p4) target bundleno = 1 (0x1), region = 68 }

// kernel: encoder_forward.17
= control target key start
LH: loop header
LB: loop body
LE: loop exit
PB: predicated region body
PF: predicated region fallthrough
CT: control target
= control target key end

     0   :  { %s1763_s21 = smov 0   ;;  %s1765_s22 = smov 0   ;;  %s2435_s0 = inlined_call_operand.vmem [shape: f32[256,128], index: 0, kind: input, shape index: {}]   ;;  %s2436_s1 = inlined_call_operand.vmem [shape: f32[128,512], index: 1, kind: input, shape index: {}]   ;;  %s2437_s2 = inlined_call_operand.vmem [shape: f32[1,512], index: 2, kind: input, shape index: {}]   ;;  %s2438_s3 = inlined_call_operand.vmem [shape: f32[512,128], index: 3, kind: input, shape index: {}]   ;;  %s2439_s4 = inlined_call_operand.vmem [shape: f32[1,128], index: 4, kind: input, shape index: {}]   ;;  %s2440_s5 = inlined_call_operand.vmem [shape: f32[256,128], index: 5, kind: input, shape index: {}]   ;;  %s2441_s6 = inlined_call_operand.vmem [shape: f32[256,128], index: 6, kind: output, shape index: {}]  }
   0x1   :  { %s1767_s23 = smov 0   ;;  %s1769_s24 = smov 0  }
   0x2   :  { %s1771_s25 = smov 0  }
   0x3 LB: > { %s25_s26 = sadd.s32 1, %s1719_s24  ;;  %p68_p1 = scmp.ne.s32.totalorder %s1711_s22, %s1707_s21  ;;  %s1723_s25 = sphi %s1771_s25, %s16_s25   ;;  %s1719_s24 = sphi %s1769_s24, %s2445_s24   ;;  %s1715_s23 = sphi %s1767_s23, %s2444_s23   ;;  %s1711_s22 = sphi %s1765_s22, %s2443_s22   ;;  %s1707_s21 = sphi %s1763_s21, %s2442_s21  }
   0x4   : > { %p26_p0 = scmp.ge.s32.totalorder %s25_s26, 2  ;;  %p69_p2 = scmp.eq.s32.totalorder %s1723_s25, 0 }
   0x5   : > { %s61_s28 = sadd.s32 1, %s1711_s22  ;;  %p1513_p5 = scmp.ge.s32.totalorder %s1723_s25, 2 }
   0x6   : > { %s2447_s26 = smov (%p26_p0, %s25_s26), 0  ;;  %p70_p3 = por %p69_p2, %p68_p1 }
   0x7   : > { %s58_s27 = ssub.s32 %s1719_s24, %s2447_s26  ;;  %240 = sbr.rel (%p1513_p5) target bundleno = 34 (0x22), region = 28 }
   0x8   : > { %p59_p4 = scmp.eq.s32.totalorder %s58_s27, 0 }
   0xa   : > { %s1798_s29 = scalar_select %p59_p4, %s1711_s22, %s61_s28  }
   0xe   : > { %243 = sbr.rel (!%p70_p3) target bundleno = 34 (0x22), region = 32  ;;  %s245_s30 = sand.u32 (%p70_p3), 1, %s1711_s22  }
   0xf   : > { %s1529_s7 = sshll.u32 (%p70_p3), %s1719_s24, 4  ;;  %s1514_s8 = sshll.u32 (%p70_p3), %s245_s30, 8 }
  0x10   : > { %s1806_s11 = scalar_lea.vmem (%p70_p3), %s2436_s1, %s1529_s7  ;;  %s1811_s12 = scalar_lea.vmem (%p70_p3), [#allocation3], %s1514_s8 }
  0x11   : > { %v263_v0 = vld [vmem:[%s1806_s11] sm:$0xff] (%p70_p3)  ;;  %v265_v1 = vld [vmem:[%s1806_s11 + $0x8] sm:$0xff] (%p70_p3) }
  0x12   : > { %v267_v2 = vld [vmem:[%s1806_s11 + $0x20] sm:$0xff] (%p70_p3)  ;;  %264 = vst [vmem:[%s1811_s12] sm:$0xff] (%p70_p3), %v263_v0  ;;  %266 = vst [vmem:[%s1811_s12 + $0x8] sm:$0xff] (%p70_p3), %v265_v1  ;;  %v269_v3 = vld [vmem:[%s1806_s11 + $0x28] sm:$0xff] (%p70_p3) }
  0x13   : > { %268 = vst [vmem:[%s1811_s12 + $0x10] sm:$0xff] (%p70_p3), %v267_v2  ;;  %v271_v4 = vld [vmem:[%s1806_s11 + $0x40] sm:$0xff] (%p70_p3)  ;;  %v273_v5 = vld [vmem:[%s1806_s11 + $0x48] sm:$0xff] (%p70_p3)  ;;  %270 = vst [vmem:[%s1811_s12 + $0x18] sm:$0xff] (%p70_p3), %v269_v3 }
  0x14   : > { %272 = vst [vmem:[%s1811_s12 + $0x20] sm:$0xff] (%p70_p3), %v271_v4  ;;  %274 = vst [vmem:[%s1811_s12 + $0x28] sm:$0xff] (%p70_p3), %v273_v5  ;;  %v275_v6 = vld [vmem:[%s1806_s11 + $0x60] sm:$0xff] (%p70_p3)  ;;  %v277_v7 = vld [vmem:[%s1806_s11 + $0x68] sm:$0xff] (%p70_p3) }
  0x15   : > { %v279_v8 = vld [vmem:[%s1806_s11 + $0x80] sm:$0xff]  ;;  %276 = vst [vmem:[%s1811_s12 + $0x30] sm:$0xff] %v275_v6  ;;  %278 = vst [vmem:[%s1811_s12 + $0x38] sm:$0xff] %v277_v7  ;;  %v281_v9 = vld [vmem:[%s1806_s11 + $0x88] sm:$0xff] }
  0x16   : > { %280 = vst [vmem:[%s1811_s12 + $0x40] sm:$0xff] %v279_v8  ;;  %v283_v10 = vld [vmem:[%s1806_s11 + $0xa0] sm:$0xff]  ;;  %v285_v11 = vld [vmem:[%s1806_s11 + $0xa8] sm:$0xff]  ;;  %282 = vst [vmem:[%s1811_s12 + $0x48] sm:$0xff] %v281_v9 }
  0x17   : > { %284 = vst [vmem:[%s1811_s12 + $0x50] sm:$0xff] %v283_v10  ;;  %286 = vst [vmem:[%s1811_s12 + $0x58] sm:$0xff] %v285_v11  ;;  %v287_v12 = vld [vmem:[%s1806_s11 + $0xc0] sm:$0xff]  ;;  %v289_v13 = vld [vmem:[%s1806_s11 + $0xc8] sm:$0xff] }
  0x18   : > { %v291_v14 = vld [vmem:[%s1806_s11 + $0xe0] sm:$0xff]  ;;  %288 = vst [vmem:[%s1811_s12 + $0x60] sm:$0xff] %v287_v12  ;;  %290 = vst [vmem:[%s1811_s12 + $0x68] sm:$0xff] %v289_v13  ;;  %v293_v15 = vld [vmem:[%s1806_s11 + $0xe8] sm:$0xff] }
  0x19   : > { %292 = vst [vmem:[%s1811_s12 + $0x70] sm:$0xff] %v291_v14  ;;  %v295_v16 = vld [vmem:[%s1806_s11 + $0x100] sm:$0xff]  ;;  %v297_v17 = vld [vmem:[%s1806_s11 + $0x108] sm:$0xff]  ;;  %294 = vst [vmem:[%s1811_s12 + $0x78] sm:$0xff] %v293_v15 }
  0x1a   : > { %296 = vst [vmem:[%s1811_s12 + $0x80] sm:$0xff] %v295_v16  ;;  %298 = vst [vmem:[%s1811_s12 + $0x88] sm:$0xff] %v297_v17  ;;  %v299_v18 = vld [vmem:[%s1806_s11 + $0x120] sm:$0xff]  ;;  %v301_v19 = vld [vmem:[%s1806_s11 + $0x128] sm:$0xff] }
  0x1b   : > { %v303_v20 = vld [vmem:[%s1806_s11 + $0x140] sm:$0xff]  ;;  %300 = vst [vmem:[%s1811_s12 + $0x90] sm:$0xff] %v299_v18  ;;  %302 = vst [vmem:[%s1811_s12 + $0x98] sm:$0xff] %v301_v19  ;;  %v305_v21 = vld [vmem:[%s1806_s11 + $0x148] sm:$0xff] }
  0x1c   : > { %304 = vst [vmem:[%s1811_s12 + $0xa0] sm:$0xff] %v303_v20  ;;  %v307_v22 = vld [vmem:[%s1806_s11 + $0x160] sm:$0xff]  ;;  %v309_v23 = vld [vmem:[%s1806_s11 + $0x168] sm:$0xff]  ;;  %306 = vst [vmem:[%s1811_s12 + $0xa8] sm:$0xff] %v305_v21 }
  0x1d   : > { %308 = vst [vmem:[%s1811_s12 + $0xb0] sm:$0xff] %v307_v22  ;;  %310 = vst [vmem:[%s1811_s12 + $0xb8] sm:$0xff] %v309_v23  ;;  %v311_v24 = vld [vmem:[%s1806_s11 + $0x180] sm:$0xff]  ;;  %v313_v25 = vld [vmem:[%s1806_s11 + $0x188] sm:$0xff] }
  0x1e   : > { %v315_v26 = vld [vmem:[%s1806_s11 + $0x1a0] sm:$0xff]  ;;  %312 = vst [vmem:[%s1811_s12 + $0xc0] sm:$0xff] %v311_v24  ;;  %314 = vst [vmem:[%s1811_s12 + $0xc8] sm:$0xff] %v313_v25  ;;  %v317_v27 = vld [vmem:[%s1806_s11 + $0x1a8] sm:$0xff] }
  0x1f   : > { %316 = vst [vmem:[%s1811_s12 + $0xd0] sm:$0xff] %v315_v26  ;;  %v319_v28 = vld [vmem:[%s1806_s11 + $0x1c0] sm:$0xff]  ;;  %v321_v29 = vld [vmem:[%s1806_s11 + $0x1c8] sm:$0xff]  ;;  %318 = vst [vmem:[%s1811_s12 + $0xd8] sm:$0xff] %v317_v27 }
  0x20   : > { %320 = vst [vmem:[%s1811_s12 + $0xe0] sm:$0xff] %v319_v28  ;;  %322 = vst [vmem:[%s1811_s12 + $0xe8] sm:$0xff] %v321_v29  ;;  %v323_v30 = vld [vmem:[%s1806_s11 + $0x1e0] sm:$0xff]  ;;  %v325_v31 = vld [vmem:[%s1806_s11 + $0x1e8] sm:$0xff] }
  0x21   : > { %324 = vst [vmem:[%s1811_s12 + $0xf0] sm:$0xff] %v323_v30  ;;  %326 = vst [vmem:[%s1811_s12 + $0xf8] sm:$0xff] %v325_v31 }
  0x22 PF: > { %p1517_p6 = scmp.ge.s32.totalorder %s1723_s25, 1  ;;  %p348_p7 = scmp.lt.s32.totalorder %s1723_s25, 3 }
  0x24   : > { %p349_p8 = pnand %p1517_p6, %p348_p7 }
  0x25   : > { %s355_s13 = sand.u32 (!%p349_p8), 1, %s1707_s21   ;;  %s1519_s14 = sshll.u32 (!%p349_p8), %s1715_s23, 1 }
  0x26   : > { %352 = sbr.rel (%p349_p8) target bundleno = 667 (0x29b), region = 63  ;;  %s1518_s15 = sshll.u32 (!%p349_p8), %s355_s13, 8 }
  0x27   : > { %p411_p9 = scmp.lt.s32.totalorder (!%p349_p8), %s1519_s14, 3  ;;  %s1520_s16 = sshll.u32 (!%p349_p8), %s1715_s23, 5 }
  0x28   : > { %p416_p10 = scmp.lt.s32.totalorder (!%p349_p8), %s1520_s16, 63  ;;  %s1890_s21 = scalar_lea.vmem (!%p349_p8), [#allocation3], %s1518_s15 }
  0x29   : > { %p1522_p11 = scmp.ne.s32.totalorder (!%p349_p8), %s1715_s23, 0 }
  0x2d   : > { %s2449_s14 = smov (!%p411_p9, %s1519_s14), 3  ;;  %s2451_s16 = smov (!%p416_p10, %s1520_s16), 63 }
  0x2e   : > { %s413_s19 = scalar_lea.vmem %s2437_s2, %s2449_s14  ;;  %s1521_s20 = sshll.u32 %s2451_s16, 3  ;;  %v1725_v32 = vmov (!%p1522_p11), 0.0  }
  0x2f   : > { %s1888_s30 = scalar_lea.vmem %s2438_s3, %s1521_s20  ;;  %436 = sbr.rel (%p1522_p11) target bundleno = 63 (0x3f), region = 71  ;;  %437 = vst [vmem:[#allocation2] sm:$0xff] (!%p1522_p11), %v1725_v32  ;;  %438 = vst [vmem:[#allocation2 + $0x8] sm:$0xff] (!%p1522_p11), %v1725_v32 }
  0x30   : > { %439 = vst [vmem:[#allocation2 + $0x10] sm:$0xff] (!%p1522_p11), %v1725_v32  ;;  %440 = vst [vmem:[#allocation2 + $0x18] sm:$0xff] (!%p1522_p11), %v1725_v32 }
  0x31   : > { %441 = vst [vmem:[#allocation2 + $0x20] sm:$0xff] (!%p1522_p11), %v1725_v32  ;;  %442 = vst [vmem:[#allocation2 + $0x28] sm:$0xff] (!%p1522_p11), %v1725_v32 }
  0x32   : > { %443 = vst [vmem:[#allocation2 + $0x30] sm:$0xff] (!%p1522_p11), %v1725_v32  ;;  %444 = vst [vmem:[#allocation2 + $0x38] sm:$0xff] (!%p1522_p11), %v1725_v32 }
  0x33   : > { %445 = vst [vmem:[#allocation2 + $0x40] sm:$0xff] (!%p1522_p11), %v1725_v32  ;;  %446 = vst [vmem:[#allocation2 + $0x48] sm:$0xff] (!%p1522_p11), %v1725_v32 }
  0x34   : > { %447 = vst [vmem:[#allocation2 + $0x50] sm:$0xff] (!%p1522_p11), %v1725_v32  ;;  %448 = vst [vmem:[#allocation2 + $0x58] sm:$0xff] (!%p1522_p11), %v1725_v32 }
  0x35   : > { %449 = vst [vmem:[#allocation2 + $0x60] sm:$0xff] (!%p1522_p11), %v1725_v32  ;;  %450 = vst [vmem:[#allocation2 + $0x68] sm:$0xff] (!%p1522_p11), %v1725_v32 }
  0x36   : > { %451 = vst [vmem:[#allocation2 + $0x70] sm:$0xff] %v1725_v32  ;;  %452 = vst [vmem:[#allocation2 + $0x78] sm:$0xff] %v1725_v32 }
  0x37   : > { %453 = vst [vmem:[#allocation2 + $0x80] sm:$0xff] %v1725_v32  ;;  %454 = vst [vmem:[#allocation2 + $0x88] sm:$0xff] %v1725_v32 }
  0x38   : > { %455 = vst [vmem:[#allocation2 + $0x90] sm:$0xff] %v1725_v32  ;;  %456 = vst [vmem:[#allocation2 + $0x98] sm:$0xff] %v1725_v32 }
  0x39   : > { %457 = vst [vmem:[#allocation2 + $0xa0] sm:$0xff] %v1725_v32  ;;  %458 = vst [vmem:[#allocation2 + $0xa8] sm:$0xff] %v1725_v32 }
  0x3a   : > { %459 = vst [vmem:[#allocation2 + $0xb0] sm:$0xff] %v1725_v32  ;;  %460 = vst [vmem:[#allocation2 + $0xb8] sm:$0xff] %v1725_v32 }
  0x3b   : > { %461 = vst [vmem:[#allocation2 + $0xc0] sm:$0xff] %v1725_v32  ;;  %462 = vst [vmem:[#allocation2 + $0xc8] sm:$0xff] %v1725_v32 }
  0x3c   : > { %463 = vst [vmem:[#allocation2 + $0xd0] sm:$0xff] %v1725_v32  ;;  %464 = vst [vmem:[#allocation2 + $0xd8] sm:$0xff] %v1725_v32 }
  0x3d   : > { %465 = vst [vmem:[#allocation2 + $0xe0] sm:$0xff] %v1725_v32  ;;  %466 = vst [vmem:[#allocation2 + $0xe8] sm:$0xff] %v1725_v32 }
  0x3e   : > { %467 = vst [vmem:[#allocation2 + $0xf0] sm:$0xff] %v1725_v32  ;;  %468 = vst [vmem:[#allocation2 + $0xf8] sm:$0xff] %v1725_v32 }
  0x3f PF: > { %v502_v33 = vld [vmem:[%s1890_s21 + $0x8] sm:$0xff]  ;;  %v504_v34 = vld [vmem:[%s1890_s21 + $0x18] sm:$0xff]  ;;  %v501_v35 = vld [vmem:[%s1890_s21] sm:$0xff]  ;;  %v1726_v40 = vmov 0.0   ;;  %v1727_v22 = vmov 0.0|0.0   ;;  %p1523_p12 = scmp.ne.s32.totalorder %s1715_s23, 1 }
  0x40   : > { %v1530_v36 = vpack.c.bf16 %v504_v34, %v502_v33  ;;  %v503_v37 = vld [vmem:[%s1890_s21 + $0x10] sm:$0xff]  ;;  %v506_v38 = vld [vmem:[%s1890_s21 + $0x28] sm:$0xff]  ;;  %v508_v39 = vld [vmem:[%s1890_s21 + $0x38] sm:$0xff]  ;;  %609 = vmatprep.mubr.f32.mxu0 %v1726_v40  ;;  %1610 = vmatprep.subr.bf16.mxu1 %v1727_v22 }
  0x41   : > { %v1532_v41 = vpack.c.bf16 %v503_v37, %v501_v35  ;;  %v1534_v42 = vpack.c.bf16 %v508_v39, %v506_v38  ;;  %v505_v43 = vld [vmem:[%s1890_s21 + $0x20] sm:$0xff]  ;;  %v507_v44 = vld [vmem:[%s1890_s21 + $0x30] sm:$0xff]  ;;  %v510_v45 = vld [vmem:[%s1890_s21 + $0x48] sm:$0xff] }
  0x42   : > { %1531 = vmatprep.subr.bf16.mxu0 %v1530_v36  ;;  %v512_v46 = vld [vmem:[%s1890_s21 + $0x58] sm:$0xff]  ;;  %v1536_v47 = vpack.c.bf16 %v507_v44, %v505_v43  ;;  %v509_v49 = vld [vmem:[%s1890_s21 + $0x40] sm:$0xff]  ;;  %v511_v50 = vld [vmem:[%s1890_s21 + $0x50] sm:$0xff] }
  0x43   : > { %1533 = vmatpush1.bf16.msra.mxu0 %v1532_v41  ;;  %v1538_v48 = vpack.c.bf16 %v512_v46, %v510_v45  ;;  %v514_v51 = vld [vmem:[%s1890_s21 + $0x68] sm:$0xff]  ;;  %v516_v52 = vld [vmem:[%s1890_s21 + $0x78] sm:$0xff]  ;;  %v1540_v53 = vpack.c.bf16 %v511_v50, %v509_v49  ;;  %v513_v55 = vld [vmem:[%s1890_s21 + $0x60] sm:$0xff] }
  0x44   : > { %1535 = vmatprep.subr.bf16.mxu0 %v1534_v42  ;;  %v1542_v54 = vpack.c.bf16 %v516_v52, %v514_v51  ;;  %v515_v56 = vld [vmem:[%s1890_s21 + $0x70] sm:$0xff]  ;;  %v518_v57 = vld [vmem:[%s1890_s21 + $0x88] sm:$0xff]  ;;  %v520_v58 = vld [vmem:[%s1890_s21 + $0x98] sm:$0xff] }
  0x45   : > { %v1544_v59 = vpack.c.bf16 %v515_v56, %v513_v55  ;;  %v1546_v60 = vpack.c.bf16 %v520_v58, %v518_v57  ;;  %v517_v61 = vld [vmem:[%s1890_s21 + $0x80] sm:$0xff]  ;;  %v519_v62 = vld [vmem:[%s1890_s21 + $0x90] sm:$0xff]  ;;  %v522_v63 = vld [vmem:[%s1890_s21 + $0xa8] sm:$0xff] }
  0x46   : > { %v524_v0 = vld [vmem:[%s1890_s21 + $0xb8] sm:$0xff]  ;;  %v1548_v1 = vpack.c.bf16 %v519_v62, %v517_v61  ;;  %v521_v3 = vld [vmem:[%s1890_s21 + $0xa0] sm:$0xff]  ;;  %v523_v4 = vld [vmem:[%s1890_s21 + $0xb0] sm:$0xff] }
  0x47   : > { %1537 = vmatpush1.bf16.msra.mxu0 %v1536_v47  ;;  %v1550_v2 = vpack.c.bf16 %v524_v0, %v522_v63  ;;  %v526_v5 = vld [vmem:[%s1890_s21 + $0xc8] sm:$0xff]  ;;  %v528_v6 = vld [vmem:[%s1890_s21 + $0xd8] sm:$0xff]  ;;  %v1552_v7 = vpack.c.bf16 %v523_v4, %v521_v3  ;;  %v525_v9 = vld [vmem:[%s1890_s21 + $0xc0] sm:$0xff] }
  0x48   : > { %1539 = vmatprep.subr.bf16.mxu0 %v1538_v48  ;;  %v1554_v8 = vpack.c.bf16 %v528_v6, %v526_v5  ;;  %v527_v10 = vld [vmem:[%s1890_s21 + $0xd0] sm:$0xff]  ;;  %v530_v11 = vld [vmem:[%s1890_s21 + $0xe8] sm:$0xff]  ;;  %v532_v12 = vld [vmem:[%s1890_s21 + $0xf8] sm:$0xff] }
  0x49   : > { %v1556_v13 = vpack.c.bf16 %v527_v10, %v525_v9  ;;  %v1558_v14 = vpack.c.bf16 %v532_v12, %v530_v11  ;;  %v529_v15 = vld [vmem:[%s1890_s21 + $0xe0] sm:$0xff]  ;;  %v531_v16 = vld [vmem:[%s1890_s21 + $0xf0] sm:$0xff]  ;;  %v899_v19 = vld [vmem:[%s1888_s30 + $0x8] sm:$0xff] }
  0x4a   : > { %v1560_v17 = vpack.c.bf16 %v531_v16, %v529_v15  ;;  %v898_v18 = vld [vmem:[%s1888_s30] sm:$0xff]  ;;  %v900_v23 = vld [vmem:[%s1888_s30 + $0x10] sm:$0xff]  ;;  %v901_v24 = vld [vmem:[%s1888_s30 + $0x18] sm:$0xff] }
  0x4b   : > { %1541 = vmatpush1.bf16.msra.mxu0 %v1540_v53  ;;  %v469_v20 = vld [vmem:[%s2435_s0] sm:$0xff]  ;;  %v1563_v21 = vpack.c.bf16 %v899_v19, %v898_v18  ;;  %v470_v25 = vld [vmem:[%s2435_s0 + $0x8] sm:$0xff]  ;;  %v1566_v26 = vpack.c.bf16 %v901_v24, %v900_v23  ;;  %v471_v29 = vld [vmem:[%s2435_s0 + $0x10] sm:$0xff] }
  0x4c   : > { %1543 = vmatprep.subr.bf16.mxu0 %v1542_v54  ;;  %v902_v27 = vld [vmem:[%s1888_s30 + $0x20] sm:$0xff]  ;;  %v903_v28 = vld [vmem:[%s1888_s30 + $0x28] sm:$0xff]  ;;  %v904_v31 = vld [vmem:[%s1888_s30 + $0x30] sm:$0xff] }
  0x4d   : > { %1626 = vmatpush1.bf16.msra.mxu1 %v1563_v21  ;;  %v1569_v30 = vpack.c.bf16 %v903_v28, %v902_v27  ;;  %v905_v32 = vld [vmem:[%s1888_s30 + $0x38] sm:$0xff]  ;;  %v906_v35 = vld [vmem:[%s1888_s30 + $0x40] sm:$0xff]  ;;  %v907_v36 = vld [vmem:[%s1888_s30 + $0x48] sm:$0xff] }
  0x4e   : > { %1611 = vmatprep.subr.bf16.mxu1 %v1727_v22  ;;  %v472_v33 = vld [vmem:[%s2435_s0 + $0x18] sm:$0xff]  ;;  %v1572_v34 = vpack.c.bf16 %v905_v32, %v904_v31  ;;  %v473_v37 = vld [vmem:[%s2435_s0 + $0x20] sm:$0xff]  ;;  %v1575_v38 = vpack.c.bf16 %v907_v36, %v906_v35  ;;  %v908_v39 = vld [vmem:[%s1888_s30 + $0x50] sm:$0xff]  ;;  %v535_v36 = vlaneseq }
  0x4f   : > { %1545 = vmatpush1.bf16.msra.mxu0 %v1544_v59  ;;  %v909_v41 = vld [vmem:[%s1888_s30 + $0x58] sm:$0xff]  ;;  %v474_v42 = vld [vmem:[%s2435_s0 + $0x28] sm:$0xff]  ;;  %v910_v44 = vld [vmem:[%s1888_s30 + $0x60] sm:$0xff] }
  0x50   : > { %1547 = vmatprep.subr.bf16.mxu0 %v1546_v60  ;;  %v1578_v43 = vpack.c.bf16 %v909_v41, %v908_v39  ;;  %v911_v45 = vld [vmem:[%s1888_s30 + $0x68] sm:$0xff]  ;;  %v475_v46 = vld [vmem:[%s2435_s0 + $0x30] sm:$0xff]  ;;  %v913_v49 = vld [vmem:[%s1888_s30 + $0x78] sm:$0xff] }
  0x51   : > { %1627 = vmatpush1.bf16.msra.mxu1 %v1566_v26  ;;  %v1581_v47 = vpack.c.bf16 %v911_v45, %v910_v44  ;;  %v912_v48 = vld [vmem:[%s1888_s30 + $0x70] sm:$0xff]  ;;  %v476_v50 = vld [vmem:[%s2435_s0 + $0x38] sm:$0xff]  ;;  %v914_v52 = vld [vmem:[%s1888_s30 + $0x80] sm:$0xff] }
  0x52   : > { %1612 = vmatprep.subr.bf16.mxu1 %v1727_v22  ;;  %v1584_v51 = vpack.c.bf16 %v913_v49, %v912_v48  ;;  %v915_v53 = vld [vmem:[%s1888_s30 + $0x88] sm:$0xff]  ;;  %v477_v54 = vld [vmem:[%s2435_s0 + $0x40] sm:$0xff]  ;;  %v916_v56 = vld [vmem:[%s1888_s30 + $0x90] sm:$0xff] }
  0x53   : > { %1549 = vmatpush1.bf16.msra.mxu0 %v1548_v1  ;;  %v1587_v55 = vpack.c.bf16 %v915_v53, %v914_v52  ;;  %v917_v57 = vld [vmem:[%s1888_s30 + $0x98] sm:$0xff]  ;;  %v478_v58 = vld [vmem:[%s2435_s0 + $0x48] sm:$0xff]  ;;  %v918_v60 = vld [vmem:[%s1888_s30 + $0xa0] sm:$0xff] }
  0x54   : > { %1551 = vmatprep.subr.bf16.mxu0 %v1550_v2  ;;  %v1590_v59 = vpack.c.bf16 %v917_v57, %v916_v56  ;;  %v919_v61 = vld [vmem:[%s1888_s30 + $0xa8] sm:$0xff]  ;;  %v479_v62 = vld [vmem:[%s2435_s0 + $0x50] sm:$0xff]  ;;  %v921_v1 = vld [vmem:[%s1888_s30 + $0xb8] sm:$0xff] }
  0x55   : > { %1628 = vmatpush1.bf16.msra.mxu1 %v1569_v30  ;;  %v1593_v63 = vpack.c.bf16 %v919_v61, %v918_v60  ;;  %v920_v0 = vld [vmem:[%s1888_s30 + $0xb0] sm:$0xff]  ;;  %v480_v2 = vld [vmem:[%s2435_s0 + $0x58] sm:$0xff]  ;;  %v922_v4 = vld [vmem:[%s1888_s30 + $0xc0] sm:$0xff] }
  0x56   : > { %1613 = vmatprep.subr.bf16.mxu1 %v1727_v22  ;;  %v1596_v3 = vpack.c.bf16 %v921_v1, %v920_v0  ;;  %v923_v5 = vld [vmem:[%s1888_s30 + $0xc8] sm:$0xff]  ;;  %v481_v6 = vld [vmem:[%s2435_s0 + $0x60] sm:$0xff]  ;;  %v925_v9 = vld [vmem:[%s1888_s30 + $0xd8] sm:$0xff] }
  0x57   : > { %1553 = vmatpush1.bf16.msra.mxu0 %v1552_v7  ;;  %v1599_v7 = vpack.c.bf16 %v923_v5, %v922_v4  ;;  %v482_v10 = vld [vmem:[%s2435_s0 + $0x68] sm:$0xff]  ;;  %v483_v12 = vld [vmem:[%s2435_s0 + $0x70] sm:$0xff]  ;;  %v489_v18 = vld [vmem:[%s2435_s0 + $0xa0] sm:$0xff] }
  0x58   : > { %1555 = vmatprep.subr.bf16.mxu0 %v1554_v8  ;;  %v924_v8 = vld [vmem:[%s1888_s30 + $0xd0] sm:$0xff]  ;;  %v486_v15 = vld [vmem:[%s2435_s0 + $0x88] sm:$0xff]  ;;  %v926_v19 = vld [vmem:[%s1888_s30 + $0xe0] sm:$0xff] }
  0x59   : > { %1629 = vmatpush1.bf16.msra.mxu1 %v1572_v34  ;;  %v1602_v11 = vpack.c.bf16 %v925_v9, %v924_v8  ;;  %v487_v16 = vld [vmem:[%s2435_s0 + $0x90] sm:$0xff]  ;;  %v492_v28 = vld [vmem:[%s2435_s0 + $0xb8] sm:$0xff]  ;;  %v497_v32 = vld [vmem:[%s2435_s0 + $0xe0] sm:$0xff] }
  0x5a   : > { %1614 = vmatprep.subr.bf16.mxu1 %v1727_v22  ;;  %v928_v24 = vld [vmem:[%s1888_s30 + $0xf0] sm:$0xff]  ;;  %v496_v31 = vld [vmem:[%s2435_s0 + $0xd8] sm:$0xff]  ;;  %v533_v39 = vld [vmem:[%s413_s19] sm:$0x3] }
  0x5b   : > { %1557 = vmatpush1.bf16.msra.mxu0 %v1556_v13  ;;  %v484_v13 = vld [vmem:[%s2435_s0 + $0x78] sm:$0xff] }
  0x5c   : > { %1559 = vmatprep.subr.bf16.mxu0 %v1558_v14  ;;  %v485_v14 = vld [vmem:[%s2435_s0 + $0x80] sm:$0xff]  ;;  %v500_v35 = vld [vmem:[%s2435_s0 + $0xf8] sm:$0xff] }
  0x5d   : > { %1630 = vmatpush1.bf16.msra.mxu1 %v1575_v38 }
  0x5e   : > { %1615 = vmatprep.subr.bf16.mxu1 %v1727_v22 }
  0x5f   : > { %1561 = vmatpush1.bf16.msra.mxu0 %v1560_v17  ;;  %v488_v17 = vld [vmem:[%s2435_s0 + $0x98] sm:$0xff] }
  0x60   : > { %1562 = vmatprep.subr.bf16.mxu0 %v1727_v22 }
  0x61   : > { %1631 = vmatpush1.bf16.msra.mxu1 %v1578_v43 }
  0x62   : > { %610 = vmatmul.mubr.f32.vlgmr.msra.gmra.mrb[0].mxu0 %v469_v20  ;;  %1616 = vmatprep.subr.bf16.mxu1 %v1727_v22  ;;  %v927_v20 = vld [vmem:[%s1888_s30 + $0xe8] sm:$0xff] }
  0x63   : > { %615 = vmatprep.mubr.f32.mxu0 %v1726_v40  ;;  %1564 = vmatpush1.bf16.msra.mxu0 %v1563_v21  ;;  %v490_v21 = vld [vmem:[%s2435_s0 + $0xa8] sm:$0xff]  ;;  %v1605_v23 = vpack.c.bf16 %v927_v20, %v926_v19 }
  0x64   : > { %1565 = vmatprep.subr.bf16.mxu0 %v1727_v22 }
  0x65   : > { %1632 = vmatpush1.bf16.msra.mxu1 %v1581_v47 }
  0x66   : > { %616 = vmatmul.mubr.f32.gmra.mrb[2].mxu0 %v470_v25  ;;  %1617 = vmatprep.subr.bf16.mxu1 %v1727_v22  ;;  %v929_v25 = vld [vmem:[%s1888_s30 + $0xf8] sm:$0xff] }
  0x67   : > { %621 = vmatprep.mubr.f32.mxu0 %v1726_v40  ;;  %1567 = vmatpush1.bf16.msra.mxu0 %v1566_v26  ;;  %v491_v26 = vld [vmem:[%s2435_s0 + $0xb0] sm:$0xff]  ;;  %v1608_v27 = vpack.c.bf16 %v929_v25, %v928_v24 }
  0x68   : > { %1568 = vmatprep.subr.bf16.mxu0 %v1727_v22 }
  0x69   : > { %1633 = vmatpush1.bf16.msra.mxu1 %v1584_v51 }
  0x6a   : > { %622 = vmatmul.mubr.f32.gmra.mrb[4].mxu0 %v471_v29  ;;  %1618 = vmatprep.subr.bf16.mxu1 %v1727_v22  ;;  %v493_v29 = vld [vmem:[%s2435_s0 + $0xc0] sm:$0xff] }
  0x6b   : > { %627 = vmatprep.mubr.f32.mxu0 %v1726_v40  ;;  %1570 = vmatpush1.bf16.msra.mxu0 %v1569_v30  ;;  %v495_v30 = vld [vmem:[%s2435_s0 + $0xd0] sm:$0xff] }
  0x6c   : > { %1571 = vmatprep.subr.bf16.mxu0 %v1727_v22 }
  0x6d   : > { %1634 = vmatpush1.bf16.msra.mxu1 %v1587_v55 }
  0x6e   : > { %628 = vmatmul.mubr.f32.gmra.mrb[6].mxu0 %v472_v33  ;;  %1619 = vmatprep.subr.bf16.mxu1 %v1727_v22  ;;  %v498_v33 = vld [vmem:[%s2435_s0 + $0xe8] sm:$0xff] }
  0x6f   : > { %633 = vmatprep.mubr.f32.mxu0 %v1726_v40  ;;  %1573 = vmatpush1.bf16.msra.mxu0 %v1572_v34  ;;  %v499_v34 = vld [vmem:[%s2435_s0 + $0xf0] sm:$0xff] }
  0x70   : > { %1574 = vmatprep.subr.bf16.mxu0 %v1727_v22 }
  0x71   : > { %1635 = vmatpush1.bf16.msra.mxu1 %v1590_v59 }
  0x72   : > { %634 = vmatmul.mubr.f32.gmra.mrb[8].mxu0 %v473_v37  ;;  %1620 = vmatprep.subr.bf16.mxu1 %v1727_v22  ;;  %v536_v37 = vshrl.u32 %v535_v36, 7 }
  0x73   : > { %639 = vmatprep.mubr.f32.mxu0 %v1726_v40  ;;  %1576 = vmatpush1.bf16.msra.mxu0 %v1575_v38 }
  0x74   : > { %1577 = vmatprep.subr.bf16.mxu0 %v1727_v22  ;;  %v537_v38 = vsub.s32 0, %v536_v37  ;;  %v541_v41 = vsub.s32 1, %v536_v37 }
  0x75   : > { %1636 = vmatpush1.bf16.msra.mxu1 %v1593_v63 }
  0x76   : > { %640 = vmatmul.mubr.f32.gmra.mrb[10].mxu0 %v474_v42  ;;  %1621 = vmatprep.subr.bf16.mxu1 %v1727_v22  ;;  %v2122_v42 = vrot.slane %v533_v39, %v537_v38 }
  0x77   : > { %645 = vmatprep.mubr.f32.mxu0 %v1726_v40  ;;  %1579 = vmatpush1.bf16.msra.mxu0 %v1578_v43  ;;  %v2124_v43 = vrot.slane %v533_v39, %v541_v41 }
  0x78   : > { %1580 = vmatprep.subr.bf16.mxu0 %v1727_v22 }
  0x79   : > { %1637 = vmatpush1.bf16.msra.mxu1 %v1596_v3 }
  0x7a   : > { %646 = vmatmul.mubr.f32.gmra.mrb[12].mxu0 %v475_v46  ;;  %1622 = vmatprep.subr.bf16.mxu1 %v1727_v22 }
  0x7b   : > { %651 = vmatprep.mubr.f32.mxu0 %v1726_v40  ;;  %1582 = vmatpush1.bf16.msra.mxu0 %v1581_v47 }
  0x7c   : > { %1583 = vmatprep.subr.bf16.mxu0 %v1727_v22 }
  0x7d   : > { %1638 = vmatpush1.bf16.msra.mxu1 %v1599_v7 }
  0x7e   : > { %652 = vmatmul.mubr.f32.gmra.mrb[14].mxu0 %v476_v50  ;;  %1623 = vmatprep.subr.bf16.mxu1 %v1727_v22 }
  0x7f   : > { %657 = vmatprep.mubr.f32.mxu0 %v1726_v40  ;;  %1585 = vmatpush1.bf16.msra.mxu0 %v1584_v51 }
  0x80   : > { %1586 = vmatprep.subr.bf16.mxu0 %v1727_v22 }
  0x81   : > { %1639 = vmatpush1.bf16.msra.mxu1 %v1602_v11 }
  0x82   : > { %658 = vmatmul.mubr.f32.gmra.mrb[16].mxu0 %v477_v54  ;;  %1624 = vmatprep.subr.bf16.mxu1 %v1727_v22 }
  0x83   : > { %663 = vmatprep.mubr.f32.mxu0 %v1726_v40  ;;  %1588 = vmatpush1.bf16.msra.mxu0 %v1587_v55 }
  0x84   : > { %1589 = vmatprep.subr.bf16.mxu0 %v1727_v22 }
  0x85   : > { %1640 = vmatpush1.bf16.msra.mxu1 %v1605_v23 }
  0x86   : > { %664 = vmatmul.mubr.f32.gmra.mrb[18].mxu0 %v478_v58  ;;  %1625 = vmatprep.subr.bf16.mxu1 %v1727_v22 }
  0x87   : > { %669 = vmatprep.mubr.f32.mxu0 %v1726_v40  ;;  %1591 = vmatpush1.bf16.msra.mxu0 %v1590_v59 }
  0x88   : > { %1592 = vmatprep.subr.bf16.mxu0 %v1727_v22 }
  0x89   : > { %1641 = vmatpush1.bf16.msra.mxu1 %v1608_v27 }
  0x8a   : > { %670 = vmatmul.mubr.f32.gmra.mrb[20].mxu0 %v479_v62 }
  0x8b   : > { %675 = vmatprep.mubr.f32.mxu0 %v1726_v40  ;;  %1594 = vmatpush1.bf16.msra.mxu0 %v1593_v63 }
  0x8c   : > { %1595 = vmatprep.subr.bf16.mxu0 %v1727_v22 }
  0x8e   : > { %676 = vmatmul.mubr.f32.gmra.mrb[22].mxu0 %v480_v2 }
  0x8f   : > { %681 = vmatprep.mubr.f32.mxu0 %v1726_v40  ;;  %1597 = vmatpush1.bf16.msra.mxu0 %v1596_v3 }
  0x90   : > { %1598 = vmatprep.subr.bf16.mxu0 %v1727_v22 }
  0x92   : > { %682 = vmatmul.mubr.f32.gmra.mrb[24].mxu0 %v481_v6 }
  0x93   : > { %687 = vmatprep.mubr.f32.mxu0 %v1726_v40  ;;  %1600 = vmatpush1.bf16.msra.mxu0 %v1599_v7 }
  0x94   : > { %1601 = vmatprep.subr.bf16.mxu0 %v1727_v22 }
  0x96   : > { %688 = vmatmul.mubr.f32.gmra.mrb[26].mxu0 %v482_v10 }
  0x97   : > { %693 = vmatprep.mubr.f32.mxu0 %v1726_v40  ;;  %1603 = vmatpush1.bf16.msra.mxu0 %v1602_v11 }
  0x98   : > { %1604 = vmatprep.subr.bf16.mxu0 %v1727_v22 }
  0x9a   : > { %694 = vmatmul.mubr.f32.gmra.mrb[28].mxu0 %v483_v12 }
  0x9b   : > { %699 = vmatprep.mubr.f32.mxu0 %v1726_v40  ;;  %1606 = vmatpush1.bf16.msra.mxu0 %v1605_v23 }
  0x9c   : > { %1607 = vmatprep.subr.bf16.mxu0 %v1727_v22  ;;  %v494_v22 = vld [vmem:[%s2435_s0 + $0xc8] sm:$0xff] }
  0x9e   : > { %700 = vmatmul.mubr.f32.gmra.mrb[30].mxu0 %v484_v13 }
  0x9f   : > { %705 = vmatprep.mubr.f32.mxu0 %v1726_v40  ;;  %1609 = vmatpush1.bf16.msra.mxu0 %v1608_v27 }
  0xa2   : > { %706 = vmatmul.mubr.f32.gmra.mrb[32].mxu0 %v485_v14 }
  0xa3   : > { %711 = vmatprep.mubr.f32.mxu0 %v1726_v40 }
  0xa6   : > { %712 = vmatmul.mubr.f32.gmra.mrb[34].mxu0 %v486_v15 }
  0xa7   : > { %717 = vmatprep.mubr.f32.mxu0 %v1726_v40 }
  0xaa   : > { %718 = vmatmul.mubr.f32.gmra.mrb[36].mxu0 %v487_v16 }
  0xab   : > { %723 = vmatprep.mubr.f32.mxu0 %v1726_v40 }
  0xae   : > { %724 = vmatmul.mubr.f32.gmra.mrb[38].mxu0 %v488_v17 }
  0xaf   : > { %729 = vmatprep.mubr.f32.mxu0 %v1726_v40 }
  0xb2   : > { %730 = vmatmul.mubr.f32.gmra.mrb[40].mxu0 %v489_v18 }
  0xb3   : > { %735 = vmatprep.mubr.f32.mxu0 %v1726_v40 }
  0xb6   : > { %736 = vmatmul.mubr.f32.gmra.mrb[42].mxu0 %v490_v21 }
  0xb7   : > { %741 = vmatprep.mubr.f32.mxu0 %v1726_v40 }
  0xba   : > { %742 = vmatmul.mubr.f32.gmra.mrb[44].mxu0 %v491_v26 }
  0xbb   : > { %747 = vmatprep.mubr.f32.mxu0 %v1726_v40 }
  0xbe   : > { %748 = vmatmul.mubr.f32.gmra.mrb[46].mxu0 %v492_v28 }
  0xbf   : > { %753 = vmatprep.mubr.f32.mxu0 %v1726_v40 }
  0xc2   : > { %754 = vmatmul.mubr.f32.gmra.mrb[48].mxu0 %v493_v29 }
  0xc3   : > { %759 = vmatprep.mubr.f32.mxu0 %v1726_v40 }
  0xc6   : > { %760 = vmatmul.mubr.f32.gmra.mrb[50].mxu0 %v494_v22 }
  0xc7   : > { %765 = vmatprep.mubr.f32.mxu0 %v1726_v40 }
  0xca   : > { %766 = vmatmul.mubr.f32.gmra.mrb[52].mxu0 %v495_v30 }
  0xcb   : > { %771 = vmatprep.mubr.f32.mxu0 %v1726_v40 }
  0xce   : > { %772 = vmatmul.mubr.f32.gmra.mrb[54].mxu0 %v496_v31 }
  0xcf   : > { %777 = vmatprep.mubr.f32.mxu0 %v1726_v40 }
  0xd2   : > { %778 = vmatmul.mubr.f32.gmra.mrb[56].mxu0 %v497_v32 }
  0xd3   : > { %783 = vmatprep.mubr.f32.mxu0 %v1726_v40 }
  0xd6   : > { %784 = vmatmul.mubr.f32.gmra.mrb[58].mxu0 %v498_v33 }
  0xd7   : > { %789 = vmatprep.mubr.f32.mxu0 %v1726_v40 }
  0xda   : > { %790 = vmatmul.mubr.f32.gmra.mrb[60].mxu0 %v499_v34 }
  0xdb   : > { %795 = vmatprep.mubr.f32.mxu0 %v1726_v40 }
  0xde   : > { %796 = vmatmul.mubr.f32.gmra.mrb[62].mxu0 %v500_v35 }
 0x135   : > { %v611_v44 = vpop.f32.mrb[0].mxu0 }
 0x136   : > { %v612_v40 = vadd.f32 %v611_v44, %v2122_v42  ;;  %v613_v45 = vpop.f32.mrb[1].mxu0 }
 0x137   : > { %v614_v46 = vadd.f32 %v613_v45, %v2124_v43 }
 0x138   : > { %v802_v49 = vmax.f32 %v612_v40, 0.0 }
 0x139   : > { %v803_v47 = vmax.f32 %v614_v46, 0.0  ;;  %v617_v48 = vpop.f32.mrb[2].mxu0 }
 0x13a   : > { %v618_v50 = vadd.f32 %v617_v48, %v2122_v42  ;;  %v619_v51 = vpop.f32.mrb[3].mxu0 }
 0x13b   : > { %v620_v52 = vadd.f32 %v619_v51, %v2124_v43  ;;  %994 = vmatprep.mubr.f32.mxu0 %v803_v47 }
 0x13c   : > { %995 = vmatmul.mubr.f32.vlgmr.msra.gmra.mrb[64].mxu0 %v802_v49  ;;  %v804_v55 = vmax.f32 %v618_v50, 0.0 }
 0x13d   : > { %v805_v53 = vmax.f32 %v620_v52, 0.0  ;;  %v623_v54 = vpop.f32.mrb[4].mxu0 }
 0x13e   : > { %v624_v56 = vadd.f32 %v623_v54, %v2122_v42  ;;  %v625_v57 = vpop.f32.mrb[5].mxu0 }
 0x13f   : > { %v626_v58 = vadd.f32 %v625_v57, %v2124_v43  ;;  %999 = vmatprep.mubr.f32.mxu0 %v805_v53 }
 0x140   : > { %1000 = vmatmul.mubr.f32.gmra.mrb[66].mxu0 %v804_v55  ;;  %v806_v61 = vmax.f32 %v624_v56, 0.0 }
 0x141   : > { %v807_v59 = vmax.f32 %v626_v58, 0.0  ;;  %v629_v60 = vpop.f32.mrb[6].mxu0 }
 0x142   : > { %v630_v62 = vadd.f32 %v629_v60, %v2122_v42  ;;  %v631_v63 = vpop.f32.mrb[7].mxu0 }
 0x143   : > { %v632_v0 = vadd.f32 %v631_v63, %v2124_v43  ;;  %1004 = vmatprep.mubr.f32.mxu0 %v807_v59 }
 0x144   : > { %1005 = vmatmul.mubr.f32.gmra.mrb[68].mxu0 %v806_v61  ;;  %v808_v3 = vmax.f32 %v630_v62, 0.0 }
 0x145   : > { %v809_v1 = vmax.f32 %v632_v0, 0.0  ;;  %v635_v2 = vpop.f32.mrb[8].mxu0 }
 0x146   : > { %v636_v4 = vadd.f32 %v635_v2, %v2122_v42  ;;  %v637_v5 = vpop.f32.mrb[9].mxu0 }
 0x147   : > { %1009 = vmatprep.mubr.f32.mxu0 %v809_v1  ;;  %v638_v6 = vadd.f32 %v637_v5, %v2124_v43 }
 0x148   : > { %1010 = vmatmul.mubr.f32.gmra.mrb[70].mxu0 %v808_v3  ;;  %v810_v9 = vmax.f32 %v636_v4, 0.0 }
 0x149   : > { %v641_v7 = vpop.f32.mrb[10].mxu0  ;;  %v811_v8 = vmax.f32 %v638_v6, 0.0 }
 0x14a   : > { %v642_v10 = vadd.f32 %v641_v7, %v2122_v42  ;;  %v643_v11 = vpop.f32.mrb[11].mxu0 }
 0x14b   : > { %v644_v12 = vadd.f32 %v643_v11, %v2124_v43  ;;  %1014 = vmatprep.mubr.f32.mxu1 %v811_v8 }
 0x14c   : > { %1015 = vmatmul.mubr.f32.vlgmr.msra.gmra.mrb[0].mxu1 %v810_v9  ;;  %v812_v15 = vmax.f32 %v642_v10, 0.0 }
 0x14d   : > { %v813_v13 = vmax.f32 %v644_v12, 0.0  ;;  %v647_v14 = vpop.f32.mrb[12].mxu0 }
 0x14e   : > { %v648_v16 = vadd.f32 %v647_v14, %v2122_v42  ;;  %v649_v17 = vpop.f32.mrb[13].mxu0 }
 0x14f   : > { %v650_v18 = vadd.f32 %v649_v17, %v2124_v43  ;;  %1019 = vmatprep.mubr.f32.mxu1 %v813_v13 }
 0x150   : > { %1020 = vmatmul.mubr.f32.gmra.mrb[2].mxu1 %v812_v15  ;;  %v814_v21 = vmax.f32 %v648_v16, 0.0 }
 0x151   : > { %v815_v19 = vmax.f32 %v650_v18, 0.0  ;;  %v653_v20 = vpop.f32.mrb[14].mxu0 }
 0x152   : > { %v654_v23 = vadd.f32 %v653_v20, %v2122_v42  ;;  %v655_v24 = vpop.f32.mrb[15].mxu0 }
 0x153   : > { %v656_v25 = vadd.f32 %v655_v24, %v2124_v43  ;;  %1024 = vmatprep.mubr.f32.mxu1 %v815_v19 }
 0x154   : > { %1025 = vmatmul.mubr.f32.gmra.mrb[4].mxu1 %v814_v21  ;;  %v816_v28 = vmax.f32 %v654_v23, 0.0 }
 0x155   : > { %v817_v26 = vmax.f32 %v656_v25, 0.0  ;;  %v659_v27 = vpop.f32.mrb[16].mxu0 }
 0x156   : > { %v660_v29 = vadd.f32 %v659_v27, %v2122_v42  ;;  %v661_v22 = vpop.f32.mrb[17].mxu0 }
 0x157   : > { %v662_v30 = vadd.f32 %v661_v22, %v2124_v43  ;;  %1029 = vmatprep.mubr.f32.mxu1 %v817_v26 }
 0x158   : > { %1030 = vmatmul.mubr.f32.gmra.mrb[6].mxu1 %v816_v28  ;;  %v818_v33 = vmax.f32 %v660_v29, 0.0 }
 0x159   : > { %v819_v31 = vmax.f32 %v662_v30, 0.0  ;;  %v665_v32 = vpop.f32.mrb[18].mxu0 }
 0x15a   : > { %v666_v34 = vadd.f32 %v665_v32, %v2122_v42  ;;  %v667_v35 = vpop.f32.mrb[19].mxu0 }
 0x15b   : > { %v668_v36 = vadd.f32 %v667_v35, %v2124_v43  ;;  %1034 = vmatprep.mubr.f32.mxu1 %v819_v31 }
 0x15c   : > { %1035 = vmatmul.mubr.f32.gmra.mrb[8].mxu1 %v818_v33  ;;  %v820_v39 = vmax.f32 %v666_v34, 0.0 }
 0x15d   : > { %v821_v37 = vmax.f32 %v668_v36, 0.0  ;;  %v671_v38 = vpop.f32.mrb[20].mxu0 }
 0x15e   : > { %v672_v41 = vadd.f32 %v671_v38, %v2122_v42  ;;  %v673_v44 = vpop.f32.mrb[21].mxu0 }
 0x15f   : > { %v674_v40 = vadd.f32 %v673_v44, %v2124_v43  ;;  %1039 = vmatprep.mubr.f32.mxu1 %v821_v37 }
 0x160   : > { %1040 = vmatmul.mubr.f32.gmra.mrb[10].mxu1 %v820_v39  ;;  %v822_v47 = vmax.f32 %v672_v41, 0.0 }
 0x161   : > { %v823_v45 = vmax.f32 %v674_v40, 0.0  ;;  %v677_v46 = vpop.f32.mrb[22].mxu0 }
 0x162   : > { %v678_v48 = vadd.f32 %v677_v46, %v2122_v42  ;;  %v679_v49 = vpop.f32.mrb[23].mxu0 }
 0x163   : > { %v680_v50 = vadd.f32 %v679_v49, %v2124_v43  ;;  %1044 = vmatprep.mubr.f32.mxu1 %v823_v45 }
 0x164   : > { %1045 = vmatmul.mubr.f32.gmra.mrb[12].mxu1 %v822_v47  ;;  %v824_v53 = vmax.f32 %v678_v48, 0.0 }
 0x165   : > { %v825_v51 = vmax.f32 %v680_v50, 0.0  ;;  %v683_v52 = vpop.f32.mrb[24].mxu0 }
 0x166   : > { %v684_v54 = vadd.f32 %v683_v52, %v2122_v42  ;;  %v685_v55 = vpop.f32.mrb[25].mxu0 }
 0x167   : > { %v686_v56 = vadd.f32 %v685_v55, %v2124_v43  ;;  %1049 = vmatprep.mubr.f32.mxu1 %v825_v51 }
 0x168   : > { %1050 = vmatmul.mubr.f32.gmra.mrb[14].mxu1 %v824_v53  ;;  %v826_v59 = vmax.f32 %v684_v54, 0.0 }
 0x169   : > { %v827_v57 = vmax.f32 %v686_v56, 0.0  ;;  %v689_v58 = vpop.f32.mrb[26].mxu0 }
 0x16a   : > { %v690_v60 = vadd.f32 %v689_v58, %v2122_v42  ;;  %v691_v61 = vpop.f32.mrb[27].mxu0 }
 0x16b   : > { %v692_v62 = vadd.f32 %v691_v61, %v2124_v43  ;;  %1054 = vmatprep.mubr.f32.mxu1 %v827_v57 }
 0x16c   : > { %1055 = vmatmul.mubr.f32.gmra.mrb[16].mxu1 %v826_v59  ;;  %v828_v1 = vmax.f32 %v690_v60, 0.0 }
 0x16d   : > { %v829_v63 = vmax.f32 %v692_v62, 0.0  ;;  %v695_v0 = vpop.f32.mrb[28].mxu0 }
 0x16e   : > { %v696_v2 = vadd.f32 %v695_v0, %v2122_v42  ;;  %v697_v3 = vpop.f32.mrb[29].mxu0 }
 0x16f   : > { %v698_v4 = vadd.f32 %v697_v3, %v2124_v43  ;;  %1059 = vmatprep.mubr.f32.mxu1 %v829_v63 }
 0x170   : > { %1060 = vmatmul.mubr.f32.gmra.mrb[18].mxu1 %v828_v1  ;;  %v830_v7 = vmax.f32 %v696_v2, 0.0 }
 0x171   : > { %v831_v5 = vmax.f32 %v698_v4, 0.0  ;;  %v701_v6 = vpop.f32.mrb[30].mxu0 }
 0x172   : > { %v702_v8 = vadd.f32 %v701_v6, %v2122_v42  ;;  %v703_v9 = vpop.f32.mrb[31].mxu0 }
 0x173   : > { %v704_v10 = vadd.f32 %v703_v9, %v2124_v43  ;;  %1064 = vmatprep.mubr.f32.mxu1 %v831_v5 }
 0x174   : > { %1065 = vmatmul.mubr.f32.gmra.mrb[20].mxu1 %v830_v7  ;;  %v832_v13 = vmax.f32 %v702_v8, 0.0 }
 0x175   : > { %v833_v11 = vmax.f32 %v704_v10, 0.0  ;;  %v707_v12 = vpop.f32.mrb[32].mxu0 }
 0x176   : > { %v708_v14 = vadd.f32 %v707_v12, %v2122_v42  ;;  %v709_v15 = vpop.f32.mrb[33].mxu0 }
 0x177   : > { %v710_v16 = vadd.f32 %v709_v15, %v2124_v43  ;;  %1069 = vmatprep.mubr.f32.mxu1 %v833_v11 }
 0x178   : > { %1070 = vmatmul.mubr.f32.gmra.mrb[22].mxu1 %v832_v13  ;;  %v834_v19 = vmax.f32 %v708_v14, 0.0 }
 0x179   : > { %v835_v17 = vmax.f32 %v710_v16, 0.0  ;;  %v713_v18 = vpop.f32.mrb[34].mxu0 }
 0x17a   : > { %v714_v20 = vadd.f32 %v713_v18, %v2122_v42  ;;  %v715_v21 = vpop.f32.mrb[35].mxu0 }
 0x17b   : > { %v716_v23 = vadd.f32 %v715_v21, %v2124_v43  ;;  %1074 = vmatprep.mubr.f32.mxu1 %v835_v17 }
 0x17c   : > { %1075 = vmatmul.mubr.f32.gmra.mrb[24].mxu1 %v834_v19  ;;  %v836_v26 = vmax.f32 %v714_v20, 0.0 }
 0x17d   : > { %v837_v24 = vmax.f32 %v716_v23, 0.0  ;;  %v719_v25 = vpop.f32.mrb[36].mxu0 }
 0x17e   : > { %v720_v27 = vadd.f32 %v719_v25, %v2122_v42  ;;  %v721_v28 = vpop.f32.mrb[37].mxu0 }
 0x17f   : > { %v722_v29 = vadd.f32 %v721_v28, %v2124_v43  ;;  %1079 = vmatprep.mubr.f32.mxu1 %v837_v24 }
 0x180   : > { %1080 = vmatmul.mubr.f32.gmra.mrb[26].mxu1 %v836_v26  ;;  %v838_v31 = vmax.f32 %v720_v27, 0.0 }
 0x181   : > { %v839_v22 = vmax.f32 %v722_v29, 0.0  ;;  %v725_v30 = vpop.f32.mrb[38].mxu0 }
 0x182   : > { %v726_v32 = vadd.f32 %v725_v30, %v2122_v42  ;;  %v727_v33 = vpop.f32.mrb[39].mxu0 }
 0x183   : > { %v728_v34 = vadd.f32 %v727_v33, %v2124_v43  ;;  %1084 = vmatprep.mubr.f32.mxu1 %v839_v22 }
 0x184   : > { %1085 = vmatmul.mubr.f32.gmra.mrb[28].mxu1 %v838_v31  ;;  %v840_v37 = vmax.f32 %v726_v32, 0.0 }
 0x185   : > { %v841_v35 = vmax.f32 %v728_v34, 0.0  ;;  %v731_v36 = vpop.f32.mrb[40].mxu0 }
 0x186   : > { %v732_v38 = vadd.f32 %v731_v36, %v2122_v42  ;;  %v733_v39 = vpop.f32.mrb[41].mxu0 }
 0x187   : > { %v734_v41 = vadd.f32 %v733_v39, %v2124_v43  ;;  %1089 = vmatprep.mubr.f32.mxu1 %v841_v35 }
 0x188   : > { %1090 = vmatmul.mubr.f32.gmra.mrb[30].mxu1 %v840_v37  ;;  %v842_v45 = vmax.f32 %v732_v38, 0.0 }
 0x189   : > { %v843_v44 = vmax.f32 %v734_v41, 0.0  ;;  %v737_v40 = vpop.f32.mrb[42].mxu0 }
 0x18a   : > { %v738_v46 = vadd.f32 %v737_v40, %v2122_v42  ;;  %v739_v47 = vpop.f32.mrb[43].mxu0 }
 0x18b   : > { %v740_v48 = vadd.f32 %v739_v47, %v2124_v43  ;;  %1094 = vmatprep.mubr.f32.mxu1 %v843_v44 }
 0x18c   : > { %1095 = vmatmul.mubr.f32.gmra.mrb[32].mxu1 %v842_v45  ;;  %v844_v51 = vmax.f32 %v738_v46, 0.0 }
 0x18d   : > { %v845_v49 = vmax.f32 %v740_v48, 0.0  ;;  %v743_v50 = vpop.f32.mrb[44].mxu0 }
 0x18e   : > { %v744_v52 = vadd.f32 %v743_v50, %v2122_v42  ;;  %v745_v53 = vpop.f32.mrb[45].mxu0 }
 0x18f   : > { %v746_v54 = vadd.f32 %v745_v53, %v2124_v43  ;;  %1099 = vmatprep.mubr.f32.mxu1 %v845_v49  ;;  %v866_v49 = vld [vmem:[#allocation2] sm:$0xff]  ;;  %v867_v53 = vld [vmem:[#allocation2 + $0x8] sm:$0xff] }
 0x190   : > { %1100 = vmatmul.mubr.f32.gmra.mrb[34].mxu1 %v844_v51  ;;  %v846_v57 = vmax.f32 %v744_v52, 0.0 }
 0x191   : > { %v847_v55 = vmax.f32 %v746_v54, 0.0  ;;  %v749_v56 = vpop.f32.mrb[46].mxu0 }
 0x192   : > { %v750_v58 = vadd.f32 %v749_v56, %v2122_v42  ;;  %v751_v59 = vpop.f32.mrb[47].mxu0 }
 0x193   : > { %v752_v60 = vadd.f32 %v751_v59, %v2124_v43  ;;  %1104 = vmatprep.mubr.f32.mxu1 %v847_v55  ;;  %v869_v59 = vld [vmem:[#allocation2 + $0x18] sm:$0xff] }
 0x194   : > { %1105 = vmatmul.mubr.f32.gmra.mrb[36].mxu1 %v846_v57  ;;  %v848_v63 = vmax.f32 %v750_v58, 0.0  ;;  %v868_v57 = vld [vmem:[#allocation2 + $0x10] sm:$0xff] }
 0x195   : > { %v849_v61 = vmax.f32 %v752_v60, 0.0  ;;  %v755_v62 = vpop.f32.mrb[48].mxu0 }
 0x196   : > { %v756_v0 = vadd.f32 %v755_v62, %v2122_v42  ;;  %v757_v1 = vpop.f32.mrb[49].mxu0 }
 0x197   : > { %v758_v2 = vadd.f32 %v757_v1, %v2124_v43  ;;  %1109 = vmatprep.mubr.f32.mxu1 %v849_v61 }
 0x198   : > { %1110 = vmatmul.mubr.f32.gmra.mrb[38].mxu1 %v848_v63  ;;  %v850_v5 = vmax.f32 %v756_v0, 0.0  ;;  %v870_v63 = vld [vmem:[#allocation2 + $0x20] sm:$0xff] }
 0x199   : > { %v851_v3 = vmax.f32 %v758_v2, 0.0  ;;  %v761_v4 = vpop.f32.mrb[50].mxu0 }
 0x19a   : > { %v762_v6 = vadd.f32 %v761_v4, %v2122_v42  ;;  %v763_v7 = vpop.f32.mrb[51].mxu0 }
 0x19b   : > { %v764_v8 = vadd.f32 %v763_v7, %v2124_v43  ;;  %1114 = vmatprep.mubr.f32.mxu1 %v851_v3  ;;  %v871_v3 = vld [vmem:[#allocation2 + $0x28] sm:$0xff]  ;;  %v872_v7 = vld [vmem:[#allocation2 + $0x30] sm:$0xff] }
 0x19c   : > { %1115 = vmatmul.mubr.f32.gmra.mrb[40].mxu1 %v850_v5  ;;  %v852_v11 = vmax.f32 %v762_v6, 0.0 }
 0x19d   : > { %v853_v9 = vmax.f32 %v764_v8, 0.0  ;;  %v767_v10 = vpop.f32.mrb[52].mxu0 }
 0x19e   : > { %v768_v12 = vadd.f32 %v767_v10, %v2122_v42  ;;  %v769_v13 = vpop.f32.mrb[53].mxu0 }
 0x19f   : > { %v770_v14 = vadd.f32 %v769_v13, %v2124_v43  ;;  %1119 = vmatprep.mubr.f32.mxu1 %v853_v9 }
 0x1a0   : > { %1120 = vmatmul.mubr.f32.gmra.mrb[42].mxu1 %v852_v11  ;;  %v854_v17 = vmax.f32 %v768_v12, 0.0  ;;  %v873_v11 = vld [vmem:[#allocation2 + $0x38] sm:$0xff] }
 0x1a1   : > { %v855_v15 = vmax.f32 %v770_v14, 0.0  ;;  %v773_v16 = vpop.f32.mrb[54].mxu0 }
 0x1a2   : > { %v774_v18 = vadd.f32 %v773_v16, %v2122_v42  ;;  %v775_v19 = vpop.f32.mrb[55].mxu0 }
 0x1a3   : > { %v776_v20 = vadd.f32 %v775_v19, %v2124_v43  ;;  %1124 = vmatprep.mubr.f32.mxu1 %v855_v15  ;;  %v874_v15 = vld [vmem:[#allocation2 + $0x40] sm:$0xff]  ;;  %v875_v19 = vld [vmem:[#allocation2 + $0x48] sm:$0xff] }
 0x1a4   : > { %1125 = vmatmul.mubr.f32.gmra.mrb[44].mxu1 %v854_v17  ;;  %v856_v24 = vmax.f32 %v774_v18, 0.0 }
 0x1a5   : > { %v857_v21 = vmax.f32 %v776_v20, 0.0  ;;  %v779_v23 = vpop.f32.mrb[56].mxu0 }
 0x1a6   : > { %v780_v25 = vadd.f32 %v779_v23, %v2122_v42  ;;  %v781_v26 = vpop.f32.mrb[57].mxu0 }
 0x1a7   : > { %v782_v27 = vadd.f32 %v781_v26, %v2124_v43  ;;  %1129 = vmatprep.mubr.f32.mxu1 %v857_v21 }
 0x1a8   : > { %1130 = vmatmul.mubr.f32.gmra.mrb[46].mxu1 %v856_v24  ;;  %v858_v22 = vmax.f32 %v780_v25, 0.0  ;;  %v876_v24 = vld [vmem:[#allocation2 + $0x50] sm:$0xff] }
 0x1a9   : > { %v859_v28 = vmax.f32 %v782_v27, 0.0  ;;  %v785_v29 = vpop.f32.mrb[58].mxu0 }
 0x1aa   : > { %v786_v30 = vadd.f32 %v785_v29, %v2122_v42  ;;  %v787_v31 = vpop.f32.mrb[59].mxu0 }
 0x1ab   : > { %v788_v32 = vadd.f32 %v787_v31, %v2124_v43  ;;  %1134 = vmatprep.mubr.f32.mxu1 %v859_v28  ;;  %v877_v28 = vld [vmem:[#allocation2 + $0x58] sm:$0xff]  ;;  %v878_v31 = vld [vmem:[#allocation2 + $0x60] sm:$0xff] }
 0x1ac   : > { %1135 = vmatmul.mubr.f32.gmra.mrb[48].mxu1 %v858_v22  ;;  %v860_v35 = vmax.f32 %v786_v30, 0.0 }
 0x1ad   : > { %v861_v33 = vmax.f32 %v788_v32, 0.0  ;;  %v791_v34 = vpop.f32.mrb[60].mxu0 }
 0x1ae   : > { %v792_v36 = vadd.f32 %v791_v34, %v2122_v42  ;;  %v793_v37 = vpop.f32.mrb[61].mxu0 }
 0x1af   : > { %v794_v38 = vadd.f32 %v793_v37, %v2124_v43  ;;  %1139 = vmatprep.mubr.f32.mxu1 %v861_v33 }
 0x1b0   : > { %1140 = vmatmul.mubr.f32.gmra.mrb[50].mxu1 %v860_v35  ;;  %v862_v44 = vmax.f32 %v792_v36, 0.0  ;;  %v879_v35 = vld [vmem:[#allocation2 + $0x68] sm:$0xff] }
 0x1b1   : > { %v863_v39 = vmax.f32 %v794_v38, 0.0  ;;  %v797_v41 = vpop.f32.mrb[62].mxu0 }
 0x1b2   : > { %v798_v40 = vadd.f32 %v797_v41, %v2122_v42  ;;  %v799_v45 = vpop.f32.mrb[63].mxu0 }
 0x1b3   : > { %v800_v46 = vadd.f32 %v799_v45, %v2124_v43  ;;  %1144 = vmatprep.mubr.f32.mxu1 %v863_v39  ;;  %v880_v39 = vld [vmem:[#allocation2 + $0x70] sm:$0xff]  ;;  %v881_v45 = vld [vmem:[#allocation2 + $0x78] sm:$0xff] }
 0x1b4   : > { %1145 = vmatmul.mubr.f32.gmra.mrb[52].mxu1 %v862_v44  ;;  %v864_v48 = vmax.f32 %v798_v40, 0.0 }
 0x1b5   : > { %v865_v47 = vmax.f32 %v800_v46, 0.0 }
 0x1b7   : > { %1149 = vmatprep.mubr.f32.mxu1 %v865_v47 }
 0x1b8   : > { %1150 = vmatmul.mubr.f32.gmra.mrb[54].mxu1 %v864_v48 }
 0x20f   : > { %v996_v50 = vpop.f32.mrb[64].mxu0 }
 0x210   : > { %v1155_v51 = vadd.f32 %v996_v50, %v866_v49  ;;  %v998_v52 = vpop.f32.mrb[65].mxu0  ;;  %v882_v49 = vld [vmem:[#allocation2 + $0x80] sm:$0xff] }
 0x212   : > { %1187 = vst [vmem:[#allocation2] sm:$0xff] %v1155_v51 }
 0x213   : > { %v1001_v54 = vpop.f32.mrb[66].mxu0 }
 0x214   : > { %v1156_v55 = vadd.f32 %v1001_v54, %v867_v53  ;;  %v1003_v56 = vpop.f32.mrb[67].mxu0  ;;  %v883_v53 = vld [vmem:[#allocation2 + $0x88] sm:$0xff] }
 0x216   : > { %1188 = vst [vmem:[#allocation2 + $0x8] sm:$0xff] %v1156_v55 }
 0x217   : > { %v1006_v42 = vpop.f32.mrb[68].mxu0 }
 0x218   : > { %v1157_v58 = vadd.f32 %v1006_v42, %v868_v57  ;;  %v1008_v43 = vpop.f32.mrb[69].mxu0  ;;  %v884_v57 = vld [vmem:[#allocation2 + $0x90] sm:$0xff] }
 0x21a   : > { %1189 = vst [vmem:[#allocation2 + $0x10] sm:$0xff] %v1157_v58 }
 0x21b   : > { %v1011_v60 = vpop.f32.mrb[70].mxu0 }
 0x21c   : > { %v1158_v61 = vadd.f32 %v1011_v60, %v869_v59  ;;  %v1013_v62 = vpop.f32.mrb[71].mxu0  ;;  %v885_v59 = vld [vmem:[#allocation2 + $0x98] sm:$0xff] }
 0x21e   : > { %1190 = vst [vmem:[#allocation2 + $0x18] sm:$0xff] %v1158_v61 }
 0x21f   : > { %v1016_v0 = vpop.f32.mrb[0].mxu1 }
 0x220   : > { %v1159_v1 = vadd.f32 %v1016_v0, %v870_v63  ;;  %v1018_v2 = vpop.f32.mrb[1].mxu1  ;;  %v886_v63 = vld [vmem:[#allocation2 + $0xa0] sm:$0xff] }
 0x222   : > { %1191 = vst [vmem:[#allocation2 + $0x20] sm:$0xff] %v1159_v1 }
 0x223   : > { %v1021_v4 = vpop.f32.mrb[2].mxu1 }
 0x224   : > { %v1160_v5 = vadd.f32 %v1021_v4, %v871_v3  ;;  %v1023_v6 = vpop.f32.mrb[3].mxu1  ;;  %v887_v3 = vld [vmem:[#allocation2 + $0xa8] sm:$0xff] }
 0x226   : > { %1192 = vst [vmem:[#allocation2 + $0x28] sm:$0xff] %v1160_v5 }
 0x227   : > { %v1026_v8 = vpop.f32.mrb[4].mxu1 }
 0x228   : > { %v1161_v9 = vadd.f32 %v1026_v8, %v872_v7  ;;  %v1028_v10 = vpop.f32.mrb[5].mxu1  ;;  %v888_v7 = vld [vmem:[#allocation2 + $0xb0] sm:$0xff] }
 0x22a   : > { %1193 = vst [vmem:[#allocation2 + $0x30] sm:$0xff] %v1161_v9 }
 0x22b   : > { %v1031_v12 = vpop.f32.mrb[6].mxu1 }
 0x22c   : > { %v1162_v13 = vadd.f32 %v1031_v12, %v873_v11  ;;  %v1033_v14 = vpop.f32.mrb[7].mxu1  ;;  %v889_v11 = vld [vmem:[#allocation2 + $0xb8] sm:$0xff] }
 0x22e   : > { %1194 = vst [vmem:[#allocation2 + $0x38] sm:$0xff] %v1162_v13 }
 0x22f   : > { %v1036_v16 = vpop.f32.mrb[8].mxu1 }
 0x230   : > { %v1163_v17 = vadd.f32 %v1036_v16, %v874_v15  ;;  %v1038_v18 = vpop.f32.mrb[9].mxu1  ;;  %v890_v15 = vld [vmem:[#allocation2 + $0xc0] sm:$0xff] }
 0x232   : > { %1195 = vst [vmem:[#allocation2 + $0x40] sm:$0xff] %v1163_v17 }
 0x233   : > { %v1041_v20 = vpop.f32.mrb[10].mxu1 }
 0x234   : > { %v1164_v21 = vadd.f32 %v1041_v20, %v875_v19  ;;  %v1043_v23 = vpop.f32.mrb[11].mxu1  ;;  %v891_v19 = vld [vmem:[#allocation2 + $0xc8] sm:$0xff] }
 0x236   : > { %1196 = vst [vmem:[#allocation2 + $0x48] sm:$0xff] %v1164_v21 }
 0x237   : > { %v1046_v25 = vpop.f32.mrb[12].mxu1 }
 0x238   : > { %v1165_v26 = vadd.f32 %v1046_v25, %v876_v24  ;;  %v1048_v27 = vpop.f32.mrb[13].mxu1  ;;  %v892_v24 = vld [vmem:[#allocation2 + $0xd0] sm:$0xff] }
 0x23a   : > { %1197 = vst [vmem:[#allocation2 + $0x50] sm:$0xff] %v1165_v26 }
 0x23b   : > { %v1051_v29 = vpop.f32.mrb[14].mxu1 }
 0x23c   : > { %v1166_v22 = vadd.f32 %v1051_v29, %v877_v28  ;;  %v1053_v30 = vpop.f32.mrb[15].mxu1  ;;  %v893_v28 = vld [vmem:[#allocation2 + $0xd8] sm:$0xff] }
 0x23e   : > { %1198 = vst [vmem:[#allocation2 + $0x58] sm:$0xff] %v1166_v22 }
 0x23f   : > { %v1056_v32 = vpop.f32.mrb[16].mxu1 }
 0x240   : > { %v1167_v33 = vadd.f32 %v1056_v32, %v878_v31  ;;  %v1058_v34 = vpop.f32.mrb[17].mxu1  ;;  %v894_v31 = vld [vmem:[#allocation2 + $0xe0] sm:$0xff] }
 0x242   : > { %1199 = vst [vmem:[#allocation2 + $0x60] sm:$0xff] %v1167_v33 }
 0x243   : > { %v1061_v36 = vpop.f32.mrb[18].mxu1 }
 0x244   : > { %v1168_v37 = vadd.f32 %v1061_v36, %v879_v35  ;;  %v1063_v38 = vpop.f32.mrb[19].mxu1  ;;  %v895_v35 = vld [vmem:[#allocation2 + $0xe8] sm:$0xff] }
 0x246   : > { %1200 = vst [vmem:[#allocation2 + $0x68] sm:$0xff] %v1168_v37 }
 0x247   : > { %v1066_v41 = vpop.f32.mrb[20].mxu1 }
 0x248   : > { %v1169_v44 = vadd.f32 %v1066_v41, %v880_v39  ;;  %v1068_v40 = vpop.f32.mrb[21].mxu1  ;;  %v896_v39 = vld [vmem:[#allocation2 + $0xf0] sm:$0xff] }
 0x24a   : > { %1201 = vst [vmem:[#allocation2 + $0x70] sm:$0xff] %v1169_v44 }
 0x24b   : > { %v1071_v46 = vpop.f32.mrb[22].mxu1 }
 0x24c   : > { %v1170_v47 = vadd.f32 %v1071_v46, %v881_v45  ;;  %v1073_v48 = vpop.f32.mrb[23].mxu1  ;;  %v897_v45 = vld [vmem:[#allocation2 + $0xf8] sm:$0xff] }
 0x24e   : > { %1202 = vst [vmem:[#allocation2 + $0x78] sm:$0xff] %v1170_v47 }
 0x24f   : > { %v1076_v50 = vpop.f32.mrb[24].mxu1 }
 0x250   : > { %v1171_v51 = vadd.f32 %v1076_v50, %v882_v49  ;;  %v1078_v52 = vpop.f32.mrb[25].mxu1  ;;  %v1223_v49 = vld [vmem:[#allocation2] sm:$0xff] (!%p1523_p12) }
 0x251   : > { %v2194_v50 = vld [vmem:[%s2439_s4] ss:$0 sm:$0xff] (!%p1523_p12) }
 0x252   : > { %1203 = vst [vmem:[#allocation2 + $0x80] sm:$0xff] %v1171_v51  ;;  %v1294_v51 = vld [vmem:[%s2440_s5] sm:$0xff] (!%p1523_p12)  ;;  %v1262_v52 = vadd.f32 (!%p1523_p12), %v2194_v50, %v1223_v49 }
 0x253   : > { %v1081_v54 = vpop.f32.mrb[26].mxu1 }
 0x254   : > { %v1172_v55 = vadd.f32 %v1081_v54, %v883_v53  ;;  %v1083_v56 = vpop.f32.mrb[27].mxu1  ;;  %v1224_v53 = vld [vmem:[#allocation2 + $0x8] sm:$0xff] (!%p1523_p12) }
 0x255   : > { %v1295_v54 = vld [vmem:[%s2440_s5 + $0x8] sm:$0xff] (!%p1523_p12)  ;;  %v1263_v56 = vadd.f32 (!%p1523_p12), %v2194_v50, %v1224_v53 }
 0x256   : > { %1204 = vst [vmem:[#allocation2 + $0x88] sm:$0xff] %v1172_v55  ;;  %v1225_v55 = vld [vmem:[#allocation2 + $0x10] sm:$0xff] (!%p1523_p12) }
 0x257   : > { %v1086_v42 = vpop.f32.mrb[28].mxu1 }
 0x258   : > { %v1173_v58 = vadd.f32 %v1086_v42, %v884_v57  ;;  %v1088_v43 = vpop.f32.mrb[29].mxu1  ;;  %v1264_v57 = vadd.f32 (!%p1523_p12), %v2194_v50, %v1225_v55  ;;  %v1296_v42 = vld [vmem:[%s2440_s5 + $0x10] sm:$0xff] (!%p1523_p12)  ;;  %v1311_v55 = vld [vmem:[%s2440_s5 + $0x88] sm:$0xff] (!%p1523_p12) }
 0x259   : > { %v1297_v43 = vld [vmem:[%s2440_s5 + $0x18] sm:$0xff] (!%p1523_p12) }
 0x25a   : > { %1205 = vst [vmem:[#allocation2 + $0x90] sm:$0xff] %v1173_v58  ;;  %v1226_v58 = vld [vmem:[#allocation2 + $0x18] sm:$0xff] (!%p1523_p12) }
 0x25b   : > { %v1091_v60 = vpop.f32.mrb[30].mxu1 }
 0x25c   : > { %v1174_v61 = vadd.f32 %v1091_v60, %v885_v59  ;;  %v1093_v62 = vpop.f32.mrb[31].mxu1  ;;  %v1326_v59 = vadd.f32 (!%p1523_p12), %v1294_v51, %v1262_v52  ;;  %v1265_v60 = vadd.f32 (!%p1523_p12), %v2194_v50, %v1226_v58 }
 0x25d   : > { %v1298_v62 = vld [vmem:[%s2440_s5 + $0x20] sm:$0xff] (!%p1523_p12)  ;;  %v1240_v49 = vld [vmem:[#allocation2 + $0x88] sm:$0xff] (!%p1523_p12) }
 0x25e   : > { %1206 = vst [vmem:[#allocation2 + $0x98] sm:$0xff] %v1174_v61  ;;  %v1227_v61 = vld [vmem:[#allocation2 + $0x20] sm:$0xff] (!%p1523_p12)  ;;  %1358 = vst [vmem:[%s2441_s6] sm:$0xff] (!%p1523_p12), %v1326_v59  ;;  %v1313_v59 = vld [vmem:[%s2440_s5 + $0x98] sm:$0xff] (!%p1523_p12) }
 0x25f   : > { %v1096_v0 = vpop.f32.mrb[32].mxu1 }
 0x260   : > { %v1175_v1 = vadd.f32 %v1096_v0, %v886_v63  ;;  %v1098_v2 = vpop.f32.mrb[33].mxu1  ;;  %v1228_v63 = vld [vmem:[#allocation2 + $0x28] sm:$0xff] (!%p1523_p12)  ;;  %v1327_v0 = vadd.f32 (!%p1523_p12), %v1295_v54, %v1263_v56  ;;  %v1279_v54 = vadd.f32 (!%p1523_p12), %v2194_v50, %v1240_v49 }
 0x261   : > { %v1266_v2 = vadd.f32 (!%p1523_p12), %v2194_v50, %v1227_v61  ;;  %v1241_v56 = vld [vmem:[#allocation2 + $0x90] sm:$0xff] (!%p1523_p12) }
 0x262   : > { %1207 = vst [vmem:[#allocation2 + $0xa0] sm:$0xff] %v1175_v1  ;;  %v1328_v1 = vadd.f32 (!%p1523_p12), %v1296_v42, %v1264_v57  ;;  %1359 = vst [vmem:[%s2441_s6 + $0x8] sm:$0xff] (!%p1523_p12), %v1327_v0  ;;  %v1312_v57 = vld [vmem:[%s2440_s5 + $0x90] sm:$0xff] (!%p1523_p12)  ;;  %v1280_v58 = vadd.f32 (!%p1523_p12), %v2194_v50, %v1241_v56 }
 0x263   : > { %v1101_v4 = vpop.f32.mrb[34].mxu1 }
 0x264   : > { %v1176_v5 = vadd.f32 %v1101_v4, %v887_v3  ;;  %v1103_v6 = vpop.f32.mrb[35].mxu1  ;;  %v1267_v3 = vadd.f32 (!%p1523_p12), %v2194_v50, %v1228_v63  ;;  %v1299_v4 = vld [vmem:[%s2440_s5 + $0x28] sm:$0xff] (!%p1523_p12)  ;;  %1360 = vst [vmem:[%s2441_s6 + $0x10] sm:$0xff] (!%p1523_p12), %v1328_v1  ;;  %v1314_v1 = vld [vmem:[%s2440_s5 + $0xa0] sm:$0xff] (!%p1523_p12) }
 0x265   : > { %v1300_v6 = vld [vmem:[%s2440_s5 + $0x30] sm:$0xff] (!%p1523_p12) }
 0x266   : > { %1208 = vst [vmem:[#allocation2 + $0xa8] sm:$0xff] %v1176_v5  ;;  %v1229_v5 = vld [vmem:[#allocation2 + $0x30] sm:$0xff] (!%p1523_p12) }
 0x267   : > { %v1106_v8 = vpop.f32.mrb[36].mxu1 }
 0x268   : > { %v1177_v9 = vadd.f32 %v1106_v8, %v888_v7  ;;  %v1108_v10 = vpop.f32.mrb[37].mxu1  ;;  %v1329_v7 = vadd.f32 (!%p1523_p12), %v1297_v43, %v1265_v60  ;;  %v1268_v8 = vadd.f32 (!%p1523_p12), %v2194_v50, %v1229_v5  ;;  %v1242_v43 = vld [vmem:[#allocation2 + $0x98] sm:$0xff] (!%p1523_p12) }
 0x269   : > { %v1301_v10 = vld [vmem:[%s2440_s5 + $0x38] sm:$0xff] (!%p1523_p12)  ;;  %v1243_v60 = vld [vmem:[#allocation2 + $0xa0] sm:$0xff] (!%p1523_p12)  ;;  %v1281_v63 = vadd.f32 (!%p1523_p12), %v2194_v50, %v1242_v43 }
 0x26a   : > { %1209 = vst [vmem:[#allocation2 + $0xb0] sm:$0xff] %v1177_v9  ;;  %v1230_v9 = vld [vmem:[#allocation2 + $0x38] sm:$0xff] (!%p1523_p12)  ;;  %1361 = vst [vmem:[%s2441_s6 + $0x18] sm:$0xff] (!%p1523_p12), %v1329_v7  ;;  %v1282_v0 = vadd.f32 (!%p1523_p12), %v2194_v50, %v1243_v60  ;;  %v1316_v7 = vld [vmem:[%s2440_s5 + $0xb0] sm:$0xff] (!%p1523_p12) }
 0x26b   : > { %v1111_v12 = vpop.f32.mrb[38].mxu1 }
 0x26c   : > { %v1178_v13 = vadd.f32 %v1111_v12, %v889_v11  ;;  %v1113_v14 = vpop.f32.mrb[39].mxu1  ;;  %v1231_v11 = vld [vmem:[#allocation2 + $0x40] sm:$0xff] (!%p1523_p12)  ;;  %v1330_v12 = vadd.f32 (!%p1523_p12), %v1298_v62, %v1266_v2  ;;  %v1343_v62 = vadd.f32 (!%p1523_p12), %v1311_v55, %v1279_v54 }
 0x26d   : > { %v1269_v14 = vadd.f32 (!%p1523_p12), %v2194_v50, %v1230_v9  ;;  %v1244_v2 = vld [vmem:[#allocation2 + $0xa8] sm:$0xff] (!%p1523_p12)  ;;  %v1345_v9 = vadd.f32 (!%p1523_p12), %v1313_v59, %v1281_v63 }
 0x26e   : > { %1210 = vst [vmem:[#allocation2 + $0xb8] sm:$0xff] %v1178_v13  ;;  %v1331_v13 = vadd.f32 (!%p1523_p12), %v1299_v4, %v1267_v3  ;;  %1362 = vst [vmem:[%s2441_s6 + $0x20] sm:$0xff] (!%p1523_p12), %v1330_v12  ;;  %v1315_v3 = vld [vmem:[%s2440_s5 + $0xa8] sm:$0xff] (!%p1523_p12)  ;;  %v1344_v4 = vadd.f32 (!%p1523_p12), %v1312_v57, %v1280_v58  ;;  %v1283_v5 = vadd.f32 (!%p1523_p12), %v2194_v50, %v1244_v2 }
 0x26f   : > { %v1116_v16 = vpop.f32.mrb[40].mxu1  ;;  %1375 = vst [vmem:[%s2441_s6 + $0x88] sm:$0xff] (!%p1523_p12), %v1343_v62  ;;  %1377 = vst [vmem:[%s2441_s6 + $0x98] sm:$0xff] (!%p1523_p12), %v1345_v9 }
 0x270   : > { %v1179_v17 = vadd.f32 %v1116_v16, %v890_v15  ;;  %v1118_v18 = vpop.f32.mrb[41].mxu1  ;;  %v1270_v15 = vadd.f32 (!%p1523_p12), %v2194_v50, %v1231_v11  ;;  %v1302_v16 = vld [vmem:[%s2440_s5 + $0x40] sm:$0xff] (!%p1523_p12)  ;;  %1363 = vst [vmem:[%s2441_s6 + $0x28] sm:$0xff] (!%p1523_p12), %v1331_v13  ;;  %v1317_v13 = vld [vmem:[%s2440_s5 + $0xb8] sm:$0xff] (!%p1523_p12)  ;;  %1376 = vst [vmem:[%s2441_s6 + $0x90] sm:$0xff] (!%p1523_p12), %v1344_v4 }
 0x271   : > { %v1303_v18 = vld [vmem:[%s2440_s5 + $0x48] sm:$0xff] (!%p1523_p12) }
 0x272   : > { %1211 = vst [vmem:[#allocation2 + $0xc0] sm:$0xff] %v1179_v17  ;;  %v1232_v17 = vld [vmem:[#allocation2 + $0x48] sm:$0xff] (!%p1523_p12) }
 0x273   : > { %v1121_v20 = vpop.f32.mrb[42].mxu1 }
 0x274   : > { %v1180_v21 = vadd.f32 %v1121_v20, %v891_v19  ;;  %v1123_v23 = vpop.f32.mrb[43].mxu1  ;;  %v1332_v19 = vadd.f32 (!%p1523_p12), %v1300_v6, %v1268_v8  ;;  %v1271_v20 = vadd.f32 (!%p1523_p12), %v2194_v50, %v1232_v17  ;;  %v1245_v6 = vld [vmem:[#allocation2 + $0xb0] sm:$0xff] (!%p1523_p12) }
 0x275   : > { %v1304_v23 = vld [vmem:[%s2440_s5 + $0x50] sm:$0xff] (!%p1523_p12)  ;;  %v1246_v8 = vld [vmem:[#allocation2 + $0xb8] sm:$0xff] (!%p1523_p12)  ;;  %v1284_v11 = vadd.f32 (!%p1523_p12), %v2194_v50, %v1245_v6 }
 0x276   : > { %1212 = vst [vmem:[#allocation2 + $0xc8] sm:$0xff] %v1180_v21  ;;  %v1233_v21 = vld [vmem:[#allocation2 + $0x50] sm:$0xff] (!%p1523_p12)  ;;  %1364 = vst [vmem:[%s2441_s6 + $0x30] sm:$0xff] (!%p1523_p12), %v1332_v19  ;;  %v1285_v12 = vadd.f32 (!%p1523_p12), %v2194_v50, %v1246_v8  ;;  %v1319_v19 = vld [vmem:[%s2440_s5 + $0xc8] sm:$0xff] (!%p1523_p12) }
 0x277   : > { %v1126_v25 = vpop.f32.mrb[44].mxu1 }
 0x278   : > { %v1181_v26 = vadd.f32 %v1126_v25, %v892_v24  ;;  %v1128_v27 = vpop.f32.mrb[45].mxu1  ;;  %v1234_v24 = vld [vmem:[#allocation2 + $0x58] sm:$0xff] (!%p1523_p12)  ;;  %v1333_v25 = vadd.f32 (!%p1523_p12), %v1301_v10, %v1269_v14  ;;  %v1346_v10 = vadd.f32 (!%p1523_p12), %v1314_v1, %v1282_v0 }
 0x279   : > { %v1272_v27 = vadd.f32 (!%p1523_p12), %v2194_v50, %v1233_v21  ;;  %v1247_v14 = vld [vmem:[#allocation2 + $0xc0] sm:$0xff] (!%p1523_p12)  ;;  %v1348_v21 = vadd.f32 (!%p1523_p12), %v1316_v7, %v1284_v11 }
 0x27a   : > { %1213 = vst [vmem:[#allocation2 + $0xd0] sm:$0xff] %v1181_v26  ;;  %v1334_v26 = vadd.f32 (!%p1523_p12), %v1302_v16, %v1270_v15  ;;  %1365 = vst [vmem:[%s2441_s6 + $0x38] sm:$0xff] (!%p1523_p12), %v1333_v25  ;;  %v1318_v15 = vld [vmem:[%s2440_s5 + $0xc0] sm:$0xff] (!%p1523_p12)  ;;  %v1347_v16 = vadd.f32 (!%p1523_p12), %v1315_v3, %v1283_v5  ;;  %v1286_v17 = vadd.f32 (!%p1523_p12), %v2194_v50, %v1247_v14 }
 0x27b   : > { %v1131_v29 = vpop.f32.mrb[46].mxu1  ;;  %1378 = vst [vmem:[%s2441_s6 + $0xa0] sm:$0xff] (!%p1523_p12), %v1346_v10  ;;  %1380 = vst [vmem:[%s2441_s6 + $0xb0] sm:$0xff] (!%p1523_p12), %v1348_v21 }
 0x27c   : > { %v1182_v22 = vadd.f32 %v1131_v29, %v893_v28  ;;  %v1133_v30 = vpop.f32.mrb[47].mxu1  ;;  %v1273_v28 = vadd.f32 (!%p1523_p12), %v2194_v50, %v1234_v24  ;;  %v1305_v29 = vld [vmem:[%s2440_s5 + $0x58] sm:$0xff] (!%p1523_p12)  ;;  %1366 = vst [vmem:[%s2441_s6 + $0x40] sm:$0xff] (!%p1523_p12), %v1334_v26  ;;  %v1320_v26 = vld [vmem:[%s2440_s5 + $0xd0] sm:$0xff] (!%p1523_p12)  ;;  %1379 = vst [vmem:[%s2441_s6 + $0xa8] sm:$0xff] (!%p1523_p12), %v1347_v16 }
 0x27d   : > { %v1306_v30 = vld [vmem:[%s2440_s5 + $0x60] sm:$0xff] (!%p1523_p12) }
 0x27e   : > { %1214 = vst [vmem:[#allocation2 + $0xd8] sm:$0xff] %v1182_v22  ;;  %v1235_v22 = vld [vmem:[#allocation2 + $0x60] sm:$0xff] (!%p1523_p12) }
 0x27f   : > { %v1136_v32 = vpop.f32.mrb[48].mxu1 }
 0x280   : > { %v1183_v33 = vadd.f32 %v1136_v32, %v894_v31  ;;  %v1138_v34 = vpop.f32.mrb[49].mxu1  ;;  %v1335_v31 = vadd.f32 (!%p1523_p12), %v1303_v18, %v1271_v20  ;;  %v1274_v32 = vadd.f32 (!%p1523_p12), %v2194_v50, %v1235_v22  ;;  %v1248_v18 = vld [vmem:[#allocation2 + $0xc8] sm:$0xff] (!%p1523_p12) }
 0x281   : > { %v1307_v34 = vld [vmem:[%s2440_s5 + $0x68] sm:$0xff] (!%p1523_p12)  ;;  %v1249_v20 = vld [vmem:[#allocation2 + $0xd0] sm:$0xff] (!%p1523_p12)  ;;  %v1287_v24 = vadd.f32 (!%p1523_p12), %v2194_v50, %v1248_v18 }
 0x282   : > { %1215 = vst [vmem:[#allocation2 + $0xe0] sm:$0xff] %v1183_v33  ;;  %v1236_v33 = vld [vmem:[#allocation2 + $0x68] sm:$0xff] (!%p1523_p12)  ;;  %1367 = vst [vmem:[%s2441_s6 + $0x48] sm:$0xff] (!%p1523_p12), %v1335_v31  ;;  %v1288_v25 = vadd.f32 (!%p1523_p12), %v2194_v50, %v1249_v20  ;;  %v1322_v31 = vld [vmem:[%s2440_s5 + $0xe0] sm:$0xff] (!%p1523_p12) }
 0x283   : > { %v1141_v36 = vpop.f32.mrb[50].mxu1 }
 0x284   : > { %v1184_v37 = vadd.f32 %v1141_v36, %v895_v35  ;;  %v1143_v38 = vpop.f32.mrb[51].mxu1  ;;  %v1237_v35 = vld [vmem:[#allocation2 + $0x70] sm:$0xff] (!%p1523_p12)  ;;  %v1336_v36 = vadd.f32 (!%p1523_p12), %v1304_v23, %v1272_v27  ;;  %v1349_v23 = vadd.f32 (!%p1523_p12), %v1317_v13, %v1285_v12 }
 0x285   : > { %v1275_v38 = vadd.f32 (!%p1523_p12), %v2194_v50, %v1236_v33  ;;  %v1250_v27 = vld [vmem:[#allocation2 + $0xd8] sm:$0xff] (!%p1523_p12)  ;;  %v1351_v33 = vadd.f32 (!%p1523_p12), %v1319_v19, %v1287_v24 }
 0x286   : > { %1216 = vst [vmem:[#allocation2 + $0xe8] sm:$0xff] %v1184_v37  ;;  %v1337_v37 = vadd.f32 (!%p1523_p12), %v1305_v29, %v1273_v28  ;;  %1368 = vst [vmem:[%s2441_s6 + $0x50] sm:$0xff] (!%p1523_p12), %v1336_v36  ;;  %v1321_v28 = vld [vmem:[%s2440_s5 + $0xd8] sm:$0xff] (!%p1523_p12)  ;;  %v1350_v29 = vadd.f32 (!%p1523_p12), %v1318_v15, %v1286_v17  ;;  %v1289_v22 = vadd.f32 (!%p1523_p12), %v2194_v50, %v1250_v27 }
 0x287   : > { %v1146_v41 = vpop.f32.mrb[52].mxu1  ;;  %v1339_v51 = vadd.f32 (!%p1523_p12), %v1307_v34, %v1275_v38  ;;  %1381 = vst [vmem:[%s2441_s6 + $0xb8] sm:$0xff] (!%p1523_p12), %v1349_v23  ;;  %v1352_v34 = vadd.f32 (!%p1523_p12), %v1320_v26, %v1288_v25  ;;  %1383 = vst [vmem:[%s2441_s6 + $0xc8] sm:$0xff] (!%p1523_p12), %v1351_v33 }
 0x288   : > { %v1185_v44 = vadd.f32 %v1146_v41, %v896_v39  ;;  %v1148_v40 = vpop.f32.mrb[53].mxu1  ;;  %1222 = sbr.rel (%p1523_p12) target bundleno = 667 (0x29b), region = 75  ;;  %v1276_v39 = vadd.f32 (!%p1523_p12), %v2194_v50, %v1237_v35  ;;  %v1308_v41 = vld [vmem:[%s2440_s5 + $0x70] sm:$0xff] (!%p1523_p12)  ;;  %1369 = vst [vmem:[%s2441_s6 + $0x58] sm:$0xff] (!%p1523_p12), %v1337_v37  ;;  %v1323_v37 = vld [vmem:[%s2440_s5 + $0xe8] sm:$0xff] (!%p1523_p12)  ;;  %1382 = vst [vmem:[%s2441_s6 + $0xc0] sm:$0xff] (!%p1523_p12), %v1350_v29 }
 0x289   : > { %v1309_v40 = vld [vmem:[%s2440_s5 + $0x78] sm:$0xff] (!%p1523_p12)  ;;  %1371 = vst [vmem:[%s2441_s6 + $0x68] sm:$0xff] (!%p1523_p12), %v1339_v51  ;;  %1384 = vst [vmem:[%s2441_s6 + $0xd0] sm:$0xff] (!%p1523_p12), %v1352_v34 }
 0x28a   : > { %1217 = vst [vmem:[#allocation2 + $0xf0] sm:$0xff] %v1185_v44  ;;  %v1238_v44 = vld [vmem:[#allocation2 + $0x78] sm:$0xff] (!%p1523_p12)  ;;  %v1340_v52 = vadd.f32 (!%p1523_p12), %v1308_v41, %v1276_v39  ;;  %v1324_v39 = vld [vmem:[%s2440_s5 + $0xf0] sm:$0xff] (!%p1523_p12)  ;;  %v1353_v41 = vadd.f32 (!%p1523_p12), %v1321_v28, %v1289_v22 }
 0x28b   : > { %v1151_v46 = vpop.f32.mrb[54].mxu1 }
 0x28c   : > { %v1186_v47 = vadd.f32 %v1151_v46, %v897_v45  ;;  %v1153_v48 = vpop.f32.mrb[55].mxu1  ;;  %v1338_v45 = vadd.f32 (!%p1523_p12), %v1306_v30, %v1274_v32  ;;  %v1277_v46 = vadd.f32 (!%p1523_p12), %v2194_v50, %v1238_v44  ;;  %1372 = vst [vmem:[%s2441_s6 + $0x70] sm:$0xff] (!%p1523_p12), %v1340_v52  ;;  %v1251_v30 = vld [vmem:[#allocation2 + $0xe0] sm:$0xff] (!%p1523_p12)  ;;  %1385 = vst [vmem:[%s2441_s6 + $0xd8] sm:$0xff] (!%p1523_p12), %v1353_v41 }
 0x28d   : > { %v1310_v48 = vld [vmem:[%s2440_s5 + $0x80] sm:$0xff] (!%p1523_p12)  ;;  %v1252_v32 = vld [vmem:[#allocation2 + $0xe8] sm:$0xff] (!%p1523_p12)  ;;  %v1290_v35 = vadd.f32 (!%p1523_p12), %v2194_v50, %v1251_v30 }
 0x28e   : > { %1218 = vst [vmem:[#allocation2 + $0xf8] sm:$0xff] %v1186_v47  ;;  %v1239_v47 = vld [vmem:[#allocation2 + $0x80] sm:$0xff] (!%p1523_p12)  ;;  %1370 = vst [vmem:[%s2441_s6 + $0x60] sm:$0xff] (!%p1523_p12), %v1338_v45  ;;  %v1341_v42 = vadd.f32 (!%p1523_p12), %v1309_v40, %v1277_v46  ;;  %v1291_v36 = vadd.f32 (!%p1523_p12), %v2194_v50, %v1252_v32  ;;  %v1325_v45 = vld [vmem:[%s2440_s5 + $0xf8] sm:$0xff] (!%p1523_p12) }
 0x28f   : > { %v1278_v53 = vadd.f32 %v2194_v50, %v1239_v47  ;;  %v1354_v46 = vadd.f32 %v1322_v31, %v1290_v35 }
 0x290   : > { %1373 = vst [vmem:[%s2441_s6 + $0x78] sm:$0xff] %v1341_v42  ;;  %v1355_v47 = vadd.f32 %v1323_v37, %v1291_v36 }
 0x291   : > { %v1342_v61 = vadd.f32 %v1310_v48, %v1278_v53  ;;  %v1253_v38 = vld [vmem:[#allocation2 + $0xf0] sm:$0xff]  ;;  %1386 = vst [vmem:[%s2441_s6 + $0xe0] sm:$0xff] %v1354_v46 }
 0x292   : > { %v1292_v44 = vadd.f32 %v2194_v50, %v1253_v38  ;;  %1387 = vst [vmem:[%s2441_s6 + $0xe8] sm:$0xff] %v1355_v47 }
 0x293   : > { %1374 = vst [vmem:[%s2441_s6 + $0x80] sm:$0xff] %v1342_v61 }
 0x294   : > { %v1356_v49 = vadd.f32 %v1324_v39, %v1292_v44 }
 0x295   : > { %v1254_v40 = vld [vmem:[#allocation2 + $0xf8] sm:$0xff] }
 0x296   : > { %v1293_v48 = vadd.f32 %v2194_v50, %v1254_v40  ;;  %1388 = vst [vmem:[%s2441_s6 + $0xf0] sm:$0xff] %v1356_v49 }
 0x298   : > { %v1357_v51 = vadd.f32 %v1325_v45, %v1293_v48 }
 0x29a   : > { %1389 = vst [vmem:[%s2441_s6 + $0xf8] sm:$0xff] %v1357_v51 }
 0x29b PF: > { %s16_s25 = sadd.s32 1, %s1723_s25   ;;  %s2442_s21 = smov %s1711_s22 }
 0x29c   : > { %p13_p13 = scmp.ge.s32.totalorder %s16_s25, 4   ;;  %s2443_s22 = smov %s1798_s29 }
 0x29d   : > { %s2444_s23 = smov %s1719_s24  ;;  %s2445_s24 = smov %s2447_s26 }
 0x29e   :  { %15 = sbr.rel (!%p13_p13) target bundleno = 3 (0x3), region = 122 }

// kernel: encoder_forward.23
= control target key start
LH: loop header
LB: loop body
LE: loop exit
PB: predicated region body
PF: predicated region fallthrough
CT: control target
= control target key end

     0   :  { %11 = vsyncpa [#allocation5], 0  ;;  %s1796_s21 = smov 0   ;;  %s1798_s22 = smov 0   ;;  %s2401_s0 = inlined_call_operand.vmem [shape: f32[256,128], index: 0, kind: input, shape index: {}]   ;;  %s2402_s1 = inlined_call_operand.vmem [shape: f32[128,512], index: 1, kind: input, shape index: {}]   ;;  %s2403_s2 = inlined_call_operand.vmem [shape: f32[1,512], index: 2, kind: input, shape index: {}]   ;;  %s2404_s3 = inlined_call_operand.vmem [shape: f32[512,128], index: 3, kind: input, shape index: {}]   ;;  %s2405_s4 = inlined_call_operand.vmem [shape: f32[1,128], index: 4, kind: input, shape index: {}]   ;;  %s2406_s5 = inlined_call_operand.vmem [shape: f32[256,128], index: 5, kind: input, shape index: {}]   ;;  %s2407_s6 = inlined_call_operand.hbm [shape: f32[256,128], index: 6, kind: output, shape index: {}]  }
   0x1   :  { %s1800_s23 = smov 0   ;;  %s1802_s24 = smov 0  }
   0x2   :  { %s1804_s25 = smov 0  }
   0x3 LB: > { %s1500_s26 = sadd.s32 4294967295, %s1753_s25   ;;  %s26_s27 = sadd.s32 1, %s1749_s24  ;;  %s1753_s25 = sphi %s1804_s25, %s17_s25   ;;  %s1749_s24 = sphi %s1802_s24, %s2412_s24   ;;  %s1745_s23 = sphi %s1800_s23, %s2411_s23   ;;  %s1741_s22 = sphi %s1798_s22, %s2410_s22   ;;  %s1737_s21 = sphi %s1796_s21, %s2409_s21  }
   0x4   : > { %p27_p0 = scmp.ge.s32.totalorder %s26_s27, 2  ;;  %p69_p1 = scmp.ne.s32.totalorder %s1741_s22, %s1737_s21 }
   0x5   : > { %p70_p2 = scmp.eq.s32.totalorder %s1753_s25, 0  ;;  %s62_s29 = sadd.s32 1, %s1741_s22 }
   0x6   : > { %s2414_s27 = smov (%p27_p0, %s26_s27), 0  ;;  %p1504_p5 = scmp.ge.s32.totalorder %s1753_s25, 2 }
   0x7   : > { %p71_p3 = por %p70_p2, %p69_p1  ;;  %s59_s28 = ssub.s32 %s1749_s24, %s2414_s27 }
   0x8   : > { %p60_p4 = scmp.eq.s32.totalorder %s59_s28, 0  ;;  %241 = sbr.rel (%p1504_p5) target bundleno = 35 (0x23), region = 28 }
   0xa   : > { %s1832_s30 = scalar_select %p60_p4, %s1741_s22, %s62_s29  }
   0xf   : > { %244 = sbr.rel (!%p71_p3) target bundleno = 35 (0x23), region = 32  ;;  %s246_s7 = sand.u32 (%p71_p3), 1, %s1741_s22  }
  0x10   : > { %s1520_s8 = sshll.u32 (%p71_p3), %s1749_s24, 4  ;;  %s1505_s9 = sshll.u32 (%p71_p3), %s246_s7, 8 }
  0x11   : > { %s1840_s12 = scalar_lea.vmem (%p71_p3), %s2402_s1, %s1520_s8  ;;  %s1845_s13 = scalar_lea.vmem (%p71_p3), [#allocation3], %s1505_s9 }
  0x12   : > { %v264_v0 = vld [vmem:[%s1840_s12] sm:$0xff] (%p71_p3)  ;;  %v266_v1 = vld [vmem:[%s1840_s12 + $0x8] sm:$0xff] (%p71_p3) }
  0x13   : > { %v268_v2 = vld [vmem:[%s1840_s12 + $0x20] sm:$0xff] (%p71_p3)  ;;  %265 = vst [vmem:[%s1845_s13] sm:$0xff] (%p71_p3), %v264_v0  ;;  %267 = vst [vmem:[%s1845_s13 + $0x8] sm:$0xff] (%p71_p3), %v266_v1  ;;  %v270_v3 = vld [vmem:[%s1840_s12 + $0x28] sm:$0xff] (%p71_p3) }
  0x14   : > { %269 = vst [vmem:[%s1845_s13 + $0x10] sm:$0xff] (%p71_p3), %v268_v2  ;;  %v272_v4 = vld [vmem:[%s1840_s12 + $0x40] sm:$0xff] (%p71_p3)  ;;  %v274_v5 = vld [vmem:[%s1840_s12 + $0x48] sm:$0xff] (%p71_p3)  ;;  %271 = vst [vmem:[%s1845_s13 + $0x18] sm:$0xff] (%p71_p3), %v270_v3 }
  0x15   : > { %273 = vst [vmem:[%s1845_s13 + $0x20] sm:$0xff] (%p71_p3), %v272_v4  ;;  %275 = vst [vmem:[%s1845_s13 + $0x28] sm:$0xff] (%p71_p3), %v274_v5  ;;  %v276_v6 = vld [vmem:[%s1840_s12 + $0x60] sm:$0xff] (%p71_p3)  ;;  %v278_v7 = vld [vmem:[%s1840_s12 + $0x68] sm:$0xff] (%p71_p3) }
  0x16   : > { %v280_v8 = vld [vmem:[%s1840_s12 + $0x80] sm:$0xff]  ;;  %277 = vst [vmem:[%s1845_s13 + $0x30] sm:$0xff] %v276_v6  ;;  %279 = vst [vmem:[%s1845_s13 + $0x38] sm:$0xff] %v278_v7  ;;  %v282_v9 = vld [vmem:[%s1840_s12 + $0x88] sm:$0xff] }
  0x17   : > { %281 = vst [vmem:[%s1845_s13 + $0x40] sm:$0xff] %v280_v8  ;;  %v284_v10 = vld [vmem:[%s1840_s12 + $0xa0] sm:$0xff]  ;;  %v286_v11 = vld [vmem:[%s1840_s12 + $0xa8] sm:$0xff]  ;;  %283 = vst [vmem:[%s1845_s13 + $0x48] sm:$0xff] %v282_v9 }
  0x18   : > { %285 = vst [vmem:[%s1845_s13 + $0x50] sm:$0xff] %v284_v10  ;;  %287 = vst [vmem:[%s1845_s13 + $0x58] sm:$0xff] %v286_v11  ;;  %v288_v12 = vld [vmem:[%s1840_s12 + $0xc0] sm:$0xff]  ;;  %v290_v13 = vld [vmem:[%s1840_s12 + $0xc8] sm:$0xff] }
  0x19   : > { %v292_v14 = vld [vmem:[%s1840_s12 + $0xe0] sm:$0xff]  ;;  %289 = vst [vmem:[%s1845_s13 + $0x60] sm:$0xff] %v288_v12  ;;  %291 = vst [vmem:[%s1845_s13 + $0x68] sm:$0xff] %v290_v13  ;;  %v294_v15 = vld [vmem:[%s1840_s12 + $0xe8] sm:$0xff] }
  0x1a   : > { %293 = vst [vmem:[%s1845_s13 + $0x70] sm:$0xff] %v292_v14  ;;  %v296_v16 = vld [vmem:[%s1840_s12 + $0x100] sm:$0xff]  ;;  %v298_v17 = vld [vmem:[%s1840_s12 + $0x108] sm:$0xff]  ;;  %295 = vst [vmem:[%s1845_s13 + $0x78] sm:$0xff] %v294_v15 }
  0x1b   : > { %297 = vst [vmem:[%s1845_s13 + $0x80] sm:$0xff] %v296_v16  ;;  %299 = vst [vmem:[%s1845_s13 + $0x88] sm:$0xff] %v298_v17  ;;  %v300_v18 = vld [vmem:[%s1840_s12 + $0x120] sm:$0xff]  ;;  %v302_v19 = vld [vmem:[%s1840_s12 + $0x128] sm:$0xff] }
  0x1c   : > { %v304_v20 = vld [vmem:[%s1840_s12 + $0x140] sm:$0xff]  ;;  %301 = vst [vmem:[%s1845_s13 + $0x90] sm:$0xff] %v300_v18  ;;  %303 = vst [vmem:[%s1845_s13 + $0x98] sm:$0xff] %v302_v19  ;;  %v306_v21 = vld [vmem:[%s1840_s12 + $0x148] sm:$0xff] }
  0x1d   : > { %305 = vst [vmem:[%s1845_s13 + $0xa0] sm:$0xff] %v304_v20  ;;  %v308_v22 = vld [vmem:[%s1840_s12 + $0x160] sm:$0xff]  ;;  %v310_v23 = vld [vmem:[%s1840_s12 + $0x168] sm:$0xff]  ;;  %307 = vst [vmem:[%s1845_s13 + $0xa8] sm:$0xff] %v306_v21 }
  0x1e   : > { %309 = vst [vmem:[%s1845_s13 + $0xb0] sm:$0xff] %v308_v22  ;;  %311 = vst [vmem:[%s1845_s13 + $0xb8] sm:$0xff] %v310_v23  ;;  %v312_v24 = vld [vmem:[%s1840_s12 + $0x180] sm:$0xff]  ;;  %v314_v25 = vld [vmem:[%s1840_s12 + $0x188] sm:$0xff] }
  0x1f   : > { %v316_v26 = vld [vmem:[%s1840_s12 + $0x1a0] sm:$0xff]  ;;  %313 = vst [vmem:[%s1845_s13 + $0xc0] sm:$0xff] %v312_v24  ;;  %315 = vst [vmem:[%s1845_s13 + $0xc8] sm:$0xff] %v314_v25  ;;  %v318_v27 = vld [vmem:[%s1840_s12 + $0x1a8] sm:$0xff] }
  0x20   : > { %317 = vst [vmem:[%s1845_s13 + $0xd0] sm:$0xff] %v316_v26  ;;  %v320_v28 = vld [vmem:[%s1840_s12 + $0x1c0] sm:$0xff]  ;;  %v322_v29 = vld [vmem:[%s1840_s12 + $0x1c8] sm:$0xff]  ;;  %319 = vst [vmem:[%s1845_s13 + $0xd8] sm:$0xff] %v318_v27 }
  0x21   : > { %321 = vst [vmem:[%s1845_s13 + $0xe0] sm:$0xff] %v320_v28  ;;  %323 = vst [vmem:[%s1845_s13 + $0xe8] sm:$0xff] %v322_v29  ;;  %v324_v30 = vld [vmem:[%s1840_s12 + $0x1e0] sm:$0xff]  ;;  %v326_v31 = vld [vmem:[%s1840_s12 + $0x1e8] sm:$0xff] }
  0x22   : > { %325 = vst [vmem:[%s1845_s13 + $0xf0] sm:$0xff] %v324_v30  ;;  %327 = vst [vmem:[%s1845_s13 + $0xf8] sm:$0xff] %v326_v31 }
  0x23 PF: > { %p1508_p6 = scmp.ge.s32.totalorder %s1753_s25, 1  ;;  %p349_p7 = scmp.lt.s32.totalorder %s1753_s25, 3 }
  0x25   : > { %p350_p8 = pnand %p1508_p6, %p349_p7 }
  0x26   : > { %s356_s14 = sand.u32 (!%p350_p8), 1, %s1737_s21   ;;  %s1510_s15 = sshll.u32 (!%p350_p8), %s1745_s23, 1 }
  0x27   : > { %353 = sbr.rel (%p350_p8) target bundleno = 694 (0x2b6), region = 63  ;;  %s1509_s16 = sshll.u32 (!%p350_p8), %s356_s14, 8 }
  0x28   : > { %p407_p9 = scmp.lt.s32.totalorder (!%p350_p8), %s1510_s15, 3  ;;  %s1511_s17 = sshll.u32 (!%p350_p8), %s1745_s23, 5 }
  0x29   : > { %p412_p10 = scmp.lt.s32.totalorder (!%p350_p8), %s1511_s17, 63  ;;  %s1924_s21 = scalar_lea.vmem (!%p350_p8), [#allocation3], %s1509_s16 }
  0x2a   : > { %p1513_p11 = scmp.ne.s32.totalorder (!%p350_p8), %s1745_s23, 0 }
  0x2e   : > { %s2416_s15 = smov (!%p407_p9, %s1510_s15), 3  ;;  %s2418_s17 = smov (!%p412_p10, %s1511_s17), 63 }
  0x2f   : > { %s409_s20 = scalar_lea.vmem %s2403_s2, %s2416_s15  ;;  %s1512_s28 = sshll.u32 %s2418_s17, 3  ;;  %v1755_v32 = vmov (!%p1513_p11), 0.0  }
  0x30   : > { %s1922_s8 = scalar_lea.vmem %s2404_s3, %s1512_s28  ;;  %427 = sbr.rel (%p1513_p11) target bundleno = 64 (0x40), region = 71  ;;  %428 = vst [vmem:[#allocation2] sm:$0xff] (!%p1513_p11), %v1755_v32  ;;  %429 = vst [vmem:[#allocation2 + $0x8] sm:$0xff] (!%p1513_p11), %v1755_v32 }
  0x31   : > { %430 = vst [vmem:[#allocation2 + $0x10] sm:$0xff] (!%p1513_p11), %v1755_v32  ;;  %431 = vst [vmem:[#allocation2 + $0x18] sm:$0xff] (!%p1513_p11), %v1755_v32 }
  0x32   : > { %432 = vst [vmem:[#allocation2 + $0x20] sm:$0xff] (!%p1513_p11), %v1755_v32  ;;  %433 = vst [vmem:[#allocation2 + $0x28] sm:$0xff] (!%p1513_p11), %v1755_v32 }
  0x33   : > { %434 = vst [vmem:[#allocation2 + $0x30] sm:$0xff] (!%p1513_p11), %v1755_v32  ;;  %435 = vst [vmem:[#allocation2 + $0x38] sm:$0xff] (!%p1513_p11), %v1755_v32 }
  0x34   : > { %436 = vst [vmem:[#allocation2 + $0x40] sm:$0xff] (!%p1513_p11), %v1755_v32  ;;  %437 = vst [vmem:[#allocation2 + $0x48] sm:$0xff] (!%p1513_p11), %v1755_v32 }
  0x35   : > { %438 = vst [vmem:[#allocation2 + $0x50] sm:$0xff] (!%p1513_p11), %v1755_v32  ;;  %439 = vst [vmem:[#allocation2 + $0x58] sm:$0xff] (!%p1513_p11), %v1755_v32 }
  0x36   : > { %440 = vst [vmem:[#allocation2 + $0x60] sm:$0xff] (!%p1513_p11), %v1755_v32  ;;  %441 = vst [vmem:[#allocation2 + $0x68] sm:$0xff] (!%p1513_p11), %v1755_v32 }
  0x37   : > { %442 = vst [vmem:[#allocation2 + $0x70] sm:$0xff] %v1755_v32  ;;  %443 = vst [vmem:[#allocation2 + $0x78] sm:$0xff] %v1755_v32 }
  0x38   : > { %444 = vst [vmem:[#allocation2 + $0x80] sm:$0xff] %v1755_v32  ;;  %445 = vst [vmem:[#allocation2 + $0x88] sm:$0xff] %v1755_v32 }
  0x39   : > { %446 = vst [vmem:[#allocation2 + $0x90] sm:$0xff] %v1755_v32  ;;  %447 = vst [vmem:[#allocation2 + $0x98] sm:$0xff] %v1755_v32 }
  0x3a   : > { %448 = vst [vmem:[#allocation2 + $0xa0] sm:$0xff] %v1755_v32  ;;  %449 = vst [vmem:[#allocation2 + $0xa8] sm:$0xff] %v1755_v32 }
  0x3b   : > { %450 = vst [vmem:[#allocation2 + $0xb0] sm:$0xff] %v1755_v32  ;;  %451 = vst [vmem:[#allocation2 + $0xb8] sm:$0xff] %v1755_v32 }
  0x3c   : > { %452 = vst [vmem:[#allocation2 + $0xc0] sm:$0xff] %v1755_v32  ;;  %453 = vst [vmem:[#allocation2 + $0xc8] sm:$0xff] %v1755_v32 }
  0x3d   : > { %454 = vst [vmem:[#allocation2 + $0xd0] sm:$0xff] %v1755_v32  ;;  %455 = vst [vmem:[#allocation2 + $0xd8] sm:$0xff] %v1755_v32 }
  0x3e   : > { %456 = vst [vmem:[#allocation2 + $0xe0] sm:$0xff] %v1755_v32  ;;  %457 = vst [vmem:[#allocation2 + $0xe8] sm:$0xff] %v1755_v32 }
  0x3f   : > { %458 = vst [vmem:[#allocation2 + $0xf0] sm:$0xff] %v1755_v32  ;;  %459 = vst [vmem:[#allocation2 + $0xf8] sm:$0xff] %v1755_v32 }
  0x40 PF: > { %v493_v33 = vld [vmem:[%s1924_s21 + $0x8] sm:$0xff]  ;;  %v495_v34 = vld [vmem:[%s1924_s21 + $0x18] sm:$0xff]  ;;  %v492_v35 = vld [vmem:[%s1924_s21] sm:$0xff]  ;;  %v1756_v40 = vmov 0.0   ;;  %v1757_v22 = vmov 0.0|0.0   ;;  %p1514_p12 = scmp.ne.s32.totalorder %s1745_s23, 1 }
  0x41   : > { %v1521_v36 = vpack.c.bf16 %v495_v34, %v493_v33  ;;  %v494_v37 = vld [vmem:[%s1924_s21 + $0x10] sm:$0xff]  ;;  %v497_v38 = vld [vmem:[%s1924_s21 + $0x28] sm:$0xff]  ;;  %v499_v39 = vld [vmem:[%s1924_s21 + $0x38] sm:$0xff]  ;;  %600 = vmatprep.mubr.f32.mxu0 %v1756_v40  ;;  %1601 = vmatprep.subr.bf16.mxu1 %v1757_v22 }
  0x42   : > { %v1523_v41 = vpack.c.bf16 %v494_v37, %v492_v35  ;;  %v1525_v42 = vpack.c.bf16 %v499_v39, %v497_v38  ;;  %v496_v43 = vld [vmem:[%s1924_s21 + $0x20] sm:$0xff]  ;;  %v498_v44 = vld [vmem:[%s1924_s21 + $0x30] sm:$0xff]  ;;  %v501_v45 = vld [vmem:[%s1924_s21 + $0x48] sm:$0xff] }
  0x43   : > { %1522 = vmatprep.subr.bf16.mxu0 %v1521_v36  ;;  %v503_v46 = vld [vmem:[%s1924_s21 + $0x58] sm:$0xff]  ;;  %v1527_v47 = vpack.c.bf16 %v498_v44, %v496_v43  ;;  %v500_v49 = vld [vmem:[%s1924_s21 + $0x40] sm:$0xff]  ;;  %v502_v50 = vld [vmem:[%s1924_s21 + $0x50] sm:$0xff] }
  0x44   : > { %1524 = vmatpush1.bf16.msra.mxu0 %v1523_v41  ;;  %v1529_v48 = vpack.c.bf16 %v503_v46, %v501_v45  ;;  %v505_v51 = vld [vmem:[%s1924_s21 + $0x68] sm:$0xff]  ;;  %v507_v52 = vld [vmem:[%s1924_s21 + $0x78] sm:$0xff]  ;;  %v1531_v53 = vpack.c.bf16 %v502_v50, %v500_v49  ;;  %v504_v55 = vld [vmem:[%s1924_s21 + $0x60] sm:$0xff] }
  0x45   : > { %1526 = vmatprep.subr.bf16.mxu0 %v1525_v42  ;;  %v1533_v54 = vpack.c.bf16 %v507_v52, %v505_v51  ;;  %v506_v56 = vld [vmem:[%s1924_s21 + $0x70] sm:$0xff]  ;;  %v509_v57 = vld [vmem:[%s1924_s21 + $0x88] sm:$0xff]  ;;  %v511_v58 = vld [vmem:[%s1924_s21 + $0x98] sm:$0xff] }
  0x46   : > { %v1535_v59 = vpack.c.bf16 %v506_v56, %v504_v55  ;;  %v1537_v60 = vpack.c.bf16 %v511_v58, %v509_v57  ;;  %v508_v61 = vld [vmem:[%s1924_s21 + $0x80] sm:$0xff]  ;;  %v510_v62 = vld [vmem:[%s1924_s21 + $0x90] sm:$0xff]  ;;  %v513_v63 = vld [vmem:[%s1924_s21 + $0xa8] sm:$0xff] }
  0x47   : > { %v515_v0 = vld [vmem:[%s1924_s21 + $0xb8] sm:$0xff]  ;;  %v1539_v1 = vpack.c.bf16 %v510_v62, %v508_v61  ;;  %v512_v3 = vld [vmem:[%s1924_s21 + $0xa0] sm:$0xff]  ;;  %v514_v4 = vld [vmem:[%s1924_s21 + $0xb0] sm:$0xff] }
  0x48   : > { %1528 = vmatpush1.bf16.msra.mxu0 %v1527_v47  ;;  %v1541_v2 = vpack.c.bf16 %v515_v0, %v513_v63  ;;  %v517_v5 = vld [vmem:[%s1924_s21 + $0xc8] sm:$0xff]  ;;  %v519_v6 = vld [vmem:[%s1924_s21 + $0xd8] sm:$0xff]  ;;  %v1543_v7 = vpack.c.bf16 %v514_v4, %v512_v3  ;;  %v516_v9 = vld [vmem:[%s1924_s21 + $0xc0] sm:$0xff] }
  0x49   : > { %1530 = vmatprep.subr.bf16.mxu0 %v1529_v48  ;;  %v1545_v8 = vpack.c.bf16 %v519_v6, %v517_v5  ;;  %v518_v10 = vld [vmem:[%s1924_s21 + $0xd0] sm:$0xff]  ;;  %v521_v11 = vld [vmem:[%s1924_s21 + $0xe8] sm:$0xff]  ;;  %v523_v12 = vld [vmem:[%s1924_s21 + $0xf8] sm:$0xff] }
  0x4a   : > { %v1547_v13 = vpack.c.bf16 %v518_v10, %v516_v9  ;;  %v1549_v14 = vpack.c.bf16 %v523_v12, %v521_v11  ;;  %v520_v15 = vld [vmem:[%s1924_s21 + $0xe0] sm:$0xff]  ;;  %v522_v16 = vld [vmem:[%s1924_s21 + $0xf0] sm:$0xff]  ;;  %v890_v19 = vld [vmem:[%s1922_s8 + $0x8] sm:$0xff] }
  0x4b   : > { %v1551_v17 = vpack.c.bf16 %v522_v16, %v520_v15  ;;  %v889_v18 = vld [vmem:[%s1922_s8] sm:$0xff]  ;;  %v891_v23 = vld [vmem:[%s1922_s8 + $0x10] sm:$0xff]  ;;  %v892_v24 = vld [vmem:[%s1922_s8 + $0x18] sm:$0xff] }
  0x4c   : > { %1532 = vmatpush1.bf16.msra.mxu0 %v1531_v53  ;;  %v460_v20 = vld [vmem:[%s2401_s0] sm:$0xff]  ;;  %v1554_v21 = vpack.c.bf16 %v890_v19, %v889_v18  ;;  %v461_v25 = vld [vmem:[%s2401_s0 + $0x8] sm:$0xff]  ;;  %v1557_v26 = vpack.c.bf16 %v892_v24, %v891_v23  ;;  %v462_v29 = vld [vmem:[%s2401_s0 + $0x10] sm:$0xff] }
  0x4d   : > { %1534 = vmatprep.subr.bf16.mxu0 %v1533_v54  ;;  %v893_v27 = vld [vmem:[%s1922_s8 + $0x20] sm:$0xff]  ;;  %v894_v28 = vld [vmem:[%s1922_s8 + $0x28] sm:$0xff]  ;;  %v895_v31 = vld [vmem:[%s1922_s8 + $0x30] sm:$0xff] }
  0x4e   : > { %1617 = vmatpush1.bf16.msra.mxu1 %v1554_v21  ;;  %v1560_v30 = vpack.c.bf16 %v894_v28, %v893_v27  ;;  %v896_v32 = vld [vmem:[%s1922_s8 + $0x38] sm:$0xff]  ;;  %v897_v35 = vld [vmem:[%s1922_s8 + $0x40] sm:$0xff]  ;;  %v898_v36 = vld [vmem:[%s1922_s8 + $0x48] sm:$0xff] }
  0x4f   : > { %1602 = vmatprep.subr.bf16.mxu1 %v1757_v22  ;;  %v463_v33 = vld [vmem:[%s2401_s0 + $0x18] sm:$0xff]  ;;  %v1563_v34 = vpack.c.bf16 %v896_v32, %v895_v31  ;;  %v464_v37 = vld [vmem:[%s2401_s0 + $0x20] sm:$0xff]  ;;  %v1566_v38 = vpack.c.bf16 %v898_v36, %v897_v35  ;;  %v899_v39 = vld [vmem:[%s1922_s8 + $0x50] sm:$0xff]  ;;  %v526_v36 = vlaneseq }
  0x50   : > { %1536 = vmatpush1.bf16.msra.mxu0 %v1535_v59  ;;  %v900_v41 = vld [vmem:[%s1922_s8 + $0x58] sm:$0xff]  ;;  %v465_v42 = vld [vmem:[%s2401_s0 + $0x28] sm:$0xff]  ;;  %v901_v44 = vld [vmem:[%s1922_s8 + $0x60] sm:$0xff] }
  0x51   : > { %1538 = vmatprep.subr.bf16.mxu0 %v1537_v60  ;;  %v1569_v43 = vpack.c.bf16 %v900_v41, %v899_v39  ;;  %v902_v45 = vld [vmem:[%s1922_s8 + $0x68] sm:$0xff]  ;;  %v466_v46 = vld [vmem:[%s2401_s0 + $0x30] sm:$0xff]  ;;  %v904_v49 = vld [vmem:[%s1922_s8 + $0x78] sm:$0xff] }
  0x52   : > { %1618 = vmatpush1.bf16.msra.mxu1 %v1557_v26  ;;  %v1572_v47 = vpack.c.bf16 %v902_v45, %v901_v44  ;;  %v903_v48 = vld [vmem:[%s1922_s8 + $0x70] sm:$0xff]  ;;  %v467_v50 = vld [vmem:[%s2401_s0 + $0x38] sm:$0xff]  ;;  %v905_v52 = vld [vmem:[%s1922_s8 + $0x80] sm:$0xff] }
  0x53   : > { %1603 = vmatprep.subr.bf16.mxu1 %v1757_v22  ;;  %v1575_v51 = vpack.c.bf16 %v904_v49, %v903_v48  ;;  %v906_v53 = vld [vmem:[%s1922_s8 + $0x88] sm:$0xff]  ;;  %v468_v54 = vld [vmem:[%s2401_s0 + $0x40] sm:$0xff]  ;;  %v907_v56 = vld [vmem:[%s1922_s8 + $0x90] sm:$0xff] }
  0x54   : > { %1540 = vmatpush1.bf16.msra.mxu0 %v1539_v1  ;;  %v1578_v55 = vpack.c.bf16 %v906_v53, %v905_v52  ;;  %v908_v57 = vld [vmem:[%s1922_s8 + $0x98] sm:$0xff]  ;;  %v469_v58 = vld [vmem:[%s2401_s0 + $0x48] sm:$0xff]  ;;  %v909_v60 = vld [vmem:[%s1922_s8 + $0xa0] sm:$0xff] }
  0x55   : > { %1542 = vmatprep.subr.bf16.mxu0 %v1541_v2  ;;  %v1581_v59 = vpack.c.bf16 %v908_v57, %v907_v56  ;;  %v910_v61 = vld [vmem:[%s1922_s8 + $0xa8] sm:$0xff]  ;;  %v470_v62 = vld [vmem:[%s2401_s0 + $0x50] sm:$0xff]  ;;  %v912_v1 = vld [vmem:[%s1922_s8 + $0xb8] sm:$0xff] }
  0x56   : > { %1619 = vmatpush1.bf16.msra.mxu1 %v1560_v30  ;;  %v1584_v63 = vpack.c.bf16 %v910_v61, %v909_v60  ;;  %v911_v0 = vld [vmem:[%s1922_s8 + $0xb0] sm:$0xff]  ;;  %v471_v2 = vld [vmem:[%s2401_s0 + $0x58] sm:$0xff]  ;;  %v913_v4 = vld [vmem:[%s1922_s8 + $0xc0] sm:$0xff] }
  0x57   : > { %1604 = vmatprep.subr.bf16.mxu1 %v1757_v22  ;;  %v1587_v3 = vpack.c.bf16 %v912_v1, %v911_v0  ;;  %v914_v5 = vld [vmem:[%s1922_s8 + $0xc8] sm:$0xff]  ;;  %v472_v6 = vld [vmem:[%s2401_s0 + $0x60] sm:$0xff]  ;;  %v916_v9 = vld [vmem:[%s1922_s8 + $0xd8] sm:$0xff] }
  0x58   : > { %1544 = vmatpush1.bf16.msra.mxu0 %v1543_v7  ;;  %v1590_v7 = vpack.c.bf16 %v914_v5, %v913_v4  ;;  %v473_v10 = vld [vmem:[%s2401_s0 + $0x68] sm:$0xff]  ;;  %v474_v12 = vld [vmem:[%s2401_s0 + $0x70] sm:$0xff]  ;;  %v480_v18 = vld [vmem:[%s2401_s0 + $0xa0] sm:$0xff] }
  0x59   : > { %1546 = vmatprep.subr.bf16.mxu0 %v1545_v8  ;;  %v915_v8 = vld [vmem:[%s1922_s8 + $0xd0] sm:$0xff]  ;;  %v477_v15 = vld [vmem:[%s2401_s0 + $0x88] sm:$0xff]  ;;  %v917_v19 = vld [vmem:[%s1922_s8 + $0xe0] sm:$0xff] }
  0x5a   : > { %1620 = vmatpush1.bf16.msra.mxu1 %v1563_v34  ;;  %v1593_v11 = vpack.c.bf16 %v916_v9, %v915_v8  ;;  %v478_v16 = vld [vmem:[%s2401_s0 + $0x90] sm:$0xff]  ;;  %v483_v28 = vld [vmem:[%s2401_s0 + $0xb8] sm:$0xff]  ;;  %v488_v32 = vld [vmem:[%s2401_s0 + $0xe0] sm:$0xff] }
  0x5b   : > { %1605 = vmatprep.subr.bf16.mxu1 %v1757_v22  ;;  %v919_v24 = vld [vmem:[%s1922_s8 + $0xf0] sm:$0xff]  ;;  %v487_v31 = vld [vmem:[%s2401_s0 + $0xd8] sm:$0xff]  ;;  %v524_v39 = vld [vmem:[%s409_s20] sm:$0x3] }
  0x5c   : > { %1548 = vmatpush1.bf16.msra.mxu0 %v1547_v13  ;;  %v475_v13 = vld [vmem:[%s2401_s0 + $0x78] sm:$0xff] }
  0x5d   : > { %1550 = vmatprep.subr.bf16.mxu0 %v1549_v14  ;;  %v476_v14 = vld [vmem:[%s2401_s0 + $0x80] sm:$0xff]  ;;  %v491_v35 = vld [vmem:[%s2401_s0 + $0xf8] sm:$0xff] }
  0x5e   : > { %1621 = vmatpush1.bf16.msra.mxu1 %v1566_v38 }
  0x5f   : > { %1606 = vmatprep.subr.bf16.mxu1 %v1757_v22 }
  0x60   : > { %1552 = vmatpush1.bf16.msra.mxu0 %v1551_v17  ;;  %v479_v17 = vld [vmem:[%s2401_s0 + $0x98] sm:$0xff] }
  0x61   : > { %1553 = vmatprep.subr.bf16.mxu0 %v1757_v22 }
  0x62   : > { %1622 = vmatpush1.bf16.msra.mxu1 %v1569_v43 }
  0x63   : > { %601 = vmatmul.mubr.f32.vlgmr.msra.gmra.mrb[0].mxu0 %v460_v20  ;;  %1607 = vmatprep.subr.bf16.mxu1 %v1757_v22  ;;  %v918_v20 = vld [vmem:[%s1922_s8 + $0xe8] sm:$0xff] }
  0x64   : > { %606 = vmatprep.mubr.f32.mxu0 %v1756_v40  ;;  %1555 = vmatpush1.bf16.msra.mxu0 %v1554_v21  ;;  %v481_v21 = vld [vmem:[%s2401_s0 + $0xa8] sm:$0xff]  ;;  %v1596_v23 = vpack.c.bf16 %v918_v20, %v917_v19 }
  0x65   : > { %1556 = vmatprep.subr.bf16.mxu0 %v1757_v22 }
  0x66   : > { %1623 = vmatpush1.bf16.msra.mxu1 %v1572_v47 }
  0x67   : > { %607 = vmatmul.mubr.f32.gmra.mrb[2].mxu0 %v461_v25  ;;  %1608 = vmatprep.subr.bf16.mxu1 %v1757_v22  ;;  %v920_v25 = vld [vmem:[%s1922_s8 + $0xf8] sm:$0xff] }
  0x68   : > { %612 = vmatprep.mubr.f32.mxu0 %v1756_v40  ;;  %1558 = vmatpush1.bf16.msra.mxu0 %v1557_v26  ;;  %v482_v26 = vld [vmem:[%s2401_s0 + $0xb0] sm:$0xff]  ;;  %v1599_v27 = vpack.c.bf16 %v920_v25, %v919_v24 }
  0x69   : > { %1559 = vmatprep.subr.bf16.mxu0 %v1757_v22 }
  0x6a   : > { %1624 = vmatpush1.bf16.msra.mxu1 %v1575_v51 }
  0x6b   : > { %613 = vmatmul.mubr.f32.gmra.mrb[4].mxu0 %v462_v29  ;;  %1609 = vmatprep.subr.bf16.mxu1 %v1757_v22  ;;  %v484_v29 = vld [vmem:[%s2401_s0 + $0xc0] sm:$0xff] }
  0x6c   : > { %618 = vmatprep.mubr.f32.mxu0 %v1756_v40  ;;  %1561 = vmatpush1.bf16.msra.mxu0 %v1560_v30  ;;  %v486_v30 = vld [vmem:[%s2401_s0 + $0xd0] sm:$0xff] }
  0x6d   : > { %1562 = vmatprep.subr.bf16.mxu0 %v1757_v22 }
  0x6e   : > { %1625 = vmatpush1.bf16.msra.mxu1 %v1578_v55 }
  0x6f   : > { %619 = vmatmul.mubr.f32.gmra.mrb[6].mxu0 %v463_v33  ;;  %1610 = vmatprep.subr.bf16.mxu1 %v1757_v22  ;;  %v489_v33 = vld [vmem:[%s2401_s0 + $0xe8] sm:$0xff] }
  0x70   : > { %624 = vmatprep.mubr.f32.mxu0 %v1756_v40  ;;  %1564 = vmatpush1.bf16.msra.mxu0 %v1563_v34  ;;  %v490_v34 = vld [vmem:[%s2401_s0 + $0xf0] sm:$0xff] }
  0x71   : > { %1565 = vmatprep.subr.bf16.mxu0 %v1757_v22 }
  0x72   : > { %1626 = vmatpush1.bf16.msra.mxu1 %v1581_v59 }
  0x73   : > { %625 = vmatmul.mubr.f32.gmra.mrb[8].mxu0 %v464_v37  ;;  %1611 = vmatprep.subr.bf16.mxu1 %v1757_v22  ;;  %v527_v37 = vshrl.u32 %v526_v36, 7 }
  0x74   : > { %630 = vmatprep.mubr.f32.mxu0 %v1756_v40  ;;  %1567 = vmatpush1.bf16.msra.mxu0 %v1566_v38 }
  0x75   : > { %1568 = vmatprep.subr.bf16.mxu0 %v1757_v22  ;;  %v528_v38 = vsub.s32 0, %v527_v37  ;;  %v532_v41 = vsub.s32 1, %v527_v37 }
  0x76   : > { %1627 = vmatpush1.bf16.msra.mxu1 %v1584_v63 }
  0x77   : > { %631 = vmatmul.mubr.f32.gmra.mrb[10].mxu0 %v465_v42  ;;  %1612 = vmatprep.subr.bf16.mxu1 %v1757_v22  ;;  %v2156_v42 = vrot.slane %v524_v39, %v528_v38 }
  0x78   : > { %636 = vmatprep.mubr.f32.mxu0 %v1756_v40  ;;  %1570 = vmatpush1.bf16.msra.mxu0 %v1569_v43  ;;  %v2158_v43 = vrot.slane %v524_v39, %v532_v41 }
  0x79   : > { %1571 = vmatprep.subr.bf16.mxu0 %v1757_v22 }
  0x7a   : > { %1628 = vmatpush1.bf16.msra.mxu1 %v1587_v3 }
  0x7b   : > { %637 = vmatmul.mubr.f32.gmra.mrb[12].mxu0 %v466_v46  ;;  %1613 = vmatprep.subr.bf16.mxu1 %v1757_v22 }
  0x7c   : > { %642 = vmatprep.mubr.f32.mxu0 %v1756_v40  ;;  %1573 = vmatpush1.bf16.msra.mxu0 %v1572_v47 }
  0x7d   : > { %1574 = vmatprep.subr.bf16.mxu0 %v1757_v22 }
  0x7e   : > { %1629 = vmatpush1.bf16.msra.mxu1 %v1590_v7 }
  0x7f   : > { %643 = vmatmul.mubr.f32.gmra.mrb[14].mxu0 %v467_v50  ;;  %1614 = vmatprep.subr.bf16.mxu1 %v1757_v22 }
  0x80   : > { %648 = vmatprep.mubr.f32.mxu0 %v1756_v40  ;;  %1576 = vmatpush1.bf16.msra.mxu0 %v1575_v51 }
  0x81   : > { %1577 = vmatprep.subr.bf16.mxu0 %v1757_v22 }
  0x82   : > { %1630 = vmatpush1.bf16.msra.mxu1 %v1593_v11 }
  0x83   : > { %649 = vmatmul.mubr.f32.gmra.mrb[16].mxu0 %v468_v54  ;;  %1615 = vmatprep.subr.bf16.mxu1 %v1757_v22 }
  0x84   : > { %654 = vmatprep.mubr.f32.mxu0 %v1756_v40  ;;  %1579 = vmatpush1.bf16.msra.mxu0 %v1578_v55 }
  0x85   : > { %1580 = vmatprep.subr.bf16.mxu0 %v1757_v22 }
  0x86   : > { %1631 = vmatpush1.bf16.msra.mxu1 %v1596_v23 }
  0x87   : > { %655 = vmatmul.mubr.f32.gmra.mrb[18].mxu0 %v469_v58  ;;  %1616 = vmatprep.subr.bf16.mxu1 %v1757_v22 }
  0x88   : > { %660 = vmatprep.mubr.f32.mxu0 %v1756_v40  ;;  %1582 = vmatpush1.bf16.msra.mxu0 %v1581_v59 }
  0x89   : > { %1583 = vmatprep.subr.bf16.mxu0 %v1757_v22 }
  0x8a   : > { %1632 = vmatpush1.bf16.msra.mxu1 %v1599_v27 }
  0x8b   : > { %661 = vmatmul.mubr.f32.gmra.mrb[20].mxu0 %v470_v62 }
  0x8c   : > { %666 = vmatprep.mubr.f32.mxu0 %v1756_v40  ;;  %1585 = vmatpush1.bf16.msra.mxu0 %v1584_v63 }
  0x8d   : > { %1586 = vmatprep.subr.bf16.mxu0 %v1757_v22 }
  0x8f   : > { %667 = vmatmul.mubr.f32.gmra.mrb[22].mxu0 %v471_v2 }
  0x90   : > { %672 = vmatprep.mubr.f32.mxu0 %v1756_v40  ;;  %1588 = vmatpush1.bf16.msra.mxu0 %v1587_v3 }
  0x91   : > { %1589 = vmatprep.subr.bf16.mxu0 %v1757_v22 }
  0x93   : > { %673 = vmatmul.mubr.f32.gmra.mrb[24].mxu0 %v472_v6 }
  0x94   : > { %678 = vmatprep.mubr.f32.mxu0 %v1756_v40  ;;  %1591 = vmatpush1.bf16.msra.mxu0 %v1590_v7 }
  0x95   : > { %1592 = vmatprep.subr.bf16.mxu0 %v1757_v22 }
  0x97   : > { %679 = vmatmul.mubr.f32.gmra.mrb[26].mxu0 %v473_v10 }
  0x98   : > { %684 = vmatprep.mubr.f32.mxu0 %v1756_v40  ;;  %1594 = vmatpush1.bf16.msra.mxu0 %v1593_v11 }
  0x99   : > { %1595 = vmatprep.subr.bf16.mxu0 %v1757_v22 }
  0x9b   : > { %685 = vmatmul.mubr.f32.gmra.mrb[28].mxu0 %v474_v12 }
  0x9c   : > { %690 = vmatprep.mubr.f32.mxu0 %v1756_v40  ;;  %1597 = vmatpush1.bf16.msra.mxu0 %v1596_v23 }
  0x9d   : > { %1598 = vmatprep.subr.bf16.mxu0 %v1757_v22  ;;  %v485_v22 = vld [vmem:[%s2401_s0 + $0xc8] sm:$0xff] }
  0x9f   : > { %691 = vmatmul.mubr.f32.gmra.mrb[30].mxu0 %v475_v13 }
  0xa0   : > { %696 = vmatprep.mubr.f32.mxu0 %v1756_v40  ;;  %1600 = vmatpush1.bf16.msra.mxu0 %v1599_v27 }
  0xa3   : > { %697 = vmatmul.mubr.f32.gmra.mrb[32].mxu0 %v476_v14 }
  0xa4   : > { %702 = vmatprep.mubr.f32.mxu0 %v1756_v40 }
  0xa7   : > { %703 = vmatmul.mubr.f32.gmra.mrb[34].mxu0 %v477_v15 }
  0xa8   : > { %708 = vmatprep.mubr.f32.mxu0 %v1756_v40 }
  0xab   : > { %709 = vmatmul.mubr.f32.gmra.mrb[36].mxu0 %v478_v16 }
  0xac   : > { %714 = vmatprep.mubr.f32.mxu0 %v1756_v40 }
  0xaf   : > { %715 = vmatmul.mubr.f32.gmra.mrb[38].mxu0 %v479_v17 }
  0xb0   : > { %720 = vmatprep.mubr.f32.mxu0 %v1756_v40 }
  0xb3   : > { %721 = vmatmul.mubr.f32.gmra.mrb[40].mxu0 %v480_v18 }
  0xb4   : > { %726 = vmatprep.mubr.f32.mxu0 %v1756_v40 }
  0xb7   : > { %727 = vmatmul.mubr.f32.gmra.mrb[42].mxu0 %v481_v21 }
  0xb8   : > { %732 = vmatprep.mubr.f32.mxu0 %v1756_v40 }
  0xbb   : > { %733 = vmatmul.mubr.f32.gmra.mrb[44].mxu0 %v482_v26 }
  0xbc   : > { %738 = vmatprep.mubr.f32.mxu0 %v1756_v40 }
  0xbf   : > { %739 = vmatmul.mubr.f32.gmra.mrb[46].mxu0 %v483_v28 }
  0xc0   : > { %744 = vmatprep.mubr.f32.mxu0 %v1756_v40 }
  0xc3   : > { %745 = vmatmul.mubr.f32.gmra.mrb[48].mxu0 %v484_v29 }
  0xc4   : > { %750 = vmatprep.mubr.f32.mxu0 %v1756_v40 }
  0xc7   : > { %751 = vmatmul.mubr.f32.gmra.mrb[50].mxu0 %v485_v22 }
  0xc8   : > { %756 = vmatprep.mubr.f32.mxu0 %v1756_v40 }
  0xcb   : > { %757 = vmatmul.mubr.f32.gmra.mrb[52].mxu0 %v486_v30 }
  0xcc   : > { %762 = vmatprep.mubr.f32.mxu0 %v1756_v40 }
  0xcf   : > { %763 = vmatmul.mubr.f32.gmra.mrb[54].mxu0 %v487_v31 }
  0xd0   : > { %768 = vmatprep.mubr.f32.mxu0 %v1756_v40 }
  0xd3   : > { %769 = vmatmul.mubr.f32.gmra.mrb[56].mxu0 %v488_v32 }
  0xd4   : > { %774 = vmatprep.mubr.f32.mxu0 %v1756_v40 }
  0xd7   : > { %775 = vmatmul.mubr.f32.gmra.mrb[58].mxu0 %v489_v33 }
  0xd8   : > { %780 = vmatprep.mubr.f32.mxu0 %v1756_v40 }
  0xdb   : > { %781 = vmatmul.mubr.f32.gmra.mrb[60].mxu0 %v490_v34 }
  0xdc   : > { %786 = vmatprep.mubr.f32.mxu0 %v1756_v40 }
  0xdf   : > { %787 = vmatmul.mubr.f32.gmra.mrb[62].mxu0 %v491_v35 }
 0x136   : > { %v602_v44 = vpop.f32.mrb[0].mxu0 }
 0x137   : > { %v603_v40 = vadd.f32 %v602_v44, %v2156_v42  ;;  %v604_v45 = vpop.f32.mrb[1].mxu0 }
 0x138   : > { %v605_v46 = vadd.f32 %v604_v45, %v2158_v43 }
 0x139   : > { %v793_v49 = vmax.f32 %v603_v40, 0.0 }
 0x13a   : > { %v794_v47 = vmax.f32 %v605_v46, 0.0  ;;  %v608_v48 = vpop.f32.mrb[2].mxu0 }
 0x13b   : > { %v609_v50 = vadd.f32 %v608_v48, %v2156_v42  ;;  %v610_v51 = vpop.f32.mrb[3].mxu0 }
 0x13c   : > { %v611_v52 = vadd.f32 %v610_v51, %v2158_v43  ;;  %985 = vmatprep.mubr.f32.mxu0 %v794_v47 }
 0x13d   : > { %986 = vmatmul.mubr.f32.vlgmr.msra.gmra.mrb[64].mxu0 %v793_v49  ;;  %v795_v55 = vmax.f32 %v609_v50, 0.0 }
 0x13e   : > { %v796_v53 = vmax.f32 %v611_v52, 0.0  ;;  %v614_v54 = vpop.f32.mrb[4].mxu0 }
 0x13f   : > { %v615_v56 = vadd.f32 %v614_v54, %v2156_v42  ;;  %v616_v57 = vpop.f32.mrb[5].mxu0 }
 0x140   : > { %v617_v58 = vadd.f32 %v616_v57, %v2158_v43  ;;  %990 = vmatprep.mubr.f32.mxu0 %v796_v53 }
 0x141   : > { %991 = vmatmul.mubr.f32.gmra.mrb[66].mxu0 %v795_v55  ;;  %v797_v61 = vmax.f32 %v615_v56, 0.0 }
 0x142   : > { %v798_v59 = vmax.f32 %v617_v58, 0.0  ;;  %v620_v60 = vpop.f32.mrb[6].mxu0 }
 0x143   : > { %v621_v62 = vadd.f32 %v620_v60, %v2156_v42  ;;  %v622_v63 = vpop.f32.mrb[7].mxu0 }
 0x144   : > { %v623_v0 = vadd.f32 %v622_v63, %v2158_v43  ;;  %995 = vmatprep.mubr.f32.mxu0 %v798_v59 }
 0x145   : > { %996 = vmatmul.mubr.f32.gmra.mrb[68].mxu0 %v797_v61  ;;  %v799_v3 = vmax.f32 %v621_v62, 0.0 }
 0x146   : > { %v800_v1 = vmax.f32 %v623_v0, 0.0  ;;  %v626_v2 = vpop.f32.mrb[8].mxu0 }
 0x147   : > { %v627_v4 = vadd.f32 %v626_v2, %v2156_v42  ;;  %v628_v5 = vpop.f32.mrb[9].mxu0 }
 0x148   : > { %1000 = vmatprep.mubr.f32.mxu0 %v800_v1  ;;  %v629_v6 = vadd.f32 %v628_v5, %v2158_v43 }
 0x149   : > { %1001 = vmatmul.mubr.f32.gmra.mrb[70].mxu0 %v799_v3  ;;  %v801_v9 = vmax.f32 %v627_v4, 0.0 }
 0x14a   : > { %v632_v7 = vpop.f32.mrb[10].mxu0  ;;  %v802_v8 = vmax.f32 %v629_v6, 0.0 }
 0x14b   : > { %v633_v10 = vadd.f32 %v632_v7, %v2156_v42  ;;  %v634_v11 = vpop.f32.mrb[11].mxu0 }
 0x14c   : > { %v635_v12 = vadd.f32 %v634_v11, %v2158_v43  ;;  %1005 = vmatprep.mubr.f32.mxu1 %v802_v8 }
 0x14d   : > { %1006 = vmatmul.mubr.f32.vlgmr.msra.gmra.mrb[0].mxu1 %v801_v9  ;;  %v803_v15 = vmax.f32 %v633_v10, 0.0 }
 0x14e   : > { %v804_v13 = vmax.f32 %v635_v12, 0.0  ;;  %v638_v14 = vpop.f32.mrb[12].mxu0 }
 0x14f   : > { %v639_v16 = vadd.f32 %v638_v14, %v2156_v42  ;;  %v640_v17 = vpop.f32.mrb[13].mxu0 }
 0x150   : > { %v641_v18 = vadd.f32 %v640_v17, %v2158_v43  ;;  %1010 = vmatprep.mubr.f32.mxu1 %v804_v13 }
 0x151   : > { %1011 = vmatmul.mubr.f32.gmra.mrb[2].mxu1 %v803_v15  ;;  %v805_v21 = vmax.f32 %v639_v16, 0.0 }
 0x152   : > { %v806_v19 = vmax.f32 %v641_v18, 0.0  ;;  %v644_v20 = vpop.f32.mrb[14].mxu0 }
 0x153   : > { %v645_v23 = vadd.f32 %v644_v20, %v2156_v42  ;;  %v646_v24 = vpop.f32.mrb[15].mxu0 }
 0x154   : > { %v647_v25 = vadd.f32 %v646_v24, %v2158_v43  ;;  %1015 = vmatprep.mubr.f32.mxu1 %v806_v19 }
 0x155   : > { %1016 = vmatmul.mubr.f32.gmra.mrb[4].mxu1 %v805_v21  ;;  %v807_v28 = vmax.f32 %v645_v23, 0.0 }
 0x156   : > { %v808_v26 = vmax.f32 %v647_v25, 0.0  ;;  %v650_v27 = vpop.f32.mrb[16].mxu0 }
 0x157   : > { %v651_v29 = vadd.f32 %v650_v27, %v2156_v42  ;;  %v652_v22 = vpop.f32.mrb[17].mxu0 }
 0x158   : > { %v653_v30 = vadd.f32 %v652_v22, %v2158_v43  ;;  %1020 = vmatprep.mubr.f32.mxu1 %v808_v26 }
 0x159   : > { %1021 = vmatmul.mubr.f32.gmra.mrb[6].mxu1 %v807_v28  ;;  %v809_v33 = vmax.f32 %v651_v29, 0.0 }
 0x15a   : > { %v810_v31 = vmax.f32 %v653_v30, 0.0  ;;  %v656_v32 = vpop.f32.mrb[18].mxu0 }
 0x15b   : > { %v657_v34 = vadd.f32 %v656_v32, %v2156_v42  ;;  %v658_v35 = vpop.f32.mrb[19].mxu0 }
 0x15c   : > { %v659_v36 = vadd.f32 %v658_v35, %v2158_v43  ;;  %1025 = vmatprep.mubr.f32.mxu1 %v810_v31 }
 0x15d   : > { %1026 = vmatmul.mubr.f32.gmra.mrb[8].mxu1 %v809_v33  ;;  %v811_v39 = vmax.f32 %v657_v34, 0.0 }
 0x15e   : > { %v812_v37 = vmax.f32 %v659_v36, 0.0  ;;  %v662_v38 = vpop.f32.mrb[20].mxu0 }
 0x15f   : > { %v663_v41 = vadd.f32 %v662_v38, %v2156_v42  ;;  %v664_v44 = vpop.f32.mrb[21].mxu0 }
 0x160   : > { %v665_v40 = vadd.f32 %v664_v44, %v2158_v43  ;;  %1030 = vmatprep.mubr.f32.mxu1 %v812_v37 }
 0x161   : > { %1031 = vmatmul.mubr.f32.gmra.mrb[10].mxu1 %v811_v39  ;;  %v813_v47 = vmax.f32 %v663_v41, 0.0 }
 0x162   : > { %v814_v45 = vmax.f32 %v665_v40, 0.0  ;;  %v668_v46 = vpop.f32.mrb[22].mxu0 }
 0x163   : > { %v669_v48 = vadd.f32 %v668_v46, %v2156_v42  ;;  %v670_v49 = vpop.f32.mrb[23].mxu0 }
 0x164   : > { %v671_v50 = vadd.f32 %v670_v49, %v2158_v43  ;;  %1035 = vmatprep.mubr.f32.mxu1 %v814_v45 }
 0x165   : > { %1036 = vmatmul.mubr.f32.gmra.mrb[12].mxu1 %v813_v47  ;;  %v815_v53 = vmax.f32 %v669_v48, 0.0 }
 0x166   : > { %v816_v51 = vmax.f32 %v671_v50, 0.0  ;;  %v674_v52 = vpop.f32.mrb[24].mxu0 }
 0x167   : > { %v675_v54 = vadd.f32 %v674_v52, %v2156_v42  ;;  %v676_v55 = vpop.f32.mrb[25].mxu0 }
 0x168   : > { %v677_v56 = vadd.f32 %v676_v55, %v2158_v43  ;;  %1040 = vmatprep.mubr.f32.mxu1 %v816_v51 }
 0x169   : > { %1041 = vmatmul.mubr.f32.gmra.mrb[14].mxu1 %v815_v53  ;;  %v817_v59 = vmax.f32 %v675_v54, 0.0 }
 0x16a   : > { %v818_v57 = vmax.f32 %v677_v56, 0.0  ;;  %v680_v58 = vpop.f32.mrb[26].mxu0 }
 0x16b   : > { %v681_v60 = vadd.f32 %v680_v58, %v2156_v42  ;;  %v682_v61 = vpop.f32.mrb[27].mxu0 }
 0x16c   : > { %v683_v62 = vadd.f32 %v682_v61, %v2158_v43  ;;  %1045 = vmatprep.mubr.f32.mxu1 %v818_v57 }
 0x16d   : > { %1046 = vmatmul.mubr.f32.gmra.mrb[16].mxu1 %v817_v59  ;;  %v819_v1 = vmax.f32 %v681_v60, 0.0 }
 0x16e   : > { %v820_v63 = vmax.f32 %v683_v62, 0.0  ;;  %v686_v0 = vpop.f32.mrb[28].mxu0 }
 0x16f   : > { %v687_v2 = vadd.f32 %v686_v0, %v2156_v42  ;;  %v688_v3 = vpop.f32.mrb[29].mxu0 }
 0x170   : > { %v689_v4 = vadd.f32 %v688_v3, %v2158_v43  ;;  %1050 = vmatprep.mubr.f32.mxu1 %v820_v63 }
 0x171   : > { %1051 = vmatmul.mubr.f32.gmra.mrb[18].mxu1 %v819_v1  ;;  %v821_v7 = vmax.f32 %v687_v2, 0.0 }
 0x172   : > { %v822_v5 = vmax.f32 %v689_v4, 0.0  ;;  %v692_v6 = vpop.f32.mrb[30].mxu0 }
 0x173   : > { %v693_v8 = vadd.f32 %v692_v6, %v2156_v42  ;;  %v694_v9 = vpop.f32.mrb[31].mxu0 }
 0x174   : > { %v695_v10 = vadd.f32 %v694_v9, %v2158_v43  ;;  %1055 = vmatprep.mubr.f32.mxu1 %v822_v5 }
 0x175   : > { %1056 = vmatmul.mubr.f32.gmra.mrb[20].mxu1 %v821_v7  ;;  %v823_v13 = vmax.f32 %v693_v8, 0.0 }
 0x176   : > { %v824_v11 = vmax.f32 %v695_v10, 0.0  ;;  %v698_v12 = vpop.f32.mrb[32].mxu0 }
 0x177   : > { %v699_v14 = vadd.f32 %v698_v12, %v2156_v42  ;;  %v700_v15 = vpop.f32.mrb[33].mxu0 }
 0x178   : > { %v701_v16 = vadd.f32 %v700_v15, %v2158_v43  ;;  %1060 = vmatprep.mubr.f32.mxu1 %v824_v11 }
 0x179   : > { %1061 = vmatmul.mubr.f32.gmra.mrb[22].mxu1 %v823_v13  ;;  %v825_v19 = vmax.f32 %v699_v14, 0.0 }
 0x17a   : > { %v826_v17 = vmax.f32 %v701_v16, 0.0  ;;  %v704_v18 = vpop.f32.mrb[34].mxu0 }
 0x17b   : > { %v705_v20 = vadd.f32 %v704_v18, %v2156_v42  ;;  %v706_v21 = vpop.f32.mrb[35].mxu0 }
 0x17c   : > { %v707_v23 = vadd.f32 %v706_v21, %v2158_v43  ;;  %1065 = vmatprep.mubr.f32.mxu1 %v826_v17 }
 0x17d   : > { %1066 = vmatmul.mubr.f32.gmra.mrb[24].mxu1 %v825_v19  ;;  %v827_v26 = vmax.f32 %v705_v20, 0.0 }
 0x17e   : > { %v828_v24 = vmax.f32 %v707_v23, 0.0  ;;  %v710_v25 = vpop.f32.mrb[36].mxu0 }
 0x17f   : > { %v711_v27 = vadd.f32 %v710_v25, %v2156_v42  ;;  %v712_v28 = vpop.f32.mrb[37].mxu0 }
 0x180   : > { %v713_v29 = vadd.f32 %v712_v28, %v2158_v43  ;;  %1070 = vmatprep.mubr.f32.mxu1 %v828_v24 }
 0x181   : > { %1071 = vmatmul.mubr.f32.gmra.mrb[26].mxu1 %v827_v26  ;;  %v829_v31 = vmax.f32 %v711_v27, 0.0 }
 0x182   : > { %v830_v22 = vmax.f32 %v713_v29, 0.0  ;;  %v716_v30 = vpop.f32.mrb[38].mxu0 }
 0x183   : > { %v717_v32 = vadd.f32 %v716_v30, %v2156_v42  ;;  %v718_v33 = vpop.f32.mrb[39].mxu0 }
 0x184   : > { %v719_v34 = vadd.f32 %v718_v33, %v2158_v43  ;;  %1075 = vmatprep.mubr.f32.mxu1 %v830_v22 }
 0x185   : > { %1076 = vmatmul.mubr.f32.gmra.mrb[28].mxu1 %v829_v31  ;;  %v831_v37 = vmax.f32 %v717_v32, 0.0 }
 0x186   : > { %v832_v35 = vmax.f32 %v719_v34, 0.0  ;;  %v722_v36 = vpop.f32.mrb[40].mxu0 }
 0x187   : > { %v723_v38 = vadd.f32 %v722_v36, %v2156_v42  ;;  %v724_v39 = vpop.f32.mrb[41].mxu0 }
 0x188   : > { %v725_v41 = vadd.f32 %v724_v39, %v2158_v43  ;;  %1080 = vmatprep.mubr.f32.mxu1 %v832_v35 }
 0x189   : > { %1081 = vmatmul.mubr.f32.gmra.mrb[30].mxu1 %v831_v37  ;;  %v833_v45 = vmax.f32 %v723_v38, 0.0 }
 0x18a   : > { %v834_v44 = vmax.f32 %v725_v41, 0.0  ;;  %v728_v40 = vpop.f32.mrb[42].mxu0 }
 0x18b   : > { %v729_v46 = vadd.f32 %v728_v40, %v2156_v42  ;;  %v730_v47 = vpop.f32.mrb[43].mxu0 }
 0x18c   : > { %v731_v48 = vadd.f32 %v730_v47, %v2158_v43  ;;  %1085 = vmatprep.mubr.f32.mxu1 %v834_v44 }
 0x18d   : > { %1086 = vmatmul.mubr.f32.gmra.mrb[32].mxu1 %v833_v45  ;;  %v835_v51 = vmax.f32 %v729_v46, 0.0 }
 0x18e   : > { %v836_v49 = vmax.f32 %v731_v48, 0.0  ;;  %v734_v50 = vpop.f32.mrb[44].mxu0 }
 0x18f   : > { %v735_v52 = vadd.f32 %v734_v50, %v2156_v42  ;;  %v736_v53 = vpop.f32.mrb[45].mxu0 }
 0x190   : > { %v737_v54 = vadd.f32 %v736_v53, %v2158_v43  ;;  %1090 = vmatprep.mubr.f32.mxu1 %v836_v49  ;;  %v857_v49 = vld [vmem:[#allocation2] sm:$0xff]  ;;  %v858_v53 = vld [vmem:[#allocation2 + $0x8] sm:$0xff] }
 0x191   : > { %1091 = vmatmul.mubr.f32.gmra.mrb[34].mxu1 %v835_v51  ;;  %v837_v57 = vmax.f32 %v735_v52, 0.0 }
 0x192   : > { %v838_v55 = vmax.f32 %v737_v54, 0.0  ;;  %v740_v56 = vpop.f32.mrb[46].mxu0 }
 0x193   : > { %v741_v58 = vadd.f32 %v740_v56, %v2156_v42  ;;  %v742_v59 = vpop.f32.mrb[47].mxu0 }
 0x194   : > { %v743_v60 = vadd.f32 %v742_v59, %v2158_v43  ;;  %1095 = vmatprep.mubr.f32.mxu1 %v838_v55  ;;  %v860_v59 = vld [vmem:[#allocation2 + $0x18] sm:$0xff] }
 0x195   : > { %1096 = vmatmul.mubr.f32.gmra.mrb[36].mxu1 %v837_v57  ;;  %v839_v63 = vmax.f32 %v741_v58, 0.0  ;;  %v859_v57 = vld [vmem:[#allocation2 + $0x10] sm:$0xff] }
 0x196   : > { %v840_v61 = vmax.f32 %v743_v60, 0.0  ;;  %v746_v62 = vpop.f32.mrb[48].mxu0 }
 0x197   : > { %v747_v0 = vadd.f32 %v746_v62, %v2156_v42  ;;  %v748_v1 = vpop.f32.mrb[49].mxu0 }
 0x198   : > { %v749_v2 = vadd.f32 %v748_v1, %v2158_v43  ;;  %1100 = vmatprep.mubr.f32.mxu1 %v840_v61 }
 0x199   : > { %1101 = vmatmul.mubr.f32.gmra.mrb[38].mxu1 %v839_v63  ;;  %v841_v5 = vmax.f32 %v747_v0, 0.0  ;;  %v861_v63 = vld [vmem:[#allocation2 + $0x20] sm:$0xff] }
 0x19a   : > { %v842_v3 = vmax.f32 %v749_v2, 0.0  ;;  %v752_v4 = vpop.f32.mrb[50].mxu0 }
 0x19b   : > { %v753_v6 = vadd.f32 %v752_v4, %v2156_v42  ;;  %v754_v7 = vpop.f32.mrb[51].mxu0 }
 0x19c   : > { %v755_v8 = vadd.f32 %v754_v7, %v2158_v43  ;;  %1105 = vmatprep.mubr.f32.mxu1 %v842_v3  ;;  %v862_v3 = vld [vmem:[#allocation2 + $0x28] sm:$0xff]  ;;  %v863_v7 = vld [vmem:[#allocation2 + $0x30] sm:$0xff] }
 0x19d   : > { %1106 = vmatmul.mubr.f32.gmra.mrb[40].mxu1 %v841_v5  ;;  %v843_v11 = vmax.f32 %v753_v6, 0.0 }
 0x19e   : > { %v844_v9 = vmax.f32 %v755_v8, 0.0  ;;  %v758_v10 = vpop.f32.mrb[52].mxu0 }
 0x19f   : > { %v759_v12 = vadd.f32 %v758_v10, %v2156_v42  ;;  %v760_v13 = vpop.f32.mrb[53].mxu0 }
 0x1a0   : > { %v761_v14 = vadd.f32 %v760_v13, %v2158_v43  ;;  %1110 = vmatprep.mubr.f32.mxu1 %v844_v9 }
 0x1a1   : > { %1111 = vmatmul.mubr.f32.gmra.mrb[42].mxu1 %v843_v11  ;;  %v845_v17 = vmax.f32 %v759_v12, 0.0  ;;  %v864_v11 = vld [vmem:[#allocation2 + $0x38] sm:$0xff] }
 0x1a2   : > { %v846_v15 = vmax.f32 %v761_v14, 0.0  ;;  %v764_v16 = vpop.f32.mrb[54].mxu0 }
 0x1a3   : > { %v765_v18 = vadd.f32 %v764_v16, %v2156_v42  ;;  %v766_v19 = vpop.f32.mrb[55].mxu0 }
 0x1a4   : > { %v767_v20 = vadd.f32 %v766_v19, %v2158_v43  ;;  %1115 = vmatprep.mubr.f32.mxu1 %v846_v15  ;;  %v865_v15 = vld [vmem:[#allocation2 + $0x40] sm:$0xff]  ;;  %v866_v19 = vld [vmem:[#allocation2 + $0x48] sm:$0xff] }
 0x1a5   : > { %1116 = vmatmul.mubr.f32.gmra.mrb[44].mxu1 %v845_v17  ;;  %v847_v24 = vmax.f32 %v765_v18, 0.0 }
 0x1a6   : > { %v848_v21 = vmax.f32 %v767_v20, 0.0  ;;  %v770_v23 = vpop.f32.mrb[56].mxu0 }
 0x1a7   : > { %v771_v25 = vadd.f32 %v770_v23, %v2156_v42  ;;  %v772_v26 = vpop.f32.mrb[57].mxu0 }
 0x1a8   : > { %v773_v27 = vadd.f32 %v772_v26, %v2158_v43  ;;  %1120 = vmatprep.mubr.f32.mxu1 %v848_v21 }
 0x1a9   : > { %1121 = vmatmul.mubr.f32.gmra.mrb[46].mxu1 %v847_v24  ;;  %v849_v22 = vmax.f32 %v771_v25, 0.0  ;;  %v867_v24 = vld [vmem:[#allocation2 + $0x50] sm:$0xff] }
 0x1aa   : > { %v850_v28 = vmax.f32 %v773_v27, 0.0  ;;  %v776_v29 = vpop.f32.mrb[58].mxu0 }
 0x1ab   : > { %v777_v30 = vadd.f32 %v776_v29, %v2156_v42  ;;  %v778_v31 = vpop.f32.mrb[59].mxu0 }
 0x1ac   : > { %v779_v32 = vadd.f32 %v778_v31, %v2158_v43  ;;  %1125 = vmatprep.mubr.f32.mxu1 %v850_v28  ;;  %v868_v28 = vld [vmem:[#allocation2 + $0x58] sm:$0xff]  ;;  %v869_v31 = vld [vmem:[#allocation2 + $0x60] sm:$0xff] }
 0x1ad   : > { %1126 = vmatmul.mubr.f32.gmra.mrb[48].mxu1 %v849_v22  ;;  %v851_v35 = vmax.f32 %v777_v30, 0.0 }
 0x1ae   : > { %v852_v33 = vmax.f32 %v779_v32, 0.0  ;;  %v782_v34 = vpop.f32.mrb[60].mxu0 }
 0x1af   : > { %v783_v36 = vadd.f32 %v782_v34, %v2156_v42  ;;  %v784_v37 = vpop.f32.mrb[61].mxu0 }
 0x1b0   : > { %v785_v38 = vadd.f32 %v784_v37, %v2158_v43  ;;  %1130 = vmatprep.mubr.f32.mxu1 %v852_v33 }
 0x1b1   : > { %1131 = vmatmul.mubr.f32.gmra.mrb[50].mxu1 %v851_v35  ;;  %v853_v44 = vmax.f32 %v783_v36, 0.0  ;;  %v870_v35 = vld [vmem:[#allocation2 + $0x68] sm:$0xff] }
 0x1b2   : > { %v854_v39 = vmax.f32 %v785_v38, 0.0  ;;  %v788_v41 = vpop.f32.mrb[62].mxu0 }
 0x1b3   : > { %v789_v40 = vadd.f32 %v788_v41, %v2156_v42  ;;  %v790_v45 = vpop.f32.mrb[63].mxu0 }
 0x1b4   : > { %v791_v46 = vadd.f32 %v790_v45, %v2158_v43  ;;  %1135 = vmatprep.mubr.f32.mxu1 %v854_v39  ;;  %v871_v39 = vld [vmem:[#allocation2 + $0x70] sm:$0xff]  ;;  %v872_v45 = vld [vmem:[#allocation2 + $0x78] sm:$0xff] }
 0x1b5   : > { %1136 = vmatmul.mubr.f32.gmra.mrb[52].mxu1 %v853_v44  ;;  %v855_v48 = vmax.f32 %v789_v40, 0.0 }
 0x1b6   : > { %v856_v47 = vmax.f32 %v791_v46, 0.0 }
 0x1b8   : > { %1140 = vmatprep.mubr.f32.mxu1 %v856_v47 }
 0x1b9   : > { %1141 = vmatmul.mubr.f32.gmra.mrb[54].mxu1 %v855_v48 }
 0x210   : > { %v987_v50 = vpop.f32.mrb[64].mxu0 }
 0x211   : > { %v1146_v51 = vadd.f32 %v987_v50, %v857_v49  ;;  %v989_v52 = vpop.f32.mrb[65].mxu0  ;;  %v873_v49 = vld [vmem:[#allocation2 + $0x80] sm:$0xff] }
 0x213   : > { %1178 = vst [vmem:[#allocation2] sm:$0xff] %v1146_v51 }
 0x214   : > { %v992_v54 = vpop.f32.mrb[66].mxu0 }
 0x215   : > { %v1147_v55 = vadd.f32 %v992_v54, %v858_v53  ;;  %v994_v56 = vpop.f32.mrb[67].mxu0  ;;  %v874_v53 = vld [vmem:[#allocation2 + $0x88] sm:$0xff] }
 0x217   : > { %1179 = vst [vmem:[#allocation2 + $0x8] sm:$0xff] %v1147_v55 }
 0x218   : > { %v997_v42 = vpop.f32.mrb[68].mxu0 }
 0x219   : > { %v1148_v58 = vadd.f32 %v997_v42, %v859_v57  ;;  %v999_v43 = vpop.f32.mrb[69].mxu0  ;;  %v875_v57 = vld [vmem:[#allocation2 + $0x90] sm:$0xff] }
 0x21b   : > { %1180 = vst [vmem:[#allocation2 + $0x10] sm:$0xff] %v1148_v58 }
 0x21c   : > { %v1002_v60 = vpop.f32.mrb[70].mxu0 }
 0x21d   : > { %v1149_v61 = vadd.f32 %v1002_v60, %v860_v59  ;;  %v1004_v62 = vpop.f32.mrb[71].mxu0  ;;  %v876_v59 = vld [vmem:[#allocation2 + $0x98] sm:$0xff] }
 0x21f   : > { %1181 = vst [vmem:[#allocation2 + $0x18] sm:$0xff] %v1149_v61 }
 0x220   : > { %v1007_v0 = vpop.f32.mrb[0].mxu1 }
 0x221   : > { %v1150_v1 = vadd.f32 %v1007_v0, %v861_v63  ;;  %v1009_v2 = vpop.f32.mrb[1].mxu1  ;;  %v877_v63 = vld [vmem:[#allocation2 + $0xa0] sm:$0xff] }
 0x223   : > { %1182 = vst [vmem:[#allocation2 + $0x20] sm:$0xff] %v1150_v1 }
 0x224   : > { %v1012_v4 = vpop.f32.mrb[2].mxu1 }
 0x225   : > { %v1151_v5 = vadd.f32 %v1012_v4, %v862_v3  ;;  %v1014_v6 = vpop.f32.mrb[3].mxu1  ;;  %v878_v3 = vld [vmem:[#allocation2 + $0xa8] sm:$0xff] }
 0x227   : > { %1183 = vst [vmem:[#allocation2 + $0x28] sm:$0xff] %v1151_v5 }
 0x228   : > { %v1017_v8 = vpop.f32.mrb[4].mxu1 }
 0x229   : > { %v1152_v9 = vadd.f32 %v1017_v8, %v863_v7  ;;  %v1019_v10 = vpop.f32.mrb[5].mxu1  ;;  %v879_v7 = vld [vmem:[#allocation2 + $0xb0] sm:$0xff] }
 0x22b   : > { %1184 = vst [vmem:[#allocation2 + $0x30] sm:$0xff] %v1152_v9 }
 0x22c   : > { %v1022_v12 = vpop.f32.mrb[6].mxu1 }
 0x22d   : > { %v1153_v13 = vadd.f32 %v1022_v12, %v864_v11  ;;  %v1024_v14 = vpop.f32.mrb[7].mxu1  ;;  %v880_v11 = vld [vmem:[#allocation2 + $0xb8] sm:$0xff] }
 0x22f   : > { %1185 = vst [vmem:[#allocation2 + $0x38] sm:$0xff] %v1153_v13 }
 0x230   : > { %v1027_v16 = vpop.f32.mrb[8].mxu1 }
 0x231   : > { %v1154_v17 = vadd.f32 %v1027_v16, %v865_v15  ;;  %v1029_v18 = vpop.f32.mrb[9].mxu1  ;;  %v881_v15 = vld [vmem:[#allocation2 + $0xc0] sm:$0xff] }
 0x233   : > { %1186 = vst [vmem:[#allocation2 + $0x40] sm:$0xff] %v1154_v17 }
 0x234   : > { %v1032_v20 = vpop.f32.mrb[10].mxu1 }
 0x235   : > { %v1155_v21 = vadd.f32 %v1032_v20, %v866_v19  ;;  %v1034_v23 = vpop.f32.mrb[11].mxu1  ;;  %v882_v19 = vld [vmem:[#allocation2 + $0xc8] sm:$0xff] }
 0x237   : > { %1187 = vst [vmem:[#allocation2 + $0x48] sm:$0xff] %v1155_v21 }
 0x238   : > { %v1037_v25 = vpop.f32.mrb[12].mxu1 }
 0x239   : > { %v1156_v26 = vadd.f32 %v1037_v25, %v867_v24  ;;  %v1039_v27 = vpop.f32.mrb[13].mxu1  ;;  %v883_v24 = vld [vmem:[#allocation2 + $0xd0] sm:$0xff] }
 0x23b   : > { %1188 = vst [vmem:[#allocation2 + $0x50] sm:$0xff] %v1156_v26 }
 0x23c   : > { %v1042_v29 = vpop.f32.mrb[14].mxu1 }
 0x23d   : > { %v1157_v22 = vadd.f32 %v1042_v29, %v868_v28  ;;  %v1044_v30 = vpop.f32.mrb[15].mxu1  ;;  %v884_v28 = vld [vmem:[#allocation2 + $0xd8] sm:$0xff] }
 0x23f   : > { %1189 = vst [vmem:[#allocation2 + $0x58] sm:$0xff] %v1157_v22 }
 0x240   : > { %v1047_v32 = vpop.f32.mrb[16].mxu1 }
 0x241   : > { %v1158_v33 = vadd.f32 %v1047_v32, %v869_v31  ;;  %v1049_v34 = vpop.f32.mrb[17].mxu1  ;;  %v885_v31 = vld [vmem:[#allocation2 + $0xe0] sm:$0xff] }
 0x243   : > { %1190 = vst [vmem:[#allocation2 + $0x60] sm:$0xff] %v1158_v33 }
 0x244   : > { %v1052_v36 = vpop.f32.mrb[18].mxu1 }
 0x245   : > { %v1159_v37 = vadd.f32 %v1052_v36, %v870_v35  ;;  %v1054_v38 = vpop.f32.mrb[19].mxu1  ;;  %v886_v35 = vld [vmem:[#allocation2 + $0xe8] sm:$0xff] }
 0x247   : > { %1191 = vst [vmem:[#allocation2 + $0x68] sm:$0xff] %v1159_v37 }
 0x248   : > { %v1057_v41 = vpop.f32.mrb[20].mxu1 }
 0x249   : > { %v1160_v44 = vadd.f32 %v1057_v41, %v871_v39  ;;  %v1059_v40 = vpop.f32.mrb[21].mxu1  ;;  %v887_v39 = vld [vmem:[#allocation2 + $0xf0] sm:$0xff] }
 0x24b   : > { %1192 = vst [vmem:[#allocation2 + $0x70] sm:$0xff] %v1160_v44 }
 0x24c   : > { %v1062_v46 = vpop.f32.mrb[22].mxu1 }
 0x24d   : > { %v1161_v47 = vadd.f32 %v1062_v46, %v872_v45  ;;  %v1064_v48 = vpop.f32.mrb[23].mxu1  ;;  %v888_v45 = vld [vmem:[#allocation2 + $0xf8] sm:$0xff] }
 0x24f   : > { %1193 = vst [vmem:[#allocation2 + $0x78] sm:$0xff] %v1161_v47 }
 0x250   : > { %v1067_v50 = vpop.f32.mrb[24].mxu1 }
 0x251   : > { %v1162_v51 = vadd.f32 %v1067_v50, %v873_v49  ;;  %v1069_v52 = vpop.f32.mrb[25].mxu1  ;;  %v1214_v49 = vld [vmem:[#allocation2] sm:$0xff] (!%p1514_p12) }
 0x252   : > { %v2228_v50 = vld [vmem:[%s2405_s4] ss:$0 sm:$0xff] (!%p1514_p12) }
 0x253   : > { %1194 = vst [vmem:[#allocation2 + $0x80] sm:$0xff] %v1162_v51  ;;  %v1285_v51 = vld [vmem:[%s2406_s5] sm:$0xff] (!%p1514_p12)  ;;  %v1253_v52 = vadd.f32 (!%p1514_p12), %v2228_v50, %v1214_v49 }
 0x254   : > { %v1072_v54 = vpop.f32.mrb[26].mxu1 }
 0x255   : > { %v1163_v55 = vadd.f32 %v1072_v54, %v874_v53  ;;  %v1074_v56 = vpop.f32.mrb[27].mxu1  ;;  %v1215_v53 = vld [vmem:[#allocation2 + $0x8] sm:$0xff] (!%p1514_p12) }
 0x256   : > { %v1286_v54 = vld [vmem:[%s2406_s5 + $0x8] sm:$0xff] (!%p1514_p12)  ;;  %v1254_v56 = vadd.f32 (!%p1514_p12), %v2228_v50, %v1215_v53 }
 0x257   : > { %1195 = vst [vmem:[#allocation2 + $0x88] sm:$0xff] %v1163_v55  ;;  %v1216_v55 = vld [vmem:[#allocation2 + $0x10] sm:$0xff] (!%p1514_p12) }
 0x258   : > { %v1077_v42 = vpop.f32.mrb[28].mxu1 }
 0x259   : > { %v1164_v58 = vadd.f32 %v1077_v42, %v875_v57  ;;  %v1079_v43 = vpop.f32.mrb[29].mxu1  ;;  %v1255_v57 = vadd.f32 (!%p1514_p12), %v2228_v50, %v1216_v55  ;;  %v1287_v42 = vld [vmem:[%s2406_s5 + $0x10] sm:$0xff] (!%p1514_p12)  ;;  %v1302_v55 = vld [vmem:[%s2406_s5 + $0x88] sm:$0xff] (!%p1514_p12) }
 0x25a   : > { %v1288_v43 = vld [vmem:[%s2406_s5 + $0x18] sm:$0xff] (!%p1514_p12) }
 0x25b   : > { %1196 = vst [vmem:[#allocation2 + $0x90] sm:$0xff] %v1164_v58  ;;  %v1217_v58 = vld [vmem:[#allocation2 + $0x18] sm:$0xff] (!%p1514_p12) }
 0x25c   : > { %v1082_v60 = vpop.f32.mrb[30].mxu1 }
 0x25d   : > { %v1165_v61 = vadd.f32 %v1082_v60, %v876_v59  ;;  %v1084_v62 = vpop.f32.mrb[31].mxu1  ;;  %v1317_v59 = vadd.f32 (!%p1514_p12), %v1285_v51, %v1253_v52  ;;  %v1256_v60 = vadd.f32 (!%p1514_p12), %v2228_v50, %v1217_v58 }
 0x25e   : > { %v1289_v62 = vld [vmem:[%s2406_s5 + $0x20] sm:$0xff] (!%p1514_p12)  ;;  %v1231_v49 = vld [vmem:[#allocation2 + $0x88] sm:$0xff] (!%p1514_p12) }
 0x25f   : > { %1197 = vst [vmem:[#allocation2 + $0x98] sm:$0xff] %v1165_v61  ;;  %v1218_v61 = vld [vmem:[#allocation2 + $0x20] sm:$0xff] (!%p1514_p12)  ;;  %1349 = vst [vmem:[#allocation4] sm:$0xff] (!%p1514_p12), %v1317_v59  ;;  %v1304_v59 = vld [vmem:[%s2406_s5 + $0x98] sm:$0xff] (!%p1514_p12) }
 0x260   : > { %v1087_v0 = vpop.f32.mrb[32].mxu1 }
 0x261   : > { %v1166_v1 = vadd.f32 %v1087_v0, %v877_v63  ;;  %v1089_v2 = vpop.f32.mrb[33].mxu1  ;;  %v1219_v63 = vld [vmem:[#allocation2 + $0x28] sm:$0xff] (!%p1514_p12)  ;;  %v1318_v0 = vadd.f32 (!%p1514_p12), %v1286_v54, %v1254_v56  ;;  %v1270_v54 = vadd.f32 (!%p1514_p12), %v2228_v50, %v1231_v49 }
 0x262   : > { %v1257_v2 = vadd.f32 (!%p1514_p12), %v2228_v50, %v1218_v61  ;;  %v1232_v56 = vld [vmem:[#allocation2 + $0x90] sm:$0xff] (!%p1514_p12) }
 0x263   : > { %1198 = vst [vmem:[#allocation2 + $0xa0] sm:$0xff] %v1166_v1  ;;  %v1319_v1 = vadd.f32 (!%p1514_p12), %v1287_v42, %v1255_v57  ;;  %1350 = vst [vmem:[#allocation4 + $0x8] sm:$0xff] (!%p1514_p12), %v1318_v0  ;;  %v1303_v57 = vld [vmem:[%s2406_s5 + $0x90] sm:$0xff] (!%p1514_p12)  ;;  %v1271_v58 = vadd.f32 (!%p1514_p12), %v2228_v50, %v1232_v56 }
 0x264   : > { %v1092_v4 = vpop.f32.mrb[34].mxu1 }
 0x265   : > { %v1167_v5 = vadd.f32 %v1092_v4, %v878_v3  ;;  %v1094_v6 = vpop.f32.mrb[35].mxu1  ;;  %v1258_v3 = vadd.f32 (!%p1514_p12), %v2228_v50, %v1219_v63  ;;  %v1290_v4 = vld [vmem:[%s2406_s5 + $0x28] sm:$0xff] (!%p1514_p12)  ;;  %1351 = vst [vmem:[#allocation4 + $0x10] sm:$0xff] (!%p1514_p12), %v1319_v1  ;;  %v1305_v1 = vld [vmem:[%s2406_s5 + $0xa0] sm:$0xff] (!%p1514_p12) }
 0x266   : > { %v1291_v6 = vld [vmem:[%s2406_s5 + $0x30] sm:$0xff] (!%p1514_p12) }
 0x267   : > { %1199 = vst [vmem:[#allocation2 + $0xa8] sm:$0xff] %v1167_v5  ;;  %v1220_v5 = vld [vmem:[#allocation2 + $0x30] sm:$0xff] (!%p1514_p12) }
 0x268   : > { %v1097_v8 = vpop.f32.mrb[36].mxu1 }
 0x269   : > { %v1168_v9 = vadd.f32 %v1097_v8, %v879_v7  ;;  %v1099_v10 = vpop.f32.mrb[37].mxu1  ;;  %v1320_v7 = vadd.f32 (!%p1514_p12), %v1288_v43, %v1256_v60  ;;  %v1259_v8 = vadd.f32 (!%p1514_p12), %v2228_v50, %v1220_v5  ;;  %v1233_v43 = vld [vmem:[#allocation2 + $0x98] sm:$0xff] (!%p1514_p12) }
 0x26a   : > { %v1292_v10 = vld [vmem:[%s2406_s5 + $0x38] sm:$0xff] (!%p1514_p12)  ;;  %v1234_v60 = vld [vmem:[#allocation2 + $0xa0] sm:$0xff] (!%p1514_p12)  ;;  %v1272_v63 = vadd.f32 (!%p1514_p12), %v2228_v50, %v1233_v43 }
 0x26b   : > { %1200 = vst [vmem:[#allocation2 + $0xb0] sm:$0xff] %v1168_v9  ;;  %v1221_v9 = vld [vmem:[#allocation2 + $0x38] sm:$0xff] (!%p1514_p12)  ;;  %1352 = vst [vmem:[#allocation4 + $0x18] sm:$0xff] (!%p1514_p12), %v1320_v7  ;;  %v1273_v0 = vadd.f32 (!%p1514_p12), %v2228_v50, %v1234_v60  ;;  %v1307_v7 = vld [vmem:[%s2406_s5 + $0xb0] sm:$0xff] (!%p1514_p12) }
 0x26c   : > { %v1102_v12 = vpop.f32.mrb[38].mxu1 }
 0x26d   : > { %v1169_v13 = vadd.f32 %v1102_v12, %v880_v11  ;;  %v1104_v14 = vpop.f32.mrb[39].mxu1  ;;  %v1222_v11 = vld [vmem:[#allocation2 + $0x40] sm:$0xff] (!%p1514_p12)  ;;  %v1321_v12 = vadd.f32 (!%p1514_p12), %v1289_v62, %v1257_v2  ;;  %v1334_v62 = vadd.f32 (!%p1514_p12), %v1302_v55, %v1270_v54 }
 0x26e   : > { %v1260_v14 = vadd.f32 (!%p1514_p12), %v2228_v50, %v1221_v9  ;;  %v1235_v2 = vld [vmem:[#allocation2 + $0xa8] sm:$0xff] (!%p1514_p12)  ;;  %v1336_v9 = vadd.f32 (!%p1514_p12), %v1304_v59, %v1272_v63 }
 0x26f   : > { %1201 = vst [vmem:[#allocation2 + $0xb8] sm:$0xff] %v1169_v13  ;;  %v1322_v13 = vadd.f32 (!%p1514_p12), %v1290_v4, %v1258_v3  ;;  %1353 = vst [vmem:[#allocation4 + $0x20] sm:$0xff] (!%p1514_p12), %v1321_v12  ;;  %v1306_v3 = vld [vmem:[%s2406_s5 + $0xa8] sm:$0xff] (!%p1514_p12)  ;;  %v1335_v4 = vadd.f32 (!%p1514_p12), %v1303_v57, %v1271_v58  ;;  %v1274_v5 = vadd.f32 (!%p1514_p12), %v2228_v50, %v1235_v2 }
 0x270   : > { %v1107_v16 = vpop.f32.mrb[40].mxu1  ;;  %1366 = vst [vmem:[#allocation4 + $0x88] sm:$0xff] (!%p1514_p12), %v1334_v62  ;;  %1368 = vst [vmem:[#allocation4 + $0x98] sm:$0xff] (!%p1514_p12), %v1336_v9 }
 0x271   : > { %v1170_v17 = vadd.f32 %v1107_v16, %v881_v15  ;;  %v1109_v18 = vpop.f32.mrb[41].mxu1  ;;  %v1261_v15 = vadd.f32 (!%p1514_p12), %v2228_v50, %v1222_v11  ;;  %v1293_v16 = vld [vmem:[%s2406_s5 + $0x40] sm:$0xff] (!%p1514_p12)  ;;  %1354 = vst [vmem:[#allocation4 + $0x28] sm:$0xff] (!%p1514_p12), %v1322_v13  ;;  %v1308_v13 = vld [vmem:[%s2406_s5 + $0xb8] sm:$0xff] (!%p1514_p12)  ;;  %1367 = vst [vmem:[#allocation4 + $0x90] sm:$0xff] (!%p1514_p12), %v1335_v4 }
 0x272   : > { %v1294_v18 = vld [vmem:[%s2406_s5 + $0x48] sm:$0xff] (!%p1514_p12) }
 0x273   : > { %1202 = vst [vmem:[#allocation2 + $0xc0] sm:$0xff] %v1170_v17  ;;  %v1223_v17 = vld [vmem:[#allocation2 + $0x48] sm:$0xff] (!%p1514_p12) }
 0x274   : > { %v1112_v20 = vpop.f32.mrb[42].mxu1 }
 0x275   : > { %v1171_v21 = vadd.f32 %v1112_v20, %v882_v19  ;;  %v1114_v23 = vpop.f32.mrb[43].mxu1  ;;  %v1323_v19 = vadd.f32 (!%p1514_p12), %v1291_v6, %v1259_v8  ;;  %v1262_v20 = vadd.f32 (!%p1514_p12), %v2228_v50, %v1223_v17  ;;  %v1236_v6 = vld [vmem:[#allocation2 + $0xb0] sm:$0xff] (!%p1514_p12) }
 0x276   : > { %v1295_v23 = vld [vmem:[%s2406_s5 + $0x50] sm:$0xff] (!%p1514_p12)  ;;  %v1237_v8 = vld [vmem:[#allocation2 + $0xb8] sm:$0xff] (!%p1514_p12)  ;;  %v1275_v11 = vadd.f32 (!%p1514_p12), %v2228_v50, %v1236_v6 }
 0x277   : > { %1203 = vst [vmem:[#allocation2 + $0xc8] sm:$0xff] %v1171_v21  ;;  %v1224_v21 = vld [vmem:[#allocation2 + $0x50] sm:$0xff] (!%p1514_p12)  ;;  %1355 = vst [vmem:[#allocation4 + $0x30] sm:$0xff] (!%p1514_p12), %v1323_v19  ;;  %v1276_v12 = vadd.f32 (!%p1514_p12), %v2228_v50, %v1237_v8  ;;  %v1310_v19 = vld [vmem:[%s2406_s5 + $0xc8] sm:$0xff] (!%p1514_p12) }
 0x278   : > { %v1117_v25 = vpop.f32.mrb[44].mxu1 }
 0x279   : > { %v1172_v26 = vadd.f32 %v1117_v25, %v883_v24  ;;  %v1119_v27 = vpop.f32.mrb[45].mxu1  ;;  %v1225_v24 = vld [vmem:[#allocation2 + $0x58] sm:$0xff] (!%p1514_p12)  ;;  %v1324_v25 = vadd.f32 (!%p1514_p12), %v1292_v10, %v1260_v14  ;;  %v1337_v10 = vadd.f32 (!%p1514_p12), %v1305_v1, %v1273_v0 }
 0x27a   : > { %v1263_v27 = vadd.f32 (!%p1514_p12), %v2228_v50, %v1224_v21  ;;  %v1238_v14 = vld [vmem:[#allocation2 + $0xc0] sm:$0xff] (!%p1514_p12)  ;;  %v1339_v21 = vadd.f32 (!%p1514_p12), %v1307_v7, %v1275_v11 }
 0x27b   : > { %1204 = vst [vmem:[#allocation2 + $0xd0] sm:$0xff] %v1172_v26  ;;  %v1325_v26 = vadd.f32 (!%p1514_p12), %v1293_v16, %v1261_v15  ;;  %1356 = vst [vmem:[#allocation4 + $0x38] sm:$0xff] (!%p1514_p12), %v1324_v25  ;;  %v1309_v15 = vld [vmem:[%s2406_s5 + $0xc0] sm:$0xff] (!%p1514_p12)  ;;  %v1338_v16 = vadd.f32 (!%p1514_p12), %v1306_v3, %v1274_v5  ;;  %v1277_v17 = vadd.f32 (!%p1514_p12), %v2228_v50, %v1238_v14 }
 0x27c   : > { %v1122_v29 = vpop.f32.mrb[46].mxu1  ;;  %1369 = vst [vmem:[#allocation4 + $0xa0] sm:$0xff] (!%p1514_p12), %v1337_v10  ;;  %1371 = vst [vmem:[#allocation4 + $0xb0] sm:$0xff] (!%p1514_p12), %v1339_v21 }
 0x27d   : > { %v1173_v22 = vadd.f32 %v1122_v29, %v884_v28  ;;  %v1124_v30 = vpop.f32.mrb[47].mxu1  ;;  %v1264_v28 = vadd.f32 (!%p1514_p12), %v2228_v50, %v1225_v24  ;;  %v1296_v29 = vld [vmem:[%s2406_s5 + $0x58] sm:$0xff] (!%p1514_p12)  ;;  %1357 = vst [vmem:[#allocation4 + $0x40] sm:$0xff] (!%p1514_p12), %v1325_v26  ;;  %v1311_v26 = vld [vmem:[%s2406_s5 + $0xd0] sm:$0xff] (!%p1514_p12)  ;;  %1370 = vst [vmem:[#allocation4 + $0xa8] sm:$0xff] (!%p1514_p12), %v1338_v16 }
 0x27e   : > { %v1297_v30 = vld [vmem:[%s2406_s5 + $0x60] sm:$0xff] (!%p1514_p12) }
 0x27f   : > { %1205 = vst [vmem:[#allocation2 + $0xd8] sm:$0xff] %v1173_v22  ;;  %v1226_v22 = vld [vmem:[#allocation2 + $0x60] sm:$0xff] (!%p1514_p12) }
 0x280   : > { %v1127_v32 = vpop.f32.mrb[48].mxu1 }
 0x281   : > { %v1174_v33 = vadd.f32 %v1127_v32, %v885_v31  ;;  %v1129_v34 = vpop.f32.mrb[49].mxu1  ;;  %v1326_v31 = vadd.f32 (!%p1514_p12), %v1294_v18, %v1262_v20  ;;  %v1265_v32 = vadd.f32 (!%p1514_p12), %v2228_v50, %v1226_v22  ;;  %v1239_v18 = vld [vmem:[#allocation2 + $0xc8] sm:$0xff] (!%p1514_p12) }
 0x282   : > { %v1298_v34 = vld [vmem:[%s2406_s5 + $0x68] sm:$0xff] (!%p1514_p12)  ;;  %v1240_v20 = vld [vmem:[#allocation2 + $0xd0] sm:$0xff] (!%p1514_p12)  ;;  %v1278_v24 = vadd.f32 (!%p1514_p12), %v2228_v50, %v1239_v18 }
 0x283   : > { %1206 = vst [vmem:[#allocation2 + $0xe0] sm:$0xff] %v1174_v33  ;;  %v1227_v33 = vld [vmem:[#allocation2 + $0x68] sm:$0xff] (!%p1514_p12)  ;;  %1358 = vst [vmem:[#allocation4 + $0x48] sm:$0xff] (!%p1514_p12), %v1326_v31  ;;  %v1279_v25 = vadd.f32 (!%p1514_p12), %v2228_v50, %v1240_v20  ;;  %v1313_v31 = vld [vmem:[%s2406_s5 + $0xe0] sm:$0xff] (!%p1514_p12) }
 0x284   : > { %v1132_v36 = vpop.f32.mrb[50].mxu1 }
 0x285   : > { %v1175_v37 = vadd.f32 %v1132_v36, %v886_v35  ;;  %v1134_v38 = vpop.f32.mrb[51].mxu1  ;;  %v1228_v35 = vld [vmem:[#allocation2 + $0x70] sm:$0xff] (!%p1514_p12)  ;;  %v1327_v36 = vadd.f32 (!%p1514_p12), %v1295_v23, %v1263_v27  ;;  %v1340_v23 = vadd.f32 (!%p1514_p12), %v1308_v13, %v1276_v12 }
 0x286   : > { %v1266_v38 = vadd.f32 (!%p1514_p12), %v2228_v50, %v1227_v33  ;;  %v1241_v27 = vld [vmem:[#allocation2 + $0xd8] sm:$0xff] (!%p1514_p12)  ;;  %v1342_v33 = vadd.f32 (!%p1514_p12), %v1310_v19, %v1278_v24 }
 0x287   : > { %1207 = vst [vmem:[#allocation2 + $0xe8] sm:$0xff] %v1175_v37  ;;  %v1328_v37 = vadd.f32 (!%p1514_p12), %v1296_v29, %v1264_v28  ;;  %1359 = vst [vmem:[#allocation4 + $0x50] sm:$0xff] (!%p1514_p12), %v1327_v36  ;;  %v1312_v28 = vld [vmem:[%s2406_s5 + $0xd8] sm:$0xff] (!%p1514_p12)  ;;  %v1341_v29 = vadd.f32 (!%p1514_p12), %v1309_v15, %v1277_v17  ;;  %v1280_v22 = vadd.f32 (!%p1514_p12), %v2228_v50, %v1241_v27 }
 0x288   : > { %v1137_v41 = vpop.f32.mrb[52].mxu1  ;;  %v1330_v51 = vadd.f32 (!%p1514_p12), %v1298_v34, %v1266_v38  ;;  %1372 = vst [vmem:[#allocation4 + $0xb8] sm:$0xff] (!%p1514_p12), %v1340_v23  ;;  %v1343_v34 = vadd.f32 (!%p1514_p12), %v1311_v26, %v1279_v25  ;;  %1374 = vst [vmem:[#allocation4 + $0xc8] sm:$0xff] (!%p1514_p12), %v1342_v33 }
 0x289   : > { %v1176_v44 = vadd.f32 %v1137_v41, %v887_v39  ;;  %v1139_v40 = vpop.f32.mrb[53].mxu1  ;;  %1213 = sbr.rel (%p1514_p12) target bundleno = 668 (0x29c), region = 75  ;;  %v1267_v39 = vadd.f32 (!%p1514_p12), %v2228_v50, %v1228_v35  ;;  %v1299_v41 = vld [vmem:[%s2406_s5 + $0x70] sm:$0xff] (!%p1514_p12)  ;;  %1360 = vst [vmem:[#allocation4 + $0x58] sm:$0xff] (!%p1514_p12), %v1328_v37  ;;  %v1314_v37 = vld [vmem:[%s2406_s5 + $0xe8] sm:$0xff] (!%p1514_p12)  ;;  %1373 = vst [vmem:[#allocation4 + $0xc0] sm:$0xff] (!%p1514_p12), %v1341_v29 }
 0x28a   : > { %v1300_v40 = vld [vmem:[%s2406_s5 + $0x78] sm:$0xff] (!%p1514_p12)  ;;  %1362 = vst [vmem:[#allocation4 + $0x68] sm:$0xff] (!%p1514_p12), %v1330_v51  ;;  %1375 = vst [vmem:[#allocation4 + $0xd0] sm:$0xff] (!%p1514_p12), %v1343_v34 }
 0x28b   : > { %1208 = vst [vmem:[#allocation2 + $0xf0] sm:$0xff] %v1176_v44  ;;  %v1229_v44 = vld [vmem:[#allocation2 + $0x78] sm:$0xff] (!%p1514_p12)  ;;  %v1331_v52 = vadd.f32 (!%p1514_p12), %v1299_v41, %v1267_v39  ;;  %v1315_v39 = vld [vmem:[%s2406_s5 + $0xf0] sm:$0xff] (!%p1514_p12)  ;;  %v1344_v41 = vadd.f32 (!%p1514_p12), %v1312_v28, %v1280_v22 }
 0x28c   : > { %v1142_v46 = vpop.f32.mrb[54].mxu1 }
 0x28d   : > { %v1177_v47 = vadd.f32 %v1142_v46, %v888_v45  ;;  %v1144_v48 = vpop.f32.mrb[55].mxu1  ;;  %v1329_v45 = vadd.f32 (!%p1514_p12), %v1297_v30, %v1265_v32  ;;  %v1268_v46 = vadd.f32 (!%p1514_p12), %v2228_v50, %v1229_v44  ;;  %1363 = vst [vmem:[#allocation4 + $0x70] sm:$0xff] (!%p1514_p12), %v1331_v52  ;;  %v1242_v30 = vld [vmem:[#allocation2 + $0xe0] sm:$0xff] (!%p1514_p12)  ;;  %1376 = vst [vmem:[#allocation4 + $0xd8] sm:$0xff] (!%p1514_p12), %v1344_v41 }
 0x28e   : > { %v1301_v48 = vld [vmem:[%s2406_s5 + $0x80] sm:$0xff] (!%p1514_p12)  ;;  %v1243_v32 = vld [vmem:[#allocation2 + $0xe8] sm:$0xff] (!%p1514_p12)  ;;  %v1281_v35 = vadd.f32 (!%p1514_p12), %v2228_v50, %v1242_v30 }
 0x28f   : > { %1209 = vst [vmem:[#allocation2 + $0xf8] sm:$0xff] %v1177_v47  ;;  %v1230_v47 = vld [vmem:[#allocation2 + $0x80] sm:$0xff] (!%p1514_p12)  ;;  %1361 = vst [vmem:[#allocation4 + $0x60] sm:$0xff] (!%p1514_p12), %v1329_v45  ;;  %v1332_v42 = vadd.f32 (!%p1514_p12), %v1300_v40, %v1268_v46  ;;  %v1282_v36 = vadd.f32 (!%p1514_p12), %v2228_v50, %v1243_v32  ;;  %v1316_v45 = vld [vmem:[%s2406_s5 + $0xf8] sm:$0xff] (!%p1514_p12) }
 0x290   : > { %v1269_v53 = vadd.f32 %v2228_v50, %v1230_v47  ;;  %v1345_v46 = vadd.f32 %v1313_v31, %v1281_v35 }
 0x291   : > { %1364 = vst [vmem:[#allocation4 + $0x78] sm:$0xff] %v1332_v42  ;;  %v1346_v47 = vadd.f32 %v1314_v37, %v1282_v36 }
 0x292   : > { %v1333_v61 = vadd.f32 %v1301_v48, %v1269_v53  ;;  %v1244_v38 = vld [vmem:[#allocation2 + $0xf0] sm:$0xff]  ;;  %1377 = vst [vmem:[#allocation4 + $0xe0] sm:$0xff] %v1345_v46 }
 0x293   : > { %v1283_v44 = vadd.f32 %v2228_v50, %v1244_v38  ;;  %1378 = vst [vmem:[#allocation4 + $0xe8] sm:$0xff] %v1346_v47 }
 0x294   : > { %1365 = vst [vmem:[#allocation4 + $0x80] sm:$0xff] %v1333_v61 }
 0x295   : > { %v1347_v49 = vadd.f32 %v1315_v39, %v1283_v44 }
 0x296   : > { %v1245_v40 = vld [vmem:[#allocation2 + $0xf8] sm:$0xff] }
 0x297   : > { %v1284_v48 = vadd.f32 %v2228_v50, %v1245_v40  ;;  %1379 = vst [vmem:[#allocation4 + $0xf0] sm:$0xff] %v1347_v49 }
 0x299   : > { %v1348_v51 = vadd.f32 %v1316_v45, %v1284_v48 }
 0x29b   : > { %1380 = vst [vmem:[#allocation4 + $0xf8] sm:$0xff] %v1348_v51 }
 0x29c PF: > { %p2360_p13 = scmp.eq.s32.totalorder %s1500_s26, 1  ;;  %s1758_s13 = smov [#allocation4]  }
 0x29d   : > { %s1390_s14 = sshll.u32 %s1758_s13, 4  ;;  %s1391_s14 = int_to_ptr.vmem [resolvable:$true] %s1390_s14 }
 0x29e   : > { %s1685_s8 = scalar_lea.vmem %s1391_s14, 4096  ;;  %p1692_p3 = scmp.lt.s32.totalorder %s1391_s14, %s1391_s14 }
 0x29f   : > { %p1686_p0 = scmp.ne.s32.totalorder %s1391_s14, %s1685_s8  ;;  %p1693_p4 = scmp.lt.s32.totalorder %s1685_s8, %s1685_s8 }
 0x2a1   : > { %p1687_p1 = pnand %p1686_p0, %p2360_p13  ;;  %p1694_p5 = por %p1693_p4, %p1692_p3 }
 0x2a3   : > { %p1688_p2 = pneg %p1687_p1 }
 0x2a5   : > { %p1695_p6 = pnand %p1694_p5, %p1688_p2 }
 0x2a7   : > { %1698 = shalt.err (!%p1695_p6)
}
 0x2a8   : > { %s1699_s26 = scalar_lea.hbm %s2407_s6, 4096 }
 0x2a9   : > { %p1700_p7 = scmp.ne.s32.totalorder %s2407_s6, %s1699_s26  ;;  %p1705_p10 = scmp.lt.u32.totalorder %s1699_s26, %s2407_s6 }
 0x2ab   : > { %p1701_p8 = pnand %p1700_p7, %p2360_p13 }
 0x2ad   : > { %p1702_p9 = pneg %p1701_p8 }
 0x2af   : > { %p1707_p11 = pnand %p1705_p10, %p1702_p9 }
 0x2b1   : > { %1710 = shalt.err (!%p1707_p11)
}
 0x2b2   : > { %s1759_s28 = smov 128   ;;  %s1760_s29 = smov 8  }
 0x2b3   : > { %1634 = dma.vmem_to_hbm [thread:$0]  (%p2360_p13), %s1391_s14, 4096, %s2407_s6, [#allocation5], %s1759_s28, %s1759_s28, %s1760_s29  }
 0x2b4   : > { %1732 = dma.done.wait (%p2360_p13), [#allocation5], 4096  }
 0x2b5   : > { %1734 = vsyncadd (%p2360_p13), [#allocation5], 4294963200 }
 0x2b6 PF: > { %s17_s25 = sadd.s32 1, %s1753_s25   ;;  %s2409_s21 = smov %s1741_s22 }
 0x2b7   : > { %p14_p12 = scmp.ge.s32.totalorder %s17_s25, 4   ;;  %s2410_s22 = smov %s1832_s30 }
 0x2b8   : > { %s2411_s23 = smov %s1749_s24  ;;  %s2412_s24 = smov %s2414_s27 }
 0x2b9   :  { %16 = sbr.rel (!%p14_p12) target bundleno = 3 (0x3), region = 120 }
 0x2c0   :  { %1406 = vsyncpa [#allocation5], 1 }
 0x2c1   :  { %1408 = vsyncpa [#allocation5 + $0x1], 1 }

</bundles_post_ra>
